<compile_context>
chip_gen: v7x
topology: tpu7x:2x2x1
jax: 0.10.0
libtpu: 0.0.40
codegen_flags: <defaults>
</compile_context>

<pallas_src>
import jax
import jax.numpy as jnp
from jax.experimental import pallas as pl
from jax.experimental.pallas import tpu as pltpu


# ---------------------------------------------------------------------------
# Config (scaled-down synthetic shapes consistent with the module)
# ---------------------------------------------------------------------------
IN_CH = 4                    # input image channels stand-in
BACKBONE_CH = [16, 32, 64]   # stand-in for ShuffleNetV2 in_channels_list [132,264,528]
OUT_CH = 32                  # cfg['out_channel']
ANCHOR_NUM = 2               # cfg['anchorNum_per_stage']
FPN_NUM = 3
CLS_DIM = 12
LOC_DIM = 4
EMB_DIM = 128
N_CLASSIFIER = 547           # nn.Linear(128, 547)

TASK_BLK = 128               # per-anchor task-tower block, padded to 128 lanes
HEAD_PAD = 256               # per-anchor head block [emb 0:128 | cls 128:140 | loc 140:144 | pad]
CLF_PAD = 640                # 547 padded to 5*128 lanes
SLAB = 128                   # FPN/SSH lane-dense output slab [p 0:32 | f 32:64 | zeros 64:128]

# Explicit scoped-VMEM budget; tiles below are sized so double-buffered blocks
# stay far under this on every generation (v7x physical VMEM = 64 MiB/TC).
VMEM_LIMIT = 32 * 1024 * 1024


def _tile_rows(M, desired):
    """Pick an M tile (multiple of 8 when tiling) and padded row count."""
    if M <= desired:
        return M, M
    tm = desired
    Mp = ((M + tm - 1) // tm) * tm
    return tm, Mp


def _pad_rows(x, Mp):
    M = x.shape[0]
    if Mp == M:
        return x
    return jnp.pad(x, ((0, Mp - M), (0, 0)))


# ---------------------------------------------------------------------------
# Pallas kernels
# ---------------------------------------------------------------------------
def _matmul_bias_relu_kernel(x_ref, w_ref, b_ref, o_ref):
    """Backbone stage: (avg-pool folded into K) matmul + bias + ReLU."""
    y = jnp.dot(x_ref[...], w_ref[...], preferred_element_type=jnp.float32) + b_ref[...]
    o_ref[...] = jnp.maximum(y, 0.0).astype(o_ref.dtype)


def _fpn_top_kernel(c_ref, wlat_ref, blat_ref, wssh_ref, bssh_ref, o_ref):
    """Coarsest FPN level: p = relu(c@Wlat+b); f = relu(p@Wssh+b). Lane-dense slab out."""
    tm = c_ref.shape[0]
    p = jnp.maximum(jnp.dot(c_ref[...], wlat_ref[...],
                            preferred_element_type=jnp.float32) + blat_ref[...], 0.0)
    f = jnp.maximum(jnp.dot(p.astype(wssh_ref.dtype), wssh_ref[...],
                            preferred_element_type=jnp.float32) + bssh_ref[...], 0.0)
    o_ref[:, 0:OUT_CH] = p.astype(o_ref.dtype)
    o_ref[:, OUT_CH:2 * OUT_CH] = f.astype(o_ref.dtype)
    o_ref[:, 2 * OUT_CH:] = jnp.zeros((tm, SLAB - 2 * OUT_CH), o_ref.dtype)


def _fpn_merge_kernel(c_ref, up_ref, wlat_ref, blat_ref, wmrg_ref, bmrg_ref,
                      wssh_ref, bssh_ref, o_ref):
    """FPN merge: lateral conv + (pre-upsampled) coarse add + merge conv + SSH conv."""
    tm = c_ref.shape[0]
    lat = jnp.maximum(jnp.dot(c_ref[...], wlat_ref[...],
                              preferred_element_type=jnp.float32) + blat_ref[...], 0.0)
    x = (lat + up_ref[...].astype(jnp.float32)).astype(wmrg_ref.dtype)
    p = jnp.maximum(jnp.dot(x, wmrg_ref[...],
                            preferred_element_type=jnp.float32) + bmrg_ref[...], 0.0)
    f = jnp.maximum(jnp.dot(p.astype(wssh_ref.dtype), wssh_ref[...],
                            preferred_element_type=jnp.float32) + bssh_ref[...], 0.0)
    o_ref[:, 0:OUT_CH] = p.astype(o_ref.dtype)
    o_ref[:, OUT_CH:2 * OUT_CH] = f.astype(o_ref.dtype)
    o_ref[:, 2 * OUT_CH:] = jnp.zeros((tm, SLAB - 2 * OUT_CH), o_ref.dtype)


def _heads_kernel(x_ref, wws_ref, bws_ref, wtask_ref, btask_ref,
                  whead_ref, bhead_ref, wclf_ref, bclf_ref,
                  head_ref, clf_ref):
    """Per-level heads: weight_shared + task towers + per-anchor heads + classifier.

    x_ref:    (tm, 128)  FPN/SSH slab (f in lanes 32:64; weight rows zero elsewhere)
    head_ref: (tm, 512)  per anchor 256-wide block [emb | cls | loc | pad]
    clf_ref:  (A, tm, 640) classifier output (zero-padded lanes), one matmul for both anchors
    """
    tm = x_ref.shape[0]
    ws = jnp.maximum(jnp.dot(x_ref[...], wws_ref[...],
                             preferred_element_type=jnp.float32) + bws_ref[...], 0.0)
    t = jnp.maximum(jnp.dot(ws.astype(wtask_ref.dtype), wtask_ref[...],
                            preferred_element_type=jnp.float32) + btask_ref[...], 0.0)
    h = jnp.dot(t.astype(whead_ref.dtype), whead_ref[...],
                preferred_element_type=jnp.float32) + bhead_ref[...]
    head_ref[...] = h.astype(head_ref.dtype)
    # One classifier matmul for both anchors: row-stack the embeddings.
    emb = jnp.concatenate(
        [h[:, a * HEAD_PAD:a * HEAD_PAD + EMB_DIM] for a in range(ANCHOR_NUM)], axis=0)
    c = jnp.dot(emb.astype(wclf_ref.dtype), wclf_ref[...],
                preferred_element_type=jnp.float32) + bclf_ref[...]
    for a in range(ANCHOR_NUM):
        clf_ref[a, :, :] = c[a * tm:(a + 1) * tm, :].astype(clf_ref.dtype)


# ---------------------------------------------------------------------------
# Kernel wrappers (M-tiled, parallel grid, VMEM-resident weights)
# ---------------------------------------------------------------------------
def _cparams():
    return pltpu.CompilerParams(dimension_semantics=("parallel",),
                                vmem_limit_bytes=VMEM_LIMIT)


def backbone_stage(x4_2d, w4, b, *, tile_m=1024):
    """(M, 4C) pool-phase-packed input @ (4C, Cout) weight (+bias, ReLU)."""
    M, K = x4_2d.shape
    Cout = w4.shape[1]
    tm, Mp = _tile_rows(M, tile_m)
    x4_2d = _pad_rows(x4_2d, Mp)
    out = pl.pallas_call(
        _matmul_bias_relu_kernel,
        out_shape=jax.ShapeDtypeStruct((Mp, Cout), jnp.bfloat16),
        grid=(Mp // tm,),
        in_specs=[pl.BlockSpec((tm, K), lambda i: (i, 0)),
                  pl.BlockSpec((K, Cout), lambda i: (0, 0)),
                  pl.BlockSpec((1, Cout), lambda i: (0, 0))],
        out_specs=pl.BlockSpec((tm, Cout), lambda i: (i, 0)),
        compiler_params=_cparams(),
    )(x4_2d, w4, b)
    return out[:M] if Mp != M else out


def fpn_top(c2d, wlat, blat, wssh, bssh, *, tile_m=1024):
    M, Cin = c2d.shape
    tm, Mp = _tile_rows(M, tile_m)
    c2d = _pad_rows(c2d, Mp)
    out = pl.pallas_call(
        _fpn_top_kernel,
        out_shape=jax.ShapeDtypeStruct((Mp, SLAB), jnp.bfloat16),
        grid=(Mp // tm,),
        in_specs=[pl.BlockSpec((tm, Cin), lambda i: (i, 0)),
                  pl.BlockSpec((Cin, OUT_CH), lambda i: (0, 0)),
                  pl.BlockSpec((1, OUT_CH), lambda i: (0, 0)),
                  pl.BlockSpec((OUT_CH, OUT_CH), lambda i: (0, 0)),
                  pl.BlockSpec((1, OUT_CH), lambda i: (0, 0))],
        out_specs=pl.BlockSpec((tm, SLAB), lambda i: (i, 0)),
        compiler_params=_cparams(),
    )(c2d, wlat, blat, wssh, bssh)
    return out[:M] if Mp != M else out


def fpn_merge(c2d, up2d, wlat, blat, wmrg, bmrg, wssh, bssh, *, tile_m=1024):
    M, Cin = c2d.shape
    tm, Mp = _tile_rows(M, tile_m)
    c2d = _pad_rows(c2d, Mp)
    up2d = _pad_rows(up2d, Mp)
    out = pl.pallas_call(
        _fpn_merge_kernel,
        out_shape=jax.ShapeDtypeStruct((Mp, SLAB), jnp.bfloat16),
        grid=(Mp // tm,),
        in_specs=[pl.BlockSpec((tm, Cin), lambda i: (i, 0)),
                  pl.BlockSpec((tm, OUT_CH), lambda i: (i, 0)),
                  pl.BlockSpec((Cin, OUT_CH), lambda i: (0, 0)),
                  pl.BlockSpec((1, OUT_CH), lambda i: (0, 0)),
                  pl.BlockSpec((OUT_CH, OUT_CH), lambda i: (0, 0)),
                  pl.BlockSpec((1, OUT_CH), lambda i: (0, 0)),
                  pl.BlockSpec((OUT_CH, OUT_CH), lambda i: (0, 0)),
                  pl.BlockSpec((1, OUT_CH), lambda i: (0, 0))],
        out_specs=pl.BlockSpec((tm, SLAB), lambda i: (i, 0)),
        compiler_params=_cparams(),
    )(c2d, up2d, wlat, blat, wmrg, bmrg, wssh, bssh)
    return out[:M] if Mp != M else out


def heads_level(slab2d, fused, lvl, *, tile_m=512):
    """One FPN level: weight_shared + tasks + both anchor heads + classifier, fused."""
    M, _ = slab2d.shape
    A = ANCHOR_NUM
    tm, Mp = _tile_rows(M, tile_m)
    slab2d = _pad_rows(slab2d, Mp)
    head, clf = pl.pallas_call(
        _heads_kernel,
        out_shape=(jax.ShapeDtypeStruct((Mp, A * HEAD_PAD), jnp.bfloat16),
                   jax.ShapeDtypeStruct((A, Mp, CLF_PAD), jnp.bfloat16)),
        grid=(Mp // tm,),
        in_specs=[pl.BlockSpec((tm, SLAB), lambda i: (i, 0)),
                  pl.BlockSpec((SLAB, A * OUT_CH), lambda i: (0, 0)),
                  pl.BlockSpec((1, A * OUT_CH), lambda i: (0, 0)),
                  pl.BlockSpec((A * OUT_CH, A * TASK_BLK), lambda i: (0, 0)),
                  pl.BlockSpec((1, A * TASK_BLK), lambda i: (0, 0)),
                  pl.BlockSpec((A * TASK_BLK, A * HEAD_PAD), lambda i: (0, 0)),
                  pl.BlockSpec((1, A * HEAD_PAD), lambda i: (0, 0)),
                  pl.BlockSpec((EMB_DIM, CLF_PAD), lambda i: (0, 0)),
                  pl.BlockSpec((1, CLF_PAD), lambda i: (0, 0))],
        out_specs=(pl.BlockSpec((tm, A * HEAD_PAD), lambda i: (i, 0)),
                   pl.BlockSpec((A, tm, CLF_PAD), lambda i: (0, i, 0))),
        compiler_params=_cparams(),
    )(slab2d, fused["w_ws"], fused["b_ws"], fused["w_task"], fused["b_task"],
      fused[f"w_head{lvl}"], fused[f"b_head{lvl}"], fused["w_clf"], fused["b_clf"])
    if Mp != M:
        head = head[:M]
        clf = clf[:, :M]
    return head, clf


# ---------------------------------------------------------------------------
# Parameters (module-faithful raw params + packed/fused bf16 weights)
# ---------------------------------------------------------------------------
def _init_linear(key, cin, cout):
    kw, kb = jax.random.split(key)
    w = jax.random.normal(kw, (cin, cout), jnp.float32) * (1.0 / jnp.sqrt(cin))
    b = jax.random.normal(kb, (cout,), jnp.float32) * 0.01
    return w, b


def init_params(key):
    p = {}
    keys = iter(jax.random.split(key, 64))
    # backbone stages (TODO(synk): ShuffleNetV2 body not provided; stand-in =
    # fused 2x2 avg-pool + 1x1 conv + ReLU per stage producing 3 pyramid levels)
    cin = IN_CH
    for i, cout in enumerate(BACKBONE_CH):
        p[f"bb_w{i}"], p[f"bb_b{i}"] = _init_linear(next(keys), cin, cout)
        cin = cout
    # FPN (TODO(synk): real FPN merge convs are 3x3; stand-in is 1x1 pointwise)
    p["fpn_lat1_w"], p["fpn_lat1_b"] = _init_linear(next(keys), BACKBONE_CH[0], OUT_CH)
    p["fpn_lat2_w"], p["fpn_lat2_b"] = _init_linear(next(keys), BACKBONE_CH[1], OUT_CH)
    p["fpn_lat3_w"], p["fpn_lat3_b"] = _init_linear(next(keys), BACKBONE_CH[2], OUT_CH)
    p["fpn_mrg1_w"], p["fpn_mrg1_b"] = _init_linear(next(keys), OUT_CH, OUT_CH)
    p["fpn_mrg2_w"], p["fpn_mrg2_b"] = _init_linear(next(keys), OUT_CH, OUT_CH)
    # SSH (TODO(synk): multi-branch 3x3/5x5/7x7 SSH not defined; 1x1 + ReLU stand-in)
    for i in range(FPN_NUM):
        p[f"ssh{i}_w"], p[f"ssh{i}_b"] = _init_linear(next(keys), OUT_CH, OUT_CH)
    # weight_shared: ModuleList of anchorNum blocks
    for j in range(ANCHOR_NUM):
        p[f"ws{j}_w"], p[f"ws{j}_b"] = _init_linear(next(keys), OUT_CH, OUT_CH)
    # shared task towers
    for name in ("cls_task", "loc_task", "emb_task"):
        p[f"{name}_w"], p[f"{name}_b"] = _init_linear(next(keys), OUT_CH, OUT_CH)
    # per-(fpn, anchor) head convs
    for k in range(FPN_NUM * ANCHOR_NUM):
        p[f"cls_head{k}_w"], p[f"cls_head{k}_b"] = _init_linear(next(keys), OUT_CH, CLS_DIM)
        p[f"loc_head{k}_w"], p[f"loc_head{k}_b"] = _init_linear(next(keys), OUT_CH, LOC_DIM)
        p[f"emb_head{k}_w"], p[f"emb_head{k}_b"] = _init_linear(next(keys), OUT_CH, EMB_DIM)
    # final classifier Linear(128, 547)
    p["clf_w"], p["clf_b"] = _init_linear(next(keys), EMB_DIM, N_CLASSIFIER)
    return p


def pack_params(p):
    """Build fused / lane-padded bf16 weights. Called ONCE, outside the jitted forward."""
    bf, f32 = jnp.bfloat16, jnp.float32
    A, C = ANCHOR_NUM, OUT_CH
    fused = {}
    # backbone: 2x2 avg-pool folded into K -> weight tiled 4x along K and scaled by 0.25
    for i in range(len(BACKBONE_CH)):
        w = p[f"bb_w{i}"]
        fused[f"bb_w{i}"] = (0.25 * jnp.concatenate([w, w, w, w], axis=0)).astype(bf)
        fused[f"bb_b{i}"] = p[f"bb_b{i}"].reshape(1, -1).astype(f32)
    for name in ("fpn_lat1", "fpn_lat2", "fpn_lat3", "fpn_mrg1", "fpn_mrg2",
                 "ssh0", "ssh1", "ssh2"):
        fused[f"{name}_w"] = p[f"{name}_w"].astype(bf)
        fused[f"{name}_b"] = p[f"{name}_b"].reshape(1, -1).astype(f32)
    # weight_shared: consumes the 128-wide FPN slab directly; only rows 32:64 (the SSH
    # feature lanes) carry weights, anchors concatenated along N.
    wws = jnp.zeros((SLAB, A * C), f32)
    bws = jnp.zeros((1, A * C), f32)
    for a in range(A):
        wws = wws.at[C:2 * C, a * C:(a + 1) * C].set(p[f"ws{a}_w"])
        bws = bws.at[0, a * C:(a + 1) * C].set(p[f"ws{a}_b"])
    fused["w_ws"] = wws.astype(bf)
    fused["b_ws"] = bws
    # task towers: block-diagonal (A*C, A*128); per anchor block = [cls|loc|emb|pad]
    wt = jnp.zeros((A * C, A * TASK_BLK), f32)
    bt = jnp.zeros((1, A * TASK_BLK), f32)
    for a in range(A):
        for ti, tname in enumerate(("cls_task", "loc_task", "emb_task")):
            c0 = a * TASK_BLK + ti * C
            wt = wt.at[a * C:(a + 1) * C, c0:c0 + C].set(p[f"{tname}_w"])
            bt = bt.at[0, c0:c0 + C].set(p[f"{tname}_b"])
    fused["w_task"] = wt.astype(bf)
    fused["b_task"] = bt
    # per-level head weight: block-diagonal over anchors, (A*128, A*256);
    # per anchor output block = [emb 0:128 | cls 128:140 | loc 140:144 | pad]
    for lvl in range(FPN_NUM):
        wh = jnp.zeros((A * TASK_BLK, A * HEAD_PAD), f32)
        bh = jnp.zeros((1, A * HEAD_PAD), f32)
        for a in range(A):
            k = lvl * A + a
            r = a * TASK_BLK
            c0 = a * HEAD_PAD
            wh = wh.at[r + 2 * C:r + 3 * C, c0:c0 + EMB_DIM].set(p[f"emb_head{k}_w"])
            wh = wh.at[r:r + C, c0 + EMB_DIM:c0 + EMB_DIM + CLS_DIM].set(p[f"cls_head{k}_w"])
            wh = wh.at[r + C:r + 2 * C,
                       c0 + EMB_DIM + CLS_DIM:c0 + EMB_DIM + CLS_DIM + LOC_DIM].set(
                           p[f"loc_head{k}_w"])
            bh = bh.at[0, c0:c0 + EMB_DIM].set(p[f"emb_head{k}_b"])
            bh = bh.at[0, c0 + EMB_DIM:c0 + EMB_DIM + CLS_DIM].set(p[f"cls_head{k}_b"])
            bh = bh.at[0, c0 + EMB_DIM + CLS_DIM:c0 + EMB_DIM + CLS_DIM + LOC_DIM].set(
                p[f"loc_head{k}_b"])
        fused[f"w_head{lvl}"] = wh.astype(bf)
        fused[f"b_head{lvl}"] = bh
    # classifier Linear(128,547) zero-padded to 640 lanes (sliced in the wrapper)
    fused["w_clf"] = jnp.zeros((EMB_DIM, CLF_PAD), f32).at[:, :N_CLASSIFIER].set(
        p["clf_w"]).astype(bf)
    fused["b_clf"] = jnp.zeros((1, CLF_PAD), f32).at[0, :N_CLASSIFIER].set(p["clf_b"])
    return fused


# ---------------------------------------------------------------------------
# XLA-level helpers (cheap data movement kept outside the kernels)
# ---------------------------------------------------------------------------
def _pack_pool_phases(x):
    """(B,H,W,C) -> (B*Ho*Wo, 4C): 2x2 pool phases packed along the channel axis."""
    B, H, W, C = x.shape
    Ho, Wo = H // 2, W // 2
    x = x[:, :2 * Ho, :2 * Wo, :]
    x = x.reshape(B, Ho, 2, Wo, 2, C).transpose(0, 1, 3, 2, 4, 5)
    return x.reshape(B * Ho * Wo, 4 * C), (Ho, Wo)


def _upsample_nearest(p2d, B, Hc, Wc, Hf, Wf):
    """Nearest-neighbour resize to (Hf, Wf), matching F.interpolate(mode='nearest')."""
    C = p2d.shape[1]
    p = p2d.reshape(B, Hc, Wc, C)
    hi = (jnp.arange(Hf) * Hc) // Hf
    wi = (jnp.arange(Wf) * Wc) // Wf
    up = p[:, hi, :, :][:, :, wi, :]
    return up.reshape(B * Hf * Wf, C)


# ---------------------------------------------------------------------------
# Forward pass (mirrors ShuffleTrackNet.forward)
# ---------------------------------------------------------------------------
def shuffletrack_forward(fused, x_nchw):
    x = jnp.transpose(x_nchw, (0, 2, 3, 1)).astype(jnp.bfloat16)     # NCHW -> NHWC
    B = x.shape[0]

    # --- backbone (self.body): avg-pool folded into K of a 1x1-conv matmul ----
    feats, shapes = [], []
    cur = x
    for i, cout in enumerate(BACKBONE_CH):
        x4, (ho, wo) = _pack_pool_phases(cur)
        out2d = backbone_stage(x4, fused[f"bb_w{i}"], fused[f"bb_b{i}"])
        feats.append(out2d)
        shapes.append((ho, wo))
        cur = out2d.reshape(B, ho, wo, cout)
    c3, c4, c5 = feats                                # finest -> coarsest, (B*H*W, C)
    (h0, w0), (h1, w1), (h2, w2) = shapes

    # --- FPN + SSH: lane-dense 128-wide slabs [p | f | 0], upsample via XLA gather
    slab3 = fpn_top(c5, fused["fpn_lat3_w"], fused["fpn_lat3_b"],
                    fused["ssh2_w"], fused["ssh2_b"])
    p5 = slab3[:, 0:OUT_CH]
    up5 = _upsample_nearest(p5, B, h2, w2, h1, w1)
    slab2 = fpn_merge(c4, up5,
                      fused["fpn_lat2_w"], fused["fpn_lat2_b"],
                      fused["fpn_mrg2_w"], fused["fpn_mrg2_b"],
                      fused["ssh1_w"], fused["ssh1_b"])
    p4 = slab2[:, 0:OUT_CH]
    up4 = _upsample_nearest(p4, B, h1, w1, h0, w0)
    slab1 = fpn_merge(c3, up4,
                      fused["fpn_lat1_w"], fused["fpn_lat1_b"],
                      fused["fpn_mrg1_w"], fused["fpn_mrg1_b"],
                      fused["ssh0_w"], fused["ssh0_b"])

    # --- weight_shared + task towers + heads + classifier: one fused kernel per level
    cls_chunks, loc_chunks, clf_chunks = [], [], []
    for lvl, (slab, (h, w)) in enumerate(zip((slab1, slab2, slab3),
                                             ((h0, w0), (h1, w1), (h2, w2)))):
        head, clf = heads_level(slab, fused, lvl)     # (M,512) bf16, (A,M,640) bf16
        hw = h * w
        head = head.reshape(B, hw, ANCHOR_NUM * HEAD_PAD)
        clf = clf.reshape(ANCHOR_NUM, B, hw, CLF_PAD)
        for a in range(ANCHOR_NUM):                   # reference order: level-major, anchor
            base = a * HEAD_PAD
            cls_chunks.append(head[:, :, base + EMB_DIM:base + EMB_DIM + CLS_DIM])
            loc_chunks.append(
                head[:, :, base + EMB_DIM + CLS_DIM:base + EMB_DIM + CLS_DIM + LOC_DIM])
            clf_chunks.append(clf[a, :, :, :N_CLASSIFIER])

    bbox_regressions = jnp.concatenate(loc_chunks, axis=1).astype(jnp.float32)   # (B,R,4)
    classifications = jnp.concatenate(cls_chunks, axis=1).astype(jnp.float32)    # (B,R,12)
    classifier = jnp.concatenate(clf_chunks, axis=1).astype(jnp.float32)         # (B,R,547)
    return [bbox_regressions, classifications, classifier]


# ---------------------------------------------------------------------------
if __name__ == "__main__":
    key = jax.random.PRNGKey(0)
    k_param, k_x = jax.random.split(key)

    params = init_params(k_param)
    fused = pack_params(params)                       # packed once, outside the hot path
    x = jax.random.normal(k_x, (2, IN_CH, 16, 16), jnp.float32)      # NCHW input

    fwd = jax.jit(shuffletrack_forward)
    bbox, cls, clf = fwd(fused, x)
    jax.block_until_ready((bbox, cls, clf))

    # 3 levels (8x8, 4x4, 2x2) x 2 anchors -> 168 anchors per image
    assert bbox.shape == (2, 168, 4)
    assert cls.shape == (2, 168, 12)
    assert clf.shape == (2, 168, 547)

    print("KERNEL_OK")
</pallas_src>

<mosaic_0001>
module attributes {stable_mosaic.version = 11 : i64} {
  func.func @_matmul_bias_relu_kernel(%arg0: i32, %arg1: memref<128x16xbf16, #tpu.memory_space<vmem>>, %arg2: memref<16x16xbf16, #tpu.memory_space<vmem>>, %arg3: memref<1x16xf32, #tpu.memory_space<vmem>>, %arg4: memref<128x16xbf16, #tpu.memory_space<vmem>>) attributes {dimension_semantics = [#tpu.dimension_semantics<parallel>], iteration_bounds = array<i64: 1>, scalar_prefetch = 0 : i64, scratch_operands = 0 : i64, tpu.core_type = #tpu.core_type<tc>, window_params = [{transform_indices = @transform_0, window_bounds = array<i64: 128, 16>}, {pipeline_mode = #tpu.pipeline_mode<synchronous>, transform_indices = @transform_1, window_bounds = array<i64: 16, 16>}, {pipeline_mode = #tpu.pipeline_mode<synchronous>, transform_indices = @transform_2, window_bounds = array<i64: 1, 16>}, {transform_indices = @transform_3, window_bounds = array<i64: 128, 16>}]} {
    %c0 = arith.constant 0 : index
    %c0_0 = arith.constant 0 : index
    %0 = vector.load %arg1[%c0, %c0_0] : memref<128x16xbf16, #tpu.memory_space<vmem>>, vector<128x16xbf16>
    %c0_1 = arith.constant 0 : index
    %c0_2 = arith.constant 0 : index
    %1 = vector.load %arg2[%c0_1, %c0_2] : memref<16x16xbf16, #tpu.memory_space<vmem>>, vector<16x16xbf16>
    %cst = arith.constant dense<0.000000e+00> : vector<128x16xf32>
    %2 = tpu.matmul %0, %1, %cst {dimension_numbers = #tpu.dot_dimension_numbers<[1], [0], [0], [1], [0, 0, 1, 1], [], []>} : vector<128x16xbf16>, vector<16x16xbf16>, vector<128x16xf32> -> vector<128x16xf32>
    %c0_3 = arith.constant 0 : index
    %c0_4 = arith.constant 0 : index
    %3 = vector.load %arg3[%c0_3, %c0_4] : memref<1x16xf32, #tpu.memory_space<vmem>>, vector<1x16xf32>
    %4 = vector.broadcast %3 : vector<1x16xf32> to vector<128x16xf32>
    %5 = arith.addf %2, %4 : vector<128x16xf32>
    %cst_5 = arith.constant 0.000000e+00 : f32
    %6 = vector.broadcast %cst_5 : f32 to vector<128x16xf32>
    %7 = arith.maximumf %5, %6 : vector<128x16xf32>
    %8 = arith.truncf %7 : vector<128x16xf32> to vector<128x16xbf16>
    %c0_6 = arith.constant 0 : index
    %c0_7 = arith.constant 0 : index
    %9 = vector.load %arg4[%c0_6, %c0_7] : memref<128x16xbf16, #tpu.memory_space<vmem>>, vector<128x16xbf16>
    tpu.vector_store %arg4[%c0_6, %c0_7], %8 {strides = array<i32>} : memref<128x16xbf16, #tpu.memory_space<vmem>>, vector<128x16xbf16>,
    return
  }
  func.func @transform_0(%arg0: i32) -> (i32, i32) {
    %c0_i32 = arith.constant 0 : i32
    %c0_i32_0 = arith.constant 0 : i32
    return %arg0, %c0_i32 : i32, i32
  }
  func.func @transform_1(%arg0: i32) -> (i32, i32) {
    %c0_i32 = arith.constant 0 : i32
    %c0_i32_0 = arith.constant 0 : i32
    %c0_i32_1 = arith.constant 0 : i32
    return %c0_i32, %c0_i32_0 : i32, i32
  }
  func.func @transform_2(%arg0: i32) -> (i32, i32) {
    %c0_i32 = arith.constant 0 : i32
    %c0_i32_0 = arith.constant 0 : i32
    %c0_i32_1 = arith.constant 0 : i32
    return %c0_i32, %c0_i32_0 : i32, i32
  }
  func.func @transform_3(%arg0: i32) -> (i32, i32) {
    %c0_i32 = arith.constant 0 : i32
    %c0_i32_0 = arith.constant 0 : i32
    return %arg0, %c0_i32 : i32, i32
  }
}

module attributes {stable_mosaic.version = 11 : i64} {
  func.func @_matmul_bias_relu_kernel(%arg0: i32, %arg1: memref<32x64xbf16, #tpu.memory_space<vmem>>, %arg2: memref<64x32xbf16, #tpu.memory_space<vmem>>, %arg3: memref<1x32xf32, #tpu.memory_space<vmem>>, %arg4: memref<32x32xbf16, #tpu.memory_space<vmem>>) attributes {dimension_semantics = [#tpu.dimension_semantics<parallel>], iteration_bounds = array<i64: 1>, scalar_prefetch = 0 : i64, scratch_operands = 0 : i64, tpu.core_type = #tpu.core_type<tc>, window_params = [{transform_indices = @transform_0, window_bounds = array<i64: 32, 64>}, {pipeline_mode = #tpu.pipeline_mode<synchronous>, transform_indices = @transform_1, window_bounds = array<i64: 64, 32>}, {pipeline_mode = #tpu.pipeline_mode<synchronous>, transform_indices = @transform_2, window_bounds = array<i64: 1, 32>}, {transform_indices = @transform_3, window_bounds = array<i64: 32, 32>}]} {
    %c0 = arith.constant 0 : index
    %c0_0 = arith.constant 0 : index
    %0 = vector.load %arg1[%c0, %c0_0] : memref<32x64xbf16, #tpu.memory_space<vmem>>, vector<32x64xbf16>
    %c0_1 = arith.constant 0 : index
    %c0_2 = arith.constant 0 : index
    %1 = vector.load %arg2[%c0_1, %c0_2] : memref<64x32xbf16, #tpu.memory_space<vmem>>, vector<64x32xbf16>
    %cst = arith.constant dense<0.000000e+00> : vector<32x32xf32>
    %2 = tpu.matmul %0, %1, %cst {dimension_numbers = #tpu.dot_dimension_numbers<[1], [0], [0], [1], [0, 0, 1, 1], [], []>} : vector<32x64xbf16>, vector<64x32xbf16>, vector<32x32xf32> -> vector<32x32xf32>
    %c0_3 = arith.constant 0 : index
    %c0_4 = arith.constant 0 : index
    %3 = vector.load %arg3[%c0_3, %c0_4] : memref<1x32xf32, #tpu.memory_space<vmem>>, vector<1x32xf32>
    %4 = vector.broadcast %3 : vector<1x32xf32> to vector<32x32xf32>
    %5 = arith.addf %2, %4 : vector<32x32xf32>
    %cst_5 = arith.constant 0.000000e+00 : f32
    %6 = vector.broadcast %cst_5 : f32 to vector<32x32xf32>
    %7 = arith.maximumf %5, %6 : vector<32x32xf32>
    %8 = arith.truncf %7 : vector<32x32xf32> to vector<32x32xbf16>
    %c0_6 = arith.constant 0 : index
    %c0_7 = arith.constant 0 : index
    %9 = vector.load %arg4[%c0_6, %c0_7] : memref<32x32xbf16, #tpu.memory_space<vmem>>, vector<32x32xbf16>
    tpu.vector_store %arg4[%c0_6, %c0_7], %8 {strides = array<i32>} : memref<32x32xbf16, #tpu.memory_space<vmem>>, vector<32x32xbf16>,
    return
  }
  func.func @transform_0(%arg0: i32) -> (i32, i32) {
    %c0_i32 = arith.constant 0 : i32
    %c0_i32_0 = arith.constant 0 : i32
    return %arg0, %c0_i32 : i32, i32
  }
  func.func @transform_1(%arg0: i32) -> (i32, i32) {
    %c0_i32 = arith.constant 0 : i32
    %c0_i32_0 = arith.constant 0 : i32
    %c0_i32_1 = arith.constant 0 : i32
    return %c0_i32, %c0_i32_0 : i32, i32
  }
  func.func @transform_2(%arg0: i32) -> (i32, i32) {
    %c0_i32 = arith.constant 0 : i32
    %c0_i32_0 = arith.constant 0 : i32
    %c0_i32_1 = arith.constant 0 : i32
    return %c0_i32, %c0_i32_0 : i32, i32
  }
  func.func @transform_3(%arg0: i32) -> (i32, i32) {
    %c0_i32 = arith.constant 0 : i32
    %c0_i32_0 = arith.constant 0 : i32
    return %arg0, %c0_i32 : i32, i32
  }
}

module attributes {stable_mosaic.version = 11 : i64} {
  func.func @_matmul_bias_relu_kernel(%arg0: i32, %arg1: memref<8x128xbf16, #tpu.memory_space<vmem>>, %arg2: memref<128x64xbf16, #tpu.memory_space<vmem>>, %arg3: memref<1x64xf32, #tpu.memory_space<vmem>>, %arg4: memref<8x64xbf16, #tpu.memory_space<vmem>>) attributes {dimension_semantics = [#tpu.dimension_semantics<parallel>], iteration_bounds = array<i64: 1>, scalar_prefetch = 0 : i64, scratch_operands = 0 : i64, tpu.core_type = #tpu.core_type<tc>, window_params = [{transform_indices = @transform_0, window_bounds = array<i64: 8, 128>}, {pipeline_mode = #tpu.pipeline_mode<synchronous>, transform_indices = @transform_1, window_bounds = array<i64: 128, 64>}, {pipeline_mode = #tpu.pipeline_mode<synchronous>, transform_indices = @transform_2, window_bounds = array<i64: 1, 64>}, {transform_indices = @transform_3, window_bounds = array<i64: 8, 64>}]} {
    %c0 = arith.constant 0 : index
    %c0_0 = arith.constant 0 : index
    %0 = vector.load %arg1[%c0, %c0_0] : memref<8x128xbf16, #tpu.memory_space<vmem>>, vector<8x128xbf16>
    %c0_1 = arith.constant 0 : index
    %c0_2 = arith.constant 0 : index
    %1 = vector.load %arg2[%c0_1, %c0_2] : memref<128x64xbf16, #tpu.memory_space<vmem>>, vector<128x64xbf16>
    %cst = arith.constant dense<0.000000e+00> : vector<8x64xf32>
    %2 = tpu.matmul %0, %1, %cst {dimension_numbers = #tpu.dot_dimension_numbers<[1], [0], [0], [1], [0, 0, 1, 1], [], []>} : vector<8x128xbf16>, vector<128x64xbf16>, vector<8x64xf32> -> vector<8x64xf32>
    %c0_3 = arith.constant 0 : index
    %c0_4 = arith.constant 0 : index
    %3 = vector.load %arg3[%c0_3, %c0_4] : memref<1x64xf32, #tpu.memory_space<vmem>>, vector<1x64xf32>
    %4 = vector.broadcast %3 : vector<1x64xf32> to vector<8x64xf32>
    %5 = arith.addf %2, %4 : vector<8x64xf32>
    %cst_5 = arith.constant 0.000000e+00 : f32
    %6 = vector.broadcast %cst_5 : f32 to vector<8x64xf32>
    %7 = arith.maximumf %5, %6 : vector<8x64xf32>
    %8 = arith.truncf %7 : vector<8x64xf32> to vector<8x64xbf16>
    %c0_6 = arith.constant 0 : index
    %c0_7 = arith.constant 0 : index
    %9 = vector.load %arg4[%c0_6, %c0_7] : memref<8x64xbf16, #tpu.memory_space<vmem>>, vector<8x64xbf16>
    tpu.vector_store %arg4[%c0_6, %c0_7], %8 {strides = array<i32>} : memref<8x64xbf16, #tpu.memory_space<vmem>>, vector<8x64xbf16>,
    return
  }
  func.func @transform_0(%arg0: i32) -> (i32, i32) {
    %c0_i32 = arith.constant 0 : i32
    %c0_i32_0 = arith.constant 0 : i32
    return %arg0, %c0_i32 : i32, i32
  }
  func.func @transform_1(%arg0: i32) -> (i32, i32) {
    %c0_i32 = arith.constant 0 : i32
    %c0_i32_0 = arith.constant 0 : i32
    %c0_i32_1 = arith.constant 0 : i32
    return %c0_i32, %c0_i32_0 : i32, i32
  }
  func.func @transform_2(%arg0: i32) -> (i32, i32) {
    %c0_i32 = arith.constant 0 : i32
    %c0_i32_0 = arith.constant 0 : i32
    %c0_i32_1 = arith.constant 0 : i32
    return %c0_i32, %c0_i32_0 : i32, i32
  }
  func.func @transform_3(%arg0: i32) -> (i32, i32) {
    %c0_i32 = arith.constant 0 : i32
    %c0_i32_0 = arith.constant 0 : i32
    return %arg0, %c0_i32 : i32, i32
  }
}

module attributes {stable_mosaic.version = 11 : i64} {
  func.func @_fpn_top_kernel(%arg0: i32, %arg1: memref<8x64xbf16, #tpu.memory_space<vmem>>, %arg2: memref<64x32xbf16, #tpu.memory_space<vmem>>, %arg3: memref<1x32xf32, #tpu.memory_space<vmem>>, %arg4: memref<32x32xbf16, #tpu.memory_space<vmem>>, %arg5: memref<1x32xf32, #tpu.memory_space<vmem>>, %arg6: memref<8x128xbf16, #tpu.memory_space<vmem>>) attributes {dimension_semantics = [#tpu.dimension_semantics<parallel>], iteration_bounds = array<i64: 1>, scalar_prefetch = 0 : i64, scratch_operands = 0 : i64, tpu.core_type = #tpu.core_type<tc>, window_params = [{transform_indices = @transform_0, window_bounds = array<i64: 8, 64>}, {pipeline_mode = #tpu.pipeline_mode<synchronous>, transform_indices = @transform_1, window_bounds = array<i64: 64, 32>}, {pipeline_mode = #tpu.pipeline_mode<synchronous>, transform_indices = @transform_2, window_bounds = array<i64: 1, 32>}, {pipeline_mode = #tpu.pipeline_mode<synchronous>, transform_indices = @transform_3, window_bounds = array<i64: 32, 32>}, {pipeline_mode = #tpu.pipeline_mode<synchronous>, transform_indices = @transform_4, window_bounds = array<i64: 1, 32>}, {transform_indices = @transform_5, window_bounds = array<i64: 8, 128>}]} {
    %c0 = arith.constant 0 : index
    %c0_0 = arith.constant 0 : index
    %0 = vector.load %arg1[%c0, %c0_0] : memref<8x64xbf16, #tpu.memory_space<vmem>>, vector<8x64xbf16>
    %c0_1 = arith.constant 0 : index
    %c0_2 = arith.constant 0 : index
    %1 = vector.load %arg2[%c0_1, %c0_2] : memref<64x32xbf16, #tpu.memory_space<vmem>>, vector<64x32xbf16>
    %cst = arith.constant dense<0.000000e+00> : vector<8x32xf32>
    %2 = tpu.matmul %0, %1, %cst {dimension_numbers = #tpu.dot_dimension_numbers<[1], [0], [0], [1], [0, 0, 1, 1], [], []>} : vector<8x64xbf16>, vector<64x32xbf16>, vector<8x32xf32> -> vector<8x32xf32>
    %c0_3 = arith.constant 0 : index
    %c0_4 = arith.constant 0 : index
    %3 = vector.load %arg3[%c0_3, %c0_4] : memref<1x32xf32, #tpu.memory_space<vmem>>, vector<1x32xf32>
    %4 = vector.broadcast %3 : vector<1x32xf32> to vector<8x32xf32>
    %5 = arith.addf %2, %4 : vector<8x32xf32>
    %cst_5 = arith.constant 0.000000e+00 : f32
    %6 = vector.broadcast %cst_5 : f32 to vector<8x32xf32>
    %7 = arith.maximumf %5, %6 : vector<8x32xf32>
    %8 = arith.truncf %7 : vector<8x32xf32> to vector<8x32xbf16>
    %c0_6 = arith.constant 0 : index
    %c0_7 = arith.constant 0 : index
    %9 = vector.load %arg4[%c0_6, %c0_7] : memref<32x32xbf16, #tpu.memory_space<vmem>>, vector<32x32xbf16>
    %cst_8 = arith.constant dense<0.000000e+00> : vector<8x32xf32>
    %10 = tpu.matmul %8, %9, %cst_8 {dimension_numbers = #tpu.dot_dimension_numbers<[1], [0], [0], [1], [0, 0, 1, 1], [], []>} : vector<8x32xbf16>, vector<32x32xbf16>, vector<8x32xf32> -> vector<8x32xf32>
    %c0_9 = arith.constant 0 : index
    %c0_10 = arith.constant 0 : index
    %11 = vector.load %arg5[%c0_9, %c0_10] : memref<1x32xf32, #tpu.memory_space<vmem>>, vector<1x32xf32>
    %12 = vector.broadcast %11 : vector<1x32xf32> to vector<8x32xf32>
    %13 = arith.addf %10, %12 : vector<8x32xf32>
    %cst_11 = arith.constant 0.000000e+00 : f32
    %14 = vector.broadcast %cst_11 : f32 to vector<8x32xf32>
    %15 = arith.maximumf %13, %14 : vector<8x32xf32>
    %16 = arith.truncf %7 : vector<8x32xf32> to vector<8x32xbf16>
    %c0_12 = arith.constant 0 : index
    %c0_13 = arith.constant 0 : index
    %17 = vector.load %arg6[%c0_12, %c0_13] : memref<8x128xbf16, #tpu.memory_space<vmem>>, vector<8x32xbf16>
    tpu.vector_store %arg6[%c0_12, %c0_13], %16 {strides = array<i32>} : memref<8x128xbf16, #tpu.memory_space<vmem>>, vector<8x32xbf16>,
    %18 = arith.truncf %15 : vector<8x32xf32> to vector<8x32xbf16>
    %c0_14 = arith.constant 0 : index
    %c32 = arith.constant 32 : index
    %19 = vector.load %arg6[%c0_14, %c32] : memref<8x128xbf16, #tpu.memory_space<vmem>>, vector<8x32xbf16>
    tpu.vector_store %arg6[%c0_14, %c32], %18 {strides = array<i32>} : memref<8x128xbf16, #tpu.memory_space<vmem>>, vector<8x32xbf16>,
    %cst_15 = arith.constant 0.000000e+00 : bf16
    %20 = vector.broadcast %cst_15 : bf16 to vector<8x64xbf16>
    %c0_16 = arith.constant 0 : index
    %c64 = arith.constant 64 : index
    %21 = vector.load %arg6[%c0_16, %c64] : memref<8x128xbf16, #tpu.memory_space<vmem>>, vector<8x64xbf16>
    tpu.vector_store %arg6[%c0_16, %c64], %20 {strides = array<i32>} : memref<8x128xbf16, #tpu.memory_space<vmem>>, vector<8x64xbf16>,
    return
  }
  func.func @transform_0(%arg0: i32) -> (i32, i32) {
    %c0_i32 = arith.constant 0 : i32
    %c0_i32_0 = arith.constant 0 : i32
    return %arg0, %c0_i32 : i32, i32
  }
  func.func @transform_1(%arg0: i32) -> (i32, i32) {
    %c0_i32 = arith.constant 0 : i32
    %c0_i32_0 = arith.constant 0 : i32
    %c0_i32_1 = arith.constant 0 : i32
    return %c0_i32, %c0_i32_0 : i32, i32
  }
  func.func @transform_2(%arg0: i32) -> (i32, i32) {
    %c0_i32 = arith.constant 0 : i32
    %c0_i32_0 = arith.constant 0 : i32
    %c0_i32_1 = arith.constant 0 : i32
    return %c0_i32, %c0_i32_0 : i32, i32
  }
  func.func @transform_3(%arg0: i32) -> (i32, i32) {
    %c0_i32 = arith.constant 0 : i32
    %c0_i32_0 = arith.constant 0 : i32
    %c0_i32_1 = arith.constant 0 : i32
    return %c0_i32, %c0_i32_0 : i32, i32
  }
  func.func @transform_4(%arg0: i32) -> (i32, i32) {
    %c0_i32 = arith.constant 0 : i32
    %c0_i32_0 = arith.constant 0 : i32
    %c0_i32_1 = arith.constant 0 : i32
    return %c0_i32, %c0_i32_0 : i32, i32
  }
  func.func @transform_5(%arg0: i32) -> (i32, i32) {
    %c0_i32 = arith.constant 0 : i32
    %c0_i32_0 = arith.constant 0 : i32
    return %arg0, %c0_i32 : i32, i32
  }
}

module attributes {stable_mosaic.version = 11 : i64} {
  func.func @_fpn_merge_kernel(%arg0: i32, %arg1: memref<32x32xbf16, #tpu.memory_space<vmem>>, %arg2: memref<32x32xbf16, #tpu.memory_space<vmem>>, %arg3: memref<32x32xbf16, #tpu.memory_space<vmem>>, %arg4: memref<1x32xf32, #tpu.memory_space<vmem>>, %arg5: memref<32x32xbf16, #tpu.memory_space<vmem>>, %arg6: memref<1x32xf32, #tpu.memory_space<vmem>>, %arg7: memref<32x32xbf16, #tpu.memory_space<vmem>>, %arg8: memref<1x32xf32, #tpu.memory_space<vmem>>, %arg9: memref<32x128xbf16, #tpu.memory_space<vmem>>) attributes {dimension_semantics = [#tpu.dimension_semantics<parallel>], iteration_bounds = array<i64: 1>, scalar_prefetch = 0 : i64, scratch_operands = 0 : i64, tpu.core_type = #tpu.core_type<tc>, window_params = [{transform_indices = @transform_0, window_bounds = array<i64: 32, 32>}, {transform_indices = @transform_1, window_bounds = array<i64: 32, 32>}, {pipeline_mode = #tpu.pipeline_mode<synchronous>, transform_indices = @transform_2, window_bounds = array<i64: 32, 32>}, {pipeline_mode = #tpu.pipeline_mode<synchronous>, transform_indices = @transform_3, window_bounds = array<i64: 1, 32>}, {pipeline_mode = #tpu.pipeline_mode<synchronous>, transform_indices = @transform_4, window_bounds = array<i64: 32, 32>}, {pipeline_mode = #tpu.pipeline_mode<synchronous>, transform_indices = @transform_5, window_bounds = array<i64: 1, 32>}, {pipeline_mode = #tpu.pipeline_mode<synchronous>, transform_indices = @transform_6, window_bounds = array<i64: 32, 32>}, {pipeline_mode = #tpu.pipeline_mode<synchronous>, transform_indices = @transform_7, window_bounds = array<i64: 1, 32>}, {transform_indices = @transform_8, window_bounds = array<i64: 32, 128>}]} {
    %c0 = arith.constant 0 : index
    %c0_0 = arith.constant 0 : index
    %0 = vector.load %arg1[%c0, %c0_0] : memref<32x32xbf16, #tpu.memory_space<vmem>>, vector<32x32xbf16>
    %c0_1 = arith.constant 0 : index
    %c0_2 = arith.constant 0 : index
    %1 = vector.load %arg3[%c0_1, %c0_2] : memref<32x32xbf16, #tpu.memory_space<vmem>>, vector<32x32xbf16>
    %cst = arith.constant dense<0.000000e+00> : vector<32x32xf32>
    %2 = tpu.matmul %0, %1, %cst {dimension_numbers = #tpu.dot_dimension_numbers<[1], [0], [0], [1], [0, 0, 1, 1], [], []>} : vector<32x32xbf16>, vector<32x32xbf16>, vector<32x32xf32> -> vector<32x32xf32>
    %c0_3 = arith.constant 0 : index
    %c0_4 = arith.constant 0 : index
    %3 = vector.load %arg4[%c0_3, %c0_4] : memref<1x32xf32, #tpu.memory_space<vmem>>, vector<1x32xf32>
    %4 = vector.broadcast %3 : vector<1x32xf32> to vector<32x32xf32>
    %5 = arith.addf %2, %4 : vector<32x32xf32>
    %cst_5 = arith.constant 0.000000e+00 : f32
    %6 = vector.broadcast %cst_5 : f32 to vector<32x32xf32>
    %7 = arith.maximumf %5, %6 : vector<32x32xf32>
    %c0_6 = arith.constant 0 : index
    %c0_7 = arith.constant 0 : index
    %8 = vector.load %arg2[%c0_6, %c0_7] : memref<32x32xbf16, #tpu.memory_space<vmem>>, vector<32x32xbf16>
    %9 = arith.extf %8 : vector<32x32xbf16> to vector<32x32xf32>
    %10 = arith.addf %7, %9 : vector<32x32xf32>
    %11 = arith.truncf %10 : vector<32x32xf32> to vector<32x32xbf16>
    %c0_8 = arith.constant 0 : index
    %c0_9 = arith.constant 0 : index
    %12 = vector.load %arg5[%c0_8, %c0_9] : memref<32x32xbf16, #tpu.memory_space<vmem>>, vector<32x32xbf16>
    %cst_10 = arith.constant dense<0.000000e+00> : vector<32x32xf32>
    %13 = tpu.matmul %11, %12, %cst_10 {dimension_numbers = #tpu.dot_dimension_numbers<[1], [0], [0], [1], [0, 0, 1, 1], [], []>} : vector<32x32xbf16>, vector<32x32xbf16>, vector<32x32xf32> -> vector<32x32xf32>
    %c0_11 = arith.constant 0 : index
    %c0_12 = arith.constant 0 : index
    %14 = vector.load %arg6[%c0_11, %c0_12] : memref<1x32xf32, #tpu.memory_space<vmem>>, vector<1x32xf32>
    %15 = vector.broadcast %14 : vector<1x32xf32> to vector<32x32xf32>
    %16 = arith.addf %13, %15 : vector<32x32xf32>
    %cst_13 = arith.constant 0.000000e+00 : f32
    %17 = vector.broadcast %cst_13 : f32 to vector<32x32xf32>
    %18 = arith.maximumf %16, %17 : vector<32x32xf32>
    %19 = arith.truncf %18 : vector<32x32xf32> to vector<32x32xbf16>
    %c0_14 = arith.constant 0 : index
    %c0_15 = arith.constant 0 : index
    %20 = vector.load %arg7[%c0_14, %c0_15] : memref<32x32xbf16, #tpu.memory_space<vmem>>, vector<32x32xbf16>
    %cst_16 = arith.constant dense<0.000000e+00> : vector<32x32xf32>
    %21 = tpu.matmul %19, %20, %cst_16 {dimension_numbers = #tpu.dot_dimension_numbers<[1], [0], [0], [1], [0, 0, 1, 1], [], []>} : vector<32x32xbf16>, vector<32x32xbf16>, vector<32x32xf32> -> vector<32x32xf32>
    %c0_17 = arith.constant 0 : index
    %c0_18 = arith.constant 0 : index
    %22 = vector.load %arg8[%c0_17, %c0_18] : memref<1x32xf32, #tpu.memory_space<vmem>>, vector<1x32xf32>
    %23 = vector.broadcast %22 : vector<1x32xf32> to vector<32x32xf32>
    %24 = arith.addf %21, %23 : vector<32x32xf32>
    %cst_19 = arith.constant 0.000000e+00 : f32
    %25 = vector.broadcast %cst_19 : f32 to vector<32x32xf32>
    %26 = arith.maximumf %24, %25 : vector<32x32xf32>
    %27 = arith.truncf %18 : vector<32x32xf32> to vector<32x32xbf16>
    %c0_20 = arith.constant 0 : index
    %c0_21 = arith.constant 0 : index
    %28 = vector.load %arg9[%c0_20, %c0_21] : memref<32x128xbf16, #tpu.memory_space<vmem>>, vector<32x32xbf16>
    tpu.vector_store %arg9[%c0_20, %c0_21], %27 {strides = array<i32>} : memref<32x128xbf16, #tpu.memory_space<vmem>>, vector<32x32xbf16>,
    %29 = arith.truncf %26 : vector<32x32xf32> to vector<32x32xbf16>
    %c0_22 = arith.constant 0 : index
    %c32 = arith.constant 32 : index
    %30 = vector.load %arg9[%c0_22, %c32] : memref<32x128xbf16, #tpu.memory_space<vmem>>, vector<32x32xbf16>
    tpu.vector_store %arg9[%c0_22, %c32], %29 {strides = array<i32>} : memref<32x128xbf16, #tpu.memory_space<vmem>>, vector<32x32xbf16>,
    %cst_23 = arith.constant 0.000000e+00 : bf16
    %31 = vector.broadcast %cst_23 : bf16 to vector<32x64xbf16>
    %c0_24 = arith.constant 0 : index
    %c64 = arith.constant 64 : index
    %32 = vector.load %arg9[%c0_24, %c64] : memref<32x128xbf16, #tpu.memory_space<vmem>>, vector<32x64xbf16>
    tpu.vector_store %arg9[%c0_24, %c64], %31 {strides = array<i32>} : memref<32x128xbf16, #tpu.memory_space<vmem>>, vector<32x64xbf16>,
    return
  }
  func.func @transform_0(%arg0: i32) -> (i32, i32) {
    %c0_i32 = arith.constant 0 : i32
    %c0_i32_0 = arith.constant 0 : i32
    return %arg0, %c0_i32 : i32, i32
  }
  func.func @transform_1(%arg0: i32) -> (i32, i32) {
    %c0_i32 = arith.constant 0 : i32
    %c0_i32_0 = arith.constant 0 : i32
    return %arg0, %c0_i32 : i32, i32
  }
  func.func @transform_2(%arg0: i32) -> (i32, i32) {
    %c0_i32 = arith.constant 0 : i32
    %c0_i32_0 = arith.constant 0 : i32
    %c0_i32_1 = arith.constant 0 : i32
    return %c0_i32, %c0_i32_0 : i32, i32
  }
  func.func @transform_3(%arg0: i32) -> (i32, i32) {
    %c0_i32 = arith.constant 0 : i32
    %c0_i32_0 = arith.constant 0 : i32
    %c0_i32_1 = arith.constant 0 : i32
    return %c0_i32, %c0_i32_0 : i32, i32
  }
  func.func @transform_4(%arg0: i32) -> (i32, i32) {
    %c0_i32 = arith.constant 0 : i32
    %c0_i32_0 = arith.constant 0 : i32
    %c0_i32_1 = arith.constant 0 : i32
    return %c0_i32, %c0_i32_0 : i32, i32
  }
  func.func @transform_5(%arg0: i32) -> (i32, i32) {
    %c0_i32 = arith.constant 0 : i32
    %c0_i32_0 = arith.constant 0 : i32
    %c0_i32_1 = arith.constant 0 : i32
    return %c0_i32, %c0_i32_0 : i32, i32
  }
  func.func @transform_6(%arg0: i32) -> (i32, i32) {
    %c0_i32 = arith.constant 0 : i32
    %c0_i32_0 = arith.constant 0 : i32
    %c0_i32_1 = arith.constant 0 : i32
    return %c0_i32, %c0_i32_0 : i32, i32
  }
  func.func @transform_7(%arg0: i32) -> (i32, i32) {
    %c0_i32 = arith.constant 0 : i32
    %c0_i32_0 = arith.constant 0 : i32
    %c0_i32_1 = arith.constant 0 : i32
    return %c0_i32, %c0_i32_0 : i32, i32
  }
  func.func @transform_8(%arg0: i32) -> (i32, i32) {
    %c0_i32 = arith.constant 0 : i32
    %c0_i32_0 = arith.constant 0 : i32
    return %arg0, %c0_i32 : i32, i32
  }
}

module attributes {stable_mosaic.version = 11 : i64} {
  func.func @_fpn_merge_kernel(%arg0: i32, %arg1: memref<128x16xbf16, #tpu.memory_space<vmem>>, %arg2: memref<128x32xbf16, #tpu.memory_space<vmem>>, %arg3: memref<16x32xbf16, #tpu.memory_space<vmem>>, %arg4: memref<1x32xf32, #tpu.memory_space<vmem>>, %arg5: memref<32x32xbf16, #tpu.memory_space<vmem>>, %arg6: memref<1x32xf32, #tpu.memory_space<vmem>>, %arg7: memref<32x32xbf16, #tpu.memory_space<vmem>>, %arg8: memref<1x32xf32, #tpu.memory_space<vmem>>, %arg9: memref<128x128xbf16, #tpu.memory_space<vmem>>) attributes {dimension_semantics = [#tpu.dimension_semantics<parallel>], iteration_bounds = array<i64: 1>, scalar_prefetch = 0 : i64, scratch_operands = 0 : i64, tpu.core_type = #tpu.core_type<tc>, window_params = [{transform_indices = @transform_0, window_bounds = array<i64: 128, 16>}, {transform_indices = @transform_1, window_bounds = array<i64: 128, 32>}, {pipeline_mode = #tpu.pipeline_mode<synchronous>, transform_indices = @transform_2, window_bounds = array<i64: 16, 32>}, {pipeline_mode = #tpu.pipeline_mode<synchronous>, transform_indices = @transform_3, window_bounds = array<i64: 1, 32>}, {pipeline_mode = #tpu.pipeline_mode<synchronous>, transform_indices = @transform_4, window_bounds = array<i64: 32, 32>}, {pipeline_mode = #tpu.pipeline_mode<synchronous>, transform_indices = @transform_5, window_bounds = array<i64: 1, 32>}, {pipeline_mode = #tpu.pipeline_mode<synchronous>, transform_indices = @transform_6, window_bounds = array<i64: 32, 32>}, {pipeline_mode = #tpu.pipeline_mode<synchronous>, transform_indices = @transform_7, window_bounds = array<i64: 1, 32>}, {transform_indices = @transform_8, window_bounds = array<i64: 128, 128>}]} {
    %c0 = arith.constant 0 : index
    %c0_0 = arith.constant 0 : index
    %0 = vector.load %arg1[%c0, %c0_0] : memref<128x16xbf16, #tpu.memory_space<vmem>>, vector<128x16xbf16>
    %c0_1 = arith.constant 0 : index
    %c0_2 = arith.constant 0 : index
    %1 = vector.load %arg3[%c0_1, %c0_2] : memref<16x32xbf16, #tpu.memory_space<vmem>>, vector<16x32xbf16>
    %cst = arith.constant dense<0.000000e+00> : vector<128x32xf32>
    %2 = tpu.matmul %0, %1, %cst {dimension_numbers = #tpu.dot_dimension_numbers<[1], [0], [0], [1], [0, 0, 1, 1], [], []>} : vector<128x16xbf16>, vector<16x32xbf16>, vector<128x32xf32> -> vector<128x32xf32>
    %c0_3 = arith.constant 0 : index
    %c0_4 = arith.constant 0 : index
    %3 = vector.load %arg4[%c0_3, %c0_4] : memref<1x32xf32, #tpu.memory_space<vmem>>, vector<1x32xf32>
    %4 = vector.broadcast %3 : vector<1x32xf32> to vector<128x32xf32>
    %5 = arith.addf %2, %4 : vector<128x32xf32>
    %cst_5 = arith.constant 0.000000e+00 : f32
    %6 = vector.broadcast %cst_5 : f32 to vector<128x32xf32>
    %7 = arith.maximumf %5, %6 : vector<128x32xf32>
    %c0_6 = arith.constant 0 : index
    %c0_7 = arith.constant 0 : index
    %8 = vector.load %arg2[%c0_6, %c0_7] : memref<128x32xbf16, #tpu.memory_space<vmem>>, vector<128x32xbf16>
    %9 = arith.extf %8 : vector<128x32xbf16> to vector<128x32xf32>
    %10 = arith.addf %7, %9 : vector<128x32xf32>
    %11 = arith.truncf %10 : vector<128x32xf32> to vector<128x32xbf16>
    %c0_8 = arith.constant 0 : index
    %c0_9 = arith.constant 0 : index
    %12 = vector.load %arg5[%c0_8, %c0_9] : memref<32x32xbf16, #tpu.memory_space<vmem>>, vector<32x32xbf16>
    %cst_10 = arith.constant dense<0.000000e+00> : vector<128x32xf32>
    %13 = tpu.matmul %11, %12, %cst_10 {dimension_numbers = #tpu.dot_dimension_numbers<[1], [0], [0], [1], [0, 0, 1, 1], [], []>} : vector<128x32xbf16>, vector<32x32xbf16>, vector<128x32xf32> -> vector<128x32xf32>
    %c0_11 = arith.constant 0 : index
    %c0_12 = arith.constant 0 : index
    %14 = vector.load %arg6[%c0_11, %c0_12] : memref<1x32xf32, #tpu.memory_space<vmem>>, vector<1x32xf32>
    %15 = vector.broadcast %14 : vector<1x32xf32> to vector<128x32xf32>
    %16 = arith.addf %13, %15 : vector<128x32xf32>
    %cst_13 = arith.constant 0.000000e+00 : f32
    %17 = vector.broadcast %cst_13 : f32 to vector<128x32xf32>
    %18 = arith.maximumf %16, %17 : vector<128x32xf32>
    %19 = arith.truncf %18 : vector<128x32xf32> to vector<128x32xbf16>
    %c0_14 = arith.constant 0 : index
    %c0_15 = arith.constant 0 : index
    %20 = vector.load %arg7[%c0_14, %c0_15] : memref<32x32xbf16, #tpu.memory_space<vmem>>, vector<32x32xbf16>
    %cst_16 = arith.constant dense<0.000000e+00> : vector<128x32xf32>
    %21 = tpu.matmul %19, %20, %cst_16 {dimension_numbers = #tpu.dot_dimension_numbers<[1], [0], [0], [1], [0, 0, 1, 1], [], []>} : vector<128x32xbf16>, vector<32x32xbf16>, vector<128x32xf32> -> vector<128x32xf32>
    %c0_17 = arith.constant 0 : index
    %c0_18 = arith.constant 0 : index
    %22 = vector.load %arg8[%c0_17, %c0_18] : memref<1x32xf32, #tpu.memory_space<vmem>>, vector<1x32xf32>
    %23 = vector.broadcast %22 : vector<1x32xf32> to vector<128x32xf32>
    %24 = arith.addf %21, %23 : vector<128x32xf32>
    %cst_19 = arith.constant 0.000000e+00 : f32
    %25 = vector.broadcast %cst_19 : f32 to vector<128x32xf32>
    %26 = arith.maximumf %24, %25 : vector<128x32xf32>
    %27 = arith.truncf %18 : vector<128x32xf32> to vector<128x32xbf16>
    %c0_20 = arith.constant 0 : index
    %c0_21 = arith.constant 0 : index
    %28 = vector.load %arg9[%c0_20, %c0_21] : memref<128x128xbf16, #tpu.memory_space<vmem>>, vector<128x32xbf16>
    tpu.vector_store %arg9[%c0_20, %c0_21], %27 {strides = array<i32>} : memref<128x128xbf16, #tpu.memory_space<vmem>>, vector<128x32xbf16>,
    %29 = arith.truncf %26 : vector<128x32xf32> to vector<128x32xbf16>
    %c0_22 = arith.constant 0 : index
    %c32 = arith.constant 32 : index
    %30 = vector.load %arg9[%c0_22, %c32] : memref<128x128xbf16, #tpu.memory_space<vmem>>, vector<128x32xbf16>
    tpu.vector_store %arg9[%c0_22, %c32], %29 {strides = array<i32>} : memref<128x128xbf16, #tpu.memory_space<vmem>>, vector<128x32xbf16>,
    %cst_23 = arith.constant 0.000000e+00 : bf16
    %31 = vector.broadcast %cst_23 : bf16 to vector<128x64xbf16>
    %c0_24 = arith.constant 0 : index
    %c64 = arith.constant 64 : index
    %32 = vector.load %arg9[%c0_24, %c64] : memref<128x128xbf16, #tpu.memory_space<vmem>>, vector<128x64xbf16>
    tpu.vector_store %arg9[%c0_24, %c64], %31 {strides = array<i32>} : memref<128x128xbf16, #tpu.memory_space<vmem>>, vector<128x64xbf16>,
    return
  }
  func.func @transform_0(%arg0: i32) -> (i32, i32) {
    %c0_i32 = arith.constant 0 : i32
    %c0_i32_0 = arith.constant 0 : i32
    return %arg0, %c0_i32 : i32, i32
  }
  func.func @transform_1(%arg0: i32) -> (i32, i32) {
    %c0_i32 = arith.constant 0 : i32
    %c0_i32_0 = arith.constant 0 : i32
    return %arg0, %c0_i32 : i32, i32
  }
  func.func @transform_2(%arg0: i32) -> (i32, i32) {
    %c0_i32 = arith.constant 0 : i32
    %c0_i32_0 = arith.constant 0 : i32
    %c0_i32_1 = arith.constant 0 : i32
    return %c0_i32, %c0_i32_0 : i32, i32
  }
  func.func @transform_3(%arg0: i32) -> (i32, i32) {
    %c0_i32 = arith.constant 0 : i32
    %c0_i32_0 = arith.constant 0 : i32
    %c0_i32_1 = arith.constant 0 : i32
    return %c0_i32, %c0_i32_0 : i32, i32
  }
  func.func @transform_4(%arg0: i32) -> (i32, i32) {
    %c0_i32 = arith.constant 0 : i32
    %c0_i32_0 = arith.constant 0 : i32
    %c0_i32_1 = arith.constant 0 : i32
    return %c0_i32, %c0_i32_0 : i32, i32
  }
  func.func @transform_5(%arg0: i32) -> (i32, i32) {
    %c0_i32 = arith.constant 0 : i32
    %c0_i32_0 = arith.constant 0 : i32
    %c0_i32_1 = arith.constant 0 : i32
    return %c0_i32, %c0_i32_0 : i32, i32
  }
  func.func @transform_6(%arg0: i32) -> (i32, i32) {
    %c0_i32 = arith.constant 0 : i32
    %c0_i32_0 = arith.constant 0 : i32
    %c0_i32_1 = arith.constant 0 : i32
    return %c0_i32, %c0_i32_0 : i32, i32
  }
  func.func @transform_7(%arg0: i32) -> (i32, i32) {
    %c0_i32 = arith.constant 0 : i32
    %c0_i32_0 = arith.constant 0 : i32
    %c0_i32_1 = arith.constant 0 : i32
    return %c0_i32, %c0_i32_0 : i32, i32
  }
  func.func @transform_8(%arg0: i32) -> (i32, i32) {
    %c0_i32 = arith.constant 0 : i32
    %c0_i32_0 = arith.constant 0 : i32
    return %arg0, %c0_i32 : i32, i32
  }
}

module attributes {stable_mosaic.version = 11 : i64} {
  func.func @_heads_kernel(%arg0: i32, %arg1: memref<8x128xbf16, #tpu.memory_space<vmem>>, %arg2: memref<128x64xbf16, #tpu.memory_space<vmem>>, %arg3: memref<1x64xf32, #tpu.memory_space<vmem>>, %arg4: memref<64x256xbf16, #tpu.memory_space<vmem>>, %arg5: memref<1x256xf32, #tpu.memory_space<vmem>>, %arg6: memref<256x512xbf16, #tpu.memory_space<vmem>>, %arg7: memref<1x512xf32, #tpu.memory_space<vmem>>, %arg8: memref<128x640xbf16, #tpu.memory_space<vmem>>, %arg9: memref<1x640xf32, #tpu.memory_space<vmem>>, %arg10: memref<8x512xbf16, #tpu.memory_space<vmem>>, %arg11: memref<2x8x640xbf16, #tpu.memory_space<vmem>>) attributes {dimension_semantics = [#tpu.dimension_semantics<parallel>], iteration_bounds = array<i64: 1>, scalar_prefetch = 0 : i64, scratch_operands = 0 : i64, tpu.core_type = #tpu.core_type<tc>, window_params = [{transform_indices = @transform_0, window_bounds = array<i64: 8, 128>}, {pipeline_mode = #tpu.pipeline_mode<synchronous>, transform_indices = @transform_1, window_bounds = array<i64: 128, 64>}, {pipeline_mode = #tpu.pipeline_mode<synchronous>, transform_indices = @transform_2, window_bounds = array<i64: 1, 64>}, {pipeline_mode = #tpu.pipeline_mode<synchronous>, transform_indices = @transform_3, window_bounds = array<i64: 64, 256>}, {pipeline_mode = #tpu.pipeline_mode<synchronous>, transform_indices = @transform_4, window_bounds = array<i64: 1, 256>}, {pipeline_mode = #tpu.pipeline_mode<synchronous>, transform_indices = @transform_5, window_bounds = array<i64: 256, 512>}, {pipeline_mode = #tpu.pipeline_mode<synchronous>, transform_indices = @transform_6, window_bounds = array<i64: 1, 512>}, {pipeline_mode = #tpu.pipeline_mode<synchronous>, transform_indices = @transform_7, window_bounds = array<i64: 128, 640>}, {pipeline_mode = #tpu.pipeline_mode<synchronous>, transform_indices = @transform_8, window_bounds = array<i64: 1, 640>}, {transform_indices = @transform_9, window_bounds = array<i64: 8, 512>}, {transform_indices = @transform_10, window_bounds = array<i64: 2, 8, 640>}]} {
    %c0 = arith.constant 0 : index
    %c0_0 = arith.constant 0 : index
    %0 = vector.load %arg1[%c0, %c0_0] : memref<8x128xbf16, #tpu.memory_space<vmem>>, vector<8x128xbf16>
    %c0_1 = arith.constant 0 : index
    %c0_2 = arith.constant 0 : index
    %1 = vector.load %arg2[%c0_1, %c0_2] : memref<128x64xbf16, #tpu.memory_space<vmem>>, vector<128x64xbf16>
    %cst = arith.constant dense<0.000000e+00> : vector<8x64xf32>
    %2 = tpu.matmul %0, %1, %cst {dimension_numbers = #tpu.dot_dimension_numbers<[1], [0], [0], [1], [0, 0, 1, 1], [], []>} : vector<8x128xbf16>, vector<128x64xbf16>, vector<8x64xf32> -> vector<8x64xf32>
    %c0_3 = arith.constant 0 : index
    %c0_4 = arith.constant 0 : index
    %3 = vector.load %arg3[%c0_3, %c0_4] : memref<1x64xf32, #tpu.memory_space<vmem>>, vector<1x64xf32>
    %4 = vector.broadcast %3 : vector<1x64xf32> to vector<8x64xf32>
    %5 = arith.addf %2, %4 : vector<8x64xf32>
    %cst_5 = arith.constant 0.000000e+00 : f32
    %6 = vector.broadcast %cst_5 : f32 to vector<8x64xf32>
    %7 = arith.maximumf %5, %6 : vector<8x64xf32>
    %8 = arith.truncf %7 : vector<8x64xf32> to vector<8x64xbf16>
    %c0_6 = arith.constant 0 : index
    %c0_7 = arith.constant 0 : index
    %9 = vector.load %arg4[%c0_6, %c0_7] : memref<64x256xbf16, #tpu.memory_space<vmem>>, vector<64x256xbf16>
    %cst_8 = arith.constant dense<0.000000e+00> : vector<8x256xf32>
    %10 = tpu.matmul %8, %9, %cst_8 {dimension_numbers = #tpu.dot_dimension_numbers<[1], [0], [0], [1], [0, 0, 1, 1], [], []>} : vector<8x64xbf16>, vector<64x256xbf16>, vector<8x256xf32> -> vector<8x256xf32>
    %c0_9 = arith.constant 0 : index
    %c0_10 = arith.constant 0 : index
    %11 = vector.load %arg5[%c0_9, %c0_10] : memref<1x256xf32, #tpu.memory_space<vmem>>, vector<1x256xf32>
    %12 = vector.broadcast %11 : vector<1x256xf32> to vector<8x256xf32>
    %13 = arith.addf %10, %12 : vector<8x256xf32>
    %cst_11 = arith.constant 0.000000e+00 : f32
    %14 = vector.broadcast %cst_11 : f32 to vector<8x256xf32>
    %15 = arith.maximumf %13, %14 : vector<8x256xf32>
    %16 = arith.truncf %15 : vector<8x256xf32> to vector<8x256xbf16>
    %c0_12 = arith.constant 0 : index
    %c0_13 = arith.constant 0 : index
    %17 = vector.load %arg6[%c0_12, %c0_13] : memref<256x512xbf16, #tpu.memory_space<vmem>>, vector<256x512xbf16>
    %cst_14 = arith.constant dense<0.000000e+00> : vector<8x512xf32>
    %18 = tpu.matmul %16, %17, %cst_14 {dimension_numbers = #tpu.dot_dimension_numbers<[1], [0], [0], [1], [0, 0, 1, 1], [], []>} : vector<8x256xbf16>, vector<256x512xbf16>, vector<8x512xf32> -> vector<8x512xf32>
    %c0_15 = arith.constant 0 : index
    %c0_16 = arith.constant 0 : index
    %19 = vector.load %arg7[%c0_15, %c0_16] : memref<1x512xf32, #tpu.memory_space<vmem>>, vector<1x512xf32>
    %20 = vector.broadcast %19 : vector<1x512xf32> to vector<8x512xf32>
    %21 = arith.addf %18, %20 : vector<8x512xf32>
    %22 = arith.truncf %21 : vector<8x512xf32> to vector<8x512xbf16>
    %c0_17 = arith.constant 0 : index
    %c0_18 = arith.constant 0 : index
    %23 = vector.load %arg10[%c0_17, %c0_18] : memref<8x512xbf16, #tpu.memory_space<vmem>>, vector<8x512xbf16>
    tpu.vector_store %arg10[%c0_17, %c0_18], %22 {strides = array<i32>} : memref<8x512xbf16, #tpu.memory_space<vmem>>, vector<8x512xbf16>,
    %24 = vector.extract_strided_slice %21 {offsets = [0, 0], sizes = [8, 128], strides = [1, 1]} : vector<8x512xf32> to vector<8x128xf32>
    %25 = vector.extract_strided_slice %21 {offsets = [0, 256], sizes = [8, 128], strides = [1, 1]} : vector<8x512xf32> to vector<8x128xf32>
    %26 = tpu.concatenate %24, %25 in 0 : vector<8x128xf32>, vector<8x128xf32> -> vector<16x128xf32>
    %27 = arith.truncf %26 : vector<16x128xf32> to vector<16x128xbf16>
    %c0_19 = arith.constant 0 : index
    %c0_20 = arith.constant 0 : index
    %28 = vector.load %arg8[%c0_19, %c0_20] : memref<128x640xbf16, #tpu.memory_space<vmem>>, vector<128x640xbf16>
    %cst_21 = arith.constant dense<0.000000e+00> : vector<16x640xf32>
    %29 = tpu.matmul %27, %28, %cst_21 {dimension_numbers = #tpu.dot_dimension_numbers<[1], [0], [0], [1], [0, 0, 1, 1], [], []>} : vector<16x128xbf16>, vector<128x640xbf16>, vector<16x640xf32> -> vector<16x640xf32>
    %c0_22 = arith.constant 0 : index
    %c0_23 = arith.constant 0 : index
    %30 = vector.load %arg9[%c0_22, %c0_23] : memref<1x640xf32, #tpu.memory_space<vmem>>, vector<1x640xf32>
    %31 = vector.broadcast %30 : vector<1x640xf32> to vector<16x640xf32>
    %32 = arith.addf %29, %31 : vector<16x640xf32>
    %33 = vector.extract_strided_slice %32 {offsets = [0, 0], sizes = [8, 640], strides = [1, 1]} : vector<16x640xf32> to vector<8x640xf32>
    %34 = arith.truncf %33 : vector<8x640xf32> to vector<8x640xbf16>
    %c0_24 = arith.constant 0 : index
    %c0_25 = arith.constant 0 : index
    %c0_26 = arith.constant 0 : index
    %35 = vector.load %arg11[%c0_24, %c0_25, %c0_26] : memref<2x8x640xbf16, #tpu.memory_space<vmem>>, vector<1x8x640xbf16>
    %36 = vector.shape_cast %35 : vector<1x8x640xbf16> to vector<8x640xbf16>
    %37 = vector.shape_cast %34 : vector<8x640xbf16> to vector<1x8x640xbf16>
    tpu.vector_store %arg11[%c0_24, %c0_25, %c0_26], %37 {strides = array<i32>} : memref<2x8x640xbf16, #tpu.memory_space<vmem>>, vector<1x8x640xbf16>,
    %38 = vector.extract_strided_slice %32 {offsets = [8, 0], sizes = [8, 640], strides = [1, 1]} : vector<16x640xf32> to vector<8x640xf32>
    %39 = arith.truncf %38 : vector<8x640xf32> to vector<8x640xbf16>
    %c1 = arith.constant 1 : index
    %c0_27 = arith.constant 0 : index
    %c0_28 = arith.constant 0 : index
    %40 = vector.load %arg11[%c1, %c0_27, %c0_28] : memref<2x8x640xbf16, #tpu.memory_space<vmem>>, vector<1x8x640xbf16>
    %41 = vector.shape_cast %40 : vector<1x8x640xbf16> to vector<8x640xbf16>
    %42 = vector.shape_cast %39 : vector<8x640xbf16> to vector<1x8x640xbf16>
    tpu.vector_store %arg11[%c1, %c0_27, %c0_28], %42 {strides = array<i32>} : memref<2x8x640xbf16, #tpu.memory_space<vmem>>, vector<1x8x640xbf16>,
    return
  }
  func.func @transform_0(%arg0: i32) -> (i32, i32) {
    %c0_i32 = arith.constant 0 : i32
    %c0_i32_0 = arith.constant 0 : i32
    return %arg0, %c0_i32 : i32, i32
  }
  func.func @transform_1(%arg0: i32) -> (i32, i32) {
    %c0_i32 = arith.constant 0 : i32
    %c0_i32_0 = arith.constant 0 : i32
    %c0_i32_1 = arith.constant 0 : i32
    return %c0_i32, %c0_i32_0 : i32, i32
  }
  func.func @transform_2(%arg0: i32) -> (i32, i32) {
    %c0_i32 = arith.constant 0 : i32
    %c0_i32_0 = arith.constant 0 : i32
    %c0_i32_1 = arith.constant 0 : i32
    return %c0_i32, %c0_i32_0 : i32, i32
  }
  func.func @transform_3(%arg0: i32) -> (i32, i32) {
    %c0_i32 = arith.constant 0 : i32
    %c0_i32_0 = arith.constant 0 : i32
    %c0_i32_1 = arith.constant 0 : i32
    return %c0_i32, %c0_i32_0 : i32, i32
  }
  func.func @transform_4(%arg0: i32) -> (i32, i32) {
    %c0_i32 = arith.constant 0 : i32
    %c0_i32_0 = arith.constant 0 : i32
    %c0_i32_1 = arith.constant 0 : i32
    return %c0_i32, %c0_i32_0 : i32, i32
  }
  func.func @transform_5(%arg0: i32) -> (i32, i32) {
    %c0_i32 = arith.constant 0 : i32
    %c0_i32_0 = arith.constant 0 : i32
    %c0_i32_1 = arith.constant 0 : i32
    return %c0_i32, %c0_i32_0 : i32, i32
  }
  func.func @transform_6(%arg0: i32) -> (i32, i32) {
    %c0_i32 = arith.constant 0 : i32
    %c0_i32_0 = arith.constant 0 : i32
    %c0_i32_1 = arith.constant 0 : i32
    return %c0_i32, %c0_i32_0 : i32, i32
  }
  func.func @transform_7(%arg0: i32) -> (i32, i32) {
    %c0_i32 = arith.constant 0 : i32
    %c0_i32_0 = arith.constant 0 : i32
    %c0_i32_1 = arith.constant 0 : i32
    return %c0_i32, %c0_i32_0 : i32, i32
  }
  func.func @transform_8(%arg0: i32) -> (i32, i32) {
    %c0_i32 = arith.constant 0 : i32
    %c0_i32_0 = arith.constant 0 : i32
    %c0_i32_1 = arith.constant 0 : i32
    return %c0_i32, %c0_i32_0 : i32, i32
  }
  func.func @transform_9(%arg0: i32) -> (i32, i32) {
    %c0_i32 = arith.constant 0 : i32
    %c0_i32_0 = arith.constant 0 : i32
    return %arg0, %c0_i32 : i32, i32
  }
  func.func @transform_10(%arg0: i32) -> (i32, i32, i32) {
    %c0_i32 = arith.constant 0 : i32
    %c0_i32_0 = arith.constant 0 : i32
    %c0_i32_1 = arith.constant 0 : i32
    return %c0_i32, %arg0, %c0_i32_0 : i32, i32, i32
  }
}

module attributes {stable_mosaic.version = 11 : i64} {
  func.func @_heads_kernel(%arg0: i32, %arg1: memref<32x128xbf16, #tpu.memory_space<vmem>>, %arg2: memref<128x64xbf16, #tpu.memory_space<vmem>>, %arg3: memref<1x64xf32, #tpu.memory_space<vmem>>, %arg4: memref<64x256xbf16, #tpu.memory_space<vmem>>, %arg5: memref<1x256xf32, #tpu.memory_space<vmem>>, %arg6: memref<256x512xbf16, #tpu.memory_space<vmem>>, %arg7: memref<1x512xf32, #tpu.memory_space<vmem>>, %arg8: memref<128x640xbf16, #tpu.memory_space<vmem>>, %arg9: memref<1x640xf32, #tpu.memory_space<vmem>>, %arg10: memref<32x512xbf16, #tpu.memory_space<vmem>>, %arg11: memref<2x32x640xbf16, #tpu.memory_space<vmem>>) attributes {dimension_semantics = [#tpu.dimension_semantics<parallel>], iteration_bounds = array<i64: 1>, scalar_prefetch = 0 : i64, scratch_operands = 0 : i64, tpu.core_type = #tpu.core_type<tc>, window_params = [{transform_indices = @transform_0, window_bounds = array<i64: 32, 128>}, {pipeline_mode = #tpu.pipeline_mode<synchronous>, transform_indices = @transform_1, window_bounds = array<i64: 128, 64>}, {pipeline_mode = #tpu.pipeline_mode<synchronous>, transform_indices = @transform_2, window_bounds = array<i64: 1, 64>}, {pipeline_mode = #tpu.pipeline_mode<synchronous>, transform_indices = @transform_3, window_bounds = array<i64: 64, 256>}, {pipeline_mode = #tpu.pipeline_mode<synchronous>, transform_indices = @transform_4, window_bounds = array<i64: 1, 256>}, {pipeline_mode = #tpu.pipeline_mode<synchronous>, transform_indices = @transform_5, window_bounds = array<i64: 256, 512>}, {pipeline_mode = #tpu.pipeline_mode<synchronous>, transform_indices = @transform_6, window_bounds = array<i64: 1, 512>}, {pipeline_mode = #tpu.pipeline_mode<synchronous>, transform_indices = @transform_7, window_bounds = array<i64: 128, 640>}, {pipeline_mode = #tpu.pipeline_mode<synchronous>, transform_indices = @transform_8, window_bounds = array<i64: 1, 640>}, {transform_indices = @transform_9, window_bounds = array<i64: 32, 512>}, {transform_indices = @transform_10, window_bounds = array<i64: 2, 32, 640>}]} {
    %c0 = arith.constant 0 : index
    %c0_0 = arith.constant 0 : index
    %0 = vector.load %arg1[%c0, %c0_0] : memref<32x128xbf16, #tpu.memory_space<vmem>>, vector<32x128xbf16>
    %c0_1 = arith.constant 0 : index
    %c0_2 = arith.constant 0 : index
    %1 = vector.load %arg2[%c0_1, %c0_2] : memref<128x64xbf16, #tpu.memory_space<vmem>>, vector<128x64xbf16>
    %cst = arith.constant dense<0.000000e+00> : vector<32x64xf32>
    %2 = tpu.matmul %0, %1, %cst {dimension_numbers = #tpu.dot_dimension_numbers<[1], [0], [0], [1], [0, 0, 1, 1], [], []>} : vector<32x128xbf16>, vector<128x64xbf16>, vector<32x64xf32> -> vector<32x64xf32>
    %c0_3 = arith.constant 0 : index
    %c0_4 = arith.constant 0 : index
    %3 = vector.load %arg3[%c0_3, %c0_4] : memref<1x64xf32, #tpu.memory_space<vmem>>, vector<1x64xf32>
    %4 = vector.broadcast %3 : vector<1x64xf32> to vector<32x64xf32>
    %5 = arith.addf %2, %4 : vector<32x64xf32>
    %cst_5 = arith.constant 0.000000e+00 : f32
    %6 = vector.broadcast %cst_5 : f32 to vector<32x64xf32>
    %7 = arith.maximumf %5, %6 : vector<32x64xf32>
    %8 = arith.truncf %7 : vector<32x64xf32> to vector<32x64xbf16>
    %c0_6 = arith.constant 0 : index
    %c0_7 = arith.constant 0 : index
    %9 = vector.load %arg4[%c0_6, %c0_7] : memref<64x256xbf16, #tpu.memory_space<vmem>>, vector<64x256xbf16>
    %cst_8 = arith.constant dense<0.000000e+00> : vector<32x256xf32>
    %10 = tpu.matmul %8, %9, %cst_8 {dimension_numbers = #tpu.dot_dimension_numbers<[1], [0], [0], [1], [0, 0, 1, 1], [], []>} : vector<32x64xbf16>, vector<64x256xbf16>, vector<32x256xf32> -> vector<32x256xf32>
    %c0_9 = arith.constant 0 : index
    %c0_10 = arith.constant 0 : index
    %11 = vector.load %arg5[%c0_9, %c0_10] : memref<1x256xf32, #tpu.memory_space<vmem>>, vector<1x256xf32>
    %12 = vector.broadcast %11 : vector<1x256xf32> to vector<32x256xf32>
    %13 = arith.addf %10, %12 : vector<32x256xf32>
    %cst_11 = arith.constant 0.000000e+00 : f32
    %14 = vector.broadcast %cst_11 : f32 to vector<32x256xf32>
    %15 = arith.maximumf %13, %14 : vector<32x256xf32>
    %16 = arith.truncf %15 : vector<32x256xf32> to vector<32x256xbf16>
    %c0_12 = arith.constant 0 : index
    %c0_13 = arith.constant 0 : index
    %17 = vector.load %arg6[%c0_12, %c0_13] : memref<256x512xbf16, #tpu.memory_space<vmem>>, vector<256x512xbf16>
    %cst_14 = arith.constant dense<0.000000e+00> : vector<32x512xf32>
    %18 = tpu.matmul %16, %17, %cst_14 {dimension_numbers = #tpu.dot_dimension_numbers<[1], [0], [0], [1], [0, 0, 1, 1], [], []>} : vector<32x256xbf16>, vector<256x512xbf16>, vector<32x512xf32> -> vector<32x512xf32>
    %c0_15 = arith.constant 0 : index
    %c0_16 = arith.constant 0 : index
    %19 = vector.load %arg7[%c0_15, %c0_16] : memref<1x512xf32, #tpu.memory_space<vmem>>, vector<1x512xf32>
    %20 = vector.broadcast %19 : vector<1x512xf32> to vector<32x512xf32>
    %21 = arith.addf %18, %20 : vector<32x512xf32>
    %22 = arith.truncf %21 : vector<32x512xf32> to vector<32x512xbf16>
    %c0_17 = arith.constant 0 : index
    %c0_18 = arith.constant 0 : index
    %23 = vector.load %arg10[%c0_17, %c0_18] : memref<32x512xbf16, #tpu.memory_space<vmem>>, vector<32x512xbf16>
    tpu.vector_store %arg10[%c0_17, %c0_18], %22 {strides = array<i32>} : memref<32x512xbf16, #tpu.memory_space<vmem>>, vector<32x512xbf16>,
    %24 = vector.extract_strided_slice %21 {offsets = [0, 0], sizes = [32, 128], strides = [1, 1]} : vector<32x512xf32> to vector<32x128xf32>
    %25 = vector.extract_strided_slice %21 {offsets = [0, 256], sizes = [32, 128], strides = [1, 1]} : vector<32x512xf32> to vector<32x128xf32>
    %26 = tpu.concatenate %24, %25 in 0 : vector<32x128xf32>, vector<32x128xf32> -> vector<64x128xf32>
    %27 = arith.truncf %26 : vector<64x128xf32> to vector<64x128xbf16>
    %c0_19 = arith.constant 0 : index
    %c0_20 = arith.constant 0 : index
    %28 = vector.load %arg8[%c0_19, %c0_20] : memref<128x640xbf16, #tpu.memory_space<vmem>>, vector<128x640xbf16>
    %cst_21 = arith.constant dense<0.000000e+00> : vector<64x640xf32>
    %29 = tpu.matmul %27, %28, %cst_21 {dimension_numbers = #tpu.dot_dimension_numbers<[1], [0], [0], [1], [0, 0, 1, 1], [], []>} : vector<64x128xbf16>, vector<128x640xbf16>, vector<64x640xf32> -> vector<64x640xf32>
    %c0_22 = arith.constant 0 : index
    %c0_23 = arith.constant 0 : index
    %30 = vector.load %arg9[%c0_22, %c0_23] : memref<1x640xf32, #tpu.memory_space<vmem>>, vector<1x640xf32>
    %31 = vector.broadcast %30 : vector<1x640xf32> to vector<64x640xf32>
    %32 = arith.addf %29, %31 : vector<64x640xf32>
    %33 = vector.extract_strided_slice %32 {offsets = [0, 0], sizes = [32, 640], strides = [1, 1]} : vector<64x640xf32> to vector<32x640xf32>
    %34 = arith.truncf %33 : vector<32x640xf32> to vector<32x640xbf16>
    %c0_24 = arith.constant 0 : index
    %c0_25 = arith.constant 0 : index
    %c0_26 = arith.constant 0 : index
    %35 = vector.load %arg11[%c0_24, %c0_25, %c0_26] : memref<2x32x640xbf16, #tpu.memory_space<vmem>>, vector<1x32x640xbf16>
    %36 = vector.shape_cast %35 : vector<1x32x640xbf16> to vector<32x640xbf16>
    %37 = vector.shape_cast %34 : vector<32x640xbf16> to vector<1x32x640xbf16>
    tpu.vector_store %arg11[%c0_24, %c0_25, %c0_26], %37 {strides = array<i32>} : memref<2x32x640xbf16, #tpu.memory_space<vmem>>, vector<1x32x640xbf16>,
    %38 = vector.extract_strided_slice %32 {offsets = [32, 0], sizes = [32, 640], strides = [1, 1]} : vector<64x640xf32> to vector<32x640xf32>
    %39 = arith.truncf %38 : vector<32x640xf32> to vector<32x640xbf16>
    %c1 = arith.constant 1 : index
    %c0_27 = arith.constant 0 : index
    %c0_28 = arith.constant 0 : index
    %40 = vector.load %arg11[%c1, %c0_27, %c0_28] : memref<2x32x640xbf16, #tpu.memory_space<vmem>>, vector<1x32x640xbf16>
    %41 = vector.shape_cast %40 : vector<1x32x640xbf16> to vector<32x640xbf16>
    %42 = vector.shape_cast %39 : vector<32x640xbf16> to vector<1x32x640xbf16>
    tpu.vector_store %arg11[%c1, %c0_27, %c0_28], %42 {strides = array<i32>} : memref<2x32x640xbf16, #tpu.memory_space<vmem>>, vector<1x32x640xbf16>,
    return
  }
  func.func @transform_0(%arg0: i32) -> (i32, i32) {
    %c0_i32 = arith.constant 0 : i32
    %c0_i32_0 = arith.constant 0 : i32
    return %arg0, %c0_i32 : i32, i32
  }
  func.func @transform_1(%arg0: i32) -> (i32, i32) {
    %c0_i32 = arith.constant 0 : i32
    %c0_i32_0 = arith.constant 0 : i32
    %c0_i32_1 = arith.constant 0 : i32
    return %c0_i32, %c0_i32_0 : i32, i32
  }
  func.func @transform_2(%arg0: i32) -> (i32, i32) {
    %c0_i32 = arith.constant 0 : i32
    %c0_i32_0 = arith.constant 0 : i32
    %c0_i32_1 = arith.constant 0 : i32
    return %c0_i32, %c0_i32_0 : i32, i32
  }
  func.func @transform_3(%arg0: i32) -> (i32, i32) {
    %c0_i32 = arith.constant 0 : i32
    %c0_i32_0 = arith.constant 0 : i32
    %c0_i32_1 = arith.constant 0 : i32
    return %c0_i32, %c0_i32_0 : i32, i32
  }
  func.func @transform_4(%arg0: i32) -> (i32, i32) {
    %c0_i32 = arith.constant 0 : i32
    %c0_i32_0 = arith.constant 0 : i32
    %c0_i32_1 = arith.constant 0 : i32
    return %c0_i32, %c0_i32_0 : i32, i32
  }
  func.func @transform_5(%arg0: i32) -> (i32, i32) {
    %c0_i32 = arith.constant 0 : i32
    %c0_i32_0 = arith.constant 0 : i32
    %c0_i32_1 = arith.constant 0 : i32
    return %c0_i32, %c0_i32_0 : i32, i32
  }
  func.func @transform_6(%arg0: i32) -> (i32, i32) {
    %c0_i32 = arith.constant 0 : i32
    %c0_i32_0 = arith.constant 0 : i32
    %c0_i32_1 = arith.constant 0 : i32
    return %c0_i32, %c0_i32_0 : i32, i32
  }
  func.func @transform_7(%arg0: i32) -> (i32, i32) {
    %c0_i32 = arith.constant 0 : i32
    %c0_i32_0 = arith.constant 0 : i32
    %c0_i32_1 = arith.constant 0 : i32
    return %c0_i32, %c0_i32_0 : i32, i32
  }
  func.func @transform_8(%arg0: i32) -> (i32, i32) {
    %c0_i32 = arith.constant 0 : i32
    %c0_i32_0 = arith.constant 0 : i32
    %c0_i32_1 = arith.constant 0 : i32
    return %c0_i32, %c0_i32_0 : i32, i32
  }
  func.func @transform_9(%arg0: i32) -> (i32, i32) {
    %c0_i32 = arith.constant 0 : i32
    %c0_i32_0 = arith.constant 0 : i32
    return %arg0, %c0_i32 : i32, i32
  }
  func.func @transform_10(%arg0: i32) -> (i32, i32, i32) {
    %c0_i32 = arith.constant 0 : i32
    %c0_i32_0 = arith.constant 0 : i32
    %c0_i32_1 = arith.constant 0 : i32
    return %c0_i32, %arg0, %c0_i32_0 : i32, i32, i32
  }
}

module attributes {stable_mosaic.version = 11 : i64} {
  func.func @_heads_kernel(%arg0: i32, %arg1: memref<128x128xbf16, #tpu.memory_space<vmem>>, %arg2: memref<128x64xbf16, #tpu.memory_space<vmem>>, %arg3: memref<1x64xf32, #tpu.memory_space<vmem>>, %arg4: memref<64x256xbf16, #tpu.memory_space<vmem>>, %arg5: memref<1x256xf32, #tpu.memory_space<vmem>>, %arg6: memref<256x512xbf16, #tpu.memory_space<vmem>>, %arg7: memref<1x512xf32, #tpu.memory_space<vmem>>, %arg8: memref<128x640xbf16, #tpu.memory_space<vmem>>, %arg9: memref<1x640xf32, #tpu.memory_space<vmem>>, %arg10: memref<128x512xbf16, #tpu.memory_space<vmem>>, %arg11: memref<2x128x640xbf16, #tpu.memory_space<vmem>>) attributes {dimension_semantics = [#tpu.dimension_semantics<parallel>], iteration_bounds = array<i64: 1>, scalar_prefetch = 0 : i64, scratch_operands = 0 : i64, tpu.core_type = #tpu.core_type<tc>, window_params = [{transform_indices = @transform_0, window_bounds = array<i64: 128, 128>}, {pipeline_mode = #tpu.pipeline_mode<synchronous>, transform_indices = @transform_1, window_bounds = array<i64: 128, 64>}, {pipeline_mode = #tpu.pipeline_mode<synchronous>, transform_indices = @transform_2, window_bounds = array<i64: 1, 64>}, {pipeline_mode = #tpu.pipeline_mode<synchronous>, transform_indices = @transform_3, window_bounds = array<i64: 64, 256>}, {pipeline_mode = #tpu.pipeline_mode<synchronous>, transform_indices = @transform_4, window_bounds = array<i64: 1, 256>}, {pipeline_mode = #tpu.pipeline_mode<synchronous>, transform_indices = @transform_5, window_bounds = array<i64: 256, 512>}, {pipeline_mode = #tpu.pipeline_mode<synchronous>, transform_indices = @transform_6, window_bounds = array<i64: 1, 512>}, {pipeline_mode = #tpu.pipeline_mode<synchronous>, transform_indices = @transform_7, window_bounds = array<i64: 128, 640>}, {pipeline_mode = #tpu.pipeline_mode<synchronous>, transform_indices = @transform_8, window_bounds = array<i64: 1, 640>}, {transform_indices = @transform_9, window_bounds = array<i64: 128, 512>}, {transform_indices = @transform_10, window_bounds = array<i64: 2, 128, 640>}]} {
    %c0 = arith.constant 0 : index
    %c0_0 = arith.constant 0 : index
    %0 = vector.load %arg1[%c0, %c0_0] : memref<128x128xbf16, #tpu.memory_space<vmem>>, vector<128x128xbf16>
    %c0_1 = arith.constant 0 : index
    %c0_2 = arith.constant 0 : index
    %1 = vector.load %arg2[%c0_1, %c0_2] : memref<128x64xbf16, #tpu.memory_space<vmem>>, vector<128x64xbf16>
    %cst = arith.constant dense<0.000000e+00> : vector<128x64xf32>
    %2 = tpu.matmul %0, %1, %cst {dimension_numbers = #tpu.dot_dimension_numbers<[1], [0], [0], [1], [0, 0, 1, 1], [], []>} : vector<128x128xbf16>, vector<128x64xbf16>, vector<128x64xf32> -> vector<128x64xf32>
    %c0_3 = arith.constant 0 : index
    %c0_4 = arith.constant 0 : index
    %3 = vector.load %arg3[%c0_3, %c0_4] : memref<1x64xf32, #tpu.memory_space<vmem>>, vector<1x64xf32>
    %4 = vector.broadcast %3 : vector<1x64xf32> to vector<128x64xf32>
    %5 = arith.addf %2, %4 : vector<128x64xf32>
    %cst_5 = arith.constant 0.000000e+00 : f32
    %6 = vector.broadcast %cst_5 : f32 to vector<128x64xf32>
    %7 = arith.maximumf %5, %6 : vector<128x64xf32>
    %8 = arith.truncf %7 : vector<128x64xf32> to vector<128x64xbf16>
    %c0_6 = arith.constant 0 : index
    %c0_7 = arith.constant 0 : index
    %9 = vector.load %arg4[%c0_6, %c0_7] : memref<64x256xbf16, #tpu.memory_space<vmem>>, vector<64x256xbf16>
    %cst_8 = arith.constant dense<0.000000e+00> : vector<128x256xf32>
    %10 = tpu.matmul %8, %9, %cst_8 {dimension_numbers = #tpu.dot_dimension_numbers<[1], [0], [0], [1], [0, 0, 1, 1], [], []>} : vector<128x64xbf16>, vector<64x256xbf16>, vector<128x256xf32> -> vector<128x256xf32>
    %c0_9 = arith.constant 0 : index
    %c0_10 = arith.constant 0 : index
    %11 = vector.load %arg5[%c0_9, %c0_10] : memref<1x256xf32, #tpu.memory_space<vmem>>, vector<1x256xf32>
    %12 = vector.broadcast %11 : vector<1x256xf32> to vector<128x256xf32>
    %13 = arith.addf %10, %12 : vector<128x256xf32>
    %cst_11 = arith.constant 0.000000e+00 : f32
    %14 = vector.broadcast %cst_11 : f32 to vector<128x256xf32>
    %15 = arith.maximumf %13, %14 : vector<128x256xf32>
    %16 = arith.truncf %15 : vector<128x256xf32> to vector<128x256xbf16>
    %c0_12 = arith.constant 0 : index
    %c0_13 = arith.constant 0 : index
    %17 = vector.load %arg6[%c0_12, %c0_13] : memref<256x512xbf16, #tpu.memory_space<vmem>>, vector<256x512xbf16>
    %cst_14 = arith.constant dense<0.000000e+00> : vector<128x512xf32>
    %18 = tpu.matmul %16, %17, %cst_14 {dimension_numbers = #tpu.dot_dimension_numbers<[1], [0], [0], [1], [0, 0, 1, 1], [], []>} : vector<128x256xbf16>, vector<256x512xbf16>, vector<128x512xf32> -> vector<128x512xf32>
    %c0_15 = arith.constant 0 : index
    %c0_16 = arith.constant 0 : index
    %19 = vector.load %arg7[%c0_15, %c0_16] : memref<1x512xf32, #tpu.memory_space<vmem>>, vector<1x512xf32>
    %20 = vector.broadcast %19 : vector<1x512xf32> to vector<128x512xf32>
    %21 = arith.addf %18, %20 : vector<128x512xf32>
    %22 = arith.truncf %21 : vector<128x512xf32> to vector<128x512xbf16>
    %c0_17 = arith.constant 0 : index
    %c0_18 = arith.constant 0 : index
    %23 = vector.load %arg10[%c0_17, %c0_18] : memref<128x512xbf16, #tpu.memory_space<vmem>>, vector<128x512xbf16>
    tpu.vector_store %arg10[%c0_17, %c0_18], %22 {strides = array<i32>} : memref<128x512xbf16, #tpu.memory_space<vmem>>, vector<128x512xbf16>,
    %24 = vector.extract_strided_slice %21 {offsets = [0, 0], sizes = [128, 128], strides = [1, 1]} : vector<128x512xf32> to vector<128x128xf32>
    %25 = vector.extract_strided_slice %21 {offsets = [0, 256], sizes = [128, 128], strides = [1, 1]} : vector<128x512xf32> to vector<128x128xf32>
    %26 = tpu.concatenate %24, %25 in 0 : vector<128x128xf32>, vector<128x128xf32> -> vector<256x128xf32>
    %27 = arith.truncf %26 : vector<256x128xf32> to vector<256x128xbf16>
    %c0_19 = arith.constant 0 : index
    %c0_20 = arith.constant 0 : index
    %28 = vector.load %arg8[%c0_19, %c0_20] : memref<128x640xbf16, #tpu.memory_space<vmem>>, vector<128x640xbf16>
    %cst_21 = arith.constant dense<0.000000e+00> : vector<256x640xf32>
    %29 = tpu.matmul %27, %28, %cst_21 {dimension_numbers = #tpu.dot_dimension_numbers<[1], [0], [0], [1], [0, 0, 1, 1], [], []>} : vector<256x128xbf16>, vector<128x640xbf16>, vector<256x640xf32> -> vector<256x640xf32>
    %c0_22 = arith.constant 0 : index
    %c0_23 = arith.constant 0 : index
    %30 = vector.load %arg9[%c0_22, %c0_23] : memref<1x640xf32, #tpu.memory_space<vmem>>, vector<1x640xf32>
    %31 = vector.broadcast %30 : vector<1x640xf32> to vector<256x640xf32>
    %32 = arith.addf %29, %31 : vector<256x640xf32>
    %33 = vector.extract_strided_slice %32 {offsets = [0, 0], sizes = [128, 640], strides = [1, 1]} : vector<256x640xf32> to vector<128x640xf32>
    %34 = arith.truncf %33 : vector<128x640xf32> to vector<128x640xbf16>
    %c0_24 = arith.constant 0 : index
    %c0_25 = arith.constant 0 : index
    %c0_26 = arith.constant 0 : index
    %35 = vector.load %arg11[%c0_24, %c0_25, %c0_26] : memref<2x128x640xbf16, #tpu.memory_space<vmem>>, vector<1x128x640xbf16>
    %36 = vector.shape_cast %35 : vector<1x128x640xbf16> to vector<128x640xbf16>
    %37 = vector.shape_cast %34 : vector<128x640xbf16> to vector<1x128x640xbf16>
    tpu.vector_store %arg11[%c0_24, %c0_25, %c0_26], %37 {strides = array<i32>} : memref<2x128x640xbf16, #tpu.memory_space<vmem>>, vector<1x128x640xbf16>,
    %38 = vector.extract_strided_slice %32 {offsets = [128, 0], sizes = [128, 640], strides = [1, 1]} : vector<256x640xf32> to vector<128x640xf32>
    %39 = arith.truncf %38 : vector<128x640xf32> to vector<128x640xbf16>
    %c1 = arith.constant 1 : index
    %c0_27 = arith.constant 0 : index
    %c0_28 = arith.constant 0 : index
    %40 = vector.load %arg11[%c1, %c0_27, %c0_28] : memref<2x128x640xbf16, #tpu.memory_space<vmem>>, vector<1x128x640xbf16>
    %41 = vector.shape_cast %40 : vector<1x128x640xbf16> to vector<128x640xbf16>
    %42 = vector.shape_cast %39 : vector<128x640xbf16> to vector<1x128x640xbf16>
    tpu.vector_store %arg11[%c1, %c0_27, %c0_28], %42 {strides = array<i32>} : memref<2x128x640xbf16, #tpu.memory_space<vmem>>, vector<1x128x640xbf16>,
    return
  }
  func.func @transform_0(%arg0: i32) -> (i32, i32) {
    %c0_i32 = arith.constant 0 : i32
    %c0_i32_0 = arith.constant 0 : i32
    return %arg0, %c0_i32 : i32, i32
  }
  func.func @transform_1(%arg0: i32) -> (i32, i32) {
    %c0_i32 = arith.constant 0 : i32
    %c0_i32_0 = arith.constant 0 : i32
    %c0_i32_1 = arith.constant 0 : i32
    return %c0_i32, %c0_i32_0 : i32, i32
  }
  func.func @transform_2(%arg0: i32) -> (i32, i32) {
    %c0_i32 = arith.constant 0 : i32
    %c0_i32_0 = arith.constant 0 : i32
    %c0_i32_1 = arith.constant 0 : i32
    return %c0_i32, %c0_i32_0 : i32, i32
  }
  func.func @transform_3(%arg0: i32) -> (i32, i32) {
    %c0_i32 = arith.constant 0 : i32
    %c0_i32_0 = arith.constant 0 : i32
    %c0_i32_1 = arith.constant 0 : i32
    return %c0_i32, %c0_i32_0 : i32, i32
  }
  func.func @transform_4(%arg0: i32) -> (i32, i32) {
    %c0_i32 = arith.constant 0 : i32
    %c0_i32_0 = arith.constant 0 : i32
    %c0_i32_1 = arith.constant 0 : i32
    return %c0_i32, %c0_i32_0 : i32, i32
  }
  func.func @transform_5(%arg0: i32) -> (i32, i32) {
    %c0_i32 = arith.constant 0 : i32
    %c0_i32_0 = arith.constant 0 : i32
    %c0_i32_1 = arith.constant 0 : i32
    return %c0_i32, %c0_i32_0 : i32, i32
  }
  func.func @transform_6(%arg0: i32) -> (i32, i32) {
    %c0_i32 = arith.constant 0 : i32
    %c0_i32_0 = arith.constant 0 : i32
    %c0_i32_1 = arith.constant 0 : i32
    return %c0_i32, %c0_i32_0 : i32, i32
  }
  func.func @transform_7(%arg0: i32) -> (i32, i32) {
    %c0_i32 = arith.constant 0 : i32
    %c0_i32_0 = arith.constant 0 : i32
    %c0_i32_1 = arith.constant 0 : i32
    return %c0_i32, %c0_i32_0 : i32, i32
  }
  func.func @transform_8(%arg0: i32) -> (i32, i32) {
    %c0_i32 = arith.constant 0 : i32
    %c0_i32_0 = arith.constant 0 : i32
    %c0_i32_1 = arith.constant 0 : i32
    return %c0_i32, %c0_i32_0 : i32, i32
  }
  func.func @transform_9(%arg0: i32) -> (i32, i32) {
    %c0_i32 = arith.constant 0 : i32
    %c0_i32_0 = arith.constant 0 : i32
    return %arg0, %c0_i32 : i32, i32
  }
  func.func @transform_10(%arg0: i32) -> (i32, i32, i32) {
    %c0_i32 = arith.constant 0 : i32
    %c0_i32_0 = arith.constant 0 : i32
    %c0_i32_1 = arith.constant 0 : i32
    return %c0_i32, %arg0, %c0_i32_0 : i32, i32, i32
  }
}

</mosaic_0001>

<bundles_post_ra>
// kernel: shuffletrack_forward.9
= control target key start
LH: loop header
LB: loop body
LE: loop exit
PB: predicated region body
PF: predicated region fallthrough
CT: control target
= control target key end

     0   :  { %vm86_vm0 = vcmask 130048   ;;  %vm288_vm1 = vcmask 125952   ;;  %s519_s1 = inlined_call_operand.vmem [shape: bf16[16,16], index: 1, kind: input, shape index: {}]   ;;  %s520_s0 = inlined_call_operand.vmem [shape: bf16[128,16], index: 0, kind: input, shape index: {}]   ;;  %s521_s2 = inlined_call_operand.vmem [shape: f32[1,16], index: 2, kind: input, shape index: {}]   ;;  %s522_s3 = inlined_call_operand.vmem [shape: bf16[128,16], index: 3, kind: output, shape index: {}]  }
   0x1   :  { %v388_v0 = vld [vmem:[%s519_s1] sm:$0xff]   ;;  %v391_v3 = vld [vmem:[%s520_s0 + $0x8] sm:$0xff]   ;;  %v393_v5 = vld [vmem:[%s520_s0 + $0x10] sm:$0xff]  }
   0x2   :  { %v389_v1 = vld [vmem:[%s520_s0] sm:$0xff]   ;;  %368 = vmatprep.subr.bf16.mxu0 %v388_v0  ;;  %386 = vmatprep.subr.bf16.mxu1 %v388_v0  ;;  %v392_v4 = vld [vmem:[%s520_s0 + $0x28] sm:$0xff]   ;;  %v394_v6 = vld [vmem:[%s520_s0 + $0x30] sm:$0xff]  }
   0x3   :  { %v390_v2 = vld [vmem:[%s520_s0 + $0x20] sm:$0xff]   ;;  %369 = vmatpush3.bf16.msra.mxu0 %v388_v0  ;;  %387 = vmatpush3.bf16.msra.mxu1 %v388_v0  ;;  %v395_v7 = vld [vmem:[%s520_s0 + $0x18] sm:$0xff]  }
   0x4   :  { %370 = vmatprep.mubr.msk.bf16.mxu0 %vm86_vm0, %v389_v1  ;;  %378 = vmatprep.mubr.msk.bf16.mxu1 %vm86_vm0, %v390_v2  ;;  %v396_v8 = vld [vmem:[%s520_s0 + $0x38] sm:$0xff]   ;;  %v309_v9 = vld [vmem:[%s521_s2] ss:$0 sm:$0xff] }
   0x6   :  { %371 = vmatmul.mubr.msk.bf16.vlgmr.msra.gmra.mrb[0].mxu0 %vm86_vm0, %v391_v3  ;;  %379 = vmatmul.mubr.msk.bf16.vlgmr.msra.gmra.mrb[0].mxu1 %vm86_vm0, %v392_v4 }
   0x7   :  { %374 = vmatprep.mubr.msk.bf16.mxu0 %vm86_vm0, %v393_v5  ;;  %382 = vmatprep.mubr.msk.bf16.mxu1 %vm86_vm0, %v394_v6 }
   0xe   :  { %375 = vmatmul.mubr.msk.bf16.gmra.mrb[4].mxu0 %vm86_vm0, %v395_v7  ;;  %383 = vmatmul.mubr.msk.bf16.gmra.mrb[4].mxu1 %vm86_vm0, %v396_v8 }
  0xd9   :  { %v372_v10 = vpop.f32.mrb[0].mxu0  ;;  %v380_v11 = vpop.f32.mrb[0].mxu1 }
  0xda   :  { %v154_v12 = vadd.f32 %v372_v10, %v309_v9  ;;  %v186_v13 = vadd.f32 %v380_v11, %v309_v9  ;;  %v145_v14 = vpop.f32.mrb[1].mxu0  ;;  %v177_v15 = vpop.f32.mrb[1].mxu1 }
  0xdb   :  { %v146_v16 = vadd.f32 %v309_v9, %v145_v14  ;;  %v178_v17 = vadd.f32 %v309_v9, %v177_v15  ;;  %v373_v18 = vpop.f32.mrb[2].mxu0  ;;  %v381_v19 = vpop.f32.mrb[2].mxu1 }
  0xdc   :  { %v210_v20 = vmax.f32 %v154_v12, 0.0  ;;  %v218_v21 = vmax.f32 %v186_v13, 0.0  ;;  %v157_v22 = vadd.f32 %v373_v18, %v309_v9  ;;  %v189_v23 = vadd.f32 %v381_v19, %v309_v9  ;;  %v148_v24 = vpop.f32.mrb[3].mxu0  ;;  %v180_v25 = vpop.f32.mrb[3].mxu1 }
  0xdd   :  { %v208_v26 = vmax.f32 %v146_v16, 0.0  ;;  %v216_v27 = vmax.f32 %v178_v17, 0.0  ;;  %v149_v28 = vadd.f32 %v309_v9, %v148_v24  ;;  %v181_v29 = vadd.f32 %v309_v9, %v180_v25 }
  0xde   :  { %v345_v30 = vpack.c.bf16 %v210_v20, %v210_v20  ;;  %v353_v31 = vpack.c.bf16 %v218_v21, %v218_v21  ;;  %v211_v32 = vmax.f32 %v157_v22, 0.0  ;;  %v219_v33 = vmax.f32 %v189_v23, 0.0 }
  0xdf   :  { %v343_v34 = vpack.c.bf16 %v208_v26, %v208_v26  ;;  %v351_v35 = vpack.c.bf16 %v216_v27, %v216_v27  ;;  %v209_v36 = vmax.f32 %v149_v28, 0.0  ;;  %v217_v37 = vmax.f32 %v181_v29, 0.0 }
  0xe0   :  { %291 = vst.msk [vmem:[%s522_s3 + $0x8] sm:$0xf] %vm288_vm1, %v345_v30  ;;  %299 = vst.msk [vmem:[%s522_s3 + $0x28] sm:$0xf] %vm288_vm1, %v353_v31  ;;  %v346_v38 = vpack.c.bf16 %v211_v32, %v211_v32  ;;  %v354_v39 = vpack.c.bf16 %v219_v33, %v219_v33 }
  0xe1   :  { %289 = vst.msk [vmem:[%s522_s3] sm:$0xf] %vm288_vm1, %v343_v34  ;;  %297 = vst.msk [vmem:[%s522_s3 + $0x20] sm:$0xf] %vm288_vm1, %v351_v35  ;;  %v344_v40 = vpack.c.bf16 %v209_v36, %v209_v36  ;;  %v352_v41 = vpack.c.bf16 %v217_v37, %v217_v37  ;;  %v376_v42 = vpop.f32.mrb[4].mxu0  ;;  %v384_v43 = vpop.f32.mrb[4].mxu1 }
  0xe2   :  { %292 = vst.msk [vmem:[%s522_s3 + $0xc] sm:$0xf] %vm288_vm1, %v346_v38  ;;  %300 = vst.msk [vmem:[%s522_s3 + $0x2c] sm:$0xf] %vm288_vm1, %v354_v39  ;;  %v170_v44 = vadd.f32 %v376_v42, %v309_v9  ;;  %v202_v45 = vadd.f32 %v384_v43, %v309_v9  ;;  %v161_v46 = vpop.f32.mrb[5].mxu0  ;;  %v193_v47 = vpop.f32.mrb[5].mxu1 }
  0xe3   :  { %290 = vst.msk [vmem:[%s522_s3 + $0x4] sm:$0xf] %vm288_vm1, %v344_v40  ;;  %298 = vst.msk [vmem:[%s522_s3 + $0x24] sm:$0xf] %vm288_vm1, %v352_v41  ;;  %v162_v48 = vadd.f32 %v309_v9, %v161_v46  ;;  %v194_v49 = vadd.f32 %v309_v9, %v193_v47  ;;  %v377_v50 = vpop.f32.mrb[6].mxu0  ;;  %v385_v51 = vpop.f32.mrb[6].mxu1 }
  0xe4   :  { %v214_v52 = vmax.f32 %v170_v44, 0.0  ;;  %v222_v53 = vmax.f32 %v202_v45, 0.0  ;;  %v173_v54 = vadd.f32 %v377_v50, %v309_v9  ;;  %v205_v55 = vadd.f32 %v385_v51, %v309_v9  ;;  %v164_v56 = vpop.f32.mrb[7].mxu0  ;;  %v196_v57 = vpop.f32.mrb[7].mxu1 }
  0xe5   :  { %v212_v58 = vmax.f32 %v162_v48, 0.0  ;;  %v220_v59 = vmax.f32 %v194_v49, 0.0  ;;  %v165_v60 = vadd.f32 %v309_v9, %v164_v56  ;;  %v197_v61 = vadd.f32 %v309_v9, %v196_v57 }
  0xe6   :  { %v349_v62 = vpack.c.bf16 %v214_v52, %v214_v52  ;;  %v357_v63 = vpack.c.bf16 %v222_v53, %v222_v53  ;;  %v215_v0 = vmax.f32 %v173_v54, 0.0  ;;  %v223_v1 = vmax.f32 %v205_v55, 0.0 }
  0xe7   :  { %v347_v2 = vpack.c.bf16 %v212_v58, %v212_v58  ;;  %v355_v3 = vpack.c.bf16 %v220_v59, %v220_v59  ;;  %v213_v4 = vmax.f32 %v165_v60, 0.0  ;;  %v221_v5 = vmax.f32 %v197_v61, 0.0 }
  0xe8   :  { %295 = vst.msk [vmem:[%s522_s3 + $0x18] sm:$0xf] %vm288_vm1, %v349_v62  ;;  %303 = vst.msk [vmem:[%s522_s3 + $0x38] sm:$0xf] %vm288_vm1, %v357_v63  ;;  %v350_v6 = vpack.c.bf16 %v215_v0, %v215_v0  ;;  %v358_v7 = vpack.c.bf16 %v223_v1, %v223_v1 }
  0xe9   :  { %293 = vst.msk [vmem:[%s522_s3 + $0x10] sm:$0xf] %vm288_vm1, %v347_v2  ;;  %301 = vst.msk [vmem:[%s522_s3 + $0x30] sm:$0xf] %vm288_vm1, %v355_v3  ;;  %v348_v8 = vpack.c.bf16 %v213_v4, %v213_v4  ;;  %v356_v9 = vpack.c.bf16 %v221_v5, %v221_v5 }
  0xea   :  { %296 = vst.msk [vmem:[%s522_s3 + $0x1c] sm:$0xf] %vm288_vm1, %v350_v6  ;;  %304 = vst.msk [vmem:[%s522_s3 + $0x3c] sm:$0xf] %vm288_vm1, %v358_v7 }
  0xeb   :  { %294 = vst.msk [vmem:[%s522_s3 + $0x14] sm:$0xf] %vm288_vm1, %v348_v8  ;;  %302 = vst.msk [vmem:[%s522_s3 + $0x34] sm:$0xf] %vm288_vm1, %v356_v9 }

// kernel: shuffletrack_forward.10
= control target key start
LH: loop header
LB: loop body
LE: loop exit
PB: predicated region body
PF: predicated region fallthrough
CT: control target
= control target key end

     0   :  { %vm68_vm0 = vcmask 523264   ;;  %vm144_vm1 = vcmask 257024   ;;  %s247_s1 = inlined_call_operand.vmem [shape: bf16[64,32], index: 1, kind: input, shape index: {}]   ;;  %s248_s0 = inlined_call_operand.vmem [shape: bf16[32,64], index: 0, kind: input, shape index: {}]   ;;  %s249_s2 = inlined_call_operand.vmem [shape: f32[1,32], index: 2, kind: input, shape index: {}]   ;;  %s250_s3 = inlined_call_operand.vmem [shape: bf16[32,32], index: 3, kind: output, shape index: {}]  }
   0x1   :  { %v188_v0 = vld [vmem:[%s247_s1] sm:$0xff]   ;;  %v189_v1 = vld [vmem:[%s247_s1 + $0x8] sm:$0xff]   ;;  %v190_v2 = vld [vmem:[%s247_s1 + $0x10] sm:$0xff]  }
   0x2   :  { %176 = vmatprep.subr.bf16.mxu0 %v188_v0  ;;  %v192_v3 = vld [vmem:[%s248_s0] sm:$0xff]   ;;  %v191_v4 = vld [vmem:[%s247_s1 + $0x18] sm:$0xff]   ;;  %v193_v5 = vld [vmem:[%s248_s0 + $0x8] sm:$0xff]  }
   0x3   :  { %177 = vmatpush3.bf16.msra.mxu0 %v188_v0  ;;  %184 = vmatprep.mubr.msk.bf16.mxu0 %vm68_vm0, %v192_v3  ;;  %v153_v6 = vld [vmem:[%s249_s2] ss:$0 sm:$0xff] }
   0x4   :  { %178 = vmatprep.subr.bf16.mxu0 %v189_v1 }
   0x7   :  { %179 = vmatpush3.bf16.msra.mxu0 %v189_v1 }
   0x8   :  { %180 = vmatprep.subr.bf16.mxu0 %v190_v2 }
   0xb   :  { %181 = vmatpush3.bf16.msra.mxu0 %v190_v2 }
   0xc   :  { %182 = vmatprep.subr.bf16.mxu0 %v191_v4 }
   0xf   :  { %183 = vmatpush3.bf16.msra.mxu0 %v191_v4 }
  0x12   :  { %185 = vmatmul.mubr.msk.bf16.vlgmr.msra.gmra.mrb[0].mxu0 %vm68_vm0, %v193_v5 }
  0xe5   :  { %v186_v7 = vpop.f32.mrb[0].mxu0 }
  0xe6   :  { %v118_v8 = vadd.f32 %v186_v7, %v153_v6  ;;  %v109_v9 = vpop.f32.mrb[1].mxu0 }
  0xe7   :  { %v110_v10 = vadd.f32 %v153_v6, %v109_v9  ;;  %v187_v11 = vpop.f32.mrb[2].mxu0 }
  0xe8   :  { %v126_v12 = vmax.f32 %v118_v8, 0.0  ;;  %v121_v13 = vadd.f32 %v187_v11, %v153_v6  ;;  %v112_v14 = vpop.f32.mrb[3].mxu0 }
  0xe9   :  { %v124_v15 = vmax.f32 %v110_v10, 0.0  ;;  %v113_v16 = vadd.f32 %v153_v6, %v112_v14 }
  0xea   :  { %v168_v17 = vpack.c.bf16 %v126_v12, %v126_v12  ;;  %v127_v18 = vmax.f32 %v121_v13, 0.0 }
  0xeb   :  { %v166_v19 = vpack.c.bf16 %v124_v15, %v124_v15  ;;  %v125_v20 = vmax.f32 %v113_v16, 0.0 }
  0xec   :  { %147 = vst.msk [vmem:[%s250_s3 + $0x8] sm:$0xf] %vm144_vm1, %v168_v17  ;;  %v169_v21 = vpack.c.bf16 %v127_v18, %v127_v18 }
  0xed   :  { %145 = vst.msk [vmem:[%s250_s3] sm:$0xf] %vm144_vm1, %v166_v19  ;;  %v167_v22 = vpack.c.bf16 %v125_v20, %v125_v20 }
  0xee   :  { %148 = vst.msk [vmem:[%s250_s3 + $0xc] sm:$0xf] %vm144_vm1, %v169_v21 }
  0xef   :  { %146 = vst.msk [vmem:[%s250_s3 + $0x4] sm:$0xf] %vm144_vm1, %v167_v22 }

// kernel: shuffletrack_forward.11
= control target key start
LH: loop header
LB: loop body
LE: loop exit
PB: predicated region body
PF: predicated region fallthrough
CT: control target
= control target key end

     0   :  { %v183_v0 = vmov 0.0   ;;  %vm184_vm0 = vmmov 0   ;;  %vm129_vm1 = vcmask 519168   ;;  %s238_s1 = inlined_call_operand.vmem [shape: bf16[128,64], index: 1, kind: input, shape index: {}]   ;;  %s239_s0 = inlined_call_operand.vmem [shape: bf16[8,128], index: 0, kind: input, shape index: {}]   ;;  %s240_s2 = inlined_call_operand.vmem [shape: f32[1,64], index: 2, kind: input, shape index: {}]   ;;  %s241_s3 = inlined_call_operand.vmem [shape: bf16[8,64], index: 3, kind: output, shape index: {}]  }
   0x1   :  { %153 = vmatprep.subr.bf16.mxu0 %v183_v0  ;;  %v175_v1 = vld [vmem:[%s238_s1] sm:$0xff]   ;;  %169 = vmatprep.mubr.msk.bf16.mxu0 %vm184_vm0, %v183_v0  ;;  %v176_v2 = vld [vmem:[%s238_s1 + $0x8] sm:$0xff]   ;;  %v177_v3 = vld [vmem:[%s238_s1 + $0x10] sm:$0xff]  }
   0x2   :  { %154 = vmatpush3.bf16.msra.mxu0 %v175_v1  ;;  %v178_v4 = vld [vmem:[%s238_s1 + $0x18] sm:$0xff]   ;;  %v179_v5 = vld [vmem:[%s238_s1 + $0x20] sm:$0xff]   ;;  %v180_v6 = vld [vmem:[%s238_s1 + $0x28] sm:$0xff]  }
   0x3   :  { %155 = vmatprep.subr.bf16.mxu0 %v183_v0  ;;  %v181_v7 = vld [vmem:[%s238_s1 + $0x30] sm:$0xff]   ;;  %v182_v8 = vld [vmem:[%s238_s1 + $0x38] sm:$0xff]   ;;  %v15_v9 = vld [vmem:[%s239_s0] sm:$0xf] }
   0x4   :  { %v135_v10 = vld [vmem:[%s240_s2] ss:$0 sm:$0xff] }
   0x6   :  { %156 = vmatpush3.bf16.msra.mxu0 %v176_v2 }
   0x7   :  { %157 = vmatprep.subr.bf16.mxu0 %v183_v0 }
   0xa   :  { %158 = vmatpush3.bf16.msra.mxu0 %v177_v3 }
   0xb   :  { %159 = vmatprep.subr.bf16.mxu0 %v183_v0 }
   0xe   :  { %160 = vmatpush3.bf16.msra.mxu0 %v178_v4 }
   0xf   :  { %161 = vmatprep.subr.bf16.mxu0 %v183_v0 }
  0x12   :  { %162 = vmatpush3.bf16.msra.mxu0 %v179_v5 }
  0x13   :  { %163 = vmatprep.subr.bf16.mxu0 %v183_v0 }
  0x16   :  { %164 = vmatpush3.bf16.msra.mxu0 %v180_v6 }
  0x17   :  { %165 = vmatprep.subr.bf16.mxu0 %v183_v0 }
  0x1a   :  { %166 = vmatpush3.bf16.msra.mxu0 %v181_v7 }
  0x1b   :  { %167 = vmatprep.subr.bf16.mxu0 %v183_v0 }
  0x1e   :  { %168 = vmatpush3.bf16.msra.mxu0 %v182_v8 }
  0x21   :  { %170 = vmatmul.mubr.bf16.vlgmr.msra.gmra.mrb[0].mxu0 %v15_v9 }
  0xf4   :  { %v121_v11 = vpop.f32.mrb[0].mxu0 }
  0xf5   :  { %v122_v12 = vadd.f32 %v135_v10, %v121_v11  ;;  %v171_v13 = vpop.f32.mrb[1].mxu0 }
  0xf6   :  { %v124_v14 = vpop.f32.mrb[2].mxu0 }
  0xf7   :  { %v127_v15 = vmax.f32 %v122_v12, 0.0  ;;  %v172_v16 = vpop.f32.mrb[3].mxu0 }
  0xf9   :  { %v128_v17 = vpack.c.bf16 %v127_v15, %v127_v15 }
  0xfb   :  { %130 = vst.msk [vmem:[%s241_s3] sm:$0xf] %vm129_vm1, %v128_v17 }

// kernel: shuffletrack_forward.12
= control target key start
LH: loop header
LB: loop body
LE: loop exit
PB: predicated region body
PF: predicated region fallthrough
CT: control target
= control target key end

     0   :  { %v242_v0 = vmov 0.0   ;;  %vm243_vm0 = vmmov 0   ;;  %vm61_vm1 = vcmask 523264   ;;  %vm175_vm2 = vcmask 257024   ;;  %s312_s1 = inlined_call_operand.vmem [shape: bf16[64,32], index: 1, kind: input, shape index: {}]   ;;  %s313_s0 = inlined_call_operand.vmem [shape: bf16[8,64], index: 0, kind: input, shape index: {}]   ;;  %s314_s3 = inlined_call_operand.vmem [shape: bf16[32,32], index: 3, kind: input, shape index: {}]   ;;  %s315_s2 = inlined_call_operand.vmem [shape: f32[1,32], index: 2, kind: input, shape index: {}]   ;;  %s316_s5 = inlined_call_operand.vmem [shape: bf16[8,128], index: 5, kind: output, shape index: {}]   ;;  %s317_s4 = inlined_call_operand.vmem [shape: f32[1,32], index: 4, kind: input, shape index: {}]  }
   0x1   :  { %212 = vmatprep.subr.bf16.mxu0 %v242_v0  ;;  %v236_v1 = vld [vmem:[%s312_s1] sm:$0xff]   ;;  %220 = vmatprep.mubr.msk.bf16.mxu0 %vm243_vm0, %v242_v0  ;;  %v237_v2 = vld [vmem:[%s312_s1 + $0x8] sm:$0xff]   ;;  %v238_v3 = vld [vmem:[%s312_s1 + $0x10] sm:$0xff]   ;;  %vm130_vm3 = vcmask 261120   ;;  %vm184_vm4 = vcmask 519424   ;;  %vm186_vm5 = vcmask 1043968  }
   0x2   :  { %224 = vmatprep.subr.bf16.mxu1 %v242_v0  ;;  %228 = vmatprep.mubr.msk.bf16.mxu1 %vm243_vm0, %v242_v0  ;;  %v239_v4 = vld [vmem:[%s312_s1 + $0x18] sm:$0xff]   ;;  %v21_v5 = vld [vmem:[%s313_s0] sm:$0xf]  ;;  %v241_v7 = vld [vmem:[%s314_s3 + $0x8] sm:$0xff]   ;;  %v245_v25 = vmov 0  }
   0x3   :  { %213 = vmatpush3.bf16.msra.mxu0 %v236_v1  ;;  %v240_v6 = vld [vmem:[%s314_s3] sm:$0xff]  }
   0x4   :  { %214 = vmatprep.subr.bf16.mxu0 %v242_v0  ;;  %225 = vmatpush3.bf16.msra.mxu1 %v240_v6  ;;  %v192_v8 = vld [vmem:[%s315_s2] ss:$0 sm:$0xff]  ;;  %s244_s2 = smov 32  }
   0x5   :  { %226 = vmatprep.subr.bf16.mxu1 %v242_v0  ;;  %v198_v16 = vld [vmem:[%s317_s4] ss:$0 sm:$0xff] }
   0x7   :  { %215 = vmatpush3.bf16.msra.mxu0 %v237_v2 }
   0x8   :  { %216 = vmatprep.subr.bf16.mxu0 %v242_v0  ;;  %227 = vmatpush3.bf16.msra.mxu1 %v241_v7 }
   0xb   :  { %217 = vmatpush3.bf16.msra.mxu0 %v238_v3 }
   0xc   :  { %218 = vmatprep.subr.bf16.mxu0 %v242_v0 }
   0xf   :  { %219 = vmatpush3.bf16.msra.mxu0 %v239_v4 }
  0x12   :  { %221 = vmatmul.mubr.msk.bf16.vlgmr.msra.gmra.mrb[0].mxu0 %vm61_vm1, %v21_v5 }
  0xe5   :  { %v99_v9 = vpop.f32.mrb[0].mxu0 }
  0xe6   :  { %v100_v10 = vadd.f32 %v192_v8, %v99_v9  ;;  %v222_v11 = vpop.f32.mrb[1].mxu0 }
  0xe7   :  { %v102_v12 = vpop.f32.mrb[2].mxu0 }
  0xe8   :  { %v105_v13 = vmax.f32 %v100_v10, 0.0  ;;  %v223_v14 = vpop.f32.mrb[3].mxu0 }
  0xea   :  { %v106_v15 = vpack.c.bf16 %v105_v13, %v105_v13 }
  0xec   :  { %176 = vst.msk [vmem:[%s316_s5] sm:$0xf] %vm175_vm2, %v106_v15  ;;  %229 = vmatmul.mubr.msk.bf16.vlgmr.msra.gmra.mrb[0].mxu1 %vm130_vm3, %v106_v15 }
 0x1bf   :  { %v168_v17 = vpop.f32.mrb[0].mxu1 }
 0x1c0   :  { %v169_v18 = vadd.f32 %v198_v16, %v168_v17  ;;  %v230_v19 = vpop.f32.mrb[1].mxu1 }
 0x1c1   :  { %v171_v20 = vpop.f32.mrb[2].mxu1 }
 0x1c2   :  { %v174_v21 = vmax.f32 %v169_v18, 0.0  ;;  %v231_v22 = vpop.f32.mrb[3].mxu1 }
 0x1c4   :  { %v203_v23 = vpack.c.bf16 %v174_v21, %v174_v21 }
 0x1c6   :  { %181 = vrot.lane.b32.xlu0 %v203_v23, %s244_s2 }
 0x238   :  { %v182_v24 = vpop.permute.xlu0 %181 }
 0x239   :  { %185 = vst.msk [vmem:[%s316_s5] sm:$0xf] %vm184_vm4, %v182_v24 }
 0x23a   :  { %187 = vst.msk [vmem:[%s316_s5] sm:$0xf] %vm186_vm5, %v245_v25 }

// kernel: shuffletrack_forward.13
= control target key start
LH: loop header
LB: loop body
LE: loop exit
PB: predicated region body
PF: predicated region fallthrough
CT: control target
= control target key end

     0   :  { %vm67_vm0 = vcmask 261120   ;;  %vm321_vm1 = vcmask 257024   ;;  %s452_s10 = smov 32   ;;  %vm350_vm2 = vcmask 519424   ;;  %vm355_vm3 = vcmask 1043968   ;;  %s580_s2 = inlined_call_operand.vmem [shape: bf16[32,32], index: 2, kind: input, shape index: {}]   ;;  %s581_s0 = inlined_call_operand.vmem [shape: bf16[32,32], index: 0, kind: input, shape index: {}]   ;;  %s582_s4 = inlined_call_operand.vmem [shape: bf16[32,32], index: 4, kind: input, shape index: {}]   ;;  %s583_s3 = inlined_call_operand.vmem [shape: f32[1,32], index: 3, kind: input, shape index: {}]   ;;  %s584_s1 = inlined_call_operand.vmem [shape: bf16[32,32], index: 1, kind: input, shape index: {}]   ;;  %s585_s6 = inlined_call_operand.vmem [shape: bf16[32,32], index: 6, kind: input, shape index: {}]   ;;  %s586_s5 = inlined_call_operand.vmem [shape: f32[1,32], index: 5, kind: input, shape index: {}]   ;;  %s587_s8 = inlined_call_operand.vmem [shape: bf16[32,128], index: 8, kind: output, shape index: {}]   ;;  %s588_s7 = inlined_call_operand.vmem [shape: f32[1,32], index: 7, kind: input, shape index: {}]  }
   0x1   :  { %v444_v0 = vld [vmem:[%s580_s2] sm:$0xff]   ;;  %v445_v1 = vld [vmem:[%s580_s2 + $0x8] sm:$0xff]  }
   0x2   :  { %418 = vmatprep.subr.bf16.mxu0 %v444_v0  ;;  %v446_v2 = vld [vmem:[%s581_s0] sm:$0xff]   ;;  %v447_v3 = vld [vmem:[%s581_s0 + $0x8] sm:$0xff]  }
   0x3   :  { %419 = vmatpush3.bf16.msra.mxu0 %v444_v0  ;;  %422 = vmatprep.mubr.msk.bf16.mxu0 %vm67_vm0, %v446_v2  ;;  %v448_v4 = vld [vmem:[%s582_s4] sm:$0xff]   ;;  %v449_v5 = vld [vmem:[%s582_s4 + $0x8] sm:$0xff]  }
   0x4   :  { %420 = vmatprep.subr.bf16.mxu0 %v445_v1  ;;  %426 = vmatprep.subr.bf16.mxu1 %v448_v4  ;;  %v364_v6 = vld [vmem:[%s583_s3] ss:$0 sm:$0xff]  ;;  %v405_v8 = vld [vmem:[%s584_s1 + $0x8] sm:$0xff]  }
   0x5   :  { %427 = vmatpush3.bf16.msra.mxu1 %v448_v4  ;;  %v398_v11 = vld [vmem:[%s584_s1] sm:$0xff]   ;;  %v403_v15 = vunpack.c.l.bf16 %v405_v8  ;;  %v404_v17 = vunpack.c.h.bf16 %v405_v8  ;;  %v451_v32 = vld [vmem:[%s585_s6 + $0x8] sm:$0xff]  }
   0x6   :  { %428 = vmatprep.subr.bf16.mxu1 %v449_v5  ;;  %v399_v20 = vunpack.c.l.bf16 %v398_v11  ;;  %v400_v22 = vunpack.c.h.bf16 %v398_v11  ;;  %v450_v31 = vld [vmem:[%s585_s6] sm:$0xff]  }
   0x7   :  { %421 = vmatpush3.bf16.msra.mxu0 %v445_v1  ;;  %v371_v33 = vld [vmem:[%s586_s5] ss:$0 sm:$0xff] }
   0x8   :  { %434 = vmatprep.subr.bf16.mxu0 %v450_v31  ;;  %v376_v52 = vld [vmem:[%s588_s7] ss:$0 sm:$0xff] }
   0x9   :  { %429 = vmatpush3.bf16.msra.mxu1 %v449_v5 }
   0xa   :  { %423 = vmatmul.mubr.msk.bf16.vlgmr.msra.gmra.mrb[0].mxu0 %vm67_vm0, %v447_v3 }
   0xb   :  { %435 = vmatpush3.bf16.msra.mxu0 %v450_v31 }
   0xc   :  { %436 = vmatprep.subr.bf16.mxu0 %v451_v32 }
   0xf   :  { %437 = vmatpush3.bf16.msra.mxu0 %v451_v32 }
  0xdd   :  { %v424_v7 = vpop.f32.mrb[0].mxu0 }
  0xde   :  { %v117_v9 = vadd.f32 %v424_v7, %v364_v6  ;;  %v108_v10 = vpop.f32.mrb[1].mxu0  ;;  %v453_v7 = vmov 0  }
  0xdf   :  { %v109_v12 = vadd.f32 %v364_v6, %v108_v10  ;;  %v425_v13 = vpop.f32.mrb[2].mxu0 }
  0xe0   :  { %v125_v14 = vmax.f32 %v117_v9, 0.0  ;;  %v120_v16 = vadd.f32 %v425_v13, %v364_v6  ;;  %v111_v18 = vpop.f32.mrb[3].mxu0 }
  0xe1   :  { %v123_v19 = vmax.f32 %v109_v12, 0.0  ;;  %v112_v21 = vadd.f32 %v364_v6, %v111_v18 }
  0xe2   :  { %v126_v23 = vmax.f32 %v120_v16, 0.0  ;;  %v137_v25 = vadd.f32 %v403_v15, %v125_v14 }
  0xe3   :  { %v124_v24 = vmax.f32 %v112_v21, 0.0  ;;  %v135_v27 = vadd.f32 %v399_v20, %v123_v19 }
  0xe4   :  { %v138_v26 = vadd.f32 %v404_v17, %v126_v23 }
  0xe5   :  { %v136_v28 = vadd.f32 %v400_v22, %v124_v24 }
  0xe6   :  { %v140_v29 = vpack.c.bf16 %v138_v26, %v137_v25 }
  0xe7   :  { %v139_v30 = vpack.c.bf16 %v136_v28, %v135_v27 }
  0xe9   :  { %430 = vmatprep.mubr.msk.bf16.mxu1 %vm67_vm0, %v139_v30 }
  0xea   :  { %431 = vmatmul.mubr.msk.bf16.vlgmr.msra.gmra.mrb[0].mxu1 %vm67_vm0, %v140_v29 }
 0x1bd   :  { %v432_v34 = vpop.f32.mrb[0].mxu1 }
 0x1be   :  { %v213_v35 = vadd.f32 %v432_v34, %v371_v33  ;;  %v204_v36 = vpop.f32.mrb[1].mxu1 }
 0x1bf   :  { %v205_v37 = vadd.f32 %v371_v33, %v204_v36  ;;  %v433_v38 = vpop.f32.mrb[2].mxu1 }
 0x1c0   :  { %v221_v39 = vmax.f32 %v213_v35, 0.0  ;;  %v216_v40 = vadd.f32 %v433_v38, %v371_v33  ;;  %v207_v41 = vpop.f32.mrb[3].mxu1 }
 0x1c1   :  { %v219_v42 = vmax.f32 %v205_v37, 0.0  ;;  %v208_v43 = vadd.f32 %v371_v33, %v207_v41 }
 0x1c2   :  { %v391_v44 = vpack.c.bf16 %v221_v39, %v221_v39  ;;  %v222_v45 = vmax.f32 %v216_v40, 0.0 }
 0x1c3   :  { %v389_v46 = vpack.c.bf16 %v219_v42, %v219_v42  ;;  %v220_v47 = vmax.f32 %v208_v43, 0.0 }
 0x1c4   :  { %v224_v48 = vpack.c.bf16 %v222_v45, %v221_v39  ;;  %v392_v49 = vpack.c.bf16 %v222_v45, %v222_v45  ;;  %324 = vst.msk [vmem:[%s587_s8 + $0x8] sm:$0xf] %vm321_vm1, %v391_v44 }
 0x1c5   :  { %v223_v50 = vpack.c.bf16 %v220_v47, %v219_v42  ;;  %v390_v51 = vpack.c.bf16 %v220_v47, %v220_v47  ;;  %322 = vst.msk [vmem:[%s587_s8] sm:$0xf] %vm321_vm1, %v389_v46 }
 0x1c6   :  { %325 = vst.msk [vmem:[%s587_s8 + $0xc] sm:$0xf] %vm321_vm1, %v392_v49 }
 0x1c7   :  { %438 = vmatprep.mubr.msk.bf16.mxu0 %vm67_vm0, %v223_v50  ;;  %323 = vst.msk [vmem:[%s587_s8 + $0x4] sm:$0xf] %vm321_vm1, %v390_v51 }
 0x1c8   :  { %439 = vmatmul.mubr.msk.bf16.vlgmr.msra.gmra.mrb[4].mxu0 %vm67_vm0, %v224_v48 }
 0x29b   :  { %v440_v53 = vpop.f32.mrb[4].mxu0 }
 0x29c   :  { %v297_v54 = vadd.f32 %v440_v53, %v376_v52  ;;  %v288_v55 = vpop.f32.mrb[5].mxu0 }
 0x29d   :  { %v289_v56 = vadd.f32 %v376_v52, %v288_v55  ;;  %v441_v57 = vpop.f32.mrb[6].mxu0 }
 0x29e   :  { %v305_v58 = vmax.f32 %v297_v54, 0.0  ;;  %v300_v59 = vadd.f32 %v441_v57, %v376_v52  ;;  %v291_v60 = vpop.f32.mrb[7].mxu0 }
 0x29f   :  { %v303_v61 = vmax.f32 %v289_v56, 0.0  ;;  %v292_v62 = vadd.f32 %v376_v52, %v291_v60 }
 0x2a0   :  { %v306_v63 = vmax.f32 %v300_v59, 0.0  ;;  %v395_v0 = vpack.c.bf16 %v305_v58, %v305_v58 }
 0x2a1   :  { %v304_v1 = vmax.f32 %v292_v62, 0.0  ;;  %v393_v2 = vpack.c.bf16 %v303_v61, %v303_v61 }
 0x2a2   :  { %342 = vrot.lane.b32.xlu1 %v395_v0, %s452_s10  ;;  %v396_v3 = vpack.c.bf16 %v306_v63, %v306_v63 }
 0x2a3   :  { %338 = vrot.lane.b32.xlu0 %v393_v2, %s452_s10  ;;  %v394_v4 = vpack.c.bf16 %v304_v1, %v304_v1 }
 0x2a6   :  { %344 = vrot.lane.b32.xlu1 %v396_v3, %s452_s10 }
 0x2a7   :  { %340 = vrot.lane.b32.xlu0 %v394_v4, %s452_s10 }
 0x314   :  { %v343_v5 = vpop.permute.xlu1 %342 }
 0x315   :  { %353 = vst.msk [vmem:[%s587_s8 + $0x8] sm:$0xf] %vm350_vm2, %v343_v5  ;;  %v339_v6 = vpop.permute.xlu0 %338 }
 0x316   :  { %358 = vst.msk [vmem:[%s587_s8 + $0x8] sm:$0xf] %vm355_vm3, %v453_v7 }
 0x317   :  { %351 = vst.msk [vmem:[%s587_s8] sm:$0xf] %vm350_vm2, %v339_v6 }
 0x318   :  { %356 = vst.msk [vmem:[%s587_s8] sm:$0xf] %vm355_vm3, %v453_v7  ;;  %v345_v8 = vpop.permute.xlu1 %344 }
 0x319   :  { %354 = vst.msk [vmem:[%s587_s8 + $0xc] sm:$0xf] %vm350_vm2, %v345_v8  ;;  %v341_v9 = vpop.permute.xlu0 %340 }
 0x31a   :  { %359 = vst.msk [vmem:[%s587_s8 + $0xc] sm:$0xf] %vm355_vm3, %v453_v7 }
 0x31b   :  { %352 = vst.msk [vmem:[%s587_s8 + $0x4] sm:$0xf] %vm350_vm2, %v341_v9 }
 0x31c   :  { %357 = vst.msk [vmem:[%s587_s8 + $0x4] sm:$0xf] %vm355_vm3, %v453_v7 }

// kernel: shuffletrack_forward.14
= control target key start
LH: loop header
LB: loop body
LE: loop exit
PB: predicated region body
PF: predicated region fallthrough
CT: control target
= control target key end

     0   :  { %vm101_vm0 = vcmask 130048   ;;  %vm318_vm1 = vcmask 261120   ;;  %vm680_vm2 = vcmask 257024   ;;  %vm793_vm3 = vcmask 519424   ;;  %s1499_s2 = inlined_call_operand.vmem [shape: bf16[16,32], index: 2, kind: input, shape index: {}]   ;;  %s1500_s0 = inlined_call_operand.vmem [shape: bf16[128,16], index: 0, kind: input, shape index: {}]   ;;  %s1501_s4 = inlined_call_operand.vmem [shape: bf16[32,32], index: 4, kind: input, shape index: {}]   ;;  %s1502_s6 = inlined_call_operand.vmem [shape: bf16[32,32], index: 6, kind: input, shape index: {}]   ;;  %s1503_s1 = inlined_call_operand.vmem [shape: bf16[128,32], index: 1, kind: input, shape index: {}]   ;;  %s1504_s3 = inlined_call_operand.vmem [shape: f32[1,32], index: 3, kind: input, shape index: {}]   ;;  %s1505_s5 = inlined_call_operand.vmem [shape: f32[1,32], index: 5, kind: input, shape index: {}]   ;;  %s1506_s8 = inlined_call_operand.vmem [shape: bf16[128,128], index: 8, kind: output, shape index: {}]   ;;  %s1507_s7 = inlined_call_operand.vmem [shape: f32[1,32], index: 7, kind: input, shape index: {}]  }
   0x1   :  { %v1065_v0 = vld [vmem:[%s1499_s2] sm:$0xff]   ;;  %v1067_v2 = vld [vmem:[%s1500_s0 + $0x8] sm:$0xff]   ;;  %v1068_v3 = vld [vmem:[%s1500_s0 + $0x10] sm:$0xff]   ;;  %vm810_vm4 = vcmask 1043968  }
   0x2   :  { %v1066_v1 = vld [vmem:[%s1500_s0] sm:$0xff]   ;;  %1003 = vmatprep.subr.bf16.mxu0 %v1065_v0  ;;  %1061 = vmatprep.subr.bf16.mxu1 %v1065_v0  ;;  %v1071_v5 = vld [vmem:[%s1500_s0 + $0x28] sm:$0xff]   ;;  %v1072_v6 = vld [vmem:[%s1500_s0 + $0x30] sm:$0xff]  }
   0x3   :  { %1004 = vmatpush3.bf16.msra.mxu0 %v1065_v0  ;;  %1005 = vmatprep.mubr.msk.bf16.mxu0 %vm101_vm0, %v1066_v1  ;;  %v1070_v4 = vld [vmem:[%s1500_s0 + $0x20] sm:$0xff]   ;;  %v1069_v8 = vld [vmem:[%s1500_s0 + $0x18] sm:$0xff]   ;;  %v1075_v10 = vld [vmem:[%s1501_s4 + $0x8] sm:$0xff]  }
   0x4   :  { %1062 = vmatpush3.bf16.msra.mxu1 %v1065_v0  ;;  %1013 = vmatprep.mubr.msk.bf16.mxu1 %vm101_vm0, %v1070_v4  ;;  %v1074_v7 = vld [vmem:[%s1501_s4] sm:$0xff]   ;;  %v1073_v9 = vld [vmem:[%s1500_s0 + $0x38] sm:$0xff]   ;;  %v967_v12 = vld [vmem:[%s1503_s1 + $0x8] sm:$0xff]  }
   0x5   :  { %1021 = vmatprep.subr.bf16.mxu1 %v1074_v7  ;;  %v1076_v11 = vld [vmem:[%s1502_s6] sm:$0xff]   ;;  %v1183_v15 = vld [vmem:[%s1503_s1 + $0x18] sm:$0xff]   ;;  %v1188_v16 = vld [vmem:[%s1503_s1 + $0x10] sm:$0xff]   ;;  %v941_v18 = vunpack.c.l.bf16 %v967_v12  ;;  %v942_v20 = vunpack.c.h.bf16 %v967_v12 }
   0x6   :  { %1006 = vmatmul.mubr.msk.bf16.vlgmr.msra.gmra.mrb[0].mxu0 %vm101_vm0, %v1067_v2  ;;  %1041 = vmatprep.subr.bf16.mxu0 %v1076_v11  ;;  %v936_v13 = vld [vmem:[%s1503_s1] sm:$0xff]   ;;  %v971_v21 = vld [vmem:[%s1503_s1 + $0x28] sm:$0xff]   ;;  %v949_v25 = vunpack.c.l.bf16 %v1183_v15  ;;  %v945_v29 = vunpack.c.l.bf16 %v1188_v16  ;;  %v950_v30 = vunpack.c.h.bf16 %v1183_v15  ;;  %v946_v31 = vunpack.c.h.bf16 %v1188_v16  ;;  %v973_v53 = vld [vmem:[%s1503_s1 + $0x38] sm:$0xff]  }
   0x7   :  { %1009 = vmatprep.mubr.msk.bf16.mxu0 %vm101_vm0, %v1068_v3  ;;  %1014 = vmatmul.mubr.msk.bf16.vlgmr.msra.gmra.mrb[0].mxu1 %vm101_vm0, %v1071_v5  ;;  %v1178_v14 = vld [vmem:[%s1504_s3] ss:$0 sm:$0xff]  ;;  %v937_v19 = vunpack.c.l.bf16 %v936_v13  ;;  %v938_v24 = vunpack.c.h.bf16 %v936_v13  ;;  %v957_v37 = vunpack.c.l.bf16 %v971_v21  ;;  %v958_v47 = vunpack.c.h.bf16 %v971_v21  ;;  %v972_v58 = vld [vmem:[%s1503_s1 + $0x30] sm:$0xff]   ;;  %v1077_v15 = vld [vmem:[%s1502_s6 + $0x8] sm:$0xff]  }
   0x8   :  { %1017 = vmatprep.mubr.msk.bf16.mxu1 %vm101_vm0, %v1072_v6  ;;  %1022 = vmatpush3.bf16.msra.mxu1 %v1074_v7  ;;  %v970_v26 = vld [vmem:[%s1503_s1 + $0x20] sm:$0xff]   ;;  %v965_v4 = vunpack.c.l.bf16 %v973_v53 }
   0x9   :  { %1023 = vmatprep.subr.bf16.mxu1 %v1075_v10  ;;  %1042 = vmatpush3.bf16.msra.mxu0 %v1076_v11  ;;  %v953_v42 = vunpack.c.l.bf16 %v970_v26  ;;  %v954_v52 = vunpack.c.h.bf16 %v970_v26  ;;  %v1244_v16 = vld [vmem:[%s1505_s5] ss:$0 sm:$0xff] }
   0xa   :  { %1043 = vmatprep.subr.bf16.mxu0 %v1077_v15 }
   0xc   :  { %1024 = vmatpush3.bf16.msra.mxu1 %v1075_v10  ;;  %v961_v10 = vunpack.c.l.bf16 %v972_v58 }
   0xd   :  { %1044 = vmatpush3.bf16.msra.mxu0 %v1077_v15 }
   0xe   :  { %1010 = vmatmul.mubr.msk.bf16.gmra.mrb[4].mxu0 %vm101_vm0, %v1069_v8 }
   0xf   :  { %1018 = vmatmul.mubr.msk.bf16.gmra.mrb[4].mxu1 %vm101_vm0, %v1073_v9 }
  0xd9   :  { %v1007_v17 = vpop.f32.mrb[0].mxu0 }
  0xda   :  { %v169_v22 = vadd.f32 %v1007_v17, %v1178_v14  ;;  %v160_v23 = vpop.f32.mrb[1].mxu0  ;;  %v1015_v32 = vpop.f32.mrb[0].mxu1 }
  0xdb   :  { %v161_v27 = vadd.f32 %v1178_v14, %v160_v23  ;;  %v1008_v28 = vpop.f32.mrb[2].mxu0  ;;  %v201_v36 = vadd.f32 %v1015_v32, %v1178_v14  ;;  %v192_v38 = vpop.f32.mrb[1].mxu1  ;;  %v966_v32 = vunpack.c.h.bf16 %v973_v53 }
  0xdc   :  { %v225_v33 = vmax.f32 %v169_v22, 0.0  ;;  %v172_v34 = vadd.f32 %v1008_v28, %v1178_v14  ;;  %v163_v35 = vpop.f32.mrb[3].mxu0  ;;  %v193_v41 = vadd.f32 %v1178_v14, %v192_v38  ;;  %v1016_v43 = vpop.f32.mrb[2].mxu1 }
  0xdd   :  { %v223_v39 = vmax.f32 %v161_v27, 0.0  ;;  %v164_v40 = vadd.f32 %v1178_v14, %v163_v35  ;;  %v233_v45 = vmax.f32 %v201_v36, 0.0  ;;  %v204_v46 = vadd.f32 %v1016_v43, %v1178_v14  ;;  %v195_v48 = vpop.f32.mrb[3].mxu1 }
  0xde   :  { %v226_v44 = vmax.f32 %v172_v34, 0.0  ;;  %v231_v50 = vmax.f32 %v193_v41, 0.0  ;;  %v196_v51 = vadd.f32 %v1178_v14, %v195_v48  ;;  %v273_v54 = vadd.f32 %v941_v18, %v225_v33 }
  0xdf   :  { %v224_v49 = vmax.f32 %v164_v40, 0.0  ;;  %v281_v56 = vadd.f32 %v957_v37, %v233_v45  ;;  %v234_v57 = vmax.f32 %v204_v46, 0.0  ;;  %v271_v59 = vadd.f32 %v937_v19, %v223_v39 }
  0xe0   :  { %v274_v55 = vadd.f32 %v942_v20, %v226_v44  ;;  %v279_v62 = vadd.f32 %v953_v42, %v231_v50  ;;  %v232_v63 = vmax.f32 %v196_v51, 0.0  ;;  %v962_v37 = vunpack.c.h.bf16 %v972_v58 }
  0xe1   :  { %v272_v60 = vadd.f32 %v938_v24, %v224_v49  ;;  %v1011_v61 = vpop.f32.mrb[4].mxu0  ;;  %v282_v3 = vadd.f32 %v958_v47, %v234_v57 }
  0xe2   :  { %v288_v0 = vpack.c.bf16 %v274_v55, %v273_v54  ;;  %v185_v1 = vadd.f32 %v1011_v61, %v1178_v14  ;;  %v176_v2 = vpop.f32.mrb[5].mxu0  ;;  %v280_v8 = vadd.f32 %v954_v52, %v232_v63  ;;  %v1019_v9 = vpop.f32.mrb[4].mxu1 }
  0xe3   :  { %v287_v5 = vpack.c.bf16 %v272_v60, %v271_v59  ;;  %v177_v6 = vadd.f32 %v1178_v14, %v176_v2  ;;  %v1012_v7 = vpop.f32.mrb[6].mxu0  ;;  %v292_v17 = vpack.c.bf16 %v282_v3, %v281_v56  ;;  %v217_v18 = vadd.f32 %v1019_v9, %v1178_v14  ;;  %v208_v19 = vpop.f32.mrb[5].mxu1 }
  0xe4   :  { %v229_v11 = vmax.f32 %v185_v1, 0.0  ;;  %v188_v12 = vadd.f32 %v1012_v7, %v1178_v14  ;;  %v179_v13 = vpop.f32.mrb[7].mxu0  ;;  %v291_v22 = vpack.c.bf16 %v280_v8, %v279_v62  ;;  %v209_v23 = vadd.f32 %v1178_v14, %v208_v19  ;;  %v1020_v24 = vpop.f32.mrb[6].mxu1 }
  0xe5   :  { %v227_v20 = vmax.f32 %v177_v6, 0.0  ;;  %v180_v21 = vadd.f32 %v1178_v14, %v179_v13  ;;  %1025 = vmatprep.mubr.msk.bf16.mxu1 %vm318_vm1, %v287_v5  ;;  %v237_v27 = vmax.f32 %v217_v18, 0.0  ;;  %v220_v28 = vadd.f32 %v1020_v24, %v1178_v14  ;;  %v211_v33 = vpop.f32.mrb[7].mxu1 }
  0xe6   :  { %v230_v26 = vmax.f32 %v188_v12, 0.0  ;;  %1026 = vmatmul.mubr.msk.bf16.vlgmr.msra.gmra.mrb[8].mxu1 %vm318_vm1, %v288_v0  ;;  %v235_v35 = vmax.f32 %v209_v23, 0.0  ;;  %v212_v36 = vadd.f32 %v1178_v14, %v211_v33  ;;  %v277_v38 = vadd.f32 %v949_v25, %v229_v11 }
  0xe7   :  { %v228_v34 = vmax.f32 %v180_v21, 0.0  ;;  %v285_v40 = vadd.f32 %v965_v4, %v237_v27  ;;  %v238_v41 = vmax.f32 %v220_v28, 0.0  ;;  %v275_v42 = vadd.f32 %v945_v29, %v227_v20 }
  0xe8   :  { %v278_v39 = vadd.f32 %v950_v30, %v230_v26  ;;  %v283_v44 = vadd.f32 %v961_v10, %v235_v35  ;;  %v236_v45 = vmax.f32 %v212_v36, 0.0 }
  0xe9   :  { %v276_v43 = vadd.f32 %v946_v31, %v228_v34  ;;  %v286_v47 = vadd.f32 %v966_v32, %v238_v41 }
  0xea   :  { %v290_v46 = vpack.c.bf16 %v278_v39, %v277_v38  ;;  %v284_v48 = vadd.f32 %v962_v37, %v236_v45 }
  0xeb   :  { %v289_v14 = vpack.c.bf16 %v276_v43, %v275_v42  ;;  %v294_v49 = vpack.c.bf16 %v286_v47, %v285_v40 }
  0xec   :  { %v293_v25 = vpack.c.bf16 %v284_v48, %v283_v44 }
  0xed   :  { %1029 = vmatprep.mubr.msk.bf16.mxu1 %vm318_vm1, %v289_v14 }
  0xee   :  { %1030 = vmatmul.mubr.msk.bf16.gmra.mrb[12].mxu1 %vm318_vm1, %v290_v46 }
  0xef   :  { %1033 = vmatprep.mubr.msk.bf16.mxu1 %vm318_vm1, %v291_v22 }
  0xf6   :  { %1034 = vmatmul.mubr.msk.bf16.gmra.mrb[16].mxu1 %vm318_vm1, %v292_v17 }
  0xf7   :  { %1037 = vmatprep.mubr.msk.bf16.mxu1 %vm318_vm1, %v293_v25 }
  0xfe   :  { %1038 = vmatmul.mubr.msk.bf16.gmra.mrb[20].mxu1 %vm318_vm1, %v294_v49 }
 0x1b9   :  { %v1027_v29 = vpop.f32.mrb[8].mxu1 }
 0x1ba   :  { %v386_v30 = vadd.f32 %v1027_v29, %v1244_v16  ;;  %v377_v31 = vpop.f32.mrb[9].mxu1 }
 0x1bb   :  { %v378_v50 = vadd.f32 %v1244_v16, %v377_v31  ;;  %v1028_v51 = vpop.f32.mrb[10].mxu1 }
 0x1bc   :  { %v442_v52 = vmax.f32 %v386_v30, 0.0  ;;  %v389_v53 = vadd.f32 %v1028_v51, %v1244_v16  ;;  %v380_v54 = vpop.f32.mrb[11].mxu1 }
 0x1bd   :  { %v440_v55 = vmax.f32 %v378_v50, 0.0  ;;  %v381_v56 = vadd.f32 %v1244_v16, %v380_v54 }
 0x1be   :  { %v905_v57 = vpack.c.bf16 %v442_v52, %v442_v52  ;;  %v443_v58 = vmax.f32 %v389_v53, 0.0 }
 0x1bf   :  { %v903_v59 = vpack.c.bf16 %v440_v55, %v440_v55  ;;  %v441_v60 = vmax.f32 %v381_v56, 0.0 }
 0x1c0   :  { %v457_v61 = vpack.c.bf16 %v443_v58, %v442_v52  ;;  %v906_v62 = vpack.c.bf16 %v443_v58, %v443_v58  ;;  %683 = vst.msk [vmem:[%s1506_s8 + $0x8] sm:$0xf] %vm680_vm2, %v905_v57 }
 0x1c1   :  { %v456_v63 = vpack.c.bf16 %v441_v60, %v440_v55  ;;  %v904_v0 = vpack.c.bf16 %v441_v60, %v441_v60  ;;  %v1031_v1 = vpop.f32.mrb[12].mxu1  ;;  %681 = vst.msk [vmem:[%s1506_s8] sm:$0xf] %vm680_vm2, %v903_v59 }
 0x1c2   :  { %v402_v2 = vadd.f32 %v1031_v1, %v1244_v16  ;;  %v393_v3 = vpop.f32.mrb[13].mxu1  ;;  %684 = vst.msk [vmem:[%s1506_s8 + $0xc] sm:$0xf] %vm680_vm2, %v906_v62 }
 0x1c3   :  { %v394_v4 = vadd.f32 %v1244_v16, %v393_v3  ;;  %v1032_v5 = vpop.f32.mrb[14].mxu1  ;;  %1045 = vmatprep.mubr.msk.bf16.mxu0 %vm318_vm1, %v456_v63  ;;  %682 = vst.msk [vmem:[%s1506_s8 + $0x4] sm:$0xf] %vm680_vm2, %v904_v0 }
 0x1c4   :  { %v446_v6 = vmax.f32 %v402_v2, 0.0  ;;  %v405_v7 = vadd.f32 %v1032_v5, %v1244_v16  ;;  %v396_v8 = vpop.f32.mrb[15].mxu1  ;;  %1046 = vmatmul.mubr.msk.bf16.vlgmr.msra.gmra.mrb[8].mxu0 %vm318_vm1, %v457_v61 }
 0x1c5   :  { %v444_v9 = vmax.f32 %v394_v4, 0.0  ;;  %v397_v10 = vadd.f32 %v1244_v16, %v396_v8 }
 0x1c6   :  { %v909_v11 = vpack.c.bf16 %v446_v6, %v446_v6  ;;  %v447_v12 = vmax.f32 %v405_v7, 0.0 }
 0x1c7   :  { %v907_v13 = vpack.c.bf16 %v444_v9, %v444_v9  ;;  %v445_v17 = vmax.f32 %v397_v10, 0.0 }
 0x1c8   :  { %v459_v18 = vpack.c.bf16 %v447_v12, %v446_v6  ;;  %v910_v19 = vpack.c.bf16 %v447_v12, %v447_v12  ;;  %687 = vst.msk [vmem:[%s1506_s8 + $0x18] sm:$0xf] %vm680_vm2, %v909_v11 }
 0x1c9   :  { %v458_v20 = vpack.c.bf16 %v445_v17, %v444_v9  ;;  %v908_v21 = vpack.c.bf16 %v445_v17, %v445_v17  ;;  %v1035_v22 = vpop.f32.mrb[16].mxu1  ;;  %685 = vst.msk [vmem:[%s1506_s8 + $0x10] sm:$0xf] %vm680_vm2, %v907_v13 }
 0x1ca   :  { %v418_v23 = vadd.f32 %v1035_v22, %v1244_v16  ;;  %v409_v24 = vpop.f32.mrb[17].mxu1  ;;  %688 = vst.msk [vmem:[%s1506_s8 + $0x1c] sm:$0xf] %vm680_vm2, %v910_v19 }
 0x1cb   :  { %v410_v26 = vadd.f32 %v1244_v16, %v409_v24  ;;  %v1036_v27 = vpop.f32.mrb[18].mxu1  ;;  %1049 = vmatprep.mubr.msk.bf16.mxu0 %vm318_vm1, %v458_v20  ;;  %686 = vst.msk [vmem:[%s1506_s8 + $0x14] sm:$0xf] %vm680_vm2, %v908_v21 }
 0x1cc   :  { %v450_v28 = vmax.f32 %v418_v23, 0.0  ;;  %v421_v32 = vadd.f32 %v1036_v27, %v1244_v16  ;;  %v412_v33 = vpop.f32.mrb[19].mxu1  ;;  %1050 = vmatmul.mubr.msk.bf16.gmra.mrb[12].mxu0 %vm318_vm1, %v459_v18 }
 0x1cd   :  { %v448_v34 = vmax.f32 %v410_v26, 0.0  ;;  %v413_v35 = vadd.f32 %v1244_v16, %v412_v33 }
 0x1ce   :  { %v913_v36 = vpack.c.bf16 %v450_v28, %v450_v28  ;;  %v451_v37 = vmax.f32 %v421_v32, 0.0 }
 0x1cf   :  { %v911_v38 = vpack.c.bf16 %v448_v34, %v448_v34  ;;  %v449_v39 = vmax.f32 %v413_v35, 0.0 }
 0x1d0   :  { %v461_v40 = vpack.c.bf16 %v451_v37, %v450_v28  ;;  %v914_v41 = vpack.c.bf16 %v451_v37, %v451_v37  ;;  %691 = vst.msk [vmem:[%s1506_s8 + $0x28] sm:$0xf] %vm680_vm2, %v913_v36 }
 0x1d1   :  { %v460_v42 = vpack.c.bf16 %v449_v39, %v448_v34  ;;  %v912_v43 = vpack.c.bf16 %v449_v39, %v449_v39  ;;  %v1039_v44 = vpop.f32.mrb[20].mxu1  ;;  %689 = vst.msk [vmem:[%s1506_s8 + $0x20] sm:$0xf] %vm680_vm2, %v911_v38 }
 0x1d2   :  { %v434_v45 = vadd.f32 %v1039_v44, %v1244_v16  ;;  %v425_v46 = vpop.f32.mrb[21].mxu1  ;;  %692 = vst.msk [vmem:[%s1506_s8 + $0x2c] sm:$0xf] %vm680_vm2, %v914_v41 }
 0x1d3   :  { %v426_v47 = vadd.f32 %v1244_v16, %v425_v46  ;;  %v1040_v14 = vpop.f32.mrb[22].mxu1  ;;  %1053 = vmatprep.mubr.msk.bf16.mxu0 %vm318_vm1, %v460_v42  ;;  %690 = vst.msk [vmem:[%s1506_s8 + $0x24] sm:$0xf] %vm680_vm2, %v912_v43 }
 0x1d4   :  { %v454_v48 = vmax.f32 %v434_v45, 0.0  ;;  %v437_v49 = vadd.f32 %v1040_v14, %v1244_v16  ;;  %v428_v25 = vpop.f32.mrb[23].mxu1  ;;  %1054 = vmatmul.mubr.msk.bf16.gmra.mrb[16].mxu0 %vm318_vm1, %v461_v40 }
 0x1d5   :  { %v452_v15 = vmax.f32 %v426_v47, 0.0  ;;  %v429_v29 = vadd.f32 %v1244_v16, %v428_v25  ;;  %v1337_v16 = vld [vmem:[%s1507_s7] ss:$0 sm:$0xff]  ;;  %s1078_s7 = smov 32  }
 0x1d6   :  { %v917_v30 = vpack.c.bf16 %v454_v48, %v454_v48  ;;  %v455_v31 = vmax.f32 %v437_v49, 0.0 }
 0x1d7   :  { %v915_v50 = vpack.c.bf16 %v452_v15, %v452_v15  ;;  %v453_v51 = vmax.f32 %v429_v29, 0.0 }
 0x1d8   :  { %v463_v52 = vpack.c.bf16 %v455_v31, %v454_v48  ;;  %v918_v53 = vpack.c.bf16 %v455_v31, %v455_v31  ;;  %695 = vst.msk [vmem:[%s1506_s8 + $0x38] sm:$0xf] %vm680_vm2, %v917_v30 }
 0x1d9   :  { %v462_v54 = vpack.c.bf16 %v453_v51, %v452_v15  ;;  %v916_v55 = vpack.c.bf16 %v453_v51, %v453_v51  ;;  %693 = vst.msk [vmem:[%s1506_s8 + $0x30] sm:$0xf] %vm680_vm2, %v915_v50 }
 0x1da   :  { %696 = vst.msk [vmem:[%s1506_s8 + $0x3c] sm:$0xf] %vm680_vm2, %v918_v53 }
 0x1db   :  { %1057 = vmatprep.mubr.msk.bf16.mxu0 %vm318_vm1, %v462_v54  ;;  %694 = vst.msk [vmem:[%s1506_s8 + $0x34] sm:$0xf] %vm680_vm2, %v916_v55 }
 0x1dc   :  { %1058 = vmatmul.mubr.msk.bf16.gmra.mrb[20].mxu0 %vm318_vm1, %v463_v52 }
 0x297   :  { %v1047_v56 = vpop.f32.mrb[8].mxu0 }
 0x298   :  { %v554_v57 = vadd.f32 %v1047_v56, %v1337_v16  ;;  %v545_v58 = vpop.f32.mrb[9].mxu0 }
 0x299   :  { %v546_v59 = vadd.f32 %v1337_v16, %v545_v58  ;;  %v1048_v60 = vpop.f32.mrb[10].mxu0  ;;  %v1079_v58 = vmov 0  }
 0x29a   :  { %v610_v61 = vmax.f32 %v554_v57, 0.0  ;;  %v557_v62 = vadd.f32 %v1048_v60, %v1337_v16  ;;  %v548_v63 = vpop.f32.mrb[11].mxu0 }
 0x29b   :  { %v608_v0 = vmax.f32 %v546_v59, 0.0  ;;  %v549_v1 = vadd.f32 %v1337_v16, %v548_v63 }
 0x29c   :  { %v611_v2 = vmax.f32 %v557_v62, 0.0  ;;  %v921_v3 = vpack.c.bf16 %v610_v61, %v610_v61 }
 0x29d   :  { %v609_v4 = vmax.f32 %v549_v1, 0.0  ;;  %v919_v5 = vpack.c.bf16 %v608_v0, %v608_v0 }
 0x29e   :  { %749 = vrot.lane.b32.xlu1 %v921_v3, %s1078_s7  ;;  %v922_v7 = vpack.c.bf16 %v611_v2, %v611_v2 }
 0x29f   :  { %v1051_v6 = vpop.f32.mrb[12].mxu0  ;;  %745 = vrot.lane.b32.xlu0 %v919_v5, %s1078_s7  ;;  %v920_v10 = vpack.c.bf16 %v609_v4, %v609_v4 }
 0x2a0   :  { %v570_v8 = vadd.f32 %v1051_v6, %v1337_v16  ;;  %v561_v9 = vpop.f32.mrb[13].mxu0 }
 0x2a1   :  { %v562_v11 = vadd.f32 %v1337_v16, %v561_v9  ;;  %v1052_v12 = vpop.f32.mrb[14].mxu0 }
 0x2a2   :  { %v614_v13 = vmax.f32 %v570_v8, 0.0  ;;  %v573_v17 = vadd.f32 %v1052_v12, %v1337_v16  ;;  %751 = vrot.lane.b32.xlu1 %v922_v7, %s1078_s7  ;;  %v564_v18 = vpop.f32.mrb[15].mxu0 }
 0x2a3   :  { %v565_v19 = vadd.f32 %v1337_v16, %v564_v18  ;;  %747 = vrot.lane.b32.xlu0 %v920_v10, %s1078_s7  ;;  %v612_v22 = vmax.f32 %v562_v11, 0.0 }
 0x2a4   :  { %v925_v20 = vpack.c.bf16 %v614_v13, %v614_v13  ;;  %v615_v21 = vmax.f32 %v573_v17, 0.0 }
 0x2a5   :  { %v613_v24 = vmax.f32 %v565_v19, 0.0  ;;  %v923_v32 = vpack.c.bf16 %v612_v22, %v612_v22 }
 0x2a6   :  { %v926_v23 = vpack.c.bf16 %v615_v21, %v615_v21 }
 0x2a7   :  { %v1055_v26 = vpop.f32.mrb[16].mxu0  ;;  %757 = vrot.lane.b32.xlu0 %v925_v20, %s1078_s7  ;;  %v924_v35 = vpack.c.bf16 %v613_v24, %v613_v24 }
 0x2a8   :  { %v586_v27 = vadd.f32 %v1055_v26, %v1337_v16  ;;  %759 = vrot.lane.b32.xlu1 %v926_v23, %s1078_s7  ;;  %v577_v28 = vpop.f32.mrb[17].mxu0 }
 0x2a9   :  { %v578_v33 = vadd.f32 %v1337_v16, %v577_v28  ;;  %v1056_v34 = vpop.f32.mrb[18].mxu0 }
 0x2aa   :  { %v618_v36 = vmax.f32 %v586_v27, 0.0  ;;  %v589_v37 = vadd.f32 %v1056_v34, %v1337_v16  ;;  %v580_v38 = vpop.f32.mrb[19].mxu0 }
 0x2ab   :  { %v581_v39 = vadd.f32 %v1337_v16, %v580_v38  ;;  %753 = vrot.lane.b32.xlu0 %v923_v32, %s1078_s7  ;;  %v616_v42 = vmax.f32 %v578_v33, 0.0 }
 0x2ac   :  { %v929_v40 = vpack.c.bf16 %v618_v36, %v618_v36  ;;  %v619_v41 = vmax.f32 %v589_v37, 0.0  ;;  %755 = vrot.lane.b32.xlu1 %v924_v35, %s1078_s7 }
 0x2ad   :  { %v617_v44 = vmax.f32 %v581_v39, 0.0  ;;  %v927_v47 = vpack.c.bf16 %v616_v42, %v616_v42 }
 0x2ae   :  { %v930_v43 = vpack.c.bf16 %v619_v41, %v619_v41 }
 0x2af   :  { %v1059_v45 = vpop.f32.mrb[20].mxu0  ;;  %765 = vrot.lane.b32.xlu0 %v929_v40, %s1078_s7  ;;  %v928_v25 = vpack.c.bf16 %v617_v44, %v617_v44 }
 0x2b0   :  { %v593_v46 = vpop.f32.mrb[21].mxu0  ;;  %767 = vrot.lane.b32.xlu1 %v930_v43, %s1078_s7  ;;  %v602_v14 = vadd.f32 %v1059_v45, %v1337_v16 }
 0x2b1   :  { %v594_v48 = vadd.f32 %v1337_v16, %v593_v46  ;;  %v1060_v49 = vpop.f32.mrb[22].mxu0 }
 0x2b2   :  { %v596_v15 = vpop.f32.mrb[23].mxu0  ;;  %v605_v30 = vadd.f32 %v1060_v49, %v1337_v16  ;;  %v622_v50 = vmax.f32 %v602_v14, 0.0 }
 0x2b3   :  { %v620_v29 = vmax.f32 %v594_v48, 0.0  ;;  %v597_v31 = vadd.f32 %v1337_v16, %v596_v15  ;;  %761 = vrot.lane.b32.xlu0 %v927_v47, %s1078_s7 }
 0x2b4   :  { %763 = vrot.lane.b32.xlu1 %v928_v25, %s1078_s7  ;;  %v623_v53 = vmax.f32 %v605_v30, 0.0  ;;  %v933_v55 = vpack.c.bf16 %v622_v50, %v622_v50 }
 0x2b5   :  { %v931_v51 = vpack.c.bf16 %v620_v29, %v620_v29  ;;  %v621_v52 = vmax.f32 %v597_v31, 0.0 }
 0x2b6   :  { %v934_v56 = vpack.c.bf16 %v623_v53, %v623_v53 }
 0x2b7   :  { %v932_v54 = vpack.c.bf16 %v621_v52, %v621_v52  ;;  %769 = vrot.lane.b32.xlu0 %v931_v51, %s1078_s7 }
 0x2b9   :  { %771 = vrot.lane.b32.xlu1 %v932_v54, %s1078_s7 }
 0x2bb   :  { %773 = vrot.lane.b32.xlu0 %v933_v55, %s1078_s7 }
 0x2bd   :  { %775 = vrot.lane.b32.xlu1 %v934_v56, %s1078_s7 }
 0x310   :  { %v750_v16 = vpop.permute.xlu1 %749 }
 0x311   :  { %796 = vst.msk [vmem:[%s1506_s8 + $0x8] sm:$0xf] %vm793_vm3, %v750_v16  ;;  %v746_v57 = vpop.permute.xlu0 %745 }
 0x312   :  { %813 = vst.msk [vmem:[%s1506_s8 + $0x8] sm:$0xf] %vm810_vm4, %v1079_v58 }
 0x313   :  { %794 = vst.msk [vmem:[%s1506_s8] sm:$0xf] %vm793_vm3, %v746_v57 }
 0x314   :  { %811 = vst.msk [vmem:[%s1506_s8] sm:$0xf] %vm810_vm4, %v1079_v58  ;;  %v752_v59 = vpop.permute.xlu1 %751 }
 0x315   :  { %797 = vst.msk [vmem:[%s1506_s8 + $0xc] sm:$0xf] %vm793_vm3, %v752_v59  ;;  %v748_v60 = vpop.permute.xlu0 %747 }
 0x316   :  { %814 = vst.msk [vmem:[%s1506_s8 + $0xc] sm:$0xf] %vm810_vm4, %v1079_v58 }
 0x317   :  { %795 = vst.msk [vmem:[%s1506_s8 + $0x4] sm:$0xf] %vm793_vm3, %v748_v60 }
 0x318   :  { %812 = vst.msk [vmem:[%s1506_s8 + $0x4] sm:$0xf] %vm810_vm4, %v1079_v58 }
 0x319   :  { %v758_v61 = vpop.permute.xlu0 %757 }
 0x31a   :  { %800 = vst.msk [vmem:[%s1506_s8 + $0x18] sm:$0xf] %vm793_vm3, %v758_v61  ;;  %v760_v62 = vpop.permute.xlu1 %759 }
 0x31b   :  { %817 = vst.msk [vmem:[%s1506_s8 + $0x18] sm:$0xf] %vm810_vm4, %v1079_v58 }
 0x31c   :  { %801 = vst.msk [vmem:[%s1506_s8 + $0x1c] sm:$0xf] %vm793_vm3, %v760_v62 }
 0x31d   :  { %818 = vst.msk [vmem:[%s1506_s8 + $0x1c] sm:$0xf] %vm810_vm4, %v1079_v58  ;;  %v754_v63 = vpop.permute.xlu0 %753 }
 0x31e   :  { %798 = vst.msk [vmem:[%s1506_s8 + $0x10] sm:$0xf] %vm793_vm3, %v754_v63  ;;  %v756_v0 = vpop.permute.xlu1 %755 }
 0x31f   :  { %815 = vst.msk [vmem:[%s1506_s8 + $0x10] sm:$0xf] %vm810_vm4, %v1079_v58 }
 0x320   :  { %799 = vst.msk [vmem:[%s1506_s8 + $0x14] sm:$0xf] %vm793_vm3, %v756_v0 }
 0x321   :  { %816 = vst.msk [vmem:[%s1506_s8 + $0x14] sm:$0xf] %vm810_vm4, %v1079_v58  ;;  %v766_v1 = vpop.permute.xlu0 %765 }
 0x322   :  { %804 = vst.msk [vmem:[%s1506_s8 + $0x28] sm:$0xf] %vm793_vm3, %v766_v1  ;;  %v768_v2 = vpop.permute.xlu1 %767 }
 0x323   :  { %821 = vst.msk [vmem:[%s1506_s8 + $0x28] sm:$0xf] %vm810_vm4, %v1079_v58 }
 0x324   :  { %805 = vst.msk [vmem:[%s1506_s8 + $0x2c] sm:$0xf] %vm793_vm3, %v768_v2 }
 0x325   :  { %822 = vst.msk [vmem:[%s1506_s8 + $0x2c] sm:$0xf] %vm810_vm4, %v1079_v58  ;;  %v762_v3 = vpop.permute.xlu0 %761 }
 0x326   :  { %802 = vst.msk [vmem:[%s1506_s8 + $0x20] sm:$0xf] %vm793_vm3, %v762_v3  ;;  %v764_v4 = vpop.permute.xlu1 %763 }
 0x327   :  { %819 = vst.msk [vmem:[%s1506_s8 + $0x20] sm:$0xf] %vm810_vm4, %v1079_v58 }
 0x328   :  { %803 = vst.msk [vmem:[%s1506_s8 + $0x24] sm:$0xf] %vm793_vm3, %v764_v4 }
 0x329   :  { %820 = vst.msk [vmem:[%s1506_s8 + $0x24] sm:$0xf] %vm810_vm4, %v1079_v58  ;;  %v770_v5 = vpop.permute.xlu0 %769 }
 0x32a   :  { %806 = vst.msk [vmem:[%s1506_s8 + $0x30] sm:$0xf] %vm793_vm3, %v770_v5 }
 0x32b   :  { %823 = vst.msk [vmem:[%s1506_s8 + $0x30] sm:$0xf] %vm810_vm4, %v1079_v58  ;;  %v772_v6 = vpop.permute.xlu1 %771 }
 0x32c   :  { %807 = vst.msk [vmem:[%s1506_s8 + $0x34] sm:$0xf] %vm793_vm3, %v772_v6 }
 0x32d   :  { %824 = vst.msk [vmem:[%s1506_s8 + $0x34] sm:$0xf] %vm810_vm4, %v1079_v58  ;;  %v774_v7 = vpop.permute.xlu0 %773 }
 0x32e   :  { %808 = vst.msk [vmem:[%s1506_s8 + $0x38] sm:$0xf] %vm793_vm3, %v774_v7 }
 0x32f   :  { %825 = vst.msk [vmem:[%s1506_s8 + $0x38] sm:$0xf] %vm810_vm4, %v1079_v58  ;;  %v776_v8 = vpop.permute.xlu1 %775 }
 0x330   :  { %809 = vst.msk [vmem:[%s1506_s8 + $0x3c] sm:$0xf] %vm793_vm3, %v776_v8 }
 0x331   :  { %826 = vst.msk [vmem:[%s1506_s8 + $0x3c] sm:$0xf] %vm810_vm4, %v1079_v58 }

// kernel: shuffletrack_forward.17
= control target key start
LH: loop header
LB: loop body
LE: loop exit
PB: predicated region body
PF: predicated region fallthrough
CT: control target
= control target key end

     0   :  { %v1606_v0 = vmov 0.0   ;;  %vm1607_vm0 = vmmov 0   ;;  %v1608_v18 = vmov 0   ;;  %vm209_vm1 = vcmask 523264   ;;  %s2103_s1 = inlined_call_operand.vmem [shape: bf16[128,64], index: 1, kind: input, shape index: {}]   ;;  %s2104_s3 = inlined_call_operand.vmem [shape: bf16[64,256], index: 3, kind: input, shape index: {}]   ;;  %s2105_s0 = inlined_call_operand.vmem [shape: bf16[8,128], index: 0, kind: input, shape index: {}]   ;;  %s2106_s5 = inlined_call_operand.vmem [shape: bf16[256,512], index: 5, kind: input, shape index: {}]   ;;  %s2107_s2 = inlined_call_operand.vmem [shape: f32[1,64], index: 2, kind: input, shape index: {}]   ;;  %s2108_s7 = inlined_call_operand.vmem [shape: bf16[128,640], index: 7, kind: input, shape index: {}]   ;;  %s2109_s4 = inlined_call_operand.vmem [shape: f32[1,256], index: 4, kind: input, shape index: {}]   ;;  %s2110_s6 = inlined_call_operand.vmem [shape: f32[1,512], index: 6, kind: input, shape index: {}]   ;;  %s2111_s9 = inlined_call_operand.vmem [shape: bf16[8,512], index: 9, kind: output, shape index: {0}]   ;;  %s2112_s8 = inlined_call_operand.vmem [shape: f32[1,640], index: 8, kind: input, shape index: {}]   ;;  %s2113_s10 = inlined_call_operand.vmem [shape: bf16[2,8,640], index: 10, kind: output, shape index: {1}]  }
   0x1   :  { %1391 = vmatprep.subr.bf16.mxu0 %v1606_v0  ;;  %v1434_v1 = vld [vmem:[%s2103_s1] sm:$0xff]   ;;  %1407 = vmatprep.mubr.msk.bf16.mxu0 %vm1607_vm0, %v1606_v0  ;;  %v1435_v2 = vld [vmem:[%s2103_s1 + $0x8] sm:$0xff]   ;;  %v1436_v3 = vld [vmem:[%s2103_s1 + $0x10] sm:$0xff]  }
   0x2   :  { %1392 = vmatpush3.bf16.msra.mxu0 %v1434_v1  ;;  %v1442_v4 = vld [vmem:[%s2104_s3 + $0x4] ss:$8 sps:$4 sm:$0xff]   ;;  %v1444_v5 = vld [vmem:[%s2104_s3] ss:$8 sps:$4 sm:$0xff]   ;;  %v1437_v6 = vld [vmem:[%s2103_s1 + $0x18] sm:$0xff]   ;;  %245 = vmatprep.mubr.bf16.mxu1 %v1608_v18 }
   0x3   :  { %1393 = vmatprep.subr.bf16.mxu0 %v1606_v0  ;;  %v1445_v7 = vld [vmem:[%s2104_s3 + $0x14] ss:$8 sps:$4 sm:$0xff]   ;;  %213 = vmatprep.subr.bf16.mxu1 %v1442_v4  ;;  %v1447_v8 = vld [vmem:[%s2104_s3 + $0x10] ss:$8 sps:$4 sm:$0xff]   ;;  %v1448_v9 = vld [vmem:[%s2104_s3 + $0x24] ss:$8 sps:$4 sm:$0xff]  }
   0x4   :  { %214 = vmatpush1.bf16.msra.mxu1 %v1444_v5  ;;  %v1438_v10 = vld [vmem:[%s2103_s1 + $0x20] sm:$0xff]   ;;  %v1439_v11 = vld [vmem:[%s2103_s1 + $0x28] sm:$0xff]   ;;  %v1440_v12 = vld [vmem:[%s2103_s1 + $0x30] sm:$0xff]  }
   0x5   :  { %215 = vmatprep.subr.bf16.mxu1 %v1445_v7  ;;  %v1441_v13 = vld [vmem:[%s2103_s1 + $0x38] sm:$0xff]   ;;  %v35_v14 = vld [vmem:[%s2105_s0] sm:$0xf]  ;;  %v1456_v19 = vld [vmem:[%s2106_s5 + $0x4] ss:$16 sps:$4 sm:$0xff]  }
   0x6   :  { %1394 = vmatpush3.bf16.msra.mxu0 %v1435_v2  ;;  %v1450_v15 = vld [vmem:[%s2104_s3 + $0x20] ss:$8 sps:$4 sm:$0xff]   ;;  %v1451_v16 = vld [vmem:[%s2104_s3 + $0x34] ss:$8 sps:$4 sm:$0xff]   ;;  %v1453_v17 = vld [vmem:[%s2104_s3 + $0x30] ss:$8 sps:$4 sm:$0xff]  }
   0x7   :  { %1395 = vmatprep.subr.bf16.mxu0 %v1606_v0  ;;  %v1457_v20 = vld [vmem:[%s2106_s5 + $0x8] ss:$16 sps:$4 sm:$0xff]   ;;  %v1459_v21 = vld [vmem:[%s2106_s5 + $0xc] ss:$16 sps:$4 sm:$0xff]   ;;  %v1232_v48 = vld [vmem:[%s2107_s2] ss:$0 sm:$0xff] }
   0x8   :  { %216 = vmatpush1.bf16.msra.mxu1 %v1447_v8  ;;  %v1463_v22 = vld [vmem:[%s2106_s5 + $0x28] ss:$16 sps:$4 sm:$0xff]   ;;  %v1465_v23 = vld [vmem:[%s2106_s5 + $0x2c] ss:$16 sps:$4 sm:$0xff]   ;;  %v1454_v55 = vld [vmem:[%s2106_s5] ss:$16 sps:$4 sm:$0xff]  }
   0x9   :  { %217 = vmatprep.subr.bf16.mxu1 %v1448_v9  ;;  %v1471_v24 = vld [vmem:[%s2106_s5 + $0x4c] ss:$16 sps:$4 sm:$0xff]   ;;  %v1469_v25 = vld [vmem:[%s2106_s5 + $0x48] ss:$16 sps:$4 sm:$0xff]   ;;  %v1462_v57 = vld [vmem:[%s2106_s5 + $0x24] ss:$16 sps:$4 sm:$0xff]  }
   0xa   :  { %1396 = vmatpush3.bf16.msra.mxu0 %v1436_v3  ;;  %v1477_v26 = vld [vmem:[%s2106_s5 + $0x6c] ss:$16 sps:$4 sm:$0xff]   ;;  %v1475_v27 = vld [vmem:[%s2106_s5 + $0x68] ss:$16 sps:$4 sm:$0xff]   ;;  %v1460_v58 = vld [vmem:[%s2106_s5 + $0x20] ss:$16 sps:$4 sm:$0xff]  }
   0xb   :  { %1397 = vmatprep.subr.bf16.mxu0 %v1606_v0  ;;  %v1483_v28 = vld [vmem:[%s2106_s5 + $0x8c] ss:$16 sps:$4 sm:$0xff]   ;;  %v1481_v29 = vld [vmem:[%s2106_s5 + $0x88] ss:$16 sps:$4 sm:$0xff]   ;;  %v1468_v59 = vld [vmem:[%s2106_s5 + $0x44] ss:$16 sps:$4 sm:$0xff]  }
   0xc   :  { %218 = vmatpush1.bf16.msra.mxu1 %v1450_v15  ;;  %v1489_v30 = vld [vmem:[%s2106_s5 + $0xac] ss:$16 sps:$4 sm:$0xff]   ;;  %v1487_v31 = vld [vmem:[%s2106_s5 + $0xa8] ss:$16 sps:$4 sm:$0xff]   ;;  %v1466_v60 = vld [vmem:[%s2106_s5 + $0x40] ss:$16 sps:$4 sm:$0xff]  }
   0xd   :  { %219 = vmatprep.subr.bf16.mxu1 %v1451_v16  ;;  %v1495_v32 = vld [vmem:[%s2106_s5 + $0xcc] ss:$16 sps:$4 sm:$0xff]   ;;  %v1493_v33 = vld [vmem:[%s2106_s5 + $0xc8] ss:$16 sps:$4 sm:$0xff]   ;;  %v1474_v61 = vld [vmem:[%s2106_s5 + $0x64] ss:$16 sps:$4 sm:$0xff]  }
   0xe   :  { %1398 = vmatpush3.bf16.msra.mxu0 %v1437_v6  ;;  %v1501_v34 = vld [vmem:[%s2106_s5 + $0xec] ss:$16 sps:$4 sm:$0xff]   ;;  %v1499_v35 = vld [vmem:[%s2106_s5 + $0xe8] ss:$16 sps:$4 sm:$0xff]   ;;  %v1472_v62 = vld [vmem:[%s2106_s5 + $0x60] ss:$16 sps:$4 sm:$0xff]  }
   0xf   :  { %1399 = vmatprep.subr.bf16.mxu0 %v1606_v0  ;;  %v1507_v36 = vld [vmem:[%s2106_s5 + $0x10c] ss:$16 sps:$4 sm:$0xff]   ;;  %v1505_v37 = vld [vmem:[%s2106_s5 + $0x108] ss:$16 sps:$4 sm:$0xff]   ;;  %v1480_v63 = vld [vmem:[%s2106_s5 + $0x84] ss:$16 sps:$4 sm:$0xff]  }
  0x10   :  { %220 = vmatpush1.bf16.msra.mxu1 %v1453_v17  ;;  %v1513_v38 = vld [vmem:[%s2106_s5 + $0x12c] ss:$16 sps:$4 sm:$0xff]   ;;  %v1511_v39 = vld [vmem:[%s2106_s5 + $0x128] ss:$16 sps:$4 sm:$0xff]   ;;  %v1478_v1 = vld [vmem:[%s2106_s5 + $0x80] ss:$16 sps:$4 sm:$0xff]  }
  0x11   :  { %664 = vmatprep.subr.bf16.mxu1 %v1456_v19  ;;  %v1519_v40 = vld [vmem:[%s2106_s5 + $0x14c] ss:$16 sps:$4 sm:$0xff]   ;;  %v1517_v41 = vld [vmem:[%s2106_s5 + $0x148] ss:$16 sps:$4 sm:$0xff]   ;;  %v1486_v2 = vld [vmem:[%s2106_s5 + $0xa4] ss:$16 sps:$4 sm:$0xff]  }
  0x12   :  { %1400 = vmatpush3.bf16.msra.mxu0 %v1438_v10  ;;  %v1525_v42 = vld [vmem:[%s2106_s5 + $0x16c] ss:$16 sps:$4 sm:$0xff]   ;;  %v1523_v43 = vld [vmem:[%s2106_s5 + $0x168] ss:$16 sps:$4 sm:$0xff]   ;;  %v1484_v3 = vld [vmem:[%s2106_s5 + $0xa0] ss:$16 sps:$4 sm:$0xff]  }
  0x13   :  { %1401 = vmatprep.subr.bf16.mxu0 %v1606_v0  ;;  %v1531_v44 = vld [vmem:[%s2106_s5 + $0x18c] ss:$16 sps:$4 sm:$0xff]   ;;  %v1529_v45 = vld [vmem:[%s2106_s5 + $0x188] ss:$16 sps:$4 sm:$0xff]   ;;  %v1492_v4 = vld [vmem:[%s2106_s5 + $0xc4] ss:$16 sps:$4 sm:$0xff]  }
  0x14   :  { %v1537_v46 = vld [vmem:[%s2106_s5 + $0x1ac] ss:$16 sps:$4 sm:$0xff]   ;;  %v1535_v47 = vld [vmem:[%s2106_s5 + $0x1a8] ss:$16 sps:$4 sm:$0xff]   ;;  %v1490_v5 = vld [vmem:[%s2106_s5 + $0xc0] ss:$16 sps:$4 sm:$0xff]  }
  0x15   :  { %v1498_v6 = vld [vmem:[%s2106_s5 + $0xe4] ss:$16 sps:$4 sm:$0xff]   ;;  %v1496_v7 = vld [vmem:[%s2106_s5 + $0xe0] ss:$16 sps:$4 sm:$0xff]  }
  0x16   :  { %1402 = vmatpush3.bf16.msra.mxu0 %v1439_v11  ;;  %v1504_v8 = vld [vmem:[%s2106_s5 + $0x104] ss:$16 sps:$4 sm:$0xff]   ;;  %v1502_v9 = vld [vmem:[%s2106_s5 + $0x100] ss:$16 sps:$4 sm:$0xff]  }
  0x17   :  { %1403 = vmatprep.subr.bf16.mxu0 %v1606_v0  ;;  %v1510_v10 = vld [vmem:[%s2106_s5 + $0x124] ss:$16 sps:$4 sm:$0xff]   ;;  %v1508_v11 = vld [vmem:[%s2106_s5 + $0x120] ss:$16 sps:$4 sm:$0xff]  }
  0x18   :  { %v1520_v15 = vld [vmem:[%s2106_s5 + $0x160] ss:$16 sps:$4 sm:$0xff]   ;;  %v1528_v16 = vld [vmem:[%s2106_s5 + $0x184] ss:$16 sps:$4 sm:$0xff]  }
  0x19   :  { %v1526_v17 = vld [vmem:[%s2106_s5 + $0x180] ss:$16 sps:$4 sm:$0xff]   ;;  %v1534_v19 = vld [vmem:[%s2106_s5 + $0x1a4] ss:$16 sps:$4 sm:$0xff]  }
  0x1a   :  { %1404 = vmatpush3.bf16.msra.mxu0 %v1440_v12  ;;  %v1516_v12 = vld [vmem:[%s2106_s5 + $0x144] ss:$16 sps:$4 sm:$0xff]  }
  0x1b   :  { %1405 = vmatprep.subr.bf16.mxu0 %v1606_v0 }
  0x1e   :  { %1406 = vmatpush3.bf16.msra.mxu0 %v1441_v13  ;;  %v1514_v13 = vld [vmem:[%s2106_s5 + $0x140] ss:$16 sps:$4 sm:$0xff]  }
  0x1f   :  { %705 = vmatprep.subr.bf16.mxu0 %v1459_v21  ;;  %v1540_v21 = vld [vmem:[%s2106_s5 + $0x1c4] ss:$16 sps:$4 sm:$0xff]  }
  0x21   :  { %1408 = vmatmul.mubr.bf16.vlgmr.msra.gmra.mrb[0].mxu0 %v35_v14  ;;  %v1522_v14 = vld [vmem:[%s2106_s5 + $0x164] ss:$16 sps:$4 sm:$0xff]  }
  0x22   :  { %706 = vmatpush1.bf16.msra.mxu0 %v1457_v20  ;;  %v1532_v20 = vld [vmem:[%s2106_s5 + $0x1a0] ss:$16 sps:$4 sm:$0xff]  }
  0x23   :  { %707 = vmatprep.subr.bf16.mxu0 %v1465_v23  ;;  %v1538_v23 = vld [vmem:[%s2106_s5 + $0x1c0] ss:$16 sps:$4 sm:$0xff]  }
  0x26   :  { %708 = vmatpush1.bf16.msra.mxu0 %v1463_v22  ;;  %v1543_v22 = vld [vmem:[%s2106_s5 + $0x1cc] ss:$16 sps:$4 sm:$0xff]  }
  0x27   :  { %709 = vmatprep.subr.bf16.mxu0 %v1471_v24  ;;  %v1541_v24 = vld [vmem:[%s2106_s5 + $0x1c8] ss:$16 sps:$4 sm:$0xff]  }
  0x2a   :  { %710 = vmatpush1.bf16.msra.mxu0 %v1469_v25  ;;  %v1546_v25 = vld [vmem:[%s2106_s5 + $0x1e4] ss:$16 sps:$4 sm:$0xff]  }
  0x2b   :  { %711 = vmatprep.subr.bf16.mxu0 %v1477_v26  ;;  %v1549_v26 = vld [vmem:[%s2106_s5 + $0x1ec] ss:$16 sps:$4 sm:$0xff]  }
  0x2e   :  { %712 = vmatpush1.bf16.msra.mxu0 %v1475_v27  ;;  %v1544_v27 = vld [vmem:[%s2106_s5 + $0x1e0] ss:$16 sps:$4 sm:$0xff]  }
  0x2f   :  { %713 = vmatprep.subr.bf16.mxu0 %v1483_v28  ;;  %v1547_v28 = vld [vmem:[%s2106_s5 + $0x1e8] ss:$16 sps:$4 sm:$0xff]  }
  0x32   :  { %714 = vmatpush1.bf16.msra.mxu0 %v1481_v29  ;;  %v1552_v29 = vld [vmem:[%s2108_s7 + $0x4] ss:$20 sps:$4 sm:$0xff]  }
  0x33   :  { %715 = vmatprep.subr.bf16.mxu0 %v1489_v30  ;;  %v1555_v30 = vld [vmem:[%s2108_s7 + $0xc] ss:$20 sps:$4 sm:$0xff]  }
  0x36   :  { %716 = vmatpush1.bf16.msra.mxu0 %v1487_v31  ;;  %v159_v31 = vlaneseq }
  0x37   :  { %717 = vmatprep.subr.bf16.mxu0 %v1495_v32 }
  0x38   :  { %v1927_v32 = vshrl.u32 %v159_v31, 7 }
  0x3a   :  { %718 = vmatpush1.bf16.msra.mxu0 %v1493_v33  ;;  %v1930_v33 = vsub.s32 0, %v1927_v32 }
  0x3b   :  { %719 = vmatprep.subr.bf16.mxu0 %v1501_v34  ;;  %v157_v34 = vld [vmem:[%s2109_s4] sm:$0x3] }
  0x3e   :  { %720 = vmatpush1.bf16.msra.mxu0 %v1499_v35  ;;  %v1936_v35 = vsub.s32 1, %v1927_v32 }
  0x3f   :  { %721 = vmatprep.subr.bf16.mxu0 %v1507_v36  ;;  %v162_v36 = vrot.slane %v157_v34, %v1930_v33 }
  0x42   :  { %722 = vmatpush1.bf16.msra.mxu0 %v1505_v37  ;;  %v166_v37 = vrot.slane %v157_v34, %v1936_v35  ;;  %v1598_v34 = vld [vmem:[%s2108_s7 + $0x10] ss:$20 sps:$4 sm:$0xff]  }
  0x43   :  { %723 = vmatprep.subr.bf16.mxu0 %v1513_v38 }
  0x46   :  { %724 = vmatpush1.bf16.msra.mxu0 %v1511_v39 }
  0x47   :  { %725 = vmatprep.subr.bf16.mxu0 %v1519_v40 }
  0x4a   :  { %726 = vmatpush1.bf16.msra.mxu0 %v1517_v41 }
  0x4b   :  { %727 = vmatprep.subr.bf16.mxu0 %v1525_v42 }
  0x4e   :  { %728 = vmatpush1.bf16.msra.mxu0 %v1523_v43 }
  0x4f   :  { %729 = vmatprep.subr.bf16.mxu0 %v1531_v44 }
  0x52   :  { %730 = vmatpush1.bf16.msra.mxu0 %v1529_v45 }
  0x53   :  { %731 = vmatprep.subr.bf16.mxu0 %v1537_v46 }
  0x56   :  { %732 = vmatpush1.bf16.msra.mxu0 %v1535_v47  ;;  %v1550_v47 = vld [vmem:[%s2108_s7] ss:$20 sps:$4 sm:$0xff]  }
  0x57   :  { %733 = vmatprep.subr.bf16.mxu0 %v1543_v22 }
  0x5a   :  { %734 = vmatpush1.bf16.msra.mxu0 %v1541_v24 }
  0x5b   :  { %735 = vmatprep.subr.bf16.mxu0 %v1549_v26 }
  0x5e   :  { %736 = vmatpush1.bf16.msra.mxu0 %v1547_v28 }
  0x5f   :  { %1091 = vmatprep.subr.bf16.mxu0 %v1555_v30 }
  0xf4   :  { %v141_v49 = vpop.f32.mrb[0].mxu0 }
  0xf5   :  { %v142_v50 = vadd.f32 %v1232_v48, %v141_v49  ;;  %v1409_v51 = vpop.f32.mrb[1].mxu0  ;;  %v1553_v48 = vld [vmem:[%s2108_s7 + $0x8] ss:$20 sps:$4 sm:$0xff]  }
  0xf6   :  { %v144_v52 = vpop.f32.mrb[2].mxu0  ;;  %v1561_v51 = vld [vmem:[%s2108_s7 + $0x34] ss:$20 sps:$4 sm:$0xff]  }
  0xf7   :  { %v147_v53 = vmax.f32 %v142_v50, 0.0  ;;  %v1410_v54 = vpop.f32.mrb[3].mxu0  ;;  %v1558_v50 = vld [vmem:[%s2108_s7 + $0x2c] ss:$20 sps:$4 sm:$0xff]   ;;  %v1556_v52 = vld [vmem:[%s2108_s7 + $0x28] ss:$20 sps:$4 sm:$0xff]  }
  0xf8   :  { %v1564_v54 = vld [vmem:[%s2108_s7 + $0x54] ss:$20 sps:$4 sm:$0xff]  }
  0xf9   :  { %v148_v56 = vpack.c.bf16 %v147_v53, %v147_v53  ;;  %v1559_v53 = vld [vmem:[%s2108_s7 + $0x30] ss:$20 sps:$4 sm:$0xff]  }
  0xfb   :  { %1249 = vmatmul.mubr.msk.bf16.vlgmr.msra.gmra.mrb[0].mxu1 %vm209_vm1, %v148_v56  ;;  %v1562_v56 = vld [vmem:[%s2108_s7 + $0x50] ss:$20 sps:$4 sm:$0xff]  }
  0xfc   :  { %665 = vmatpush1.bf16.msra.mxu1 %v1454_v55  ;;  %v1567_v55 = vld [vmem:[%s2108_s7 + $0x5c] ss:$20 sps:$4 sm:$0xff]  }
  0xfd   :  { %666 = vmatprep.subr.bf16.mxu1 %v1462_v57  ;;  %v1565_v57 = vld [vmem:[%s2108_s7 + $0x58] ss:$20 sps:$4 sm:$0xff]  }
 0x100   :  { %667 = vmatpush1.bf16.msra.mxu1 %v1460_v58  ;;  %v1570_v58 = vld [vmem:[%s2108_s7 + $0x7c] ss:$20 sps:$4 sm:$0xff]  }
 0x101   :  { %668 = vmatprep.subr.bf16.mxu1 %v1468_v59  ;;  %v1568_v59 = vld [vmem:[%s2108_s7 + $0x78] ss:$20 sps:$4 sm:$0xff]  }
 0x104   :  { %669 = vmatpush1.bf16.msra.mxu1 %v1466_v60  ;;  %v1571_v60 = vld [vmem:[%s2108_s7 + $0x80] ss:$20 sps:$4 sm:$0xff]  }
 0x105   :  { %670 = vmatprep.subr.bf16.mxu1 %v1474_v61  ;;  %v1576_v61 = vld [vmem:[%s2108_s7 + $0xa4] ss:$20 sps:$4 sm:$0xff]  }
 0x108   :  { %671 = vmatpush1.bf16.msra.mxu1 %v1472_v62  ;;  %v1579_v62 = vld [vmem:[%s2108_s7 + $0xac] ss:$20 sps:$4 sm:$0xff]  }
 0x109   :  { %672 = vmatprep.subr.bf16.mxu1 %v1480_v63  ;;  %v1574_v63 = vld [vmem:[%s2108_s7 + $0xa0] ss:$20 sps:$4 sm:$0xff]  }
 0x10c   :  { %673 = vmatpush1.bf16.msra.mxu1 %v1478_v1  ;;  %v1577_v1 = vld [vmem:[%s2108_s7 + $0xa8] ss:$20 sps:$4 sm:$0xff]  }
 0x10d   :  { %674 = vmatprep.subr.bf16.mxu1 %v1486_v2  ;;  %v1582_v2 = vld [vmem:[%s2108_s7 + $0xcc] ss:$20 sps:$4 sm:$0xff]  }
 0x110   :  { %675 = vmatpush1.bf16.msra.mxu1 %v1484_v3  ;;  %v1585_v3 = vld [vmem:[%s2108_s7 + $0xd4] ss:$20 sps:$4 sm:$0xff]  }
 0x111   :  { %676 = vmatprep.subr.bf16.mxu1 %v1492_v4  ;;  %v1580_v4 = vld [vmem:[%s2108_s7 + $0xc8] ss:$20 sps:$4 sm:$0xff]  }
 0x114   :  { %677 = vmatpush1.bf16.msra.mxu1 %v1490_v5  ;;  %v1583_v5 = vld [vmem:[%s2108_s7 + $0xd0] ss:$20 sps:$4 sm:$0xff]  }
 0x115   :  { %678 = vmatprep.subr.bf16.mxu1 %v1498_v6  ;;  %v1588_v6 = vld [vmem:[%s2108_s7 + $0xf4] ss:$20 sps:$4 sm:$0xff]  }
 0x118   :  { %679 = vmatpush1.bf16.msra.mxu1 %v1496_v7  ;;  %v1591_v7 = vld [vmem:[%s2108_s7 + $0xfc] ss:$20 sps:$4 sm:$0xff]  }
 0x119   :  { %680 = vmatprep.subr.bf16.mxu1 %v1504_v8  ;;  %v1586_v8 = vld [vmem:[%s2108_s7 + $0xf0] ss:$20 sps:$4 sm:$0xff]  }
 0x11c   :  { %681 = vmatpush1.bf16.msra.mxu1 %v1502_v9  ;;  %v1589_v9 = vld [vmem:[%s2108_s7 + $0xf8] ss:$20 sps:$4 sm:$0xff]  }
 0x11d   :  { %682 = vmatprep.subr.bf16.mxu1 %v1510_v10  ;;  %v1594_v10 = vld [vmem:[%s2108_s7 + $0x11c] ss:$20 sps:$4 sm:$0xff]  }
 0x120   :  { %683 = vmatpush1.bf16.msra.mxu1 %v1508_v11  ;;  %v1592_v11 = vld [vmem:[%s2108_s7 + $0x118] ss:$20 sps:$4 sm:$0xff]  }
 0x121   :  { %684 = vmatprep.subr.bf16.mxu1 %v1516_v12  ;;  %v1597_v12 = vld [vmem:[%s2108_s7 + $0x124] ss:$20 sps:$4 sm:$0xff]  }
 0x124   :  { %685 = vmatpush1.bf16.msra.mxu1 %v1514_v13  ;;  %v1595_v13 = vld [vmem:[%s2108_s7 + $0x120] ss:$20 sps:$4 sm:$0xff]  }
 0x125   :  { %686 = vmatprep.subr.bf16.mxu1 %v1522_v14  ;;  %v334_v14 = vsub.s32 2, %v1927_v32 }
 0x128   :  { %687 = vmatpush1.bf16.msra.mxu1 %v1520_v15  ;;  %v322_v15 = vld [vmem:[%s2110_s6] sm:$0xf] }
 0x129   :  { %688 = vmatprep.subr.bf16.mxu1 %v1528_v16  ;;  %v338_v16 = vsub.s32 3, %v1927_v32 }
 0x12c   :  { %689 = vmatpush1.bf16.msra.mxu1 %v1526_v17  ;;  %v327_v17 = vrot.slane %v322_v15, %v1930_v33 }
 0x12d   :  { %690 = vmatprep.subr.bf16.mxu1 %v1534_v19  ;;  %v335_v19 = vrot.slane %v322_v15, %v334_v14 }
 0x130   :  { %691 = vmatpush1.bf16.msra.mxu1 %v1532_v20  ;;  %v331_v20 = vrot.slane %v322_v15, %v1936_v35 }
 0x131   :  { %692 = vmatprep.subr.bf16.mxu1 %v1540_v21  ;;  %v339_v21 = vrot.slane %v322_v15, %v338_v16 }
 0x134   :  { %693 = vmatpush1.bf16.msra.mxu1 %v1538_v23 }
 0x135   :  { %694 = vmatprep.subr.bf16.mxu1 %v1546_v25 }
 0x138   :  { %695 = vmatpush1.bf16.msra.mxu1 %v1544_v27 }
 0x139   :  { %1048 = vmatprep.subr.bf16.mxu1 %v1552_v29 }
 0x1ce   :  { %v247_v38 = vpop.f32.mrb[0].mxu1 }
 0x1cf   :  { %v248_v39 = vadd.f32 %v247_v38, %v162_v36  ;;  %v249_v40 = vpop.f32.mrb[1].mxu1 }
 0x1d0   :  { %v250_v41 = vadd.f32 %v249_v40, %v166_v37  ;;  %v251_v42 = vpop.f32.mrb[2].mxu1 }
 0x1d1   :  { %v254_v43 = vmax.f32 %v248_v39, 0.0  ;;  %v252_v44 = vpop.f32.mrb[3].mxu1  ;;  %v1600_v42 = vld [vmem:[%s2108_s7 + $0x60] ss:$20 sps:$4 sm:$0xff]  }
 0x1d2   :  { %v255_v45 = vmax.f32 %v250_v41, 0.0  ;;  %v1599_v41 = vld [vmem:[%s2108_s7 + $0x38] ss:$20 sps:$4 sm:$0xff]   ;;  %v1602_v44 = vld [vmem:[%s2108_s7 + $0xb0] ss:$20 sps:$4 sm:$0xff]  }
 0x1d3   :  { %v256_v49 = vpack.c.bf16 %v254_v43, %v254_v43  ;;  %v1601_v43 = vld [vmem:[%s2108_s7 + $0x88] ss:$20 sps:$4 sm:$0xff]  }
 0x1d4   :  { %v257_v46 = vpack.c.bf16 %v255_v45, %v255_v45  ;;  %v1603_v45 = vld [vmem:[%s2108_s7 + $0xd8] ss:$20 sps:$4 sm:$0xff]  }
 0x1d6   :  { %696 = vmatprep.mubr.bf16.mxu1 %v257_v46  ;;  %737 = vmatprep.mubr.bf16.mxu0 %v257_v46  ;;  %v1604_v46 = vld [vmem:[%s2108_s7 + $0x100] ss:$20 sps:$4 sm:$0xff]  }
 0x1d7   :  { %697 = vmatmul.mubr.bf16.vlgmr.msra.gmra.mrb[4].mxu1 %v256_v49  ;;  %738 = vmatmul.mubr.bf16.vlgmr.msra.gmra.mrb[4].mxu0 %v256_v49 }
 0x1d8   :  { %1049 = vmatpush1.bf16.msra.mxu1 %v1550_v47  ;;  %1092 = vmatpush1.bf16.msra.mxu0 %v1553_v48  ;;  %v1605_v47 = vld [vmem:[%s2108_s7 + $0x128] ss:$20 sps:$4 sm:$0xff]   ;;  %v813_v48 = vld [vmem:[%s2112_s8] sm:$0x1f] }
 0x1d9   :  { %1050 = vmatprep.subr.bf16.mxu1 %v1558_v50  ;;  %1093 = vmatprep.subr.bf16.mxu0 %v1561_v51  ;;  %v818_v49 = vrot.slane %v813_v48, %v1930_v33  ;;  %v826_v50 = vrot.slane %v813_v48, %v334_v14  ;;  %v822_v51 = vrot.slane %v813_v48, %v1936_v35 }
 0x1da   :  { %1080 = vmatprep.mubr.bf16.mxu1 %v1608_v18  ;;  %1123 = vmatprep.mubr.bf16.mxu0 %v1608_v18  ;;  %v1573_v18 = vld [vmem:[%s2108_s7 + $0x84] ss:$20 sps:$4 sm:$0xff]  }
 0x1dc   :  { %1051 = vmatpush1.bf16.msra.mxu1 %v1556_v52  ;;  %1094 = vmatpush1.bf16.msra.mxu0 %v1559_v53  ;;  %v830_v52 = vrot.slane %v813_v48, %v338_v16 }
 0x1dd   :  { %1052 = vmatprep.subr.bf16.mxu1 %v1564_v54  ;;  %1095 = vmatprep.subr.bf16.mxu0 %v1567_v55 }
 0x1e0   :  { %1053 = vmatpush1.bf16.msra.mxu1 %v1562_v56  ;;  %1096 = vmatpush1.bf16.msra.mxu0 %v1565_v57 }
 0x1e1   :  { %1054 = vmatprep.subr.bf16.mxu1 %v1570_v58  ;;  %1097 = vmatprep.subr.bf16.mxu0 %v1573_v18 }
 0x1e4   :  { %1055 = vmatpush1.bf16.msra.mxu1 %v1568_v59  ;;  %1098 = vmatpush1.bf16.msra.mxu0 %v1571_v60 }
 0x1e5   :  { %1056 = vmatprep.subr.bf16.mxu1 %v1576_v61  ;;  %1099 = vmatprep.subr.bf16.mxu0 %v1579_v62 }
 0x1e8   :  { %1057 = vmatpush1.bf16.msra.mxu1 %v1574_v63  ;;  %1100 = vmatpush1.bf16.msra.mxu0 %v1577_v1 }
 0x1e9   :  { %1058 = vmatprep.subr.bf16.mxu1 %v1582_v2  ;;  %1101 = vmatprep.subr.bf16.mxu0 %v1585_v3 }
 0x1ec   :  { %1059 = vmatpush1.bf16.msra.mxu1 %v1580_v4  ;;  %1102 = vmatpush1.bf16.msra.mxu0 %v1583_v5 }
 0x1ed   :  { %1060 = vmatprep.subr.bf16.mxu1 %v1588_v6  ;;  %1103 = vmatprep.subr.bf16.mxu0 %v1591_v7  ;;  %v833_v6 = vsub.s32 4, %v1927_v32 }
 0x1ef   :  { %v834_v7 = vrot.slane %v813_v48, %v833_v6 }
 0x1f0   :  { %1061 = vmatpush1.bf16.msra.mxu1 %v1586_v8  ;;  %1104 = vmatpush1.bf16.msra.mxu0 %v1589_v9 }
 0x1f1   :  { %1062 = vmatprep.subr.bf16.mxu1 %v1594_v10  ;;  %1105 = vmatprep.subr.bf16.mxu0 %v1597_v12 }
 0x1f4   :  { %1063 = vmatpush1.bf16.msra.mxu1 %v1592_v11  ;;  %1106 = vmatpush1.bf16.msra.mxu0 %v1595_v13 }
 0x1f5   :  { %1411 = vmatprep.subr.bf16.mxu1 %v1606_v0 }
 0x2aa   :  { %v698_v22 = vpop.f32.mrb[4].mxu1  ;;  %v739_v23 = vpop.f32.mrb[4].mxu0 }
 0x2ab   :  { %v699_v24 = vadd.f32 %v698_v22, %v327_v17  ;;  %v740_v25 = vadd.f32 %v739_v23, %v335_v19  ;;  %v700_v26 = vpop.f32.mrb[5].mxu1  ;;  %v741_v27 = vpop.f32.mrb[5].mxu0 }
 0x2ac   :  { %v701_v28 = vadd.f32 %v700_v26, %v331_v20  ;;  %v742_v29 = vadd.f32 %v741_v27, %v339_v21  ;;  %v702_v30 = vpop.f32.mrb[6].mxu1  ;;  %v743_v31 = vpop.f32.mrb[6].mxu0 }
 0x2ad   :  { %v764_v36 = vpack.c.bf16 %v740_v25, %v699_v24  ;;  %v703_v37 = vpop.f32.mrb[7].mxu1  ;;  %v744_v38 = vpop.f32.mrb[7].mxu0 }
 0x2ae   :  { %v1365_v39 = vpack.c.bf16 %v701_v28, %v699_v24  ;;  %v1366_v40 = vpack.c.bf16 %v742_v29, %v740_v25 }
 0x2af   :  { %1081 = vmatmul.mubr.bf16.vlgmr.msra.gmra.mrb[8].mxu1 %v764_v36  ;;  %1124 = vmatmul.mubr.bf16.vlgmr.msra.gmra.mrb[8].mxu0 %v764_v36 }
 0x2b0   :  { %762 = vst [vmem:[%s2111_s9] sm:$0xff] %v1365_v39  ;;  %763 = vst [vmem:[%s2111_s9 + $0x8] sm:$0xff] %v1366_v40  ;;  %1412 = vmatpush3.bf16.msra.mxu1 %v1598_v34  ;;  %1427 = vmatprep.mubr.msk.bf16.mxu1 %vm1607_vm0, %v1606_v0 }
 0x2b1   :  { %1413 = vmatprep.subr.bf16.mxu1 %v1606_v0 }
 0x2b4   :  { %1414 = vmatpush3.bf16.msra.mxu1 %v1599_v41 }
 0x2b5   :  { %1415 = vmatprep.subr.bf16.mxu1 %v1606_v0 }
 0x2b8   :  { %1416 = vmatpush3.bf16.msra.mxu1 %v1600_v42 }
 0x2b9   :  { %1417 = vmatprep.subr.bf16.mxu1 %v1606_v0 }
 0x2bc   :  { %1418 = vmatpush3.bf16.msra.mxu1 %v1601_v43 }
 0x2bd   :  { %1419 = vmatprep.subr.bf16.mxu1 %v1606_v0 }
 0x2c0   :  { %1420 = vmatpush3.bf16.msra.mxu1 %v1602_v44 }
 0x2c1   :  { %1421 = vmatprep.subr.bf16.mxu1 %v1606_v0 }
 0x2c4   :  { %1422 = vmatpush3.bf16.msra.mxu1 %v1603_v45 }
 0x2c5   :  { %1423 = vmatprep.subr.bf16.mxu1 %v1606_v0 }
 0x2c8   :  { %1424 = vmatpush3.bf16.msra.mxu1 %v1604_v46 }
 0x2c9   :  { %1425 = vmatprep.subr.bf16.mxu1 %v1606_v0 }
 0x2cc   :  { %1426 = vmatpush3.bf16.msra.mxu1 %v1605_v47 }
 0x2cf   :  { %1428 = vmatmul.mubr.bf16.vlgmr.msra.gmra.mrb[12].mxu1 %v764_v36 }
 0x382   :  { %v1082_v53 = vpop.f32.mrb[8].mxu1  ;;  %v1125_v54 = vpop.f32.mrb[8].mxu0 }
 0x383   :  { %v1083_v55 = vadd.f32 %v1082_v53, %v818_v49  ;;  %v1126_v56 = vadd.f32 %v1125_v54, %v826_v50  ;;  %v1084_v57 = vpop.f32.mrb[9].mxu1  ;;  %v1127_v58 = vpop.f32.mrb[9].mxu0 }
 0x384   :  { %v1085_v18 = vadd.f32 %v1084_v57, %v822_v51  ;;  %v1128_v0 = vadd.f32 %v1127_v58, %v830_v52  ;;  %v1086_v59 = vpop.f32.mrb[10].mxu1  ;;  %v1129_v60 = vpop.f32.mrb[10].mxu0 }
 0x385   :  { %v1087_v61 = vadd.f32 %v1086_v59, %v818_v49  ;;  %v1130_v62 = vadd.f32 %v1129_v60, %v826_v50  ;;  %v1088_v63 = vpop.f32.mrb[11].mxu1  ;;  %v1131_v1 = vpop.f32.mrb[11].mxu0 }
 0x386   :  { %v1367_v2 = vpack.c.bf16 %v1085_v18, %v1083_v55  ;;  %v1368_v33 = vpack.c.bf16 %v1128_v0, %v1126_v56  ;;  %v1089_v3 = vadd.f32 %v1088_v63, %v822_v51  ;;  %v1132_v4 = vadd.f32 %v1131_v1, %v830_v52 }
 0x388   :  { %1196 = vst [vmem:[%s2113_s10] sm:$0xff] %v1367_v2  ;;  %1197 = vst [vmem:[%s2113_s10 + $0x8] sm:$0xff] %v1368_v33  ;;  %v1370_v35 = vpack.c.bf16 %v1089_v3, %v1087_v61  ;;  %v1371_v5 = vpack.c.bf16 %v1132_v4, %v1130_v62 }
 0x38a   :  { %1362 = vst [vmem:[%s2113_s10 + $0x14] sm:$0xff] %v1370_v35  ;;  %1363 = vst [vmem:[%s2113_s10 + $0x1c] sm:$0xff] %v1371_v5 }
 0x3a2   :  { %v1168_v8 = vpop.f32.mrb[12].mxu1 }
 0x3a3   :  { %v1169_v9 = vadd.f32 %v1168_v8, %v834_v7  ;;  %v1429_v10 = vpop.f32.mrb[13].mxu1 }
 0x3a4   :  { %v1171_v11 = vpop.f32.mrb[14].mxu1 }
 0x3a5   :  { %v1369_v12 = vpack.c.bf16 %v1169_v9, %v1169_v9  ;;  %v1172_v13 = vadd.f32 %v1171_v11, %v834_v7  ;;  %v1430_v14 = vpop.f32.mrb[15].mxu1 }
 0x3a7   :  { %1198 = vst [vmem:[%s2113_s10 + $0x10] sm:$0xf] %v1369_v12  ;;  %v1372_v15 = vpack.c.bf16 %v1172_v13, %v1172_v13 }
 0x3a9   :  { %1364 = vst [vmem:[%s2113_s10 + $0x24] sm:$0xf] %v1372_v15 }

// kernel: shuffletrack_forward.16
= control target key start
LH: loop header
LB: loop body
LE: loop exit
PB: predicated region body
PF: predicated region fallthrough
CT: control target
= control target key end

     0   :  { %v1974_v18 = vmov 0   ;;  %vm237_vm0 = vcmask 523264   ;;  %s2596_s1 = inlined_call_operand.vmem [shape: bf16[128,64], index: 1, kind: input, shape index: {}]   ;;  %s2597_s0 = inlined_call_operand.vmem [shape: bf16[32,128], index: 0, kind: input, shape index: {}]   ;;  %s2598_s3 = inlined_call_operand.vmem [shape: bf16[64,256], index: 3, kind: input, shape index: {}]   ;;  %s2599_s5 = inlined_call_operand.vmem [shape: bf16[256,512], index: 5, kind: input, shape index: {}]   ;;  %s2600_s2 = inlined_call_operand.vmem [shape: f32[1,64], index: 2, kind: input, shape index: {}]   ;;  %s2601_s7 = inlined_call_operand.vmem [shape: bf16[128,640], index: 7, kind: input, shape index: {}]   ;;  %s2602_s4 = inlined_call_operand.vmem [shape: f32[1,256], index: 4, kind: input, shape index: {}]   ;;  %s2603_s6 = inlined_call_operand.vmem [shape: f32[1,512], index: 6, kind: input, shape index: {}]   ;;  %s2604_s9 = inlined_call_operand.vmem [shape: bf16[32,512], index: 9, kind: output, shape index: {0}]   ;;  %s2605_s8 = inlined_call_operand.vmem [shape: f32[1,640], index: 8, kind: input, shape index: {}]   ;;  %s2606_s10 = inlined_call_operand.vmem [shape: bf16[2,32,640], index: 10, kind: output, shape index: {1}]  }
   0x1   :  { %v1800_v0 = vld [vmem:[%s2596_s1] sm:$0xff]   ;;  %v1801_v1 = vld [vmem:[%s2596_s1 + $0x8] sm:$0xff]   ;;  %v1802_v2 = vld [vmem:[%s2596_s1 + $0x10] sm:$0xff]   ;;  %276 = vmatprep.mubr.bf16.mxu1 %v1974_v18 }
   0x2   :  { %1755 = vmatprep.subr.bf16.mxu0 %v1800_v0  ;;  %v1803_v3 = vld [vmem:[%s2596_s1 + $0x18] sm:$0xff]   ;;  %v1808_v4 = vld [vmem:[%s2597_s0] sm:$0xff]   ;;  %v1805_v10 = vld [vmem:[%s2596_s1 + $0x28] sm:$0xff]  }
   0x3   :  { %1756 = vmatpush3.bf16.msra.mxu0 %v1800_v0  ;;  %v1804_v5 = vld [vmem:[%s2596_s1 + $0x20] sm:$0xff]   ;;  %1771 = vmatprep.mubr.bf16.mxu0 %v1808_v4  ;;  %v1813_v8 = vld [vmem:[%s2598_s3 + $0x14] ss:$8 sps:$4 sm:$0xff]   ;;  %v1815_v9 = vld [vmem:[%s2598_s3 + $0x10] ss:$8 sps:$4 sm:$0xff]  }
   0x4   :  { %1757 = vmatprep.subr.bf16.mxu0 %v1801_v1  ;;  %v1810_v6 = vld [vmem:[%s2598_s3 + $0x4] ss:$8 sps:$4 sm:$0xff]   ;;  %v1812_v7 = vld [vmem:[%s2598_s3] ss:$8 sps:$4 sm:$0xff]   ;;  %v1806_v11 = vld [vmem:[%s2596_s1 + $0x30] sm:$0xff]  }
   0x5   :  { %244 = vmatprep.subr.bf16.mxu1 %v1810_v6  ;;  %v1807_v12 = vld [vmem:[%s2596_s1 + $0x38] sm:$0xff]   ;;  %v1809_v13 = vld [vmem:[%s2597_s0 + $0x8] sm:$0xff]   ;;  %v1824_v19 = vld [vmem:[%s2599_s5 + $0x4] ss:$16 sps:$4 sm:$0xff]  }
   0x6   :  { %245 = vmatpush1.bf16.msra.mxu1 %v1812_v7  ;;  %v1816_v14 = vld [vmem:[%s2598_s3 + $0x24] ss:$8 sps:$4 sm:$0xff]   ;;  %v1818_v15 = vld [vmem:[%s2598_s3 + $0x20] ss:$8 sps:$4 sm:$0xff]   ;;  %v1819_v16 = vld [vmem:[%s2598_s3 + $0x34] ss:$8 sps:$4 sm:$0xff]  }
   0x7   :  { %1758 = vmatpush3.bf16.msra.mxu0 %v1801_v1  ;;  %246 = vmatprep.subr.bf16.mxu1 %v1813_v8  ;;  %v1821_v17 = vld [vmem:[%s2598_s3 + $0x30] ss:$8 sps:$4 sm:$0xff]   ;;  %v1827_v21 = vld [vmem:[%s2599_s5 + $0xc] ss:$16 sps:$4 sm:$0xff]   ;;  %v1532_v48 = vld [vmem:[%s2600_s2] ss:$0 sm:$0xff] }
   0x8   :  { %1759 = vmatprep.subr.bf16.mxu0 %v1802_v2  ;;  %v1825_v20 = vld [vmem:[%s2599_s5 + $0x8] ss:$16 sps:$4 sm:$0xff]   ;;  %v1833_v23 = vld [vmem:[%s2599_s5 + $0x2c] ss:$16 sps:$4 sm:$0xff]   ;;  %v1822_v62 = vld [vmem:[%s2599_s5] ss:$16 sps:$4 sm:$0xff]  }
   0x9   :  { %v1831_v22 = vld [vmem:[%s2599_s5 + $0x28] ss:$16 sps:$4 sm:$0xff]   ;;  %v1839_v24 = vld [vmem:[%s2599_s5 + $0x4c] ss:$16 sps:$4 sm:$0xff]   ;;  %v1830_v0 = vld [vmem:[%s2599_s5 + $0x24] ss:$16 sps:$4 sm:$0xff]  }
   0xa   :  { %247 = vmatpush1.bf16.msra.mxu1 %v1815_v9  ;;  %v1837_v25 = vld [vmem:[%s2599_s5 + $0x48] ss:$16 sps:$4 sm:$0xff]   ;;  %v1845_v26 = vld [vmem:[%s2599_s5 + $0x6c] ss:$16 sps:$4 sm:$0xff]   ;;  %v1828_v1 = vld [vmem:[%s2599_s5 + $0x20] ss:$16 sps:$4 sm:$0xff]  }
   0xb   :  { %1760 = vmatpush3.bf16.msra.mxu0 %v1802_v2  ;;  %248 = vmatprep.subr.bf16.mxu1 %v1816_v14  ;;  %v1843_v27 = vld [vmem:[%s2599_s5 + $0x68] ss:$16 sps:$4 sm:$0xff]   ;;  %v1851_v28 = vld [vmem:[%s2599_s5 + $0x8c] ss:$16 sps:$4 sm:$0xff]   ;;  %v1836_v2 = vld [vmem:[%s2599_s5 + $0x44] ss:$16 sps:$4 sm:$0xff]  }
   0xc   :  { %1761 = vmatprep.subr.bf16.mxu0 %v1803_v3  ;;  %v1849_v29 = vld [vmem:[%s2599_s5 + $0x88] ss:$16 sps:$4 sm:$0xff]   ;;  %v1857_v30 = vld [vmem:[%s2599_s5 + $0xac] ss:$16 sps:$4 sm:$0xff]   ;;  %v1842_v4 = vld [vmem:[%s2599_s5 + $0x64] ss:$16 sps:$4 sm:$0xff]  }
   0xd   :  { %v1855_v31 = vld [vmem:[%s2599_s5 + $0xa8] ss:$16 sps:$4 sm:$0xff]   ;;  %v1863_v32 = vld [vmem:[%s2599_s5 + $0xcc] ss:$16 sps:$4 sm:$0xff]   ;;  %v1848_v6 = vld [vmem:[%s2599_s5 + $0x84] ss:$16 sps:$4 sm:$0xff]  }
   0xe   :  { %249 = vmatpush1.bf16.msra.mxu1 %v1818_v15  ;;  %v1861_v33 = vld [vmem:[%s2599_s5 + $0xc8] ss:$16 sps:$4 sm:$0xff]   ;;  %v1869_v34 = vld [vmem:[%s2599_s5 + $0xec] ss:$16 sps:$4 sm:$0xff]   ;;  %v1846_v7 = vld [vmem:[%s2599_s5 + $0x80] ss:$16 sps:$4 sm:$0xff]  }
   0xf   :  { %1762 = vmatpush3.bf16.msra.mxu0 %v1803_v3  ;;  %250 = vmatprep.subr.bf16.mxu1 %v1819_v16  ;;  %v1867_v35 = vld [vmem:[%s2599_s5 + $0xe8] ss:$16 sps:$4 sm:$0xff]   ;;  %v1875_v36 = vld [vmem:[%s2599_s5 + $0x10c] ss:$16 sps:$4 sm:$0xff]   ;;  %v1834_v3 = vld [vmem:[%s2599_s5 + $0x40] ss:$16 sps:$4 sm:$0xff]  }
  0x10   :  { %1763 = vmatprep.subr.bf16.mxu0 %v1804_v5  ;;  %v1873_v37 = vld [vmem:[%s2599_s5 + $0x108] ss:$16 sps:$4 sm:$0xff]   ;;  %v1881_v38 = vld [vmem:[%s2599_s5 + $0x12c] ss:$16 sps:$4 sm:$0xff]   ;;  %v1854_v8 = vld [vmem:[%s2599_s5 + $0xa4] ss:$16 sps:$4 sm:$0xff]  }
  0x11   :  { %v1879_v39 = vld [vmem:[%s2599_s5 + $0x128] ss:$16 sps:$4 sm:$0xff]   ;;  %v1887_v40 = vld [vmem:[%s2599_s5 + $0x14c] ss:$16 sps:$4 sm:$0xff]   ;;  %v1852_v9 = vld [vmem:[%s2599_s5 + $0xa0] ss:$16 sps:$4 sm:$0xff]  }
  0x12   :  { %251 = vmatpush1.bf16.msra.mxu1 %v1821_v17  ;;  %v1885_v41 = vld [vmem:[%s2599_s5 + $0x148] ss:$16 sps:$4 sm:$0xff]   ;;  %v1893_v42 = vld [vmem:[%s2599_s5 + $0x16c] ss:$16 sps:$4 sm:$0xff]   ;;  %v1872_v14 = vld [vmem:[%s2599_s5 + $0x104] ss:$16 sps:$4 sm:$0xff]  }
  0x13   :  { %1764 = vmatpush3.bf16.msra.mxu0 %v1804_v5  ;;  %715 = vmatprep.subr.bf16.mxu1 %v1824_v19  ;;  %v1891_v43 = vld [vmem:[%s2599_s5 + $0x168] ss:$16 sps:$4 sm:$0xff]   ;;  %v1899_v44 = vld [vmem:[%s2599_s5 + $0x18c] ss:$16 sps:$4 sm:$0xff]   ;;  %v1840_v5 = vld [vmem:[%s2599_s5 + $0x60] ss:$16 sps:$4 sm:$0xff]  }
  0x14   :  { %1765 = vmatprep.subr.bf16.mxu0 %v1805_v10  ;;  %v1897_v45 = vld [vmem:[%s2599_s5 + $0x188] ss:$16 sps:$4 sm:$0xff]   ;;  %v1905_v46 = vld [vmem:[%s2599_s5 + $0x1ac] ss:$16 sps:$4 sm:$0xff]   ;;  %v1870_v15 = vld [vmem:[%s2599_s5 + $0x100] ss:$16 sps:$4 sm:$0xff]  }
  0x15   :  { %v1903_v47 = vld [vmem:[%s2599_s5 + $0x1a8] ss:$16 sps:$4 sm:$0xff]   ;;  %v1878_v16 = vld [vmem:[%s2599_s5 + $0x124] ss:$16 sps:$4 sm:$0xff]   ;;  %v1876_v17 = vld [vmem:[%s2599_s5 + $0x120] ss:$16 sps:$4 sm:$0xff]  }
  0x16   :  { %v1884_v19 = vld [vmem:[%s2599_s5 + $0x144] ss:$16 sps:$4 sm:$0xff]  }
  0x17   :  { %1766 = vmatpush3.bf16.msra.mxu0 %v1805_v10  ;;  %v1860_v10 = vld [vmem:[%s2599_s5 + $0xc4] ss:$16 sps:$4 sm:$0xff]  }
  0x18   :  { %1767 = vmatprep.subr.bf16.mxu0 %v1806_v11 }
  0x1b   :  { %1768 = vmatpush3.bf16.msra.mxu0 %v1806_v11  ;;  %v1858_v11 = vld [vmem:[%s2599_s5 + $0xc0] ss:$16 sps:$4 sm:$0xff]  }
  0x1c   :  { %1769 = vmatprep.subr.bf16.mxu0 %v1807_v12 }
  0x1f   :  { %1770 = vmatpush3.bf16.msra.mxu0 %v1807_v12  ;;  %v1866_v12 = vld [vmem:[%s2599_s5 + $0xe4] ss:$16 sps:$4 sm:$0xff]  }
  0x20   :  { %768 = vmatprep.subr.bf16.mxu0 %v1827_v21  ;;  %v1890_v21 = vld [vmem:[%s2599_s5 + $0x164] ss:$16 sps:$4 sm:$0xff]  }
  0x22   :  { %1772 = vmatmul.mubr.bf16.vlgmr.msra.gmra.mrb[0].mxu0 %v1809_v13  ;;  %v1864_v13 = vld [vmem:[%s2599_s5 + $0xe0] ss:$16 sps:$4 sm:$0xff]  }
  0x23   :  { %769 = vmatpush1.bf16.msra.mxu0 %v1825_v20  ;;  %v1882_v20 = vld [vmem:[%s2599_s5 + $0x140] ss:$16 sps:$4 sm:$0xff]  }
  0x24   :  { %770 = vmatprep.subr.bf16.mxu0 %v1833_v23  ;;  %v1896_v23 = vld [vmem:[%s2599_s5 + $0x184] ss:$16 sps:$4 sm:$0xff]  }
  0x27   :  { %771 = vmatpush1.bf16.msra.mxu0 %v1831_v22  ;;  %v1888_v22 = vld [vmem:[%s2599_s5 + $0x160] ss:$16 sps:$4 sm:$0xff]  }
  0x28   :  { %772 = vmatprep.subr.bf16.mxu0 %v1839_v24  ;;  %v1894_v24 = vld [vmem:[%s2599_s5 + $0x180] ss:$16 sps:$4 sm:$0xff]  }
  0x2b   :  { %773 = vmatpush1.bf16.msra.mxu0 %v1837_v25  ;;  %v1902_v25 = vld [vmem:[%s2599_s5 + $0x1a4] ss:$16 sps:$4 sm:$0xff]  }
  0x2c   :  { %774 = vmatprep.subr.bf16.mxu0 %v1845_v26  ;;  %v1900_v26 = vld [vmem:[%s2599_s5 + $0x1a0] ss:$16 sps:$4 sm:$0xff]  }
  0x2f   :  { %775 = vmatpush1.bf16.msra.mxu0 %v1843_v27  ;;  %v1908_v27 = vld [vmem:[%s2599_s5 + $0x1c4] ss:$16 sps:$4 sm:$0xff]  }
  0x30   :  { %776 = vmatprep.subr.bf16.mxu0 %v1851_v28  ;;  %v1911_v28 = vld [vmem:[%s2599_s5 + $0x1cc] ss:$16 sps:$4 sm:$0xff]  }
  0x33   :  { %777 = vmatpush1.bf16.msra.mxu0 %v1849_v29  ;;  %v1906_v29 = vld [vmem:[%s2599_s5 + $0x1c0] ss:$16 sps:$4 sm:$0xff]  }
  0x34   :  { %778 = vmatprep.subr.bf16.mxu0 %v1857_v30  ;;  %v1909_v30 = vld [vmem:[%s2599_s5 + $0x1c8] ss:$16 sps:$4 sm:$0xff]  }
  0x37   :  { %779 = vmatpush1.bf16.msra.mxu0 %v1855_v31  ;;  %v1914_v31 = vld [vmem:[%s2599_s5 + $0x1e4] ss:$16 sps:$4 sm:$0xff]  }
  0x38   :  { %780 = vmatprep.subr.bf16.mxu0 %v1863_v32  ;;  %v1917_v32 = vld [vmem:[%s2599_s5 + $0x1ec] ss:$16 sps:$4 sm:$0xff]  }
  0x3b   :  { %781 = vmatpush1.bf16.msra.mxu0 %v1861_v33  ;;  %v1912_v33 = vld [vmem:[%s2599_s5 + $0x1e0] ss:$16 sps:$4 sm:$0xff]  }
  0x3c   :  { %782 = vmatprep.subr.bf16.mxu0 %v1869_v34  ;;  %v1915_v34 = vld [vmem:[%s2599_s5 + $0x1e8] ss:$16 sps:$4 sm:$0xff]  }
  0x3f   :  { %783 = vmatpush1.bf16.msra.mxu0 %v1867_v35  ;;  %v1920_v35 = vld [vmem:[%s2601_s7 + $0x4] ss:$20 sps:$4 sm:$0xff]  }
  0x40   :  { %784 = vmatprep.subr.bf16.mxu0 %v1875_v36  ;;  %v1923_v36 = vld [vmem:[%s2601_s7 + $0xc] ss:$20 sps:$4 sm:$0xff]  }
  0x43   :  { %785 = vmatpush1.bf16.msra.mxu0 %v1873_v37  ;;  %v187_v37 = vlaneseq }
  0x44   :  { %786 = vmatprep.subr.bf16.mxu0 %v1881_v38 }
  0x45   :  { %v2287_v38 = vshrl.u32 %v187_v37, 7  ;;  %v1960_v37 = vld [vmem:[%s2601_s7 + $0x118] ss:$20 sps:$4 sm:$0xff]  }
  0x47   :  { %787 = vmatpush1.bf16.msra.mxu0 %v1879_v39  ;;  %v2290_v39 = vsub.s32 0, %v2287_v38 }
  0x48   :  { %788 = vmatprep.subr.bf16.mxu0 %v1887_v40  ;;  %v185_v40 = vld [vmem:[%s2602_s4] sm:$0x3] }
  0x4b   :  { %789 = vmatpush1.bf16.msra.mxu0 %v1885_v41  ;;  %v2296_v41 = vsub.s32 1, %v2287_v38 }
  0x4c   :  { %790 = vmatprep.subr.bf16.mxu0 %v1893_v42  ;;  %v190_v42 = vrot.slane %v185_v40, %v2290_v39 }
  0x4f   :  { %791 = vmatpush1.bf16.msra.mxu0 %v1891_v43  ;;  %v194_v43 = vrot.slane %v185_v40, %v2296_v41  ;;  %v1963_v40 = vld [vmem:[%s2601_s7 + $0x120] ss:$20 sps:$4 sm:$0xff]  }
  0x50   :  { %792 = vmatprep.subr.bf16.mxu0 %v1899_v44 }
  0x53   :  { %793 = vmatpush1.bf16.msra.mxu0 %v1897_v45 }
  0x54   :  { %794 = vmatprep.subr.bf16.mxu0 %v1905_v46 }
  0x57   :  { %795 = vmatpush1.bf16.msra.mxu0 %v1903_v47 }
  0x58   :  { %796 = vmatprep.subr.bf16.mxu0 %v1911_v28  ;;  %v1953_v28 = vld [vmem:[%s2601_s7 + $0xd4] ss:$20 sps:$4 sm:$0xff]  }
  0x5b   :  { %797 = vmatpush1.bf16.msra.mxu0 %v1909_v30  ;;  %v1951_v30 = vld [vmem:[%s2601_s7 + $0xd0] ss:$20 sps:$4 sm:$0xff]  }
  0x5c   :  { %798 = vmatprep.subr.bf16.mxu0 %v1917_v32  ;;  %v1959_v32 = vld [vmem:[%s2601_s7 + $0xfc] ss:$20 sps:$4 sm:$0xff]  }
  0x5f   :  { %799 = vmatpush1.bf16.msra.mxu0 %v1915_v34  ;;  %v1957_v34 = vld [vmem:[%s2601_s7 + $0xf8] ss:$20 sps:$4 sm:$0xff]  }
  0x60   :  { %1233 = vmatprep.subr.bf16.mxu0 %v1923_v36  ;;  %v1965_v36 = vld [vmem:[%s2601_s7 + $0x124] ss:$20 sps:$4 sm:$0xff]  }
  0xf5   :  { %v1773_v49 = vpop.f32.mrb[0].mxu0 }
  0xf6   :  { %v165_v50 = vadd.f32 %v1773_v49, %v1532_v48  ;;  %v156_v51 = vpop.f32.mrb[1].mxu0 }
  0xf7   :  { %v157_v52 = vadd.f32 %v1532_v48, %v156_v51  ;;  %v1774_v53 = vpop.f32.mrb[2].mxu0 }
  0xf8   :  { %v168_v54 = vadd.f32 %v1774_v53, %v1532_v48  ;;  %v159_v55 = vpop.f32.mrb[3].mxu0  ;;  %v173_v57 = vmax.f32 %v165_v50, 0.0 }
  0xf9   :  { %v160_v56 = vadd.f32 %v1532_v48, %v159_v55  ;;  %v171_v59 = vmax.f32 %v157_v52, 0.0 }
  0xfa   :  { %v174_v58 = vmax.f32 %v168_v54, 0.0 }
  0xfb   :  { %v172_v60 = vmax.f32 %v160_v56, 0.0 }
  0xfc   :  { %v176_v61 = vpack.c.bf16 %v174_v58, %v173_v57 }
  0xfd   :  { %v175_v63 = vpack.c.bf16 %v172_v60, %v171_v59  ;;  %v1918_v59 = vld [vmem:[%s2601_s7] ss:$20 sps:$4 sm:$0xff]   ;;  %v1921_v60 = vld [vmem:[%s2601_s7 + $0x8] ss:$20 sps:$4 sm:$0xff]  }
  0xff   :  { %1551 = vmatmul.mubr.msk.bf16.vlgmr.msra.gmra.mrb[0].mxu1 %vm237_vm0, %v175_v63  ;;  %v1926_v63 = vld [vmem:[%s2601_s7 + $0x2c] ss:$20 sps:$4 sm:$0xff]  }
 0x100   :  { %286 = vmatprep.mubr.bf16.mxu1 %v1974_v18  ;;  %716 = vmatpush1.bf16.msra.mxu1 %v1822_v62 }
 0x101   :  { %717 = vmatprep.subr.bf16.mxu1 %v1830_v0  ;;  %v1929_v0 = vld [vmem:[%s2601_s7 + $0x34] ss:$20 sps:$4 sm:$0xff]  }
 0x104   :  { %718 = vmatpush1.bf16.msra.mxu1 %v1828_v1 }
 0x105   :  { %719 = vmatprep.subr.bf16.mxu1 %v1836_v2 }
 0x107   :  { %1552 = vmatmul.mubr.msk.bf16.gmra.mrb[4].mxu1 %vm237_vm0, %v176_v61 }
 0x108   :  { %720 = vmatpush1.bf16.msra.mxu1 %v1834_v3 }
 0x109   :  { %721 = vmatprep.subr.bf16.mxu1 %v1842_v4 }
 0x10c   :  { %722 = vmatpush1.bf16.msra.mxu1 %v1840_v5 }
 0x10d   :  { %723 = vmatprep.subr.bf16.mxu1 %v1848_v6  ;;  %v1924_v6 = vld [vmem:[%s2601_s7 + $0x28] ss:$20 sps:$4 sm:$0xff]  }
 0x110   :  { %724 = vmatpush1.bf16.msra.mxu1 %v1846_v7  ;;  %v1927_v7 = vld [vmem:[%s2601_s7 + $0x30] ss:$20 sps:$4 sm:$0xff]  }
 0x111   :  { %725 = vmatprep.subr.bf16.mxu1 %v1854_v8 }
 0x114   :  { %726 = vmatpush1.bf16.msra.mxu1 %v1852_v9 }
 0x115   :  { %727 = vmatprep.subr.bf16.mxu1 %v1860_v10  ;;  %v1932_v10 = vld [vmem:[%s2601_s7 + $0x54] ss:$20 sps:$4 sm:$0xff]  }
 0x118   :  { %728 = vmatpush1.bf16.msra.mxu1 %v1858_v11  ;;  %v1935_v11 = vld [vmem:[%s2601_s7 + $0x5c] ss:$20 sps:$4 sm:$0xff]  }
 0x119   :  { %729 = vmatprep.subr.bf16.mxu1 %v1866_v12 }
 0x11c   :  { %730 = vmatpush1.bf16.msra.mxu1 %v1864_v13 }
 0x11d   :  { %731 = vmatprep.subr.bf16.mxu1 %v1872_v14 }
 0x120   :  { %732 = vmatpush1.bf16.msra.mxu1 %v1870_v15 }
 0x121   :  { %733 = vmatprep.subr.bf16.mxu1 %v1878_v16  ;;  %v1930_v16 = vld [vmem:[%s2601_s7 + $0x50] ss:$20 sps:$4 sm:$0xff]  }
 0x124   :  { %734 = vmatpush1.bf16.msra.mxu1 %v1876_v17  ;;  %v1933_v17 = vld [vmem:[%s2601_s7 + $0x58] ss:$20 sps:$4 sm:$0xff]  }
 0x125   :  { %735 = vmatprep.subr.bf16.mxu1 %v1884_v19  ;;  %v1938_v19 = vld [vmem:[%s2601_s7 + $0x7c] ss:$20 sps:$4 sm:$0xff]  }
 0x128   :  { %736 = vmatpush1.bf16.msra.mxu1 %v1882_v20  ;;  %v1941_v20 = vld [vmem:[%s2601_s7 + $0x84] ss:$20 sps:$4 sm:$0xff]  }
 0x129   :  { %737 = vmatprep.subr.bf16.mxu1 %v1890_v21  ;;  %v1936_v21 = vld [vmem:[%s2601_s7 + $0x78] ss:$20 sps:$4 sm:$0xff]  }
 0x12c   :  { %738 = vmatpush1.bf16.msra.mxu1 %v1888_v22  ;;  %v1939_v22 = vld [vmem:[%s2601_s7 + $0x80] ss:$20 sps:$4 sm:$0xff]  }
 0x12d   :  { %739 = vmatprep.subr.bf16.mxu1 %v1896_v23  ;;  %v1944_v23 = vld [vmem:[%s2601_s7 + $0xa4] ss:$20 sps:$4 sm:$0xff]  }
 0x130   :  { %740 = vmatpush1.bf16.msra.mxu1 %v1894_v24  ;;  %v1947_v24 = vld [vmem:[%s2601_s7 + $0xac] ss:$20 sps:$4 sm:$0xff]  }
 0x131   :  { %741 = vmatprep.subr.bf16.mxu1 %v1902_v25  ;;  %v1942_v25 = vld [vmem:[%s2601_s7 + $0xa0] ss:$20 sps:$4 sm:$0xff]  }
 0x134   :  { %742 = vmatpush1.bf16.msra.mxu1 %v1900_v26  ;;  %v1945_v26 = vld [vmem:[%s2601_s7 + $0xa8] ss:$20 sps:$4 sm:$0xff]  }
 0x135   :  { %743 = vmatprep.subr.bf16.mxu1 %v1908_v27  ;;  %v1950_v27 = vld [vmem:[%s2601_s7 + $0xcc] ss:$20 sps:$4 sm:$0xff]  }
 0x138   :  { %744 = vmatpush1.bf16.msra.mxu1 %v1906_v29  ;;  %v1948_v29 = vld [vmem:[%s2601_s7 + $0xc8] ss:$20 sps:$4 sm:$0xff]  }
 0x139   :  { %745 = vmatprep.subr.bf16.mxu1 %v1914_v31  ;;  %v1956_v31 = vld [vmem:[%s2601_s7 + $0xf4] ss:$20 sps:$4 sm:$0xff]  }
 0x13c   :  { %746 = vmatpush1.bf16.msra.mxu1 %v1912_v33  ;;  %v1954_v33 = vld [vmem:[%s2601_s7 + $0xf0] ss:$20 sps:$4 sm:$0xff]  }
 0x13d   :  { %1160 = vmatprep.subr.bf16.mxu1 %v1920_v35  ;;  %v1962_v35 = vld [vmem:[%s2601_s7 + $0x11c] ss:$20 sps:$4 sm:$0xff]  }
 0x1d2   :  { %v278_v44 = vpop.f32.mrb[0].mxu1 }
 0x1d3   :  { %v279_v45 = vadd.f32 %v278_v44, %v190_v42  ;;  %v280_v46 = vpop.f32.mrb[1].mxu1  ;;  %v373_v44 = vld [vmem:[%s2603_s6] sm:$0xf] }
 0x1d4   :  { %v281_v47 = vadd.f32 %v280_v46, %v194_v43  ;;  %v282_v48 = vpop.f32.mrb[2].mxu1  ;;  %v378_v46 = vrot.slane %v373_v44, %v2290_v39 }
 0x1d5   :  { %v283_v49 = vadd.f32 %v282_v48, %v190_v42  ;;  %v284_v50 = vpop.f32.mrb[3].mxu1  ;;  %v297_v52 = vmax.f32 %v279_v45, 0.0  ;;  %v389_v45 = vsub.s32 3, %v2287_v38  ;;  %v382_v48 = vrot.slane %v373_v44, %v2296_v41 }
 0x1d6   :  { %v285_v51 = vadd.f32 %v284_v50, %v194_v43  ;;  %v298_v54 = vmax.f32 %v281_v47, 0.0 }
 0x1d7   :  { %v299_v53 = vmax.f32 %v283_v49, 0.0  ;;  %v390_v49 = vrot.slane %v373_v44, %v389_v45 }
 0x1d8   :  { %v300_v55 = vmax.f32 %v285_v51, 0.0 }
 0x1d9   :  { %v305_v56 = vpack.c.bf16 %v299_v53, %v297_v52 }
 0x1da   :  { %v306_v57 = vpack.c.bf16 %v300_v55, %v298_v54  ;;  %v288_v58 = vpop.f32.mrb[4].mxu1 }
 0x1db   :  { %v289_v61 = vadd.f32 %v288_v58, %v190_v42  ;;  %v290_v62 = vpop.f32.mrb[5].mxu1 }
 0x1dc   :  { %v291_v1 = vadd.f32 %v290_v62, %v194_v43  ;;  %v292_v2 = vpop.f32.mrb[6].mxu1  ;;  %747 = vmatprep.mubr.bf16.mxu1 %v306_v57  ;;  %800 = vmatprep.mubr.bf16.mxu0 %v306_v57 }
 0x1dd   :  { %v293_v3 = vadd.f32 %v292_v2, %v190_v42  ;;  %v294_v4 = vpop.f32.mrb[7].mxu1  ;;  %748 = vmatmul.mubr.bf16.vlgmr.msra.gmra.mrb[8].mxu1 %v305_v56  ;;  %801 = vmatmul.mubr.bf16.vlgmr.msra.gmra.mrb[4].mxu0 %v305_v56  ;;  %v301_v8 = vmax.f32 %v289_v61, 0.0  ;;  %v1966_v42 = vld [vmem:[%s2601_s7 + $0x10] ss:$20 sps:$4 sm:$0xff]  }
 0x1de   :  { %v295_v5 = vadd.f32 %v294_v4, %v194_v43  ;;  %1161 = vmatpush1.bf16.msra.mxu1 %v1918_v59  ;;  %1234 = vmatpush1.bf16.msra.mxu0 %v1921_v60  ;;  %v302_v12 = vmax.f32 %v291_v1, 0.0  ;;  %v385_v43 = vsub.s32 2, %v2287_v38 }
 0x1df   :  { %v303_v9 = vmax.f32 %v293_v3, 0.0  ;;  %1162 = vmatprep.subr.bf16.mxu1 %v1926_v63  ;;  %1235 = vmatprep.subr.bf16.mxu0 %v1929_v0 }
 0x1e0   :  { %v304_v13 = vmax.f32 %v295_v5, 0.0  ;;  %v386_v47 = vrot.slane %v373_v44, %v385_v43 }
 0x1e1   :  { %v307_v14 = vpack.c.bf16 %v303_v9, %v301_v8 }
 0x1e2   :  { %v308_v15 = vpack.c.bf16 %v304_v13, %v302_v12  ;;  %1163 = vmatpush1.bf16.msra.mxu1 %v1924_v6  ;;  %1236 = vmatpush1.bf16.msra.mxu0 %v1927_v7  ;;  %v1967_v6 = vld [vmem:[%s2601_s7 + $0x38] ss:$20 sps:$4 sm:$0xff]  }
 0x1e3   :  { %1164 = vmatprep.subr.bf16.mxu1 %v1932_v10  ;;  %1237 = vmatprep.subr.bf16.mxu0 %v1935_v11 }
 0x1e4   :  { %757 = vmatprep.mubr.bf16.mxu1 %v308_v15  ;;  %810 = vmatprep.mubr.bf16.mxu0 %v308_v15  ;;  %v1968_v15 = vld [vmem:[%s2601_s7 + $0x60] ss:$20 sps:$4 sm:$0xff]  }
 0x1e5   :  { %758 = vmatmul.mubr.bf16.gmra.mrb[12].mxu1 %v307_v14  ;;  %811 = vmatmul.mubr.bf16.gmra.mrb[8].mxu0 %v307_v14 }
 0x1e6   :  { %1165 = vmatpush1.bf16.msra.mxu1 %v1930_v16  ;;  %1238 = vmatpush1.bf16.msra.mxu0 %v1933_v17 }
 0x1e7   :  { %1166 = vmatprep.subr.bf16.mxu1 %v1938_v19  ;;  %1239 = vmatprep.subr.bf16.mxu0 %v1941_v20 }
 0x1e8   :  { %1192 = vmatprep.mubr.bf16.mxu1 %v1974_v18  ;;  %1265 = vmatprep.mubr.bf16.mxu0 %v1974_v18 }
 0x1ea   :  { %1167 = vmatpush1.bf16.msra.mxu1 %v1936_v21  ;;  %1240 = vmatpush1.bf16.msra.mxu0 %v1939_v22 }
 0x1eb   :  { %1168 = vmatprep.subr.bf16.mxu1 %v1944_v23  ;;  %1241 = vmatprep.subr.bf16.mxu0 %v1947_v24 }
 0x1ee   :  { %1169 = vmatpush1.bf16.msra.mxu1 %v1942_v25  ;;  %1242 = vmatpush1.bf16.msra.mxu0 %v1945_v26 }
 0x1ef   :  { %1170 = vmatprep.subr.bf16.mxu1 %v1950_v27  ;;  %1243 = vmatprep.subr.bf16.mxu0 %v1953_v28 }
 0x1f2   :  { %1171 = vmatpush1.bf16.msra.mxu1 %v1948_v29  ;;  %1244 = vmatpush1.bf16.msra.mxu0 %v1951_v30 }
 0x1f3   :  { %1172 = vmatprep.subr.bf16.mxu1 %v1956_v31  ;;  %1245 = vmatprep.subr.bf16.mxu0 %v1959_v32  ;;  %v1969_v31 = vld [vmem:[%s2601_s7 + $0x88] ss:$20 sps:$4 sm:$0xff]  }
 0x1f6   :  { %1173 = vmatpush1.bf16.msra.mxu1 %v1954_v33  ;;  %1246 = vmatpush1.bf16.msra.mxu0 %v1957_v34  ;;  %v1970_v34 = vld [vmem:[%s2601_s7 + $0xb0] ss:$20 sps:$4 sm:$0xff]  }
 0x1f7   :  { %1174 = vmatprep.subr.bf16.mxu1 %v1962_v35  ;;  %1247 = vmatprep.subr.bf16.mxu0 %v1965_v36  ;;  %v1971_v35 = vld [vmem:[%s2601_s7 + $0xd8] ss:$20 sps:$4 sm:$0xff]   ;;  %v1972_v36 = vld [vmem:[%s2601_s7 + $0x100] ss:$20 sps:$4 sm:$0xff]  }
 0x1fa   :  { %1175 = vmatpush1.bf16.msra.mxu1 %v1960_v37  ;;  %1248 = vmatpush1.bf16.msra.mxu0 %v1963_v40  ;;  %v1973_v37 = vld [vmem:[%s2601_s7 + $0x128] ss:$20 sps:$4 sm:$0xff]  }
 0x1fb   :  { %1775 = vmatprep.subr.bf16.mxu1 %v1966_v42 }
 0x2b0   :  { %v749_v50 = vpop.f32.mrb[8].mxu1  ;;  %v802_v51 = vpop.f32.mrb[4].mxu0 }
 0x2b1   :  { %v750_v52 = vadd.f32 %v749_v50, %v378_v46  ;;  %v803_v53 = vadd.f32 %v802_v51, %v386_v47  ;;  %v751_v54 = vpop.f32.mrb[9].mxu1  ;;  %v804_v55 = vpop.f32.mrb[5].mxu0 }
 0x2b2   :  { %v752_v56 = vadd.f32 %v751_v54, %v382_v48  ;;  %v805_v57 = vadd.f32 %v804_v55, %v390_v49  ;;  %v753_v58 = vpop.f32.mrb[10].mxu1  ;;  %v806_v59 = vpop.f32.mrb[6].mxu0 }
 0x2b3   :  { %v754_v60 = vadd.f32 %v753_v58, %v378_v46  ;;  %v807_v61 = vadd.f32 %v806_v59, %v386_v47  ;;  %v755_v62 = vpop.f32.mrb[11].mxu1  ;;  %v808_v63 = vpop.f32.mrb[7].mxu0 }
 0x2b4   :  { %v1701_v0 = vpack.c.bf16 %v752_v56, %v750_v52  ;;  %v1702_v1 = vpack.c.bf16 %v805_v57, %v803_v53  ;;  %v756_v2 = vadd.f32 %v755_v62, %v382_v48  ;;  %v809_v3 = vadd.f32 %v808_v63, %v390_v49 }
 0x2b5   :  { %v2406_v4 = vpack.c.bf16 %v754_v60, %v750_v52  ;;  %v2408_v5 = vpack.c.bf16 %v807_v61, %v803_v53 }
 0x2b6   :  { %869 = vst [vmem:[%s2604_s9] sm:$0xff] %v1701_v0  ;;  %870 = vst [vmem:[%s2604_s9 + $0x8] sm:$0xff] %v1702_v1  ;;  %v1703_v7 = vpack.c.bf16 %v756_v2, %v754_v60  ;;  %v1704_v8 = vpack.c.bf16 %v809_v3, %v807_v61 }
 0x2b7   :  { %1193 = vmatmul.mubr.bf16.vlgmr.msra.gmra.mrb[16].mxu1 %v2406_v4  ;;  %1266 = vmatmul.mubr.bf16.vlgmr.msra.gmra.mrb[12].mxu0 %v2406_v4 }
 0x2b8   :  { %871 = vst [vmem:[%s2604_s9 + $0x10] sm:$0xff] %v1703_v7  ;;  %872 = vst [vmem:[%s2604_s9 + $0x18] sm:$0xff] %v1704_v8  ;;  %1776 = vmatpush3.bf16.msra.mxu1 %v1966_v42  ;;  %v759_v9 = vpop.f32.mrb[12].mxu1  ;;  %v812_v10 = vpop.f32.mrb[8].mxu0  ;;  %1202 = vmatprep.mubr.bf16.mxu1 %v1974_v18 }
 0x2b9   :  { %v760_v11 = vadd.f32 %v759_v9, %v378_v46  ;;  %v813_v12 = vadd.f32 %v812_v10, %v386_v47  ;;  %v761_v13 = vpop.f32.mrb[13].mxu1  ;;  %v814_v14 = vpop.f32.mrb[9].mxu0  ;;  %1777 = vmatprep.subr.bf16.mxu1 %v1967_v6  ;;  %1275 = vmatprep.mubr.bf16.mxu0 %v1974_v18 }
 0x2ba   :  { %v762_v16 = vadd.f32 %v761_v13, %v382_v48  ;;  %v815_v17 = vadd.f32 %v814_v14, %v390_v49  ;;  %v763_v19 = vpop.f32.mrb[14].mxu1  ;;  %v816_v20 = vpop.f32.mrb[10].mxu0 }
 0x2bb   :  { %v764_v21 = vadd.f32 %v763_v19, %v378_v46  ;;  %v817_v22 = vadd.f32 %v816_v20, %v386_v47  ;;  %v765_v23 = vpop.f32.mrb[15].mxu1  ;;  %v818_v24 = vpop.f32.mrb[11].mxu0 }
 0x2bc   :  { %v1705_v25 = vpack.c.bf16 %v762_v16, %v760_v11  ;;  %v1706_v26 = vpack.c.bf16 %v815_v17, %v813_v12  ;;  %v766_v27 = vadd.f32 %v765_v23, %v382_v48  ;;  %v819_v28 = vadd.f32 %v818_v24, %v390_v49  ;;  %1778 = vmatpush3.bf16.msra.mxu1 %v1967_v6 }
 0x2bd   :  { %v825_v29 = vpack.c.bf16 %v764_v21, %v760_v11  ;;  %v827_v30 = vpack.c.bf16 %v817_v22, %v813_v12  ;;  %1779 = vmatprep.subr.bf16.mxu1 %v1968_v15 }
 0x2be   :  { %873 = vst [vmem:[%s2604_s9 + $0x20] sm:$0xff] %v1705_v25  ;;  %874 = vst [vmem:[%s2604_s9 + $0x28] sm:$0xff] %v1706_v26  ;;  %v1707_v32 = vpack.c.bf16 %v766_v27, %v764_v21  ;;  %v1708_v33 = vpack.c.bf16 %v819_v28, %v817_v22 }
 0x2bf   :  { %1203 = vmatmul.mubr.bf16.gmra.mrb[20].mxu1 %v825_v29  ;;  %1276 = vmatmul.mubr.bf16.gmra.mrb[16].mxu0 %v825_v29 }
 0x2c0   :  { %875 = vst [vmem:[%s2604_s9 + $0x30] sm:$0xff] %v1707_v32  ;;  %876 = vst [vmem:[%s2604_s9 + $0x38] sm:$0xff] %v1708_v33  ;;  %1780 = vmatpush3.bf16.msra.mxu1 %v1968_v15  ;;  %1212 = vmatprep.mubr.bf16.mxu1 %v1974_v18 }
 0x2c1   :  { %1781 = vmatprep.subr.bf16.mxu1 %v1969_v31  ;;  %1285 = vmatprep.mubr.bf16.mxu0 %v1974_v18 }
 0x2c4   :  { %1782 = vmatpush3.bf16.msra.mxu1 %v1969_v31 }
 0x2c5   :  { %1783 = vmatprep.subr.bf16.mxu1 %v1970_v34 }
 0x2c7   :  { %1213 = vmatmul.mubr.bf16.gmra.mrb[24].mxu1 %v2408_v5  ;;  %1286 = vmatmul.mubr.bf16.gmra.mrb[20].mxu0 %v2408_v5 }
 0x2c8   :  { %1784 = vmatpush3.bf16.msra.mxu1 %v1970_v34  ;;  %1222 = vmatprep.mubr.bf16.mxu1 %v1974_v18 }
 0x2c9   :  { %1785 = vmatprep.subr.bf16.mxu1 %v1971_v35  ;;  %1295 = vmatprep.mubr.bf16.mxu0 %v1974_v18  ;;  %v2470_v18 = vld [vmem:[%s2605_s8] sm:$0x1f] }
 0x2ca   :  { %v2474_v40 = vrot.slane %v2470_v18, %v2290_v39  ;;  %v2479_v42 = vrot.slane %v2470_v18, %v385_v43  ;;  %v2483_v44 = vrot.slane %v2470_v18, %v2296_v41  ;;  %v2488_v46 = vrot.slane %v2470_v18, %v389_v45 }
 0x2cc   :  { %1786 = vmatpush3.bf16.msra.mxu1 %v1971_v35 }
 0x2cd   :  { %1787 = vmatprep.subr.bf16.mxu1 %v1972_v36 }
 0x2cf   :  { %1223 = vmatmul.mubr.bf16.gmra.mrb[28].mxu1 %v827_v30  ;;  %1296 = vmatmul.mubr.bf16.gmra.mrb[24].mxu0 %v827_v30 }
 0x2d0   :  { %1788 = vmatpush3.bf16.msra.mxu1 %v1972_v36  ;;  %1791 = vmatprep.mubr.bf16.mxu1 %v2406_v4 }
 0x2d1   :  { %1789 = vmatprep.subr.bf16.mxu1 %v1973_v37 }
 0x2d4   :  { %1790 = vmatpush3.bf16.msra.mxu1 %v1973_v37 }
 0x2d7   :  { %1792 = vmatmul.mubr.bf16.vlgmr.msra.gmra.mrb[32].mxu1 %v825_v29 }
 0x2d8   :  { %1795 = vmatprep.mubr.bf16.mxu1 %v2408_v5 }
 0x2df   :  { %1796 = vmatmul.mubr.bf16.gmra.mrb[36].mxu1 %v827_v30 }
 0x38a   :  { %v1194_v47 = vpop.f32.mrb[16].mxu1  ;;  %v1267_v48 = vpop.f32.mrb[12].mxu0 }
 0x38b   :  { %v1195_v49 = vadd.f32 %v1194_v47, %v2474_v40  ;;  %v1268_v39 = vadd.f32 %v1267_v48, %v2479_v42  ;;  %v1196_v50 = vpop.f32.mrb[17].mxu1  ;;  %v1269_v51 = vpop.f32.mrb[13].mxu0 }
 0x38c   :  { %v1197_v43 = vadd.f32 %v1196_v50, %v2483_v44  ;;  %v1270_v52 = vadd.f32 %v1269_v51, %v2488_v46  ;;  %v1198_v53 = vpop.f32.mrb[18].mxu1  ;;  %v1271_v41 = vpop.f32.mrb[14].mxu0 }
 0x38d   :  { %v1199_v54 = vadd.f32 %v1198_v53, %v2474_v40  ;;  %v1272_v55 = vadd.f32 %v1271_v41, %v2479_v42  ;;  %v1200_v45 = vpop.f32.mrb[19].mxu1  ;;  %v1273_v56 = vpop.f32.mrb[15].mxu0  ;;  %v945_v53 = vsub.s32 4, %v2287_v38 }
 0x38e   :  { %v1709_v57 = vpack.c.bf16 %v1197_v43, %v1195_v49  ;;  %v1710_v58 = vpack.c.bf16 %v1270_v52, %v1268_v39  ;;  %v1201_v59 = vadd.f32 %v1200_v45, %v2483_v44  ;;  %v1274_v60 = vadd.f32 %v1273_v56, %v2488_v46 }
 0x38f   :  { %v946_v38 = vrot.slane %v2470_v18, %v945_v53 }
 0x390   :  { %1435 = vst [vmem:[%s2606_s10] sm:$0xff] %v1709_v57  ;;  %1436 = vst [vmem:[%s2606_s10 + $0x8] sm:$0xff] %v1710_v58  ;;  %v1712_v61 = vpack.c.bf16 %v1201_v59, %v1199_v54  ;;  %v1713_v62 = vpack.c.bf16 %v1274_v60, %v1272_v55 }
 0x392   :  { %1438 = vst [vmem:[%s2606_s10 + $0x14] sm:$0xff] %v1712_v61  ;;  %1439 = vst [vmem:[%s2606_s10 + $0x1c] sm:$0xff] %v1713_v62  ;;  %v1204_v63 = vpop.f32.mrb[20].mxu1  ;;  %v1277_v0 = vpop.f32.mrb[16].mxu0 }
 0x393   :  { %v1205_v1 = vadd.f32 %v1204_v63, %v2474_v40  ;;  %v1278_v2 = vadd.f32 %v1277_v0, %v2479_v42  ;;  %v1206_v3 = vpop.f32.mrb[21].mxu1  ;;  %v1279_v4 = vpop.f32.mrb[17].mxu0 }
 0x394   :  { %v1207_v5 = vadd.f32 %v1206_v3, %v2483_v44  ;;  %v1280_v6 = vadd.f32 %v1279_v4, %v2488_v46  ;;  %v1208_v7 = vpop.f32.mrb[22].mxu1  ;;  %v1281_v8 = vpop.f32.mrb[18].mxu0 }
 0x395   :  { %v1209_v9 = vadd.f32 %v1208_v7, %v2474_v40  ;;  %v1282_v10 = vadd.f32 %v1281_v8, %v2479_v42  ;;  %v1210_v11 = vpop.f32.mrb[23].mxu1  ;;  %v1283_v12 = vpop.f32.mrb[19].mxu0 }
 0x396   :  { %v1715_v13 = vpack.c.bf16 %v1207_v5, %v1205_v1  ;;  %v1716_v14 = vpack.c.bf16 %v1280_v6, %v1278_v2  ;;  %v1211_v15 = vadd.f32 %v1210_v11, %v2483_v44  ;;  %v1284_v16 = vadd.f32 %v1283_v12, %v2488_v46 }
 0x398   :  { %1441 = vst [vmem:[%s2606_s10 + $0x28] sm:$0xff] %v1715_v13  ;;  %1442 = vst [vmem:[%s2606_s10 + $0x30] sm:$0xff] %v1716_v14  ;;  %v1718_v17 = vpack.c.bf16 %v1211_v15, %v1209_v9  ;;  %v1719_v19 = vpack.c.bf16 %v1284_v16, %v1282_v10 }
 0x39a   :  { %1444 = vst [vmem:[%s2606_s10 + $0x3c] sm:$0xff] %v1718_v17  ;;  %1445 = vst [vmem:[%s2606_s10 + $0x44] sm:$0xff] %v1719_v19  ;;  %v1214_v20 = vpop.f32.mrb[24].mxu1  ;;  %v1287_v21 = vpop.f32.mrb[20].mxu0 }
 0x39b   :  { %v1215_v22 = vadd.f32 %v1214_v20, %v2474_v40  ;;  %v1288_v23 = vadd.f32 %v1287_v21, %v2479_v42  ;;  %v1216_v24 = vpop.f32.mrb[25].mxu1  ;;  %v1289_v25 = vpop.f32.mrb[21].mxu0 }
 0x39c   :  { %v1217_v26 = vadd.f32 %v1216_v24, %v2483_v44  ;;  %v1290_v27 = vadd.f32 %v1289_v25, %v2488_v46  ;;  %v1218_v28 = vpop.f32.mrb[26].mxu1  ;;  %v1291_v29 = vpop.f32.mrb[22].mxu0 }
 0x39d   :  { %v1219_v30 = vadd.f32 %v1218_v28, %v2474_v40  ;;  %v1292_v31 = vadd.f32 %v1291_v29, %v2479_v42  ;;  %v1220_v32 = vpop.f32.mrb[27].mxu1  ;;  %v1293_v33 = vpop.f32.mrb[23].mxu0 }
 0x39e   :  { %v1721_v34 = vpack.c.bf16 %v1217_v26, %v1215_v22  ;;  %v1722_v35 = vpack.c.bf16 %v1290_v27, %v1288_v23  ;;  %v1221_v36 = vadd.f32 %v1220_v32, %v2483_v44  ;;  %v1294_v37 = vadd.f32 %v1293_v33, %v2488_v46 }
 0x3a0   :  { %1689 = vst [vmem:[%s2606_s10 + $0x50] sm:$0xff] %v1721_v34  ;;  %1690 = vst [vmem:[%s2606_s10 + $0x58] sm:$0xff] %v1722_v35  ;;  %v1724_v47 = vpack.c.bf16 %v1221_v36, %v1219_v30  ;;  %v1725_v48 = vpack.c.bf16 %v1294_v37, %v1292_v31 }
 0x3a2   :  { %1692 = vst [vmem:[%s2606_s10 + $0x64] sm:$0xff] %v1724_v47  ;;  %1693 = vst [vmem:[%s2606_s10 + $0x6c] sm:$0xff] %v1725_v48  ;;  %v1224_v49 = vpop.f32.mrb[28].mxu1  ;;  %v1297_v39 = vpop.f32.mrb[24].mxu0 }
 0x3a3   :  { %v1225_v50 = vadd.f32 %v1224_v49, %v2474_v40  ;;  %v1298_v51 = vadd.f32 %v1297_v39, %v2479_v42  ;;  %v1226_v43 = vpop.f32.mrb[29].mxu1  ;;  %v1299_v52 = vpop.f32.mrb[25].mxu0 }
 0x3a4   :  { %v1227_v41 = vadd.f32 %v1226_v43, %v2483_v44  ;;  %v1300_v54 = vadd.f32 %v1299_v52, %v2488_v46  ;;  %v1228_v55 = vpop.f32.mrb[30].mxu1  ;;  %v1301_v45 = vpop.f32.mrb[26].mxu0 }
 0x3a5   :  { %v1229_v56 = vadd.f32 %v1228_v55, %v2474_v40  ;;  %v1302_v57 = vadd.f32 %v1301_v45, %v2479_v42  ;;  %v1230_v58 = vpop.f32.mrb[31].mxu1  ;;  %v1303_v59 = vpop.f32.mrb[27].mxu0 }
 0x3a6   :  { %v1727_v60 = vpack.c.bf16 %v1227_v41, %v1225_v50  ;;  %v1728_v61 = vpack.c.bf16 %v1300_v54, %v1298_v51  ;;  %v1231_v62 = vadd.f32 %v1230_v58, %v2483_v44  ;;  %v1304_v63 = vadd.f32 %v1303_v59, %v2488_v46 }
 0x3a8   :  { %1695 = vst [vmem:[%s2606_s10 + $0x78] sm:$0xff] %v1727_v60  ;;  %1696 = vst [vmem:[%s2606_s10 + $0x80] sm:$0xff] %v1728_v61  ;;  %v1730_v40 = vpack.c.bf16 %v1231_v62, %v1229_v56  ;;  %v1731_v42 = vpack.c.bf16 %v1304_v63, %v1302_v57 }
 0x3aa   :  { %1698 = vst [vmem:[%s2606_s10 + $0x8c] sm:$0xff] %v1730_v40  ;;  %1699 = vst [vmem:[%s2606_s10 + $0x94] sm:$0xff] %v1731_v42  ;;  %v1793_v44 = vpop.f32.mrb[32].mxu1 }
 0x3ab   :  { %v1349_v18 = vadd.f32 %v1793_v44, %v946_v38  ;;  %v1340_v46 = vpop.f32.mrb[33].mxu1 }
 0x3ac   :  { %v1341_v0 = vadd.f32 %v1340_v46, %v946_v38  ;;  %v1794_v1 = vpop.f32.mrb[34].mxu1 }
 0x3ad   :  { %v1717_v2 = vpack.c.bf16 %v1349_v18, %v1349_v18  ;;  %v1352_v3 = vadd.f32 %v1794_v1, %v946_v38  ;;  %v1343_v4 = vpop.f32.mrb[35].mxu1 }
 0x3ae   :  { %v1711_v5 = vpack.c.bf16 %v1341_v0, %v1341_v0  ;;  %v1344_v6 = vadd.f32 %v1343_v4, %v946_v38 }
 0x3af   :  { %1443 = vst [vmem:[%s2606_s10 + $0x38] sm:$0xf] %v1717_v2  ;;  %v1720_v7 = vpack.c.bf16 %v1352_v3, %v1352_v3 }
 0x3b0   :  { %1437 = vst [vmem:[%s2606_s10 + $0x10] sm:$0xf] %v1711_v5  ;;  %v1714_v8 = vpack.c.bf16 %v1344_v6, %v1344_v6 }
 0x3b1   :  { %1446 = vst [vmem:[%s2606_s10 + $0x4c] sm:$0xf] %v1720_v7 }
 0x3b2   :  { %1440 = vst [vmem:[%s2606_s10 + $0x24] sm:$0xf] %v1714_v8  ;;  %v1797_v9 = vpop.f32.mrb[36].mxu1 }
 0x3b3   :  { %v1365_v10 = vadd.f32 %v1797_v9, %v946_v38  ;;  %v1356_v11 = vpop.f32.mrb[37].mxu1 }
 0x3b4   :  { %v1357_v12 = vadd.f32 %v1356_v11, %v946_v38  ;;  %v1798_v13 = vpop.f32.mrb[38].mxu1 }
 0x3b5   :  { %v1729_v14 = vpack.c.bf16 %v1365_v10, %v1365_v10  ;;  %v1368_v15 = vadd.f32 %v1798_v13, %v946_v38  ;;  %v1359_v16 = vpop.f32.mrb[39].mxu1 }
 0x3b6   :  { %v1723_v17 = vpack.c.bf16 %v1357_v12, %v1357_v12  ;;  %v1360_v19 = vadd.f32 %v1359_v16, %v946_v38 }
 0x3b7   :  { %1697 = vst [vmem:[%s2606_s10 + $0x88] sm:$0xf] %v1729_v14  ;;  %v1732_v20 = vpack.c.bf16 %v1368_v15, %v1368_v15 }
 0x3b8   :  { %1691 = vst [vmem:[%s2606_s10 + $0x60] sm:$0xf] %v1723_v17  ;;  %v1726_v21 = vpack.c.bf16 %v1360_v19, %v1360_v19 }
 0x3b9   :  { %1700 = vst [vmem:[%s2606_s10 + $0x9c] sm:$0xf] %v1732_v20 }
 0x3ba   :  { %1694 = vst [vmem:[%s2606_s10 + $0x74] sm:$0xf] %v1726_v21 }

// kernel: shuffletrack_forward.15
= control target key start
LH: loop header
LB: loop body
LE: loop exit
PB: predicated region body
PF: predicated region fallthrough
CT: control target
= control target key end

     0   :  { %v3598_v24 = vmov 0   ;;  %vm351_vm0 = vcmask 523264   ;;  %s4880_s1 = inlined_call_operand.vmem [shape: bf16[128,64], index: 1, kind: input, shape index: {}]   ;;  %s4881_s0 = inlined_call_operand.vmem [shape: bf16[128,128], index: 0, kind: input, shape index: {}]   ;;  %s4882_s3 = inlined_call_operand.vmem [shape: bf16[64,256], index: 3, kind: input, shape index: {}]   ;;  %s4883_s5 = inlined_call_operand.vmem [shape: bf16[256,512], index: 5, kind: input, shape index: {}]   ;;  %s4884_s2 = inlined_call_operand.vmem [shape: f32[1,64], index: 2, kind: input, shape index: {}]   ;;  %s4885_s7 = inlined_call_operand.vmem [shape: bf16[128,640], index: 7, kind: input, shape index: {}]   ;;  %s4886_s4 = inlined_call_operand.vmem [shape: f32[1,256], index: 4, kind: input, shape index: {}]   ;;  %s4887_s6 = inlined_call_operand.vmem [shape: f32[1,512], index: 6, kind: input, shape index: {}]   ;;  %s4888_s9 = inlined_call_operand.vmem [shape: bf16[128,512], index: 9, kind: output, shape index: {0}]   ;;  %s4889_s8 = inlined_call_operand.vmem [shape: f32[1,640], index: 8, kind: input, shape index: {}]   ;;  %s4890_s10 = inlined_call_operand.vmem [shape: bf16[2,128,640], index: 10, kind: output, shape index: {1}]  }
   0x1   :  { %v3418_v0 = vld [vmem:[%s4880_s1] sm:$0xff]   ;;  %v3419_v1 = vld [vmem:[%s4880_s1 + $0x8] sm:$0xff]   ;;  %v3420_v2 = vld [vmem:[%s4880_s1 + $0x10] sm:$0xff]   ;;  %408 = vmatprep.mubr.bf16.mxu1 %v3598_v24 }
   0x2   :  { %3321 = vmatprep.subr.bf16.mxu0 %v3418_v0  ;;  %v3421_v3 = vld [vmem:[%s4880_s1 + $0x18] sm:$0xff]   ;;  %v3426_v4 = vld [vmem:[%s4881_s0] sm:$0xff]   ;;  %v3423_v6 = vld [vmem:[%s4880_s1 + $0x28] sm:$0xff]  }
   0x3   :  { %3322 = vmatpush3.bf16.msra.mxu0 %v3418_v0  ;;  %3337 = vmatprep.mubr.bf16.mxu0 %v3426_v4  ;;  %v3422_v5 = vld [vmem:[%s4880_s1 + $0x20] sm:$0xff]   ;;  %v3437_v9 = vld [vmem:[%s4882_s3 + $0x14] ss:$8 sps:$4 sm:$0xff]   ;;  %v3439_v10 = vld [vmem:[%s4882_s3 + $0x10] ss:$8 sps:$4 sm:$0xff]  }
   0x4   :  { %3323 = vmatprep.subr.bf16.mxu0 %v3419_v1  ;;  %v3434_v7 = vld [vmem:[%s4882_s3 + $0x4] ss:$8 sps:$4 sm:$0xff]   ;;  %v3436_v8 = vld [vmem:[%s4882_s3] ss:$8 sps:$4 sm:$0xff]   ;;  %v3424_v11 = vld [vmem:[%s4880_s1 + $0x30] sm:$0xff]  }
   0x5   :  { %376 = vmatprep.subr.bf16.mxu1 %v3434_v7  ;;  %v3425_v12 = vld [vmem:[%s4880_s1 + $0x38] sm:$0xff]   ;;  %v3427_v13 = vld [vmem:[%s4881_s0 + $0x8] sm:$0xff]   ;;  %v3428_v14 = vld [vmem:[%s4881_s0 + $0x10] sm:$0xff]  }
   0x6   :  { %377 = vmatpush1.bf16.msra.mxu1 %v3436_v8  ;;  %v3429_v15 = vld [vmem:[%s4881_s0 + $0x18] sm:$0xff]   ;;  %v3430_v16 = vld [vmem:[%s4881_s0 + $0x20] sm:$0xff]   ;;  %v3431_v17 = vld [vmem:[%s4881_s0 + $0x28] sm:$0xff]  }
   0x7   :  { %3324 = vmatpush3.bf16.msra.mxu0 %v3419_v1  ;;  %378 = vmatprep.subr.bf16.mxu1 %v3437_v9  ;;  %v3432_v18 = vld [vmem:[%s4881_s0 + $0x30] sm:$0xff]   ;;  %v3433_v19 = vld [vmem:[%s4881_s0 + $0x38] sm:$0xff]   ;;  %v3440_v20 = vld [vmem:[%s4882_s3 + $0x24] ss:$8 sps:$4 sm:$0xff]  }
   0x8   :  { %3325 = vmatprep.subr.bf16.mxu0 %v3420_v2  ;;  %v3442_v21 = vld [vmem:[%s4882_s3 + $0x20] ss:$8 sps:$4 sm:$0xff]   ;;  %v3443_v22 = vld [vmem:[%s4882_s3 + $0x34] ss:$8 sps:$4 sm:$0xff]   ;;  %v3445_v23 = vld [vmem:[%s4882_s3 + $0x30] ss:$8 sps:$4 sm:$0xff]  }
   0x9   :  { %v3448_v25 = vld [vmem:[%s4883_s5 + $0x4] ss:$16 sps:$4 sm:$0xff]   ;;  %v3449_v26 = vld [vmem:[%s4883_s5 + $0x8] ss:$16 sps:$4 sm:$0xff]   ;;  %v3451_v27 = vld [vmem:[%s4883_s5 + $0xc] ss:$16 sps:$4 sm:$0xff]  }
   0xa   :  { %379 = vmatpush1.bf16.msra.mxu1 %v3439_v10  ;;  %v3455_v28 = vld [vmem:[%s4883_s5 + $0x28] ss:$16 sps:$4 sm:$0xff]   ;;  %v3457_v29 = vld [vmem:[%s4883_s5 + $0x2c] ss:$16 sps:$4 sm:$0xff]   ;;  %v3817_v54 = vld [vmem:[%s4884_s2] ss:$0 sm:$0xff] }
   0xb   :  { %3326 = vmatpush3.bf16.msra.mxu0 %v3420_v2  ;;  %380 = vmatprep.subr.bf16.mxu1 %v3440_v20  ;;  %v3463_v30 = vld [vmem:[%s4883_s5 + $0x4c] ss:$16 sps:$4 sm:$0xff]   ;;  %v3461_v31 = vld [vmem:[%s4883_s5 + $0x48] ss:$16 sps:$4 sm:$0xff]   ;;  %v3446_v4 = vld [vmem:[%s4883_s5] ss:$16 sps:$4 sm:$0xff]  }
   0xc   :  { %3327 = vmatprep.subr.bf16.mxu0 %v3421_v3  ;;  %v3469_v32 = vld [vmem:[%s4883_s5 + $0x6c] ss:$16 sps:$4 sm:$0xff]   ;;  %v3467_v33 = vld [vmem:[%s4883_s5 + $0x68] ss:$16 sps:$4 sm:$0xff]   ;;  %v3454_v7 = vld [vmem:[%s4883_s5 + $0x24] ss:$16 sps:$4 sm:$0xff]  }
   0xd   :  { %v3475_v34 = vld [vmem:[%s4883_s5 + $0x8c] ss:$16 sps:$4 sm:$0xff]   ;;  %v3473_v35 = vld [vmem:[%s4883_s5 + $0x88] ss:$16 sps:$4 sm:$0xff]  }
   0xe   :  { %381 = vmatpush1.bf16.msra.mxu1 %v3442_v21  ;;  %v3481_v36 = vld [vmem:[%s4883_s5 + $0xac] ss:$16 sps:$4 sm:$0xff]   ;;  %v3479_v37 = vld [vmem:[%s4883_s5 + $0xa8] ss:$16 sps:$4 sm:$0xff]  }
   0xf   :  { %3328 = vmatpush3.bf16.msra.mxu0 %v3421_v3  ;;  %382 = vmatprep.subr.bf16.mxu1 %v3443_v22  ;;  %v3487_v38 = vld [vmem:[%s4883_s5 + $0xcc] ss:$16 sps:$4 sm:$0xff]   ;;  %v3485_v39 = vld [vmem:[%s4883_s5 + $0xc8] ss:$16 sps:$4 sm:$0xff]   ;;  %v3458_v22 = vld [vmem:[%s4883_s5 + $0x40] ss:$16 sps:$4 sm:$0xff]  }
  0x10   :  { %3329 = vmatprep.subr.bf16.mxu0 %v3422_v5  ;;  %v3493_v40 = vld [vmem:[%s4883_s5 + $0xec] ss:$16 sps:$4 sm:$0xff]   ;;  %v3491_v41 = vld [vmem:[%s4883_s5 + $0xe8] ss:$16 sps:$4 sm:$0xff]  }
  0x11   :  { %v3499_v42 = vld [vmem:[%s4883_s5 + $0x10c] ss:$16 sps:$4 sm:$0xff]   ;;  %v3497_v43 = vld [vmem:[%s4883_s5 + $0x108] ss:$16 sps:$4 sm:$0xff]  }
  0x12   :  { %383 = vmatpush1.bf16.msra.mxu1 %v3445_v23  ;;  %v3505_v44 = vld [vmem:[%s4883_s5 + $0x12c] ss:$16 sps:$4 sm:$0xff]   ;;  %v3503_v45 = vld [vmem:[%s4883_s5 + $0x128] ss:$16 sps:$4 sm:$0xff]  }
  0x13   :  { %3330 = vmatpush3.bf16.msra.mxu0 %v3422_v5  ;;  %943 = vmatprep.subr.bf16.mxu1 %v3448_v25  ;;  %v3511_v46 = vld [vmem:[%s4883_s5 + $0x14c] ss:$16 sps:$4 sm:$0xff]   ;;  %v3509_v47 = vld [vmem:[%s4883_s5 + $0x148] ss:$16 sps:$4 sm:$0xff]  }
  0x14   :  { %3331 = vmatprep.subr.bf16.mxu0 %v3423_v6  ;;  %v3517_v48 = vld [vmem:[%s4883_s5 + $0x16c] ss:$16 sps:$4 sm:$0xff]   ;;  %v3515_v49 = vld [vmem:[%s4883_s5 + $0x168] ss:$16 sps:$4 sm:$0xff]  }
  0x15   :  { %v3523_v50 = vld [vmem:[%s4883_s5 + $0x18c] ss:$16 sps:$4 sm:$0xff]   ;;  %v3521_v51 = vld [vmem:[%s4883_s5 + $0x188] ss:$16 sps:$4 sm:$0xff]  }
  0x16   :  { %v3529_v52 = vld [vmem:[%s4883_s5 + $0x1ac] ss:$16 sps:$4 sm:$0xff]   ;;  %v3527_v53 = vld [vmem:[%s4883_s5 + $0x1a8] ss:$16 sps:$4 sm:$0xff]  }
  0x17   :  { %3332 = vmatpush3.bf16.msra.mxu0 %v3423_v6 }
  0x18   :  { %3333 = vmatprep.subr.bf16.mxu0 %v3424_v11 }
  0x1b   :  { %3334 = vmatpush3.bf16.msra.mxu0 %v3424_v11 }
  0x1c   :  { %3335 = vmatprep.subr.bf16.mxu0 %v3425_v12 }
  0x1f   :  { %3336 = vmatpush3.bf16.msra.mxu0 %v3425_v12 }
  0x20   :  { %1056 = vmatprep.subr.bf16.mxu0 %v3451_v27 }
  0x22   :  { %3338 = vmatmul.mubr.bf16.vlgmr.msra.gmra.mrb[0].mxu0 %v3427_v13 }
  0x23   :  { %3341 = vmatprep.mubr.bf16.mxu0 %v3428_v14  ;;  %1057 = vmatpush1.bf16.msra.mxu0 %v3449_v26  ;;  %v3466_v26 = vld [vmem:[%s4883_s5 + $0x64] ss:$16 sps:$4 sm:$0xff]  }
  0x24   :  { %1058 = vmatprep.subr.bf16.mxu0 %v3457_v29 }
  0x27   :  { %1059 = vmatpush1.bf16.msra.mxu0 %v3455_v28 }
  0x28   :  { %1060 = vmatprep.subr.bf16.mxu0 %v3463_v30 }
  0x2a   :  { %3342 = vmatmul.mubr.bf16.gmra.mrb[4].mxu0 %v3429_v15  ;;  %v3452_v15 = vld [vmem:[%s4883_s5 + $0x20] ss:$16 sps:$4 sm:$0xff]  }
  0x2b   :  { %3345 = vmatprep.mubr.bf16.mxu0 %v3430_v16  ;;  %1061 = vmatpush1.bf16.msra.mxu0 %v3461_v31 }
  0x2c   :  { %1062 = vmatprep.subr.bf16.mxu0 %v3469_v32 }
  0x2f   :  { %1063 = vmatpush1.bf16.msra.mxu0 %v3467_v33 }
  0x30   :  { %1064 = vmatprep.subr.bf16.mxu0 %v3475_v34  ;;  %v3464_v34 = vld [vmem:[%s4883_s5 + $0x60] ss:$16 sps:$4 sm:$0xff]  }
  0x32   :  { %3346 = vmatmul.mubr.bf16.gmra.mrb[8].mxu0 %v3431_v17 }
  0x33   :  { %3349 = vmatprep.mubr.bf16.mxu0 %v3432_v18  ;;  %1065 = vmatpush1.bf16.msra.mxu0 %v3473_v35  ;;  %v3460_v18 = vld [vmem:[%s4883_s5 + $0x44] ss:$16 sps:$4 sm:$0xff]  }
  0x34   :  { %1066 = vmatprep.subr.bf16.mxu0 %v3481_v36 }
  0x37   :  { %1067 = vmatpush1.bf16.msra.mxu0 %v3479_v37  ;;  %v3472_v37 = vld [vmem:[%s4883_s5 + $0x84] ss:$16 sps:$4 sm:$0xff]  }
  0x38   :  { %1068 = vmatprep.subr.bf16.mxu0 %v3487_v38 }
  0x3a   :  { %3350 = vmatmul.mubr.bf16.gmra.mrb[12].mxu0 %v3433_v19 }
  0x3b   :  { %1069 = vmatpush1.bf16.msra.mxu0 %v3485_v39 }
  0x3c   :  { %1070 = vmatprep.subr.bf16.mxu0 %v3493_v40 }
  0x3f   :  { %1071 = vmatpush1.bf16.msra.mxu0 %v3491_v41  ;;  %v3470_v41 = vld [vmem:[%s4883_s5 + $0x80] ss:$16 sps:$4 sm:$0xff]  }
  0x40   :  { %1072 = vmatprep.subr.bf16.mxu0 %v3499_v42 }
  0x43   :  { %1073 = vmatpush1.bf16.msra.mxu0 %v3497_v43 }
  0x44   :  { %1074 = vmatprep.subr.bf16.mxu0 %v3505_v44  ;;  %v3478_v44 = vld [vmem:[%s4883_s5 + $0xa4] ss:$16 sps:$4 sm:$0xff]  }
  0x47   :  { %1075 = vmatpush1.bf16.msra.mxu0 %v3503_v45 }
  0x48   :  { %1076 = vmatprep.subr.bf16.mxu0 %v3511_v46 }
  0x4b   :  { %1077 = vmatpush1.bf16.msra.mxu0 %v3509_v47 }
  0x4c   :  { %1078 = vmatprep.subr.bf16.mxu0 %v3517_v48 }
  0x4f   :  { %1079 = vmatpush1.bf16.msra.mxu0 %v3515_v49 }
  0x50   :  { %1080 = vmatprep.subr.bf16.mxu0 %v3523_v50 }
  0x53   :  { %1081 = vmatpush1.bf16.msra.mxu0 %v3521_v51 }
  0x54   :  { %1082 = vmatprep.subr.bf16.mxu0 %v3529_v52  ;;  %v3476_v52 = vld [vmem:[%s4883_s5 + $0xa0] ss:$16 sps:$4 sm:$0xff]  }
  0x57   :  { %1083 = vmatpush1.bf16.msra.mxu0 %v3527_v53 }
  0xf5   :  { %v3339_v55 = vpop.f32.mrb[0].mxu0 }
  0xf6   :  { %v213_v56 = vadd.f32 %v3339_v55, %v3817_v54  ;;  %v204_v57 = vpop.f32.mrb[1].mxu0 }
  0xf7   :  { %v205_v58 = vadd.f32 %v3817_v54, %v204_v57  ;;  %v3340_v59 = vpop.f32.mrb[2].mxu0 }
  0xf8   :  { %v216_v60 = vadd.f32 %v3340_v59, %v3817_v54  ;;  %v207_v61 = vpop.f32.mrb[3].mxu0  ;;  %v269_v63 = vmax.f32 %v213_v56, 0.0  ;;  %v3484_v56 = vld [vmem:[%s4883_s5 + $0xc4] ss:$16 sps:$4 sm:$0xff]  }
  0xf9   :  { %v208_v62 = vadd.f32 %v3817_v54, %v207_v61  ;;  %v267_v1 = vmax.f32 %v205_v58, 0.0 }
  0xfa   :  { %v270_v0 = vmax.f32 %v216_v60, 0.0  ;;  %v3482_v60 = vld [vmem:[%s4883_s5 + $0xc0] ss:$16 sps:$4 sm:$0xff]  }
  0xfb   :  { %v268_v2 = vmax.f32 %v208_v62, 0.0  ;;  %v3490_v62 = vld [vmem:[%s4883_s5 + $0xe4] ss:$16 sps:$4 sm:$0xff]  }
  0xfc   :  { %v284_v3 = vpack.c.bf16 %v270_v0, %v269_v63  ;;  %v3496_v63 = vld [vmem:[%s4883_s5 + $0x104] ss:$16 sps:$4 sm:$0xff]   ;;  %v3494_v0 = vld [vmem:[%s4883_s5 + $0x100] ss:$16 sps:$4 sm:$0xff]  }
  0xfd   :  { %v283_v5 = vpack.c.bf16 %v268_v2, %v267_v1  ;;  %v3343_v6 = vpop.f32.mrb[4].mxu0  ;;  %v3502_v1 = vld [vmem:[%s4883_s5 + $0x124] ss:$16 sps:$4 sm:$0xff]   ;;  %v3500_v2 = vld [vmem:[%s4883_s5 + $0x120] ss:$16 sps:$4 sm:$0xff]  }
  0xfe   :  { %v229_v8 = vadd.f32 %v3343_v6, %v3817_v54  ;;  %v220_v9 = vpop.f32.mrb[5].mxu0  ;;  %v3512_v6 = vld [vmem:[%s4883_s5 + $0x160] ss:$16 sps:$4 sm:$0xff]  }
  0xff   :  { %2865 = vmatmul.mubr.msk.bf16.vlgmr.msra.gmra.mrb[0].mxu1 %vm351_vm0, %v283_v5  ;;  %v221_v10 = vadd.f32 %v3817_v54, %v220_v9  ;;  %v3344_v11 = vpop.f32.mrb[6].mxu0  ;;  %v3514_v5 = vld [vmem:[%s4883_s5 + $0x164] ss:$16 sps:$4 sm:$0xff]  }
 0x100   :  { %v273_v12 = vmax.f32 %v229_v8, 0.0  ;;  %v232_v13 = vadd.f32 %v3344_v11, %v3817_v54  ;;  %v223_v14 = vpop.f32.mrb[7].mxu0  ;;  %418 = vmatprep.mubr.bf16.mxu1 %v3598_v24  ;;  %944 = vmatpush1.bf16.msra.mxu1 %v3446_v4  ;;  %v3506_v4 = vld [vmem:[%s4883_s5 + $0x140] ss:$16 sps:$4 sm:$0xff]   ;;  %v3526_v9 = vld [vmem:[%s4883_s5 + $0x1a4] ss:$16 sps:$4 sm:$0xff]  }
 0x101   :  { %v271_v16 = vmax.f32 %v221_v10, 0.0  ;;  %v224_v17 = vadd.f32 %v3817_v54, %v223_v14  ;;  %945 = vmatprep.subr.bf16.mxu1 %v3454_v7  ;;  %v3520_v7 = vld [vmem:[%s4883_s5 + $0x184] ss:$16 sps:$4 sm:$0xff]   ;;  %v3518_v8 = vld [vmem:[%s4883_s5 + $0x180] ss:$16 sps:$4 sm:$0xff]  }
 0x102   :  { %v274_v19 = vmax.f32 %v232_v13, 0.0  ;;  %v3524_v10 = vld [vmem:[%s4883_s5 + $0x1a0] ss:$16 sps:$4 sm:$0xff]   ;;  %v3532_v11 = vld [vmem:[%s4883_s5 + $0x1c4] ss:$16 sps:$4 sm:$0xff]  }
 0x103   :  { %v272_v20 = vmax.f32 %v224_v17, 0.0  ;;  %v3530_v13 = vld [vmem:[%s4883_s5 + $0x1c0] ss:$16 sps:$4 sm:$0xff]   ;;  %v3533_v14 = vld [vmem:[%s4883_s5 + $0x1c8] ss:$16 sps:$4 sm:$0xff]  }
 0x104   :  { %v286_v21 = vpack.c.bf16 %v274_v19, %v273_v12  ;;  %946 = vmatpush1.bf16.msra.mxu1 %v3452_v15  ;;  %v3535_v12 = vld [vmem:[%s4883_s5 + $0x1cc] ss:$16 sps:$4 sm:$0xff]   ;;  %v3538_v15 = vld [vmem:[%s4883_s5 + $0x1e4] ss:$16 sps:$4 sm:$0xff]   ;;  %v3536_v17 = vld [vmem:[%s4883_s5 + $0x1e0] ss:$16 sps:$4 sm:$0xff]  }
 0x105   :  { %v285_v23 = vpack.c.bf16 %v272_v20, %v271_v16  ;;  %v3347_v25 = vpop.f32.mrb[8].mxu0  ;;  %947 = vmatprep.subr.bf16.mxu1 %v3460_v18  ;;  %1084 = vmatprep.subr.bf16.mxu0 %v3535_v12  ;;  %v3541_v16 = vld [vmem:[%s4883_s5 + $0x1ec] ss:$16 sps:$4 sm:$0xff]   ;;  %v3539_v18 = vld [vmem:[%s4883_s5 + $0x1e8] ss:$16 sps:$4 sm:$0xff]  }
 0x106   :  { %v245_v27 = vadd.f32 %v3347_v25, %v3817_v54  ;;  %v236_v28 = vpop.f32.mrb[9].mxu0  ;;  %1085 = vmatpush1.bf16.msra.mxu0 %v3533_v14  ;;  %v3544_v19 = vld [vmem:[%s4885_s7 + $0x4] ss:$20 sps:$4 sm:$0xff]   ;;  %v3553_v20 = vld [vmem:[%s4885_s7 + $0xc] ss:$20 sps:$4 sm:$0xff]  }
 0x107   :  { %2866 = vmatmul.mubr.msk.bf16.gmra.mrb[4].mxu1 %vm351_vm0, %v284_v3  ;;  %v237_v29 = vadd.f32 %v3817_v54, %v236_v28  ;;  %v3348_v30 = vpop.f32.mrb[10].mxu0  ;;  %v3508_v3 = vld [vmem:[%s4883_s5 + $0x144] ss:$16 sps:$4 sm:$0xff]   ;;  %1086 = vmatprep.subr.bf16.mxu0 %v3541_v16  ;;  %v299_v25 = vld [vmem:[%s4886_s4] sm:$0x3] }
 0x108   :  { %428 = vmatprep.mubr.bf16.mxu1 %v3598_v24  ;;  %v277_v31 = vmax.f32 %v245_v27, 0.0  ;;  %v248_v32 = vadd.f32 %v3348_v30, %v3817_v54  ;;  %v239_v33 = vpop.f32.mrb[11].mxu0  ;;  %948 = vmatpush1.bf16.msra.mxu1 %v3458_v22  ;;  %v3569_v14 = vld [vmem:[%s4885_s7 + $0x80] ss:$20 sps:$4 sm:$0xff]  }
 0x109   :  { %v275_v35 = vmax.f32 %v237_v29, 0.0  ;;  %v240_v36 = vadd.f32 %v3817_v54, %v239_v33  ;;  %949 = vmatprep.subr.bf16.mxu1 %v3466_v26 }
 0x10a   :  { %v278_v38 = vmax.f32 %v248_v32, 0.0  ;;  %1087 = vmatpush1.bf16.msra.mxu0 %v3539_v18  ;;  %v3577_v18 = vld [vmem:[%s4885_s7 + $0xac] ss:$20 sps:$4 sm:$0xff]  }
 0x10b   :  { %v276_v39 = vmax.f32 %v240_v36, 0.0  ;;  %1869 = vmatprep.subr.bf16.mxu0 %v3553_v20 }
 0x10c   :  { %v288_v40 = vpack.c.bf16 %v278_v38, %v277_v31  ;;  %950 = vmatpush1.bf16.msra.mxu1 %v3464_v34 }
 0x10d   :  { %v287_v42 = vpack.c.bf16 %v276_v39, %v275_v35  ;;  %v3351_v43 = vpop.f32.mrb[12].mxu0  ;;  %951 = vmatprep.subr.bf16.mxu1 %v3472_v37 }
 0x10e   :  { %v261_v45 = vadd.f32 %v3351_v43, %v3817_v54  ;;  %v252_v46 = vpop.f32.mrb[13].mxu0 }
 0x10f   :  { %2867 = vmatmul.mubr.msk.bf16.gmra.mrb[8].mxu1 %vm351_vm0, %v285_v23  ;;  %v253_v47 = vadd.f32 %v3817_v54, %v252_v46  ;;  %v3352_v48 = vpop.f32.mrb[14].mxu0 }
 0x110   :  { %438 = vmatprep.mubr.bf16.mxu1 %v3598_v24  ;;  %v281_v49 = vmax.f32 %v261_v45, 0.0  ;;  %v264_v50 = vadd.f32 %v3352_v48, %v3817_v54  ;;  %v255_v51 = vpop.f32.mrb[15].mxu0  ;;  %952 = vmatpush1.bf16.msra.mxu1 %v3470_v41  ;;  %v3551_v45 = vld [vmem:[%s4885_s7 + $0x8] ss:$20 sps:$4 sm:$0xff]   ;;  %v3547_v48 = vld [vmem:[%s4885_s7 + $0x2c] ss:$20 sps:$4 sm:$0xff]  }
 0x111   :  { %v279_v53 = vmax.f32 %v253_v47, 0.0  ;;  %v256_v55 = vadd.f32 %v3817_v54, %v255_v51  ;;  %953 = vmatprep.subr.bf16.mxu1 %v3478_v44  ;;  %v3488_v54 = vld [vmem:[%s4883_s5 + $0xe0] ss:$16 sps:$4 sm:$0xff]  }
 0x112   :  { %v282_v57 = vmax.f32 %v264_v50, 0.0  ;;  %v3542_v44 = vld [vmem:[%s4885_s7] ss:$20 sps:$4 sm:$0xff]  }
 0x113   :  { %v280_v58 = vmax.f32 %v256_v55, 0.0 }
 0x114   :  { %v290_v59 = vpack.c.bf16 %v282_v57, %v281_v49  ;;  %954 = vmatpush1.bf16.msra.mxu1 %v3476_v52  ;;  %v3559_v49 = vld [vmem:[%s4885_s7 + $0x34] ss:$20 sps:$4 sm:$0xff]   ;;  %v3557_v57 = vld [vmem:[%s4885_s7 + $0x30] ss:$20 sps:$4 sm:$0xff]  }
 0x115   :  { %v289_v61 = vpack.c.bf16 %v280_v58, %v279_v53  ;;  %955 = vmatprep.subr.bf16.mxu1 %v3484_v56  ;;  %v3545_v56 = vld [vmem:[%s4885_s7 + $0x28] ss:$20 sps:$4 sm:$0xff]  }
 0x117   :  { %2868 = vmatmul.mubr.msk.bf16.gmra.mrb[12].mxu1 %vm351_vm0, %v286_v21  ;;  %v301_v21 = vlaneseq }
 0x118   :  { %448 = vmatprep.mubr.bf16.mxu1 %v3598_v24  ;;  %956 = vmatpush1.bf16.msra.mxu1 %v3482_v60  ;;  %v3550_v60 = vld [vmem:[%s4885_s7 + $0x54] ss:$20 sps:$4 sm:$0xff]  }
 0x119   :  { %957 = vmatprep.subr.bf16.mxu1 %v3490_v62  ;;  %v3961_v22 = vshrl.u32 %v301_v21, 7 }
 0x11b   :  { %v3964_v23 = vsub.s32 0, %v3961_v22  ;;  %v3970_v26 = vsub.s32 1, %v3961_v22 }
 0x11c   :  { %958 = vmatpush1.bf16.msra.mxu1 %v3488_v54 }
 0x11d   :  { %959 = vmatprep.subr.bf16.mxu1 %v3496_v63  ;;  %v3973_v27 = vrot.slane %v299_v25, %v3964_v23  ;;  %v3976_v28 = vrot.slane %v299_v25, %v3970_v26 }
 0x11f   :  { %2869 = vmatmul.mubr.msk.bf16.gmra.mrb[16].mxu1 %vm351_vm0, %v287_v42 }
 0x120   :  { %458 = vmatprep.mubr.bf16.mxu1 %v3598_v24  ;;  %960 = vmatpush1.bf16.msra.mxu1 %v3494_v0 }
 0x121   :  { %961 = vmatprep.subr.bf16.mxu1 %v3502_v1 }
 0x124   :  { %962 = vmatpush1.bf16.msra.mxu1 %v3500_v2  ;;  %v3548_v2 = vld [vmem:[%s4885_s7 + $0x50] ss:$20 sps:$4 sm:$0xff]  }
 0x125   :  { %963 = vmatprep.subr.bf16.mxu1 %v3508_v3  ;;  %v3563_v3 = vld [vmem:[%s4885_s7 + $0x58] ss:$20 sps:$4 sm:$0xff]  }
 0x127   :  { %2870 = vmatmul.mubr.msk.bf16.gmra.mrb[20].mxu1 %vm351_vm0, %v288_v40 }
 0x128   :  { %468 = vmatprep.mubr.bf16.mxu1 %v3598_v24  ;;  %964 = vmatpush1.bf16.msra.mxu1 %v3506_v4 }
 0x129   :  { %965 = vmatprep.subr.bf16.mxu1 %v3514_v5 }
 0x12c   :  { %966 = vmatpush1.bf16.msra.mxu1 %v3512_v6  ;;  %v3556_v6 = vld [vmem:[%s4885_s7 + $0x7c] ss:$20 sps:$4 sm:$0xff]  }
 0x12d   :  { %967 = vmatprep.subr.bf16.mxu1 %v3520_v7  ;;  %v3571_v7 = vld [vmem:[%s4885_s7 + $0x84] ss:$20 sps:$4 sm:$0xff]  }
 0x12f   :  { %2871 = vmatmul.mubr.msk.bf16.gmra.mrb[24].mxu1 %vm351_vm0, %v289_v61  ;;  %v3565_v61 = vld [vmem:[%s4885_s7 + $0x5c] ss:$20 sps:$4 sm:$0xff]  }
 0x130   :  { %478 = vmatprep.mubr.bf16.mxu1 %v3598_v24  ;;  %968 = vmatpush1.bf16.msra.mxu1 %v3518_v8 }
 0x131   :  { %969 = vmatprep.subr.bf16.mxu1 %v3526_v9 }
 0x134   :  { %970 = vmatpush1.bf16.msra.mxu1 %v3524_v10 }
 0x135   :  { %971 = vmatprep.subr.bf16.mxu1 %v3532_v11 }
 0x137   :  { %2872 = vmatmul.mubr.msk.bf16.gmra.mrb[28].mxu1 %vm351_vm0, %v290_v59 }
 0x138   :  { %972 = vmatpush1.bf16.msra.mxu1 %v3530_v13  ;;  %v3554_v13 = vld [vmem:[%s4885_s7 + $0x78] ss:$20 sps:$4 sm:$0xff]  }
 0x139   :  { %973 = vmatprep.subr.bf16.mxu1 %v3538_v15 }
 0x13c   :  { %974 = vmatpush1.bf16.msra.mxu1 %v3536_v17  ;;  %v3562_v17 = vld [vmem:[%s4885_s7 + $0xa4] ss:$20 sps:$4 sm:$0xff]  }
 0x13d   :  { %1676 = vmatprep.subr.bf16.mxu1 %v3544_v19 }
 0x1d2   :  { %v410_v29 = vpop.f32.mrb[0].mxu1 }
 0x1d3   :  { %v411_v30 = vadd.f32 %v410_v29, %v3973_v27  ;;  %v412_v31 = vpop.f32.mrb[1].mxu1 }
 0x1d4   :  { %v413_v32 = vadd.f32 %v412_v31, %v3976_v28  ;;  %v414_v33 = vpop.f32.mrb[2].mxu1  ;;  %v3575_v31 = vld [vmem:[%s4885_s7 + $0xa8] ss:$20 sps:$4 sm:$0xff]  }
 0x1d5   :  { %v415_v34 = vadd.f32 %v414_v33, %v3973_v27  ;;  %v416_v35 = vpop.f32.mrb[3].mxu1  ;;  %v489_v37 = vmax.f32 %v411_v30, 0.0  ;;  %v3560_v30 = vld [vmem:[%s4885_s7 + $0xa0] ss:$20 sps:$4 sm:$0xff]  }
 0x1d6   :  { %v417_v36 = vadd.f32 %v416_v35, %v3976_v28  ;;  %v490_v39 = vmax.f32 %v413_v32, 0.0  ;;  %v3580_v35 = vld [vmem:[%s4885_s7 + $0xd4] ss:$20 sps:$4 sm:$0xff]  }
 0x1d7   :  { %v491_v38 = vmax.f32 %v415_v34, 0.0  ;;  %v3568_v34 = vld [vmem:[%s4885_s7 + $0xcc] ss:$20 sps:$4 sm:$0xff]  }
 0x1d8   :  { %v492_v40 = vmax.f32 %v417_v36, 0.0 }
 0x1d9   :  { %v521_v41 = vpack.c.bf16 %v491_v38, %v489_v37 }
 0x1da   :  { %v522_v42 = vpack.c.bf16 %v492_v40, %v490_v39  ;;  %v420_v43 = vpop.f32.mrb[4].mxu1 }
 0x1db   :  { %v421_v46 = vadd.f32 %v420_v43, %v3973_v27  ;;  %v422_v47 = vpop.f32.mrb[5].mxu1 }
 0x1dc   :  { %v423_v50 = vadd.f32 %v422_v47, %v3976_v28  ;;  %v424_v51 = vpop.f32.mrb[6].mxu1  ;;  %975 = vmatprep.mubr.bf16.mxu1 %v522_v42  ;;  %1088 = vmatprep.mubr.bf16.mxu0 %v522_v42  ;;  %v3578_v42 = vld [vmem:[%s4885_s7 + $0xd0] ss:$20 sps:$4 sm:$0xff]  }
 0x1dd   :  { %v425_v52 = vadd.f32 %v424_v51, %v3973_v27  ;;  %v426_v53 = vpop.f32.mrb[7].mxu1  ;;  %976 = vmatmul.mubr.bf16.vlgmr.msra.gmra.mrb[32].mxu1 %v521_v41  ;;  %1089 = vmatmul.mubr.bf16.vlgmr.msra.gmra.mrb[16].mxu0 %v521_v41  ;;  %v493_v58 = vmax.f32 %v421_v46, 0.0  ;;  %v3566_v41 = vld [vmem:[%s4885_s7 + $0xc8] ss:$20 sps:$4 sm:$0xff]  }
 0x1de   :  { %v427_v55 = vadd.f32 %v426_v53, %v3976_v28  ;;  %1677 = vmatpush1.bf16.msra.mxu1 %v3542_v44  ;;  %1870 = vmatpush1.bf16.msra.mxu0 %v3551_v45  ;;  %v494_v62 = vmax.f32 %v423_v50, 0.0  ;;  %v3574_v45 = vld [vmem:[%s4885_s7 + $0xf4] ss:$20 sps:$4 sm:$0xff]   ;;  %v3586_v46 = vld [vmem:[%s4885_s7 + $0xfc] ss:$20 sps:$4 sm:$0xff]  }
 0x1df   :  { %v495_v59 = vmax.f32 %v425_v52, 0.0  ;;  %1678 = vmatprep.subr.bf16.mxu1 %v3547_v48  ;;  %1871 = vmatprep.subr.bf16.mxu0 %v3559_v49  ;;  %v3572_v52 = vld [vmem:[%s4885_s7 + $0xf0] ss:$20 sps:$4 sm:$0xff]   ;;  %v3584_v53 = vld [vmem:[%s4885_s7 + $0xf8] ss:$20 sps:$4 sm:$0xff]  }
 0x1e0   :  { %v496_v54 = vmax.f32 %v427_v55, 0.0 }
 0x1e1   :  { %v523_v63 = vpack.c.bf16 %v495_v59, %v493_v58 }
 0x1e2   :  { %v524_v0 = vpack.c.bf16 %v496_v54, %v494_v62  ;;  %v430_v1 = vpop.f32.mrb[8].mxu1  ;;  %1679 = vmatpush1.bf16.msra.mxu1 %v3545_v56  ;;  %1872 = vmatpush1.bf16.msra.mxu0 %v3557_v57  ;;  %v3583_v57 = vld [vmem:[%s4885_s7 + $0x11c] ss:$20 sps:$4 sm:$0xff]   ;;  %v3581_v54 = vld [vmem:[%s4885_s7 + $0x118] ss:$20 sps:$4 sm:$0xff]  }
 0x1e3   :  { %v431_v4 = vadd.f32 %v430_v1, %v3973_v27  ;;  %v432_v5 = vpop.f32.mrb[9].mxu1  ;;  %1680 = vmatprep.subr.bf16.mxu1 %v3550_v60  ;;  %1873 = vmatprep.subr.bf16.mxu0 %v3565_v61 }
 0x1e4   :  { %v433_v8 = vadd.f32 %v432_v5, %v3976_v28  ;;  %v434_v9 = vpop.f32.mrb[10].mxu1  ;;  %985 = vmatprep.mubr.bf16.mxu1 %v524_v0  ;;  %1098 = vmatprep.mubr.bf16.mxu0 %v524_v0 }
 0x1e5   :  { %v435_v10 = vadd.f32 %v434_v9, %v3973_v27  ;;  %v436_v11 = vpop.f32.mrb[11].mxu1  ;;  %986 = vmatmul.mubr.bf16.gmra.mrb[36].mxu1 %v523_v63  ;;  %1099 = vmatmul.mubr.bf16.gmra.mrb[20].mxu0 %v523_v63  ;;  %v497_v15 = vmax.f32 %v431_v4, 0.0 }
 0x1e6   :  { %v437_v12 = vadd.f32 %v436_v11, %v3976_v28  ;;  %1681 = vmatpush1.bf16.msra.mxu1 %v3548_v2  ;;  %1874 = vmatpush1.bf16.msra.mxu0 %v3563_v3  ;;  %v498_v19 = vmax.f32 %v433_v8, 0.0 }
 0x1e7   :  { %v499_v16 = vmax.f32 %v435_v10, 0.0  ;;  %1682 = vmatprep.subr.bf16.mxu1 %v3556_v6  ;;  %1875 = vmatprep.subr.bf16.mxu0 %v3571_v7 }
 0x1e8   :  { %v500_v20 = vmax.f32 %v437_v12, 0.0 }
 0x1e9   :  { %v525_v21 = vpack.c.bf16 %v499_v16, %v497_v15 }
 0x1ea   :  { %v526_v25 = vpack.c.bf16 %v500_v20, %v498_v19  ;;  %v440_v29 = vpop.f32.mrb[12].mxu1  ;;  %1683 = vmatpush1.bf16.msra.mxu1 %v3554_v13  ;;  %1876 = vmatpush1.bf16.msra.mxu0 %v3569_v14 }
 0x1eb   :  { %v441_v32 = vadd.f32 %v440_v29, %v3973_v27  ;;  %v442_v33 = vpop.f32.mrb[13].mxu1  ;;  %1684 = vmatprep.subr.bf16.mxu1 %v3562_v17  ;;  %1877 = vmatprep.subr.bf16.mxu0 %v3577_v18 }
 0x1ec   :  { %v443_v36 = vadd.f32 %v442_v33, %v3976_v28  ;;  %v444_v37 = vpop.f32.mrb[14].mxu1  ;;  %995 = vmatprep.mubr.bf16.mxu1 %v526_v25  ;;  %1108 = vmatprep.mubr.bf16.mxu0 %v526_v25 }
 0x1ed   :  { %v445_v38 = vadd.f32 %v444_v37, %v3973_v27  ;;  %v446_v39 = vpop.f32.mrb[15].mxu1  ;;  %996 = vmatmul.mubr.bf16.gmra.mrb[40].mxu1 %v525_v21  ;;  %1109 = vmatmul.mubr.bf16.gmra.mrb[24].mxu0 %v525_v21  ;;  %v501_v43 = vmax.f32 %v441_v32, 0.0 }
 0x1ee   :  { %v447_v40 = vadd.f32 %v446_v39, %v3976_v28  ;;  %1685 = vmatpush1.bf16.msra.mxu1 %v3560_v30  ;;  %1878 = vmatpush1.bf16.msra.mxu0 %v3575_v31  ;;  %v502_v47 = vmax.f32 %v443_v36, 0.0 }
 0x1ef   :  { %v503_v44 = vmax.f32 %v445_v38, 0.0  ;;  %1686 = vmatprep.subr.bf16.mxu1 %v3568_v34  ;;  %1879 = vmatprep.subr.bf16.mxu0 %v3580_v35 }
 0x1f0   :  { %v504_v48 = vmax.f32 %v447_v40, 0.0 }
 0x1f1   :  { %v527_v49 = vpack.c.bf16 %v503_v44, %v501_v43 }
 0x1f2   :  { %v528_v50 = vpack.c.bf16 %v504_v48, %v502_v47  ;;  %v450_v51 = vpop.f32.mrb[16].mxu1  ;;  %1687 = vmatpush1.bf16.msra.mxu1 %v3566_v41  ;;  %1880 = vmatpush1.bf16.msra.mxu0 %v3578_v42 }
 0x1f3   :  { %v451_v55 = vadd.f32 %v450_v51, %v3973_v27  ;;  %v452_v56 = vpop.f32.mrb[17].mxu1  ;;  %1688 = vmatprep.subr.bf16.mxu1 %v3574_v45  ;;  %1881 = vmatprep.subr.bf16.mxu0 %v3586_v46 }
 0x1f4   :  { %v453_v58 = vadd.f32 %v452_v56, %v3976_v28  ;;  %v454_v59 = vpop.f32.mrb[18].mxu1  ;;  %1005 = vmatprep.mubr.bf16.mxu1 %v528_v50  ;;  %1118 = vmatprep.mubr.bf16.mxu0 %v528_v50  ;;  %v601_v56 = vld [vmem:[%s4887_s6] sm:$0xf] }
 0x1f5   :  { %v455_v60 = vadd.f32 %v454_v59, %v3973_v27  ;;  %v456_v61 = vpop.f32.mrb[19].mxu1  ;;  %1006 = vmatmul.mubr.bf16.gmra.mrb[44].mxu1 %v527_v49  ;;  %1119 = vmatmul.mubr.bf16.gmra.mrb[28].mxu0 %v527_v49  ;;  %v505_v63 = vmax.f32 %v451_v55, 0.0  ;;  %v613_v55 = vsub.s32 2, %v3961_v22 }
 0x1f6   :  { %v457_v62 = vadd.f32 %v456_v61, %v3976_v28  ;;  %1689 = vmatpush1.bf16.msra.mxu1 %v3572_v52  ;;  %1882 = vmatpush1.bf16.msra.mxu0 %v3584_v53  ;;  %v506_v1 = vmax.f32 %v453_v58, 0.0  ;;  %v3590_v53 = vld [vmem:[%s4885_s7 + $0x10] ss:$20 sps:$4 sm:$0xff]   ;;  %v4111_v58 = vrot.slane %v601_v56, %v3964_v23 }
 0x1f7   :  { %v507_v0 = vmax.f32 %v455_v60, 0.0  ;;  %1690 = vmatprep.subr.bf16.mxu1 %v3583_v57  ;;  %v617_v57 = vsub.s32 3, %v3961_v22  ;;  %v4115_v59 = vrot.slane %v601_v56, %v613_v55  ;;  %v4118_v60 = vrot.slane %v601_v56, %v3970_v26 }
 0x1f8   :  { %v508_v2 = vmax.f32 %v457_v62, 0.0 }
 0x1f9   :  { %v529_v3 = vpack.c.bf16 %v507_v0, %v505_v63  ;;  %v4122_v61 = vrot.slane %v601_v56, %v617_v57 }
 0x1fa   :  { %v530_v4 = vpack.c.bf16 %v508_v2, %v506_v1  ;;  %v460_v5 = vpop.f32.mrb[20].mxu1  ;;  %1691 = vmatpush1.bf16.msra.mxu1 %v3581_v54 }
 0x1fb   :  { %v461_v6 = vadd.f32 %v460_v5, %v3973_v27  ;;  %v462_v7 = vpop.f32.mrb[21].mxu1  ;;  %3401 = vmatprep.subr.bf16.mxu1 %v3590_v53 }
 0x1fc   :  { %v463_v8 = vadd.f32 %v462_v7, %v3976_v28  ;;  %v464_v9 = vpop.f32.mrb[22].mxu1  ;;  %1015 = vmatprep.mubr.bf16.mxu1 %v530_v4  ;;  %1128 = vmatprep.mubr.bf16.mxu0 %v530_v4 }
 0x1fd   :  { %v465_v10 = vadd.f32 %v464_v9, %v3973_v27  ;;  %v466_v11 = vpop.f32.mrb[23].mxu1  ;;  %1016 = vmatmul.mubr.bf16.gmra.mrb[48].mxu1 %v529_v3  ;;  %1129 = vmatmul.mubr.bf16.gmra.mrb[32].mxu0 %v529_v3  ;;  %v509_v13 = vmax.f32 %v461_v6, 0.0 }
 0x1fe   :  { %v467_v12 = vadd.f32 %v466_v11, %v3976_v28  ;;  %v510_v15 = vmax.f32 %v463_v8, 0.0 }
 0x1ff   :  { %v511_v14 = vmax.f32 %v465_v10, 0.0 }
 0x200   :  { %v512_v16 = vmax.f32 %v467_v12, 0.0 }
 0x201   :  { %v531_v17 = vpack.c.bf16 %v511_v14, %v509_v13 }
 0x202   :  { %v532_v18 = vpack.c.bf16 %v512_v16, %v510_v15  ;;  %v470_v19 = vpop.f32.mrb[24].mxu1 }
 0x203   :  { %v471_v20 = vadd.f32 %v470_v19, %v3973_v27  ;;  %v472_v21 = vpop.f32.mrb[25].mxu1 }
 0x204   :  { %v473_v25 = vadd.f32 %v472_v21, %v3976_v28  ;;  %v474_v29 = vpop.f32.mrb[26].mxu1  ;;  %1025 = vmatprep.mubr.bf16.mxu1 %v532_v18  ;;  %1138 = vmatprep.mubr.bf16.mxu0 %v532_v18 }
 0x205   :  { %v475_v30 = vadd.f32 %v474_v29, %v3973_v27  ;;  %v476_v31 = vpop.f32.mrb[27].mxu1  ;;  %1026 = vmatmul.mubr.bf16.gmra.mrb[52].mxu1 %v531_v17  ;;  %1139 = vmatmul.mubr.bf16.gmra.mrb[36].mxu0 %v531_v17  ;;  %v513_v33 = vmax.f32 %v471_v20, 0.0  ;;  %v3591_v17 = vld [vmem:[%s4885_s7 + $0x38] ss:$20 sps:$4 sm:$0xff]  }
 0x206   :  { %v477_v32 = vadd.f32 %v476_v31, %v3976_v28  ;;  %v514_v35 = vmax.f32 %v473_v25, 0.0 }
 0x207   :  { %v515_v34 = vmax.f32 %v475_v30, 0.0 }
 0x208   :  { %v516_v36 = vmax.f32 %v477_v32, 0.0  ;;  %v3592_v32 = vld [vmem:[%s4885_s7 + $0x60] ss:$20 sps:$4 sm:$0xff]  }
 0x209   :  { %v533_v37 = vpack.c.bf16 %v515_v34, %v513_v33 }
 0x20a   :  { %v534_v38 = vpack.c.bf16 %v516_v36, %v514_v35  ;;  %v480_v39 = vpop.f32.mrb[28].mxu1 }
 0x20b   :  { %v481_v40 = vadd.f32 %v480_v39, %v3973_v27  ;;  %v482_v41 = vpop.f32.mrb[29].mxu1 }
 0x20c   :  { %v483_v42 = vadd.f32 %v482_v41, %v3976_v28  ;;  %v484_v43 = vpop.f32.mrb[30].mxu1  ;;  %1035 = vmatprep.mubr.bf16.mxu1 %v534_v38  ;;  %1148 = vmatprep.mubr.bf16.mxu0 %v534_v38 }
 0x20d   :  { %v485_v44 = vadd.f32 %v484_v43, %v3973_v27  ;;  %v486_v45 = vpop.f32.mrb[31].mxu1  ;;  %1036 = vmatmul.mubr.bf16.gmra.mrb[56].mxu1 %v533_v37  ;;  %1149 = vmatmul.mubr.bf16.gmra.mrb[40].mxu0 %v533_v37  ;;  %v517_v47 = vmax.f32 %v481_v40, 0.0  ;;  %v3589_v27 = vld [vmem:[%s4885_s7 + $0x124] ss:$20 sps:$4 sm:$0xff]  }
 0x20e   :  { %v487_v46 = vadd.f32 %v486_v45, %v3976_v28  ;;  %v518_v49 = vmax.f32 %v483_v42, 0.0  ;;  %v3587_v28 = vld [vmem:[%s4885_s7 + $0x120] ss:$20 sps:$4 sm:$0xff]   ;;  %1883 = vmatprep.subr.bf16.mxu0 %v3589_v27 }
 0x20f   :  { %v519_v48 = vmax.f32 %v485_v44, 0.0  ;;  %1884 = vmatpush1.bf16.msra.mxu0 %v3587_v28 }
 0x210   :  { %v520_v50 = vmax.f32 %v487_v46, 0.0  ;;  %3353 = vmatprep.subr.bf16.mxu0 %v3590_v53 }
 0x211   :  { %v535_v51 = vpack.c.bf16 %v519_v48, %v517_v47 }
 0x212   :  { %v536_v52 = vpack.c.bf16 %v520_v50, %v518_v49  ;;  %v3593_v49 = vld [vmem:[%s4885_s7 + $0x88] ss:$20 sps:$4 sm:$0xff]  }
 0x214   :  { %1045 = vmatprep.mubr.bf16.mxu1 %v536_v52  ;;  %1158 = vmatprep.mubr.bf16.mxu0 %v536_v52 }
 0x215   :  { %1046 = vmatmul.mubr.bf16.gmra.mrb[60].mxu1 %v535_v51  ;;  %1159 = vmatmul.mubr.bf16.gmra.mrb[44].mxu0 %v535_v51 }
 0x216   :  { %1708 = vmatprep.mubr.bf16.mxu1 %v3598_v24  ;;  %1901 = vmatprep.mubr.bf16.mxu0 %v3598_v24 }
 0x2b0   :  { %v977_v62 = vpop.f32.mrb[32].mxu1  ;;  %v1090_v54 = vpop.f32.mrb[16].mxu0 }
 0x2b1   :  { %v978_v63 = vadd.f32 %v977_v62, %v4111_v58  ;;  %v1091_v0 = vadd.f32 %v1090_v54, %v4115_v59  ;;  %v979_v1 = vpop.f32.mrb[33].mxu1  ;;  %v1092_v2 = vpop.f32.mrb[17].mxu0 }
 0x2b2   :  { %v980_v3 = vadd.f32 %v979_v1, %v4118_v60  ;;  %v1093_v4 = vadd.f32 %v1092_v2, %v4122_v61  ;;  %v981_v5 = vpop.f32.mrb[34].mxu1  ;;  %v1094_v6 = vpop.f32.mrb[18].mxu0 }
 0x2b3   :  { %v982_v7 = vadd.f32 %v981_v5, %v4111_v58  ;;  %v1095_v8 = vadd.f32 %v1094_v6, %v4115_v59  ;;  %v983_v9 = vpop.f32.mrb[35].mxu1  ;;  %v1096_v10 = vpop.f32.mrb[19].mxu0 }
 0x2b4   :  { %v3153_v11 = vpack.c.bf16 %v980_v3, %v978_v63  ;;  %v3154_v12 = vpack.c.bf16 %v1093_v4, %v1091_v0  ;;  %v984_v13 = vadd.f32 %v983_v9, %v4118_v60  ;;  %v1097_v14 = vadd.f32 %v1096_v10, %v4122_v61 }
 0x2b5   :  { %v4132_v15 = vpack.c.bf16 %v982_v7, %v978_v63  ;;  %v4134_v16 = vpack.c.bf16 %v1095_v8, %v1091_v0  ;;  %v3594_v0 = vld [vmem:[%s4885_s7 + $0xb0] ss:$20 sps:$4 sm:$0xff]  }
 0x2b6   :  { %1361 = vst [vmem:[%s4888_s9] sm:$0xff] %v3153_v11  ;;  %1362 = vst [vmem:[%s4888_s9 + $0x8] sm:$0xff] %v3154_v12  ;;  %v3155_v18 = vpack.c.bf16 %v984_v13, %v982_v7  ;;  %v3156_v19 = vpack.c.bf16 %v1097_v14, %v1095_v8  ;;  %v3595_v13 = vld [vmem:[%s4885_s7 + $0xd8] ss:$20 sps:$4 sm:$0xff]  }
 0x2b7   :  { %1709 = vmatmul.mubr.bf16.vlgmr.msra.gmra.mrb[64].mxu1 %v4132_v15  ;;  %1902 = vmatmul.mubr.bf16.vlgmr.msra.gmra.mrb[48].mxu0 %v4132_v15 }
 0x2b8   :  { %1363 = vst [vmem:[%s4888_s9 + $0x10] sm:$0xff] %v3155_v18  ;;  %1364 = vst [vmem:[%s4888_s9 + $0x18] sm:$0xff] %v3156_v19  ;;  %3409 = vmatpush3.bf16.msra.mxu1 %v3590_v53  ;;  %v987_v20 = vpop.f32.mrb[36].mxu1  ;;  %v1100_v21 = vpop.f32.mrb[20].mxu0  ;;  %1718 = vmatprep.mubr.bf16.mxu1 %v3598_v24 }
 0x2b9   :  { %v988_v25 = vadd.f32 %v987_v20, %v4111_v58  ;;  %v1101_v29 = vadd.f32 %v1100_v21, %v4115_v59  ;;  %v989_v30 = vpop.f32.mrb[37].mxu1  ;;  %v1102_v31 = vpop.f32.mrb[21].mxu0  ;;  %1911 = vmatprep.mubr.bf16.mxu0 %v3598_v24  ;;  %3402 = vmatprep.subr.bf16.mxu1 %v3591_v17 }
 0x2ba   :  { %v990_v33 = vadd.f32 %v989_v30, %v4118_v60  ;;  %v1103_v34 = vadd.f32 %v1102_v31, %v4122_v61  ;;  %v991_v35 = vpop.f32.mrb[38].mxu1  ;;  %v1104_v36 = vpop.f32.mrb[22].mxu0  ;;  %3354 = vmatpush3.bf16.msra.mxu0 %v3590_v53 }
 0x2bb   :  { %v992_v37 = vadd.f32 %v991_v35, %v4111_v58  ;;  %v1105_v38 = vadd.f32 %v1104_v36, %v4115_v59  ;;  %v993_v39 = vpop.f32.mrb[39].mxu1  ;;  %v1106_v40 = vpop.f32.mrb[23].mxu0  ;;  %3355 = vmatprep.subr.bf16.mxu0 %v3591_v17 }
 0x2bc   :  { %v3157_v41 = vpack.c.bf16 %v990_v33, %v988_v25  ;;  %v3158_v42 = vpack.c.bf16 %v1103_v34, %v1101_v29  ;;  %v994_v43 = vadd.f32 %v993_v39, %v4118_v60  ;;  %v1107_v44 = vadd.f32 %v1106_v40, %v4122_v61  ;;  %3410 = vmatpush3.bf16.msra.mxu1 %v3591_v17 }
 0x2bd   :  { %v4166_v45 = vpack.c.bf16 %v992_v37, %v988_v25  ;;  %v4168_v46 = vpack.c.bf16 %v1105_v38, %v1101_v29  ;;  %3403 = vmatprep.subr.bf16.mxu1 %v3592_v32 }
 0x2be   :  { %1365 = vst [vmem:[%s4888_s9 + $0x20] sm:$0xff] %v3157_v41  ;;  %1366 = vst [vmem:[%s4888_s9 + $0x28] sm:$0xff] %v3158_v42  ;;  %v3159_v47 = vpack.c.bf16 %v994_v43, %v992_v37  ;;  %v3160_v48 = vpack.c.bf16 %v1107_v44, %v1105_v38  ;;  %3356 = vmatpush3.bf16.msra.mxu0 %v3591_v17 }
 0x2bf   :  { %1719 = vmatmul.mubr.bf16.gmra.mrb[68].mxu1 %v4166_v45  ;;  %1912 = vmatmul.mubr.bf16.gmra.mrb[52].mxu0 %v4166_v45 }
 0x2c0   :  { %1367 = vst [vmem:[%s4888_s9 + $0x30] sm:$0xff] %v3159_v47  ;;  %1368 = vst [vmem:[%s4888_s9 + $0x38] sm:$0xff] %v3160_v48  ;;  %v997_v50 = vpop.f32.mrb[40].mxu1  ;;  %v1110_v51 = vpop.f32.mrb[24].mxu0  ;;  %1728 = vmatprep.mubr.bf16.mxu1 %v3598_v24  ;;  %1921 = vmatprep.mubr.bf16.mxu0 %v3598_v24  ;;  %v3597_v47 = vld [vmem:[%s4885_s7 + $0x128] ss:$20 sps:$4 sm:$0xff]  }
 0x2c1   :  { %v998_v52 = vadd.f32 %v997_v50, %v4111_v58  ;;  %v1111_v27 = vadd.f32 %v1110_v51, %v4115_v59  ;;  %v999_v28 = vpop.f32.mrb[41].mxu1  ;;  %v1112_v53 = vpop.f32.mrb[25].mxu0  ;;  %3411 = vmatpush3.bf16.msra.mxu1 %v3592_v32  ;;  %3357 = vmatprep.subr.bf16.mxu0 %v3592_v32 }
 0x2c2   :  { %v1000_v56 = vadd.f32 %v999_v28, %v4118_v60  ;;  %v1113_v62 = vadd.f32 %v1112_v53, %v4122_v61  ;;  %v1001_v54 = vpop.f32.mrb[42].mxu1  ;;  %v1114_v63 = vpop.f32.mrb[26].mxu0  ;;  %3404 = vmatprep.subr.bf16.mxu1 %v3593_v49  ;;  %3358 = vmatpush3.bf16.msra.mxu0 %v3592_v32  ;;  %v3596_v32 = vld [vmem:[%s4885_s7 + $0x100] ss:$20 sps:$4 sm:$0xff]  }
 0x2c3   :  { %v1002_v1 = vadd.f32 %v1001_v54, %v4111_v58  ;;  %v1115_v2 = vadd.f32 %v1114_v63, %v4115_v59  ;;  %v1003_v3 = vpop.f32.mrb[43].mxu1  ;;  %v1116_v4 = vpop.f32.mrb[27].mxu0  ;;  %3359 = vmatprep.subr.bf16.mxu0 %v3593_v49 }
 0x2c4   :  { %v3161_v5 = vpack.c.bf16 %v1000_v56, %v998_v52  ;;  %v3162_v6 = vpack.c.bf16 %v1113_v62, %v1111_v27  ;;  %v1004_v7 = vadd.f32 %v1003_v3, %v4118_v60  ;;  %v1117_v8 = vadd.f32 %v1116_v4, %v4122_v61 }
 0x2c5   :  { %v4200_v9 = vpack.c.bf16 %v1002_v1, %v998_v52  ;;  %v4202_v10 = vpack.c.bf16 %v1115_v2, %v1111_v27  ;;  %3412 = vmatpush3.bf16.msra.mxu1 %v3593_v49 }
 0x2c6   :  { %1369 = vst [vmem:[%s4888_s9 + $0x40] sm:$0xff] %v3161_v5  ;;  %1370 = vst [vmem:[%s4888_s9 + $0x48] sm:$0xff] %v3162_v6  ;;  %v3163_v11 = vpack.c.bf16 %v1004_v7, %v1002_v1  ;;  %v3164_v12 = vpack.c.bf16 %v1117_v8, %v1115_v2  ;;  %3405 = vmatprep.subr.bf16.mxu1 %v3594_v0  ;;  %3360 = vmatpush3.bf16.msra.mxu0 %v3593_v49 }
 0x2c7   :  { %1729 = vmatmul.mubr.bf16.gmra.mrb[72].mxu1 %v4200_v9  ;;  %1922 = vmatmul.mubr.bf16.gmra.mrb[56].mxu0 %v4200_v9 }
 0x2c8   :  { %1371 = vst [vmem:[%s4888_s9 + $0x50] sm:$0xff] %v3163_v11  ;;  %1372 = vst [vmem:[%s4888_s9 + $0x58] sm:$0xff] %v3164_v12  ;;  %v1007_v14 = vpop.f32.mrb[44].mxu1  ;;  %v1120_v17 = vpop.f32.mrb[28].mxu0  ;;  %1738 = vmatprep.mubr.bf16.mxu1 %v3598_v24  ;;  %1931 = vmatprep.mubr.bf16.mxu0 %v3598_v24 }
 0x2c9   :  { %v1008_v18 = vadd.f32 %v1007_v14, %v4111_v58  ;;  %v1121_v19 = vadd.f32 %v1120_v17, %v4115_v59  ;;  %v1009_v20 = vpop.f32.mrb[45].mxu1  ;;  %v1122_v21 = vpop.f32.mrb[29].mxu0  ;;  %3413 = vmatpush3.bf16.msra.mxu1 %v3594_v0  ;;  %3361 = vmatprep.subr.bf16.mxu0 %v3594_v0 }
 0x2ca   :  { %v1010_v25 = vadd.f32 %v1009_v20, %v4118_v60  ;;  %v1123_v29 = vadd.f32 %v1122_v21, %v4122_v61  ;;  %v1011_v30 = vpop.f32.mrb[46].mxu1  ;;  %v1124_v31 = vpop.f32.mrb[30].mxu0  ;;  %3406 = vmatprep.subr.bf16.mxu1 %v3595_v13  ;;  %3362 = vmatpush3.bf16.msra.mxu0 %v3594_v0 }
 0x2cb   :  { %v1012_v33 = vadd.f32 %v1011_v30, %v4111_v58  ;;  %v1125_v34 = vadd.f32 %v1124_v31, %v4115_v59  ;;  %v1013_v35 = vpop.f32.mrb[47].mxu1  ;;  %v1126_v36 = vpop.f32.mrb[31].mxu0  ;;  %3363 = vmatprep.subr.bf16.mxu0 %v3595_v13 }
 0x2cc   :  { %v3165_v37 = vpack.c.bf16 %v1010_v25, %v1008_v18  ;;  %v3166_v38 = vpack.c.bf16 %v1123_v29, %v1121_v19  ;;  %v1014_v39 = vadd.f32 %v1013_v35, %v4118_v60  ;;  %v1127_v40 = vadd.f32 %v1126_v36, %v4122_v61 }
 0x2cd   :  { %v4234_v41 = vpack.c.bf16 %v1012_v33, %v1008_v18  ;;  %v4236_v42 = vpack.c.bf16 %v1125_v34, %v1121_v19  ;;  %3414 = vmatpush3.bf16.msra.mxu1 %v3595_v13 }
 0x2ce   :  { %1373 = vst [vmem:[%s4888_s9 + $0x60] sm:$0xff] %v3165_v37  ;;  %1374 = vst [vmem:[%s4888_s9 + $0x68] sm:$0xff] %v3166_v38  ;;  %v3167_v43 = vpack.c.bf16 %v1014_v39, %v1012_v33  ;;  %v3168_v44 = vpack.c.bf16 %v1127_v40, %v1125_v34  ;;  %3407 = vmatprep.subr.bf16.mxu1 %v3596_v32  ;;  %3364 = vmatpush3.bf16.msra.mxu0 %v3595_v13 }
 0x2cf   :  { %1739 = vmatmul.mubr.bf16.gmra.mrb[76].mxu1 %v4234_v41  ;;  %1932 = vmatmul.mubr.bf16.gmra.mrb[60].mxu0 %v4234_v41 }
 0x2d0   :  { %1375 = vst [vmem:[%s4888_s9 + $0x70] sm:$0xff] %v3167_v43  ;;  %1376 = vst [vmem:[%s4888_s9 + $0x78] sm:$0xff] %v3168_v44  ;;  %v1017_v48 = vpop.f32.mrb[48].mxu1  ;;  %v1130_v49 = vpop.f32.mrb[32].mxu0  ;;  %1748 = vmatprep.mubr.bf16.mxu1 %v3598_v24  ;;  %1941 = vmatprep.mubr.bf16.mxu0 %v3598_v24 }
 0x2d1   :  { %v1018_v50 = vadd.f32 %v1017_v48, %v4111_v58  ;;  %v1131_v51 = vadd.f32 %v1130_v49, %v4115_v59  ;;  %v1019_v52 = vpop.f32.mrb[49].mxu1  ;;  %v1132_v27 = vpop.f32.mrb[33].mxu0  ;;  %3415 = vmatpush3.bf16.msra.mxu1 %v3596_v32  ;;  %3365 = vmatprep.subr.bf16.mxu0 %v3596_v32 }
 0x2d2   :  { %v1020_v28 = vadd.f32 %v1019_v52, %v4118_v60  ;;  %v1133_v53 = vadd.f32 %v1132_v27, %v4122_v61  ;;  %v1021_v56 = vpop.f32.mrb[50].mxu1  ;;  %v1134_v62 = vpop.f32.mrb[34].mxu0  ;;  %3408 = vmatprep.subr.bf16.mxu1 %v3597_v47  ;;  %3366 = vmatpush3.bf16.msra.mxu0 %v3596_v32 }
 0x2d3   :  { %v1022_v54 = vadd.f32 %v1021_v56, %v4111_v58  ;;  %v1135_v63 = vadd.f32 %v1134_v62, %v4115_v59  ;;  %v1023_v0 = vpop.f32.mrb[51].mxu1  ;;  %v1136_v1 = vpop.f32.mrb[35].mxu0  ;;  %3367 = vmatprep.subr.bf16.mxu0 %v3597_v47 }
 0x2d4   :  { %v3169_v2 = vpack.c.bf16 %v1020_v28, %v1018_v50  ;;  %v3170_v3 = vpack.c.bf16 %v1133_v53, %v1131_v51  ;;  %v1024_v4 = vadd.f32 %v1023_v0, %v4118_v60  ;;  %v1137_v5 = vadd.f32 %v1136_v1, %v4122_v61 }
 0x2d5   :  { %v4265_v6 = vpack.c.bf16 %v1022_v54, %v1018_v50  ;;  %v4267_v7 = vpack.c.bf16 %v1135_v63, %v1131_v51  ;;  %3416 = vmatpush3.bf16.msra.mxu1 %v3597_v47 }
 0x2d6   :  { %1377 = vst [vmem:[%s4888_s9 + $0x80] sm:$0xff] %v3169_v2  ;;  %1378 = vst [vmem:[%s4888_s9 + $0x88] sm:$0xff] %v3170_v3  ;;  %v3171_v8 = vpack.c.bf16 %v1024_v4, %v1022_v54  ;;  %v3172_v11 = vpack.c.bf16 %v1137_v5, %v1135_v63  ;;  %3368 = vmatpush3.bf16.msra.mxu0 %v3597_v47 }
 0x2d7   :  { %1749 = vmatmul.mubr.bf16.gmra.mrb[80].mxu1 %v4265_v6  ;;  %1942 = vmatmul.mubr.bf16.gmra.mrb[64].mxu0 %v4265_v6 }
 0x2d8   :  { %1379 = vst [vmem:[%s4888_s9 + $0x90] sm:$0xff] %v3171_v8  ;;  %1380 = vst [vmem:[%s4888_s9 + $0x98] sm:$0xff] %v3172_v11  ;;  %v1027_v12 = vpop.f32.mrb[52].mxu1  ;;  %v1140_v13 = vpop.f32.mrb[36].mxu0  ;;  %1758 = vmatprep.mubr.bf16.mxu1 %v3598_v24  ;;  %1951 = vmatprep.mubr.bf16.mxu0 %v3598_v24 }
 0x2d9   :  { %v1028_v14 = vadd.f32 %v1027_v12, %v4111_v58  ;;  %v1141_v17 = vadd.f32 %v1140_v13, %v4115_v59  ;;  %v1029_v18 = vpop.f32.mrb[53].mxu1  ;;  %v1142_v19 = vpop.f32.mrb[37].mxu0 }
 0x2da   :  { %v1030_v20 = vadd.f32 %v1029_v18, %v4118_v60  ;;  %v1143_v21 = vadd.f32 %v1142_v19, %v4122_v61  ;;  %v1031_v25 = vpop.f32.mrb[54].mxu1  ;;  %v1144_v29 = vpop.f32.mrb[38].mxu0 }
 0x2db   :  { %v1032_v30 = vadd.f32 %v1031_v25, %v4111_v58  ;;  %v1145_v31 = vadd.f32 %v1144_v29, %v4115_v59  ;;  %v1033_v32 = vpop.f32.mrb[55].mxu1  ;;  %v1146_v33 = vpop.f32.mrb[39].mxu0 }
 0x2dc   :  { %v3173_v34 = vpack.c.bf16 %v1030_v20, %v1028_v14  ;;  %v3174_v35 = vpack.c.bf16 %v1143_v21, %v1141_v17  ;;  %v1034_v36 = vadd.f32 %v1033_v32, %v4118_v60  ;;  %v1147_v37 = vadd.f32 %v1146_v33, %v4122_v61 }
 0x2dd   :  { %v4293_v38 = vpack.c.bf16 %v1032_v30, %v1028_v14  ;;  %v4295_v39 = vpack.c.bf16 %v1145_v31, %v1141_v17 }
 0x2de   :  { %1381 = vst [vmem:[%s4888_s9 + $0xa0] sm:$0xff] %v3173_v34  ;;  %1382 = vst [vmem:[%s4888_s9 + $0xa8] sm:$0xff] %v3174_v35  ;;  %v3175_v40 = vpack.c.bf16 %v1034_v36, %v1032_v30  ;;  %v3176_v43 = vpack.c.bf16 %v1147_v37, %v1145_v31 }
 0x2df   :  { %1759 = vmatmul.mubr.bf16.gmra.mrb[84].mxu1 %v4293_v38  ;;  %1952 = vmatmul.mubr.bf16.gmra.mrb[68].mxu0 %v4293_v38 }
 0x2e0   :  { %1383 = vst [vmem:[%s4888_s9 + $0xb0] sm:$0xff] %v3175_v40  ;;  %1384 = vst [vmem:[%s4888_s9 + $0xb8] sm:$0xff] %v3176_v43  ;;  %v1037_v44 = vpop.f32.mrb[56].mxu1  ;;  %v1150_v47 = vpop.f32.mrb[40].mxu0  ;;  %1768 = vmatprep.mubr.bf16.mxu1 %v3598_v24  ;;  %1961 = vmatprep.mubr.bf16.mxu0 %v3598_v24 }
 0x2e1   :  { %v1038_v48 = vadd.f32 %v1037_v44, %v4111_v58  ;;  %v1151_v49 = vadd.f32 %v1150_v47, %v4115_v59  ;;  %v1039_v50 = vpop.f32.mrb[57].mxu1  ;;  %v1152_v51 = vpop.f32.mrb[41].mxu0 }
 0x2e2   :  { %v1040_v52 = vadd.f32 %v1039_v50, %v4118_v60  ;;  %v1153_v27 = vadd.f32 %v1152_v51, %v4122_v61  ;;  %v1041_v28 = vpop.f32.mrb[58].mxu1  ;;  %v1154_v53 = vpop.f32.mrb[42].mxu0 }
 0x2e3   :  { %v1042_v56 = vadd.f32 %v1041_v28, %v4111_v58  ;;  %v1155_v62 = vadd.f32 %v1154_v53, %v4115_v59  ;;  %v1043_v54 = vpop.f32.mrb[59].mxu1  ;;  %v1156_v63 = vpop.f32.mrb[43].mxu0 }
 0x2e4   :  { %v3177_v0 = vpack.c.bf16 %v1040_v52, %v1038_v48  ;;  %v3178_v1 = vpack.c.bf16 %v1153_v27, %v1151_v49  ;;  %v1044_v2 = vadd.f32 %v1043_v54, %v4118_v60  ;;  %v1157_v3 = vadd.f32 %v1156_v63, %v4122_v61 }
 0x2e5   :  { %v4321_v4 = vpack.c.bf16 %v1042_v56, %v1038_v48  ;;  %v4323_v5 = vpack.c.bf16 %v1155_v62, %v1151_v49 }
 0x2e6   :  { %1385 = vst [vmem:[%s4888_s9 + $0xc0] sm:$0xff] %v3177_v0  ;;  %1386 = vst [vmem:[%s4888_s9 + $0xc8] sm:$0xff] %v3178_v1  ;;  %v3179_v8 = vpack.c.bf16 %v1044_v2, %v1042_v56  ;;  %v3180_v11 = vpack.c.bf16 %v1157_v3, %v1155_v62 }
 0x2e7   :  { %1769 = vmatmul.mubr.bf16.gmra.mrb[88].mxu1 %v4321_v4  ;;  %1962 = vmatmul.mubr.bf16.gmra.mrb[72].mxu0 %v4321_v4 }
 0x2e8   :  { %1387 = vst [vmem:[%s4888_s9 + $0xd0] sm:$0xff] %v3179_v8  ;;  %1388 = vst [vmem:[%s4888_s9 + $0xd8] sm:$0xff] %v3180_v11  ;;  %v1047_v12 = vpop.f32.mrb[60].mxu1  ;;  %v1160_v13 = vpop.f32.mrb[44].mxu0  ;;  %1778 = vmatprep.mubr.bf16.mxu1 %v3598_v24  ;;  %1971 = vmatprep.mubr.bf16.mxu0 %v3598_v24 }
 0x2e9   :  { %v1048_v14 = vadd.f32 %v1047_v12, %v4111_v58  ;;  %v1161_v17 = vadd.f32 %v1160_v13, %v4115_v59  ;;  %v1049_v18 = vpop.f32.mrb[61].mxu1  ;;  %v1162_v19 = vpop.f32.mrb[45].mxu0 }
 0x2ea   :  { %v1050_v20 = vadd.f32 %v1049_v18, %v4118_v60  ;;  %v1163_v21 = vadd.f32 %v1162_v19, %v4122_v61  ;;  %v1051_v25 = vpop.f32.mrb[62].mxu1  ;;  %v1164_v29 = vpop.f32.mrb[46].mxu0 }
 0x2eb   :  { %v1052_v30 = vadd.f32 %v1051_v25, %v4111_v58  ;;  %v1165_v31 = vadd.f32 %v1164_v29, %v4115_v59  ;;  %v1053_v32 = vpop.f32.mrb[63].mxu1  ;;  %v1166_v33 = vpop.f32.mrb[47].mxu0 }
 0x2ec   :  { %v3181_v34 = vpack.c.bf16 %v1050_v20, %v1048_v14  ;;  %v3182_v35 = vpack.c.bf16 %v1163_v21, %v1161_v17  ;;  %v1054_v36 = vadd.f32 %v1053_v32, %v4118_v60  ;;  %v1167_v37 = vadd.f32 %v1166_v33, %v4122_v61 }
 0x2ed   :  { %v1197_v40 = vpack.c.bf16 %v1052_v30, %v1048_v14  ;;  %v1199_v43 = vpack.c.bf16 %v1165_v31, %v1161_v17 }
 0x2ee   :  { %1389 = vst [vmem:[%s4888_s9 + $0xe0] sm:$0xff] %v3181_v34  ;;  %1390 = vst [vmem:[%s4888_s9 + $0xe8] sm:$0xff] %v3182_v35  ;;  %v3183_v58 = vpack.c.bf16 %v1054_v36, %v1052_v30  ;;  %v3184_v59 = vpack.c.bf16 %v1167_v37, %v1165_v31 }
 0x2ef   :  { %1779 = vmatmul.mubr.bf16.gmra.mrb[92].mxu1 %v1197_v40  ;;  %1972 = vmatmul.mubr.bf16.gmra.mrb[76].mxu0 %v1197_v40 }
 0x2f0   :  { %1391 = vst [vmem:[%s4888_s9 + $0xf0] sm:$0xff] %v3183_v58  ;;  %1392 = vst [vmem:[%s4888_s9 + $0xf8] sm:$0xff] %v3184_v59  ;;  %1788 = vmatprep.mubr.bf16.mxu1 %v3598_v24  ;;  %1981 = vmatprep.mubr.bf16.mxu0 %v3598_v24 }
 0x2f7   :  { %1789 = vmatmul.mubr.bf16.gmra.mrb[96].mxu1 %v4134_v16  ;;  %1982 = vmatmul.mubr.bf16.gmra.mrb[80].mxu0 %v4134_v16 }
 0x2f8   :  { %1798 = vmatprep.mubr.bf16.mxu1 %v3598_v24  ;;  %1991 = vmatprep.mubr.bf16.mxu0 %v3598_v24 }
 0x2ff   :  { %1799 = vmatmul.mubr.bf16.gmra.mrb[100].mxu1 %v4168_v46  ;;  %1992 = vmatmul.mubr.bf16.gmra.mrb[84].mxu0 %v4168_v46 }
 0x300   :  { %1808 = vmatprep.mubr.bf16.mxu1 %v3598_v24  ;;  %2001 = vmatprep.mubr.bf16.mxu0 %v3598_v24 }
 0x307   :  { %1809 = vmatmul.mubr.bf16.gmra.mrb[104].mxu1 %v4202_v10  ;;  %2002 = vmatmul.mubr.bf16.gmra.mrb[88].mxu0 %v4202_v10 }
 0x308   :  { %1818 = vmatprep.mubr.bf16.mxu1 %v3598_v24  ;;  %2011 = vmatprep.mubr.bf16.mxu0 %v3598_v24 }
 0x30f   :  { %1819 = vmatmul.mubr.bf16.gmra.mrb[108].mxu1 %v4236_v42  ;;  %2012 = vmatmul.mubr.bf16.gmra.mrb[92].mxu0 %v4236_v42 }
 0x310   :  { %1828 = vmatprep.mubr.bf16.mxu1 %v3598_v24  ;;  %2021 = vmatprep.mubr.bf16.mxu0 %v3598_v24 }
 0x317   :  { %1829 = vmatmul.mubr.bf16.gmra.mrb[112].mxu1 %v4267_v7  ;;  %2022 = vmatmul.mubr.bf16.gmra.mrb[96].mxu0 %v4267_v7 }
 0x318   :  { %1838 = vmatprep.mubr.bf16.mxu1 %v3598_v24  ;;  %2031 = vmatprep.mubr.bf16.mxu0 %v3598_v24 }
 0x31f   :  { %1839 = vmatmul.mubr.bf16.gmra.mrb[116].mxu1 %v4295_v39  ;;  %2032 = vmatmul.mubr.bf16.gmra.mrb[100].mxu0 %v4295_v39 }
 0x320   :  { %1848 = vmatprep.mubr.bf16.mxu1 %v3598_v24  ;;  %2041 = vmatprep.mubr.bf16.mxu0 %v3598_v24 }
 0x327   :  { %1849 = vmatmul.mubr.bf16.gmra.mrb[120].mxu1 %v4323_v5  ;;  %2042 = vmatmul.mubr.bf16.gmra.mrb[104].mxu0 %v4323_v5 }
 0x328   :  { %1858 = vmatprep.mubr.bf16.mxu1 %v3598_v24  ;;  %2051 = vmatprep.mubr.bf16.mxu0 %v3598_v24  ;;  %v4408_v24 = vld [vmem:[%s4889_s8] sm:$0x1f] }
 0x329   :  { %v4412_v60 = vrot.slane %v4408_v24, %v3964_v23  ;;  %v4417_v61 = vrot.slane %v4408_v24, %v613_v55 }
 0x32f   :  { %1859 = vmatmul.mubr.bf16.gmra.mrb[124].mxu1 %v1199_v43  ;;  %2052 = vmatmul.mubr.bf16.gmra.mrb[108].mxu0 %v1199_v43 }
 0x330   :  { %3369 = vmatprep.mubr.bf16.mxu0 %v4132_v15  ;;  %3381 = vmatprep.mubr.bf16.mxu1 %v4321_v4  ;;  %v4421_v15 = vrot.slane %v4408_v24, %v3970_v26 }
 0x337   :  { %3370 = vmatmul.mubr.bf16.vlgmr.msra.gmra.mrb[112].mxu0 %v4166_v45  ;;  %3382 = vmatmul.mubr.bf16.vlgmr.msra.gmra.mrb[128].mxu1 %v1197_v40 }
 0x338   :  { %3373 = vmatprep.mubr.bf16.mxu0 %v4200_v9  ;;  %3385 = vmatprep.mubr.bf16.mxu1 %v4134_v16  ;;  %v4426_v16 = vrot.slane %v4408_v24, %v617_v57 }
 0x33f   :  { %3374 = vmatmul.mubr.bf16.gmra.mrb[116].mxu0 %v4234_v41  ;;  %3386 = vmatmul.mubr.bf16.gmra.mrb[132].mxu1 %v4168_v46 }
 0x340   :  { %3377 = vmatprep.mubr.bf16.mxu0 %v4265_v6  ;;  %3389 = vmatprep.mubr.bf16.mxu1 %v4202_v10 }
 0x347   :  { %3378 = vmatmul.mubr.bf16.gmra.mrb[120].mxu0 %v4293_v38  ;;  %3390 = vmatmul.mubr.bf16.gmra.mrb[136].mxu1 %v4236_v42 }
 0x348   :  { %3393 = vmatprep.mubr.bf16.mxu1 %v4267_v7 }
 0x34f   :  { %3394 = vmatmul.mubr.bf16.gmra.mrb[140].mxu1 %v4295_v39 }
 0x350   :  { %3397 = vmatprep.mubr.bf16.mxu1 %v4323_v5 }
 0x357   :  { %3398 = vmatmul.mubr.bf16.gmra.mrb[144].mxu1 %v1199_v43 }
 0x38a   :  { %v1710_v45 = vpop.f32.mrb[64].mxu1  ;;  %v1903_v46 = vpop.f32.mrb[48].mxu0 }
 0x38b   :  { %v1711_v9 = vadd.f32 %v1710_v45, %v4412_v60  ;;  %v1904_v23 = vadd.f32 %v1903_v46, %v4417_v61  ;;  %v1712_v10 = vpop.f32.mrb[65].mxu1  ;;  %v1905_v41 = vpop.f32.mrb[49].mxu0 }
 0x38c   :  { %v1713_v55 = vadd.f32 %v1712_v10, %v4421_v15  ;;  %v1906_v42 = vadd.f32 %v1905_v41, %v4426_v16  ;;  %v1714_v6 = vpop.f32.mrb[66].mxu1  ;;  %v1907_v26 = vpop.f32.mrb[50].mxu0 }
 0x38d   :  { %v1715_v7 = vadd.f32 %v1714_v6, %v4412_v60  ;;  %v1908_v38 = vadd.f32 %v1907_v26, %v4417_v61  ;;  %v1716_v57 = vpop.f32.mrb[67].mxu1  ;;  %v1909_v39 = vpop.f32.mrb[51].mxu0 }
 0x38e   :  { %v3185_v44 = vpack.c.bf16 %v1713_v55, %v1711_v9  ;;  %v3186_v47 = vpack.c.bf16 %v1906_v42, %v1904_v23  ;;  %v1717_v48 = vadd.f32 %v1716_v57, %v4421_v15  ;;  %v1910_v49 = vadd.f32 %v1909_v39, %v4426_v16 }
 0x390   :  { %2479 = vst [vmem:[%s4890_s10] sm:$0xff] %v3185_v44  ;;  %2480 = vst [vmem:[%s4890_s10 + $0x8] sm:$0xff] %v3186_v47  ;;  %v3188_v50 = vpack.c.bf16 %v1717_v48, %v1715_v7  ;;  %v3189_v51 = vpack.c.bf16 %v1910_v49, %v1908_v38 }
 0x392   :  { %2482 = vst [vmem:[%s4890_s10 + $0x14] sm:$0xff] %v3188_v50  ;;  %2483 = vst [vmem:[%s4890_s10 + $0x1c] sm:$0xff] %v3189_v51  ;;  %v1720_v52 = vpop.f32.mrb[68].mxu1  ;;  %v1913_v27 = vpop.f32.mrb[52].mxu0 }
 0x393   :  { %v1721_v28 = vadd.f32 %v1720_v52, %v4412_v60  ;;  %v1914_v53 = vadd.f32 %v1913_v27, %v4417_v61  ;;  %v1722_v56 = vpop.f32.mrb[69].mxu1  ;;  %v1915_v62 = vpop.f32.mrb[53].mxu0 }
 0x394   :  { %v1723_v54 = vadd.f32 %v1722_v56, %v4421_v15  ;;  %v1916_v63 = vadd.f32 %v1915_v62, %v4426_v16  ;;  %v1724_v0 = vpop.f32.mrb[70].mxu1  ;;  %v1917_v1 = vpop.f32.mrb[54].mxu0 }
 0x395   :  { %v1725_v2 = vadd.f32 %v1724_v0, %v4412_v60  ;;  %v1918_v3 = vadd.f32 %v1917_v1, %v4417_v61  ;;  %v1726_v4 = vpop.f32.mrb[71].mxu1  ;;  %v1919_v5 = vpop.f32.mrb[55].mxu0 }
 0x396   :  { %v3191_v8 = vpack.c.bf16 %v1723_v54, %v1721_v28  ;;  %v3192_v11 = vpack.c.bf16 %v1916_v63, %v1914_v53  ;;  %v1727_v12 = vadd.f32 %v1726_v4, %v4421_v15  ;;  %v1920_v13 = vadd.f32 %v1919_v5, %v4426_v16 }
 0x398   :  { %2485 = vst [vmem:[%s4890_s10 + $0x28] sm:$0xff] %v3191_v8  ;;  %2486 = vst [vmem:[%s4890_s10 + $0x30] sm:$0xff] %v3192_v11  ;;  %v3194_v14 = vpack.c.bf16 %v1727_v12, %v1725_v2  ;;  %v3195_v17 = vpack.c.bf16 %v1920_v13, %v1918_v3 }
 0x39a   :  { %2488 = vst [vmem:[%s4890_s10 + $0x3c] sm:$0xff] %v3194_v14  ;;  %2489 = vst [vmem:[%s4890_s10 + $0x44] sm:$0xff] %v3195_v17  ;;  %v1730_v18 = vpop.f32.mrb[72].mxu1  ;;  %v1923_v19 = vpop.f32.mrb[56].mxu0 }
 0x39b   :  { %v1731_v20 = vadd.f32 %v1730_v18, %v4412_v60  ;;  %v1924_v21 = vadd.f32 %v1923_v19, %v4417_v61  ;;  %v1732_v25 = vpop.f32.mrb[73].mxu1  ;;  %v1925_v29 = vpop.f32.mrb[57].mxu0 }
 0x39c   :  { %v1733_v30 = vadd.f32 %v1732_v25, %v4421_v15  ;;  %v1926_v31 = vadd.f32 %v1925_v29, %v4426_v16  ;;  %v1734_v32 = vpop.f32.mrb[74].mxu1  ;;  %v1927_v33 = vpop.f32.mrb[58].mxu0 }
 0x39d   :  { %v1735_v34 = vadd.f32 %v1734_v32, %v4412_v60  ;;  %v1928_v35 = vadd.f32 %v1927_v33, %v4417_v61  ;;  %v1736_v36 = vpop.f32.mrb[75].mxu1  ;;  %v1929_v37 = vpop.f32.mrb[59].mxu0 }
 0x39e   :  { %v3197_v40 = vpack.c.bf16 %v1733_v30, %v1731_v20  ;;  %v3198_v43 = vpack.c.bf16 %v1926_v31, %v1924_v21  ;;  %v1737_v58 = vadd.f32 %v1736_v36, %v4421_v15  ;;  %v1930_v59 = vadd.f32 %v1929_v37, %v4426_v16 }
 0x3a0   :  { %2491 = vst [vmem:[%s4890_s10 + $0x50] sm:$0xff] %v3197_v40  ;;  %2492 = vst [vmem:[%s4890_s10 + $0x58] sm:$0xff] %v3198_v43  ;;  %v3200_v45 = vpack.c.bf16 %v1737_v58, %v1735_v34  ;;  %v3201_v46 = vpack.c.bf16 %v1930_v59, %v1928_v35 }
 0x3a2   :  { %2494 = vst [vmem:[%s4890_s10 + $0x64] sm:$0xff] %v3200_v45  ;;  %2495 = vst [vmem:[%s4890_s10 + $0x6c] sm:$0xff] %v3201_v46  ;;  %v1740_v9 = vpop.f32.mrb[76].mxu1  ;;  %v1933_v23 = vpop.f32.mrb[60].mxu0 }
 0x3a3   :  { %v1741_v10 = vadd.f32 %v1740_v9, %v4412_v60  ;;  %v1934_v41 = vadd.f32 %v1933_v23, %v4417_v61  ;;  %v1742_v55 = vpop.f32.mrb[77].mxu1  ;;  %v1935_v42 = vpop.f32.mrb[61].mxu0 }
 0x3a4   :  { %v1743_v6 = vadd.f32 %v1742_v55, %v4421_v15  ;;  %v1936_v26 = vadd.f32 %v1935_v42, %v4426_v16  ;;  %v1744_v7 = vpop.f32.mrb[78].mxu1  ;;  %v1937_v38 = vpop.f32.mrb[62].mxu0 }
 0x3a5   :  { %v1745_v57 = vadd.f32 %v1744_v7, %v4412_v60  ;;  %v1938_v39 = vadd.f32 %v1937_v38, %v4417_v61  ;;  %v1746_v44 = vpop.f32.mrb[79].mxu1  ;;  %v1939_v47 = vpop.f32.mrb[63].mxu0 }
 0x3a6   :  { %v3203_v48 = vpack.c.bf16 %v1743_v6, %v1741_v10  ;;  %v3204_v49 = vpack.c.bf16 %v1936_v26, %v1934_v41  ;;  %v1747_v50 = vadd.f32 %v1746_v44, %v4421_v15  ;;  %v1940_v51 = vadd.f32 %v1939_v47, %v4426_v16 }
 0x3a8   :  { %2497 = vst [vmem:[%s4890_s10 + $0x78] sm:$0xff] %v3203_v48  ;;  %2498 = vst [vmem:[%s4890_s10 + $0x80] sm:$0xff] %v3204_v49  ;;  %v3206_v52 = vpack.c.bf16 %v1747_v50, %v1745_v57  ;;  %v3207_v27 = vpack.c.bf16 %v1940_v51, %v1938_v39 }
 0x3aa   :  { %2500 = vst [vmem:[%s4890_s10 + $0x8c] sm:$0xff] %v3206_v52  ;;  %2501 = vst [vmem:[%s4890_s10 + $0x94] sm:$0xff] %v3207_v27  ;;  %v1750_v28 = vpop.f32.mrb[80].mxu1  ;;  %v1943_v53 = vpop.f32.mrb[64].mxu0 }
 0x3ab   :  { %v1751_v56 = vadd.f32 %v1750_v28, %v4412_v60  ;;  %v1944_v62 = vadd.f32 %v1943_v53, %v4417_v61  ;;  %v1752_v54 = vpop.f32.mrb[81].mxu1  ;;  %v1945_v63 = vpop.f32.mrb[65].mxu0 }
 0x3ac   :  { %v1753_v0 = vadd.f32 %v1752_v54, %v4421_v15  ;;  %v1946_v1 = vadd.f32 %v1945_v63, %v4426_v16  ;;  %v1754_v2 = vpop.f32.mrb[82].mxu1  ;;  %v1947_v3 = vpop.f32.mrb[66].mxu0 }
 0x3ad   :  { %v1755_v4 = vadd.f32 %v1754_v2, %v4412_v60  ;;  %v1948_v5 = vadd.f32 %v1947_v3, %v4417_v61  ;;  %v1756_v8 = vpop.f32.mrb[83].mxu1  ;;  %v1949_v11 = vpop.f32.mrb[67].mxu0 }
 0x3ae   :  { %v3209_v12 = vpack.c.bf16 %v1753_v0, %v1751_v56  ;;  %v3210_v13 = vpack.c.bf16 %v1946_v1, %v1944_v62  ;;  %v1757_v14 = vadd.f32 %v1756_v8, %v4421_v15  ;;  %v1950_v17 = vadd.f32 %v1949_v11, %v4426_v16 }
 0x3b0   :  { %2503 = vst [vmem:[%s4890_s10 + $0xa0] sm:$0xff] %v3209_v12  ;;  %2504 = vst [vmem:[%s4890_s10 + $0xa8] sm:$0xff] %v3210_v13  ;;  %v3212_v18 = vpack.c.bf16 %v1757_v14, %v1755_v4  ;;  %v3213_v19 = vpack.c.bf16 %v1950_v17, %v1948_v5 }
 0x3b2   :  { %2506 = vst [vmem:[%s4890_s10 + $0xb4] sm:$0xff] %v3212_v18  ;;  %2507 = vst [vmem:[%s4890_s10 + $0xbc] sm:$0xff] %v3213_v19  ;;  %v1760_v20 = vpop.f32.mrb[84].mxu1  ;;  %v1953_v21 = vpop.f32.mrb[68].mxu0 }
 0x3b3   :  { %v1761_v25 = vadd.f32 %v1760_v20, %v4412_v60  ;;  %v1954_v29 = vadd.f32 %v1953_v21, %v4417_v61  ;;  %v1762_v30 = vpop.f32.mrb[85].mxu1  ;;  %v1955_v31 = vpop.f32.mrb[69].mxu0 }
 0x3b4   :  { %v1763_v32 = vadd.f32 %v1762_v30, %v4421_v15  ;;  %v1956_v33 = vadd.f32 %v1955_v31, %v4426_v16  ;;  %v1764_v34 = vpop.f32.mrb[86].mxu1  ;;  %v1957_v35 = vpop.f32.mrb[70].mxu0 }
 0x3b5   :  { %v1765_v36 = vadd.f32 %v1764_v34, %v4412_v60  ;;  %v1958_v37 = vadd.f32 %v1957_v35, %v4417_v61  ;;  %v1766_v40 = vpop.f32.mrb[87].mxu1  ;;  %v1959_v43 = vpop.f32.mrb[71].mxu0 }
 0x3b6   :  { %v3215_v58 = vpack.c.bf16 %v1763_v32, %v1761_v25  ;;  %v3216_v59 = vpack.c.bf16 %v1956_v33, %v1954_v29  ;;  %v1767_v45 = vadd.f32 %v1766_v40, %v4421_v15  ;;  %v1960_v46 = vadd.f32 %v1959_v43, %v4426_v16 }
 0x3b8   :  { %2509 = vst [vmem:[%s4890_s10 + $0xc8] sm:$0xff] %v3215_v58  ;;  %2510 = vst [vmem:[%s4890_s10 + $0xd0] sm:$0xff] %v3216_v59  ;;  %v3218_v9 = vpack.c.bf16 %v1767_v45, %v1765_v36  ;;  %v3219_v23 = vpack.c.bf16 %v1960_v46, %v1958_v37 }
 0x3ba   :  { %2512 = vst [vmem:[%s4890_s10 + $0xdc] sm:$0xff] %v3218_v9  ;;  %2513 = vst [vmem:[%s4890_s10 + $0xe4] sm:$0xff] %v3219_v23  ;;  %v1770_v10 = vpop.f32.mrb[88].mxu1  ;;  %v1963_v41 = vpop.f32.mrb[72].mxu0 }
 0x3bb   :  { %v1771_v55 = vadd.f32 %v1770_v10, %v4412_v60  ;;  %v1964_v42 = vadd.f32 %v1963_v41, %v4417_v61  ;;  %v1772_v6 = vpop.f32.mrb[89].mxu1  ;;  %v1965_v26 = vpop.f32.mrb[73].mxu0 }
 0x3bc   :  { %v1773_v7 = vadd.f32 %v1772_v6, %v4421_v15  ;;  %v1966_v38 = vadd.f32 %v1965_v26, %v4426_v16  ;;  %v1774_v57 = vpop.f32.mrb[90].mxu1  ;;  %v1967_v39 = vpop.f32.mrb[74].mxu0 }
 0x3bd   :  { %v1775_v44 = vadd.f32 %v1774_v57, %v4412_v60  ;;  %v1968_v47 = vadd.f32 %v1967_v39, %v4417_v61  ;;  %v1776_v48 = vpop.f32.mrb[91].mxu1  ;;  %v1969_v49 = vpop.f32.mrb[75].mxu0 }
 0x3be   :  { %v3221_v50 = vpack.c.bf16 %v1773_v7, %v1771_v55  ;;  %v3222_v51 = vpack.c.bf16 %v1966_v38, %v1964_v42  ;;  %v1777_v52 = vadd.f32 %v1776_v48, %v4421_v15  ;;  %v1970_v27 = vadd.f32 %v1969_v49, %v4426_v16 }
 0x3c0   :  { %2515 = vst [vmem:[%s4890_s10 + $0xf0] sm:$0xff] %v3221_v50  ;;  %2516 = vst [vmem:[%s4890_s10 + $0xf8] sm:$0xff] %v3222_v51  ;;  %v3224_v28 = vpack.c.bf16 %v1777_v52, %v1775_v44  ;;  %v3225_v53 = vpack.c.bf16 %v1970_v27, %v1968_v47 }
 0x3c2   :  { %2518 = vst [vmem:[%s4890_s10 + $0x104] sm:$0xff] %v3224_v28  ;;  %2519 = vst [vmem:[%s4890_s10 + $0x10c] sm:$0xff] %v3225_v53  ;;  %v1780_v56 = vpop.f32.mrb[92].mxu1  ;;  %v1973_v62 = vpop.f32.mrb[76].mxu0 }
 0x3c3   :  { %v1781_v54 = vadd.f32 %v1780_v56, %v4412_v60  ;;  %v1974_v63 = vadd.f32 %v1973_v62, %v4417_v61  ;;  %v1782_v0 = vpop.f32.mrb[93].mxu1  ;;  %v1975_v1 = vpop.f32.mrb[77].mxu0 }
 0x3c4   :  { %v1783_v2 = vadd.f32 %v1782_v0, %v4421_v15  ;;  %v1976_v3 = vadd.f32 %v1975_v1, %v4426_v16  ;;  %v1784_v4 = vpop.f32.mrb[94].mxu1  ;;  %v1977_v5 = vpop.f32.mrb[78].mxu0 }
 0x3c5   :  { %v1785_v8 = vadd.f32 %v1784_v4, %v4412_v60  ;;  %v1978_v11 = vadd.f32 %v1977_v5, %v4417_v61  ;;  %v1786_v12 = vpop.f32.mrb[95].mxu1  ;;  %v1979_v13 = vpop.f32.mrb[79].mxu0 }
 0x3c6   :  { %v3227_v14 = vpack.c.bf16 %v1783_v2, %v1781_v54  ;;  %v3228_v17 = vpack.c.bf16 %v1976_v3, %v1974_v63  ;;  %v1787_v18 = vadd.f32 %v1786_v12, %v4421_v15  ;;  %v1980_v19 = vadd.f32 %v1979_v13, %v4426_v16 }
 0x3c8   :  { %2521 = vst [vmem:[%s4890_s10 + $0x118] sm:$0xff] %v3227_v14  ;;  %2522 = vst [vmem:[%s4890_s10 + $0x120] sm:$0xff] %v3228_v17  ;;  %v3230_v20 = vpack.c.bf16 %v1787_v18, %v1785_v8  ;;  %v3231_v21 = vpack.c.bf16 %v1980_v19, %v1978_v11 }
 0x3ca   :  { %2524 = vst [vmem:[%s4890_s10 + $0x12c] sm:$0xff] %v3230_v20  ;;  %2525 = vst [vmem:[%s4890_s10 + $0x134] sm:$0xff] %v3231_v21  ;;  %v1790_v25 = vpop.f32.mrb[96].mxu1  ;;  %v1983_v29 = vpop.f32.mrb[80].mxu0 }
 0x3cb   :  { %v1791_v30 = vadd.f32 %v1790_v25, %v4412_v60  ;;  %v1984_v31 = vadd.f32 %v1983_v29, %v4417_v61  ;;  %v1792_v32 = vpop.f32.mrb[97].mxu1  ;;  %v1985_v33 = vpop.f32.mrb[81].mxu0 }
 0x3cc   :  { %v1793_v34 = vadd.f32 %v1792_v32, %v4421_v15  ;;  %v1986_v35 = vadd.f32 %v1985_v33, %v4426_v16  ;;  %v1794_v36 = vpop.f32.mrb[98].mxu1  ;;  %v1987_v37 = vpop.f32.mrb[82].mxu0 }
 0x3cd   :  { %v1795_v40 = vadd.f32 %v1794_v36, %v4412_v60  ;;  %v1988_v43 = vadd.f32 %v1987_v37, %v4417_v61  ;;  %v1796_v58 = vpop.f32.mrb[99].mxu1  ;;  %v1989_v59 = vpop.f32.mrb[83].mxu0 }
 0x3ce   :  { %v3233_v45 = vpack.c.bf16 %v1793_v34, %v1791_v30  ;;  %v3234_v46 = vpack.c.bf16 %v1986_v35, %v1984_v31  ;;  %v1797_v9 = vadd.f32 %v1796_v58, %v4421_v15  ;;  %v1990_v23 = vadd.f32 %v1989_v59, %v4426_v16 }
 0x3d0   :  { %3105 = vst [vmem:[%s4890_s10 + $0x140] sm:$0xff] %v3233_v45  ;;  %3106 = vst [vmem:[%s4890_s10 + $0x148] sm:$0xff] %v3234_v46  ;;  %v3236_v10 = vpack.c.bf16 %v1797_v9, %v1795_v40  ;;  %v3237_v41 = vpack.c.bf16 %v1990_v23, %v1988_v43 }
 0x3d2   :  { %3108 = vst [vmem:[%s4890_s10 + $0x154] sm:$0xff] %v3236_v10  ;;  %3109 = vst [vmem:[%s4890_s10 + $0x15c] sm:$0xff] %v3237_v41  ;;  %v1800_v55 = vpop.f32.mrb[100].mxu1  ;;  %v1993_v42 = vpop.f32.mrb[84].mxu0 }
 0x3d3   :  { %v1801_v6 = vadd.f32 %v1800_v55, %v4412_v60  ;;  %v1994_v26 = vadd.f32 %v1993_v42, %v4417_v61  ;;  %v1802_v7 = vpop.f32.mrb[101].mxu1  ;;  %v1995_v38 = vpop.f32.mrb[85].mxu0 }
 0x3d4   :  { %v1803_v57 = vadd.f32 %v1802_v7, %v4421_v15  ;;  %v1996_v39 = vadd.f32 %v1995_v38, %v4426_v16  ;;  %v1804_v44 = vpop.f32.mrb[102].mxu1  ;;  %v1997_v47 = vpop.f32.mrb[86].mxu0 }
 0x3d5   :  { %v1805_v48 = vadd.f32 %v1804_v44, %v4412_v60  ;;  %v1998_v49 = vadd.f32 %v1997_v47, %v4417_v61  ;;  %v1806_v50 = vpop.f32.mrb[103].mxu1  ;;  %v1999_v51 = vpop.f32.mrb[87].mxu0 }
 0x3d6   :  { %v3239_v52 = vpack.c.bf16 %v1803_v57, %v1801_v6  ;;  %v3240_v27 = vpack.c.bf16 %v1996_v39, %v1994_v26  ;;  %v1807_v28 = vadd.f32 %v1806_v50, %v4421_v15  ;;  %v2000_v53 = vadd.f32 %v1999_v51, %v4426_v16 }
 0x3d8   :  { %3111 = vst [vmem:[%s4890_s10 + $0x168] sm:$0xff] %v3239_v52  ;;  %3112 = vst [vmem:[%s4890_s10 + $0x170] sm:$0xff] %v3240_v27  ;;  %v3242_v56 = vpack.c.bf16 %v1807_v28, %v1805_v48  ;;  %v3243_v62 = vpack.c.bf16 %v2000_v53, %v1998_v49 }
 0x3da   :  { %3114 = vst [vmem:[%s4890_s10 + $0x17c] sm:$0xff] %v3242_v56  ;;  %3115 = vst [vmem:[%s4890_s10 + $0x184] sm:$0xff] %v3243_v62  ;;  %v1810_v54 = vpop.f32.mrb[104].mxu1  ;;  %v2003_v63 = vpop.f32.mrb[88].mxu0 }
 0x3db   :  { %v1811_v0 = vadd.f32 %v1810_v54, %v4412_v60  ;;  %v2004_v1 = vadd.f32 %v2003_v63, %v4417_v61  ;;  %v1812_v2 = vpop.f32.mrb[105].mxu1  ;;  %v2005_v3 = vpop.f32.mrb[89].mxu0 }
 0x3dc   :  { %v1813_v4 = vadd.f32 %v1812_v2, %v4421_v15  ;;  %v2006_v5 = vadd.f32 %v2005_v3, %v4426_v16  ;;  %v1814_v8 = vpop.f32.mrb[106].mxu1  ;;  %v2007_v11 = vpop.f32.mrb[90].mxu0 }
 0x3dd   :  { %v1815_v12 = vadd.f32 %v1814_v8, %v4412_v60  ;;  %v2008_v13 = vadd.f32 %v2007_v11, %v4417_v61  ;;  %v1816_v14 = vpop.f32.mrb[107].mxu1  ;;  %v2009_v17 = vpop.f32.mrb[91].mxu0 }
 0x3de   :  { %v3245_v18 = vpack.c.bf16 %v1813_v4, %v1811_v0  ;;  %v3246_v19 = vpack.c.bf16 %v2006_v5, %v2004_v1  ;;  %v1817_v20 = vadd.f32 %v1816_v14, %v4421_v15  ;;  %v2010_v21 = vadd.f32 %v2009_v17, %v4426_v16 }
 0x3e0   :  { %3117 = vst [vmem:[%s4890_s10 + $0x190] sm:$0xff] %v3245_v18  ;;  %3118 = vst [vmem:[%s4890_s10 + $0x198] sm:$0xff] %v3246_v19  ;;  %v3248_v25 = vpack.c.bf16 %v1817_v20, %v1815_v12  ;;  %v3249_v29 = vpack.c.bf16 %v2010_v21, %v2008_v13 }
 0x3e2   :  { %3120 = vst [vmem:[%s4890_s10 + $0x1a4] sm:$0xff] %v3248_v25  ;;  %3121 = vst [vmem:[%s4890_s10 + $0x1ac] sm:$0xff] %v3249_v29  ;;  %v1820_v30 = vpop.f32.mrb[108].mxu1  ;;  %v2013_v31 = vpop.f32.mrb[92].mxu0 }
 0x3e3   :  { %v1821_v32 = vadd.f32 %v1820_v30, %v4412_v60  ;;  %v2014_v33 = vadd.f32 %v2013_v31, %v4417_v61  ;;  %v1822_v34 = vpop.f32.mrb[109].mxu1  ;;  %v2015_v35 = vpop.f32.mrb[93].mxu0 }
 0x3e4   :  { %v1823_v36 = vadd.f32 %v1822_v34, %v4421_v15  ;;  %v2016_v37 = vadd.f32 %v2015_v35, %v4426_v16  ;;  %v1824_v40 = vpop.f32.mrb[110].mxu1  ;;  %v2017_v43 = vpop.f32.mrb[94].mxu0 }
 0x3e5   :  { %v1825_v58 = vadd.f32 %v1824_v40, %v4412_v60  ;;  %v2018_v59 = vadd.f32 %v2017_v43, %v4417_v61  ;;  %v1826_v45 = vpop.f32.mrb[111].mxu1  ;;  %v2019_v46 = vpop.f32.mrb[95].mxu0 }
 0x3e6   :  { %v3251_v9 = vpack.c.bf16 %v1823_v36, %v1821_v32  ;;  %v3252_v23 = vpack.c.bf16 %v2016_v37, %v2014_v33  ;;  %v1827_v10 = vadd.f32 %v1826_v45, %v4421_v15  ;;  %v2020_v41 = vadd.f32 %v2019_v46, %v4426_v16 }
 0x3e8   :  { %3123 = vst [vmem:[%s4890_s10 + $0x1b8] sm:$0xff] %v3251_v9  ;;  %3124 = vst [vmem:[%s4890_s10 + $0x1c0] sm:$0xff] %v3252_v23  ;;  %v3254_v55 = vpack.c.bf16 %v1827_v10, %v1825_v58  ;;  %v3255_v42 = vpack.c.bf16 %v2020_v41, %v2018_v59 }
 0x3ea   :  { %3126 = vst [vmem:[%s4890_s10 + $0x1cc] sm:$0xff] %v3254_v55  ;;  %3127 = vst [vmem:[%s4890_s10 + $0x1d4] sm:$0xff] %v3255_v42  ;;  %v1830_v6 = vpop.f32.mrb[112].mxu1  ;;  %v2023_v26 = vpop.f32.mrb[96].mxu0 }
 0x3eb   :  { %v1831_v7 = vadd.f32 %v1830_v6, %v4412_v60  ;;  %v2024_v38 = vadd.f32 %v2023_v26, %v4417_v61  ;;  %v1832_v57 = vpop.f32.mrb[113].mxu1  ;;  %v2025_v39 = vpop.f32.mrb[97].mxu0 }
 0x3ec   :  { %v1833_v44 = vadd.f32 %v1832_v57, %v4421_v15  ;;  %v2026_v47 = vadd.f32 %v2025_v39, %v4426_v16  ;;  %v1834_v48 = vpop.f32.mrb[114].mxu1  ;;  %v2027_v49 = vpop.f32.mrb[98].mxu0 }
 0x3ed   :  { %v1835_v50 = vadd.f32 %v1834_v48, %v4412_v60  ;;  %v2028_v51 = vadd.f32 %v2027_v49, %v4417_v61  ;;  %v1836_v52 = vpop.f32.mrb[115].mxu1  ;;  %v2029_v27 = vpop.f32.mrb[99].mxu0  ;;  %v1461_v48 = vsub.s32 4, %v3961_v22 }
 0x3ee   :  { %v3257_v28 = vpack.c.bf16 %v1833_v44, %v1831_v7  ;;  %v3258_v53 = vpack.c.bf16 %v2026_v47, %v2024_v38  ;;  %v1837_v56 = vadd.f32 %v1836_v52, %v4421_v15  ;;  %v2030_v62 = vadd.f32 %v2029_v27, %v4426_v16 }
 0x3ef   :  { %v4738_v22 = vrot.slane %v4408_v24, %v1461_v48 }
 0x3f0   :  { %3129 = vst [vmem:[%s4890_s10 + $0x1e0] sm:$0xff] %v3257_v28  ;;  %3130 = vst [vmem:[%s4890_s10 + $0x1e8] sm:$0xff] %v3258_v53  ;;  %v3260_v54 = vpack.c.bf16 %v1837_v56, %v1835_v50  ;;  %v3261_v63 = vpack.c.bf16 %v2030_v62, %v2028_v51 }
 0x3f2   :  { %3132 = vst [vmem:[%s4890_s10 + $0x1f4] sm:$0xff] %v3260_v54  ;;  %3133 = vst [vmem:[%s4890_s10 + $0x1fc] sm:$0xff] %v3261_v63  ;;  %v1840_v0 = vpop.f32.mrb[116].mxu1  ;;  %v2033_v1 = vpop.f32.mrb[100].mxu0 }
 0x3f3   :  { %v1841_v2 = vadd.f32 %v1840_v0, %v4412_v60  ;;  %v2034_v3 = vadd.f32 %v2033_v1, %v4417_v61  ;;  %v1842_v4 = vpop.f32.mrb[117].mxu1  ;;  %v2035_v5 = vpop.f32.mrb[101].mxu0 }
 0x3f4   :  { %v1843_v8 = vadd.f32 %v1842_v4, %v4421_v15  ;;  %v2036_v11 = vadd.f32 %v2035_v5, %v4426_v16  ;;  %v1844_v12 = vpop.f32.mrb[118].mxu1  ;;  %v2037_v13 = vpop.f32.mrb[102].mxu0 }
 0x3f5   :  { %v1845_v14 = vadd.f32 %v1844_v12, %v4412_v60  ;;  %v2038_v17 = vadd.f32 %v2037_v13, %v4417_v61  ;;  %v1846_v18 = vpop.f32.mrb[119].mxu1  ;;  %v2039_v19 = vpop.f32.mrb[103].mxu0 }
 0x3f6   :  { %v3263_v20 = vpack.c.bf16 %v1843_v8, %v1841_v2  ;;  %v3264_v21 = vpack.c.bf16 %v2036_v11, %v2034_v3  ;;  %v1847_v25 = vadd.f32 %v1846_v18, %v4421_v15  ;;  %v2040_v29 = vadd.f32 %v2039_v19, %v4426_v16 }
 0x3f8   :  { %3135 = vst [vmem:[%s4890_s10 + $0x208] sm:$0xff] %v3263_v20  ;;  %3136 = vst [vmem:[%s4890_s10 + $0x210] sm:$0xff] %v3264_v21  ;;  %v3266_v30 = vpack.c.bf16 %v1847_v25, %v1845_v14  ;;  %v3267_v31 = vpack.c.bf16 %v2040_v29, %v2038_v17 }
 0x3fa   :  { %3138 = vst [vmem:[%s4890_s10 + $0x21c] sm:$0xff] %v3266_v30  ;;  %3139 = vst [vmem:[%s4890_s10 + $0x224] sm:$0xff] %v3267_v31  ;;  %v1850_v32 = vpop.f32.mrb[120].mxu1  ;;  %v2043_v33 = vpop.f32.mrb[104].mxu0 }
 0x3fb   :  { %v1851_v34 = vadd.f32 %v1850_v32, %v4412_v60  ;;  %v2044_v35 = vadd.f32 %v2043_v33, %v4417_v61  ;;  %v1852_v36 = vpop.f32.mrb[121].mxu1  ;;  %v2045_v37 = vpop.f32.mrb[105].mxu0 }
 0x3fc   :  { %v1853_v40 = vadd.f32 %v1852_v36, %v4421_v15  ;;  %v2046_v43 = vadd.f32 %v2045_v37, %v4426_v16  ;;  %v1854_v58 = vpop.f32.mrb[122].mxu1  ;;  %v2047_v59 = vpop.f32.mrb[106].mxu0 }
 0x3fd   :  { %v1855_v45 = vadd.f32 %v1854_v58, %v4412_v60  ;;  %v2048_v46 = vadd.f32 %v2047_v59, %v4417_v61  ;;  %v1856_v9 = vpop.f32.mrb[123].mxu1  ;;  %v2049_v23 = vpop.f32.mrb[107].mxu0 }
 0x3fe   :  { %v3269_v10 = vpack.c.bf16 %v1853_v40, %v1851_v34  ;;  %v3270_v41 = vpack.c.bf16 %v2046_v43, %v2044_v35  ;;  %v1857_v55 = vadd.f32 %v1856_v9, %v4421_v15  ;;  %v2050_v42 = vadd.f32 %v2049_v23, %v4426_v16 }
 0x400   :  { %3141 = vst [vmem:[%s4890_s10 + $0x230] sm:$0xff] %v3269_v10  ;;  %3142 = vst [vmem:[%s4890_s10 + $0x238] sm:$0xff] %v3270_v41  ;;  %v3272_v6 = vpack.c.bf16 %v1857_v55, %v1855_v45  ;;  %v3273_v26 = vpack.c.bf16 %v2050_v42, %v2048_v46 }
 0x402   :  { %3144 = vst [vmem:[%s4890_s10 + $0x244] sm:$0xff] %v3272_v6  ;;  %3145 = vst [vmem:[%s4890_s10 + $0x24c] sm:$0xff] %v3273_v26  ;;  %v1860_v7 = vpop.f32.mrb[124].mxu1  ;;  %v2053_v38 = vpop.f32.mrb[108].mxu0 }
 0x403   :  { %v1861_v57 = vadd.f32 %v1860_v7, %v4412_v60  ;;  %v2054_v39 = vadd.f32 %v2053_v38, %v4417_v61  ;;  %v1862_v44 = vpop.f32.mrb[125].mxu1  ;;  %v2055_v47 = vpop.f32.mrb[109].mxu0 }
 0x404   :  { %v1863_v49 = vadd.f32 %v1862_v44, %v4421_v15  ;;  %v2056_v50 = vadd.f32 %v2055_v47, %v4426_v16  ;;  %v1864_v51 = vpop.f32.mrb[126].mxu1  ;;  %v2057_v52 = vpop.f32.mrb[110].mxu0 }
 0x405   :  { %v1865_v27 = vadd.f32 %v1864_v51, %v4412_v60  ;;  %v2058_v28 = vadd.f32 %v2057_v52, %v4417_v61  ;;  %v1866_v53 = vpop.f32.mrb[127].mxu1  ;;  %v2059_v56 = vpop.f32.mrb[111].mxu0 }
 0x406   :  { %v3275_v62 = vpack.c.bf16 %v1863_v49, %v1861_v57  ;;  %v3276_v54 = vpack.c.bf16 %v2056_v50, %v2054_v39  ;;  %v1867_v63 = vadd.f32 %v1866_v53, %v4421_v15  ;;  %v2060_v0 = vadd.f32 %v2059_v56, %v4426_v16 }
 0x408   :  { %3147 = vst [vmem:[%s4890_s10 + $0x258] sm:$0xff] %v3275_v62  ;;  %3148 = vst [vmem:[%s4890_s10 + $0x260] sm:$0xff] %v3276_v54  ;;  %v3278_v60 = vpack.c.bf16 %v1867_v63, %v1865_v27  ;;  %v3279_v61 = vpack.c.bf16 %v2060_v0, %v2058_v28 }
 0x40a   :  { %3150 = vst [vmem:[%s4890_s10 + $0x26c] sm:$0xff] %v3278_v60  ;;  %3151 = vst [vmem:[%s4890_s10 + $0x274] sm:$0xff] %v3279_v61  ;;  %v3371_v24 = vpop.f32.mrb[112].mxu0  ;;  %v3383_v15 = vpop.f32.mrb[128].mxu1 }
 0x40b   :  { %v2105_v16 = vadd.f32 %v3371_v24, %v4738_v22  ;;  %v2153_v1 = vadd.f32 %v3383_v15, %v4738_v22  ;;  %v2096_v2 = vpop.f32.mrb[113].mxu0  ;;  %v2144_v3 = vpop.f32.mrb[129].mxu1 }
 0x40c   :  { %v2097_v4 = vadd.f32 %v2096_v2, %v4738_v22  ;;  %v2145_v5 = vadd.f32 %v2144_v3, %v4738_v22  ;;  %v3372_v8 = vpop.f32.mrb[114].mxu0  ;;  %v3384_v11 = vpop.f32.mrb[130].mxu1 }
 0x40d   :  { %v3193_v12 = vpack.c.bf16 %v2105_v16, %v2105_v16  ;;  %v3229_v13 = vpack.c.bf16 %v2153_v1, %v2153_v1  ;;  %v2108_v14 = vadd.f32 %v3372_v8, %v4738_v22  ;;  %v2156_v17 = vadd.f32 %v3384_v11, %v4738_v22  ;;  %v2099_v18 = vpop.f32.mrb[115].mxu0  ;;  %v2147_v19 = vpop.f32.mrb[131].mxu1 }
 0x40e   :  { %v3187_v20 = vpack.c.bf16 %v2097_v4, %v2097_v4  ;;  %v3223_v21 = vpack.c.bf16 %v2145_v5, %v2145_v5  ;;  %v2100_v25 = vadd.f32 %v2099_v18, %v4738_v22  ;;  %v2148_v29 = vadd.f32 %v2147_v19, %v4738_v22 }
 0x40f   :  { %2487 = vst [vmem:[%s4890_s10 + $0x38] sm:$0xf] %v3193_v12  ;;  %2523 = vst [vmem:[%s4890_s10 + $0x128] sm:$0xf] %v3229_v13  ;;  %v3196_v30 = vpack.c.bf16 %v2108_v14, %v2108_v14  ;;  %v3232_v31 = vpack.c.bf16 %v2156_v17, %v2156_v17 }
 0x410   :  { %2481 = vst [vmem:[%s4890_s10 + $0x10] sm:$0xf] %v3187_v20  ;;  %2517 = vst [vmem:[%s4890_s10 + $0x100] sm:$0xf] %v3223_v21  ;;  %v3190_v32 = vpack.c.bf16 %v2100_v25, %v2100_v25  ;;  %v3226_v33 = vpack.c.bf16 %v2148_v29, %v2148_v29 }
 0x411   :  { %2490 = vst [vmem:[%s4890_s10 + $0x4c] sm:$0xf] %v3196_v30  ;;  %2526 = vst [vmem:[%s4890_s10 + $0x13c] sm:$0xf] %v3232_v31 }
 0x412   :  { %2484 = vst [vmem:[%s4890_s10 + $0x24] sm:$0xf] %v3190_v32  ;;  %2520 = vst [vmem:[%s4890_s10 + $0x114] sm:$0xf] %v3226_v33  ;;  %v3375_v34 = vpop.f32.mrb[116].mxu0  ;;  %v3387_v35 = vpop.f32.mrb[132].mxu1 }
 0x413   :  { %v2121_v36 = vadd.f32 %v3375_v34, %v4738_v22  ;;  %v2169_v37 = vadd.f32 %v3387_v35, %v4738_v22  ;;  %v2112_v40 = vpop.f32.mrb[117].mxu0  ;;  %v2160_v43 = vpop.f32.mrb[133].mxu1 }
 0x414   :  { %v2113_v58 = vadd.f32 %v2112_v40, %v4738_v22  ;;  %v2161_v59 = vadd.f32 %v2160_v43, %v4738_v22  ;;  %v3376_v45 = vpop.f32.mrb[118].mxu0  ;;  %v3388_v46 = vpop.f32.mrb[134].mxu1 }
 0x415   :  { %v3205_v9 = vpack.c.bf16 %v2121_v36, %v2121_v36  ;;  %v3241_v23 = vpack.c.bf16 %v2169_v37, %v2169_v37  ;;  %v2124_v10 = vadd.f32 %v3376_v45, %v4738_v22  ;;  %v2172_v41 = vadd.f32 %v3388_v46, %v4738_v22  ;;  %v2115_v55 = vpop.f32.mrb[119].mxu0  ;;  %v2163_v42 = vpop.f32.mrb[135].mxu1 }
 0x416   :  { %v3199_v6 = vpack.c.bf16 %v2113_v58, %v2113_v58  ;;  %v3235_v26 = vpack.c.bf16 %v2161_v59, %v2161_v59  ;;  %v2116_v7 = vadd.f32 %v2115_v55, %v4738_v22  ;;  %v2164_v38 = vadd.f32 %v2163_v42, %v4738_v22 }
 0x417   :  { %2499 = vst [vmem:[%s4890_s10 + $0x88] sm:$0xf] %v3205_v9  ;;  %3113 = vst [vmem:[%s4890_s10 + $0x178] sm:$0xf] %v3241_v23  ;;  %v3208_v57 = vpack.c.bf16 %v2124_v10, %v2124_v10  ;;  %v3244_v39 = vpack.c.bf16 %v2172_v41, %v2172_v41 }
 0x418   :  { %2493 = vst [vmem:[%s4890_s10 + $0x60] sm:$0xf] %v3199_v6  ;;  %3107 = vst [vmem:[%s4890_s10 + $0x150] sm:$0xf] %v3235_v26  ;;  %v3202_v44 = vpack.c.bf16 %v2116_v7, %v2116_v7  ;;  %v3238_v47 = vpack.c.bf16 %v2164_v38, %v2164_v38 }
 0x419   :  { %2502 = vst [vmem:[%s4890_s10 + $0x9c] sm:$0xf] %v3208_v57  ;;  %3116 = vst [vmem:[%s4890_s10 + $0x18c] sm:$0xf] %v3244_v39 }
 0x41a   :  { %2496 = vst [vmem:[%s4890_s10 + $0x74] sm:$0xf] %v3202_v44  ;;  %3110 = vst [vmem:[%s4890_s10 + $0x164] sm:$0xf] %v3238_v47  ;;  %v3379_v48 = vpop.f32.mrb[120].mxu0  ;;  %v3391_v49 = vpop.f32.mrb[136].mxu1 }
 0x41b   :  { %v2137_v50 = vadd.f32 %v3379_v48, %v4738_v22  ;;  %v2185_v51 = vadd.f32 %v3391_v49, %v4738_v22  ;;  %v2128_v52 = vpop.f32.mrb[121].mxu0  ;;  %v2176_v27 = vpop.f32.mrb[137].mxu1 }
 0x41c   :  { %v2129_v28 = vadd.f32 %v2128_v52, %v4738_v22  ;;  %v2177_v53 = vadd.f32 %v2176_v27, %v4738_v22  ;;  %v3380_v56 = vpop.f32.mrb[122].mxu0  ;;  %v3392_v62 = vpop.f32.mrb[138].mxu1 }
 0x41d   :  { %v3217_v54 = vpack.c.bf16 %v2137_v50, %v2137_v50  ;;  %v3253_v63 = vpack.c.bf16 %v2185_v51, %v2185_v51  ;;  %v2140_v0 = vadd.f32 %v3380_v56, %v4738_v22  ;;  %v2188_v60 = vadd.f32 %v3392_v62, %v4738_v22  ;;  %v2131_v61 = vpop.f32.mrb[123].mxu0  ;;  %v2179_v24 = vpop.f32.mrb[139].mxu1 }
 0x41e   :  { %v3211_v15 = vpack.c.bf16 %v2129_v28, %v2129_v28  ;;  %v3247_v16 = vpack.c.bf16 %v2177_v53, %v2177_v53  ;;  %v2132_v1 = vadd.f32 %v2131_v61, %v4738_v22  ;;  %v2180_v2 = vadd.f32 %v2179_v24, %v4738_v22 }
 0x41f   :  { %2511 = vst [vmem:[%s4890_s10 + $0xd8] sm:$0xf] %v3217_v54  ;;  %3125 = vst [vmem:[%s4890_s10 + $0x1c8] sm:$0xf] %v3253_v63  ;;  %v3220_v3 = vpack.c.bf16 %v2140_v0, %v2140_v0  ;;  %v3256_v4 = vpack.c.bf16 %v2188_v60, %v2188_v60 }
 0x420   :  { %2505 = vst [vmem:[%s4890_s10 + $0xb0] sm:$0xf] %v3211_v15  ;;  %3119 = vst [vmem:[%s4890_s10 + $0x1a0] sm:$0xf] %v3247_v16  ;;  %v3214_v5 = vpack.c.bf16 %v2132_v1, %v2132_v1  ;;  %v3250_v8 = vpack.c.bf16 %v2180_v2, %v2180_v2 }
 0x421   :  { %2514 = vst [vmem:[%s4890_s10 + $0xec] sm:$0xf] %v3220_v3  ;;  %3128 = vst [vmem:[%s4890_s10 + $0x1dc] sm:$0xf] %v3256_v4 }
 0x422   :  { %2508 = vst [vmem:[%s4890_s10 + $0xc4] sm:$0xf] %v3214_v5  ;;  %3122 = vst [vmem:[%s4890_s10 + $0x1b4] sm:$0xf] %v3250_v8  ;;  %v3395_v11 = vpop.f32.mrb[140].mxu1 }
 0x423   :  { %v2201_v12 = vadd.f32 %v3395_v11, %v4738_v22  ;;  %v2192_v13 = vpop.f32.mrb[141].mxu1 }
 0x424   :  { %v2193_v14 = vadd.f32 %v2192_v13, %v4738_v22  ;;  %v3396_v17 = vpop.f32.mrb[142].mxu1 }
 0x425   :  { %v3265_v18 = vpack.c.bf16 %v2201_v12, %v2201_v12  ;;  %v2204_v19 = vadd.f32 %v3396_v17, %v4738_v22  ;;  %v2195_v20 = vpop.f32.mrb[143].mxu1 }
 0x426   :  { %v3259_v21 = vpack.c.bf16 %v2193_v14, %v2193_v14  ;;  %v2196_v25 = vadd.f32 %v2195_v20, %v4738_v22 }
 0x427   :  { %3137 = vst [vmem:[%s4890_s10 + $0x218] sm:$0xf] %v3265_v18  ;;  %v3268_v29 = vpack.c.bf16 %v2204_v19, %v2204_v19 }
 0x428   :  { %3131 = vst [vmem:[%s4890_s10 + $0x1f0] sm:$0xf] %v3259_v21  ;;  %v3262_v30 = vpack.c.bf16 %v2196_v25, %v2196_v25 }
 0x429   :  { %3140 = vst [vmem:[%s4890_s10 + $0x22c] sm:$0xf] %v3268_v29 }
 0x42a   :  { %3134 = vst [vmem:[%s4890_s10 + $0x204] sm:$0xf] %v3262_v30  ;;  %v3399_v31 = vpop.f32.mrb[144].mxu1 }
 0x42b   :  { %v2217_v32 = vadd.f32 %v3399_v31, %v4738_v22  ;;  %v2208_v33 = vpop.f32.mrb[145].mxu1 }
 0x42c   :  { %v2209_v34 = vadd.f32 %v2208_v33, %v4738_v22  ;;  %v3400_v35 = vpop.f32.mrb[146].mxu1 }
 0x42d   :  { %v3277_v36 = vpack.c.bf16 %v2217_v32, %v2217_v32  ;;  %v2220_v37 = vadd.f32 %v3400_v35, %v4738_v22  ;;  %v2211_v40 = vpop.f32.mrb[147].mxu1 }
 0x42e   :  { %v3271_v43 = vpack.c.bf16 %v2209_v34, %v2209_v34  ;;  %v2212_v58 = vadd.f32 %v2211_v40, %v4738_v22 }
 0x42f   :  { %3149 = vst [vmem:[%s4890_s10 + $0x268] sm:$0xf] %v3277_v36  ;;  %v3280_v59 = vpack.c.bf16 %v2220_v37, %v2220_v37 }
 0x430   :  { %3143 = vst [vmem:[%s4890_s10 + $0x240] sm:$0xf] %v3271_v43  ;;  %v3274_v45 = vpack.c.bf16 %v2212_v58, %v2212_v58 }
 0x431   :  { %3152 = vst [vmem:[%s4890_s10 + $0x27c] sm:$0xf] %v3280_v59 }
 0x432   :  { %3146 = vst [vmem:[%s4890_s10 + $0x254] sm:$0xf] %v3274_v45 }

</bundles_post_ra>
